<compile_context>
chip_gen: v7x
topology: tpu7x:2x2x1
jax: 0.10.0
libtpu: 0.0.40
codegen_flags: <defaults>
</compile_context>

<pallas_src>
import functools

import jax
import jax.numpy as jnp
from jax import lax
from jax.experimental import pallas as pl
from jax.experimental.pallas import tpu as pltpu


def _gelu_exact(x):
    # torch._C._nn.gelu default: 0.5 * x * (1 + erf(x / sqrt(2)))
    return 0.5 * x * (1.0 + lax.erf(x * (1.0 / jnp.sqrt(2.0).astype(x.dtype))))


def gelu_linear_kernel(x_ref, w_ref, b_ref, o_ref):
    k = pl.program_id(1)

    @pl.when(k == 0)
    def _():
        # Fold bias into accumulator init; the output block index is constant
        # across k, so o_ref stays VMEM-resident for the whole reduction.
        o_ref[...] = jnp.broadcast_to(b_ref[...], o_ref.shape).astype(o_ref.dtype)

    # GELU runs exactly once per x element (no N tiling -> no recompute).
    xg = _gelu_exact(x_ref[...])
    o_ref[...] += jnp.dot(xg, w_ref[...], preferred_element_type=jnp.float32)
    # Dropout(p=0.1) is identity in eval mode.
    # TODO(synk): training-mode dropout (prng mask + 1/(1-p) scale) not applied.


@functools.partial(jax.jit, static_argnames=("tm", "tk"))
def gelu_linear_dropout(x, w_t, b, *, tm=192, tk=1024):
    """x: (B, S, K) float32; w_t: (K, N); b: (N,). Returns (B, S, N)."""
    B, S, K = x.shape
    N = w_t.shape[1]
    M = B * S
    x2d = x.reshape(M, K)
    b2d = b.reshape(1, N)

    grid = (pl.cdiv(M, tm), pl.cdiv(K, tk))

    out2d = pl.pallas_call(
        gelu_linear_kernel,
        out_shape=jax.ShapeDtypeStruct((M, N), x.dtype),
        grid_spec=pltpu.PrefetchScalarGridSpec(
            num_scalar_prefetch=0,
            grid=grid,
            in_specs=[
                pl.BlockSpec((tm, tk), lambda i, k: (i, k)),   # x tile
                pl.BlockSpec((tk, N), lambda i, k: (k, 0)),    # full-N W slab
                pl.BlockSpec((1, N), lambda i, k: (0, 0)),     # bias (full N)
            ],
            out_specs=pl.BlockSpec((tm, N), lambda i, k: (i, 0)),
        ),
        compiler_params=pltpu.CompilerParams(
            dimension_semantics=("parallel", "arbitrary"),
        ),
    )(x2d, w_t, b2d)

    return out2d.reshape(B, S, N)


def reference(x, w_t, b):
    return _gelu_exact(x) @ w_t + b


if __name__ == "__main__":
    key = jax.random.PRNGKey(0)
    kx, kw, kb = jax.random.split(key, 3)

    B, S, K, N = 1, 384, 3072, 768
    x = jax.random.normal(kx, (B, S, K), dtype=jnp.float32)
    # Deterministic "Linear(3072, 768)" params (synthetic init, not a checkpoint).
    bound = 1.0 / jnp.sqrt(K)
    w = jax.random.uniform(kw, (N, K), minval=-bound, maxval=bound, dtype=jnp.float32)
    b = jax.random.uniform(kb, (N,), minval=-bound, maxval=bound, dtype=jnp.float32)
    w_t = w.T  # (K, N)

    out = gelu_linear_dropout(x, w_t, b)
    out = jax.block_until_ready(out)

    ref = reference(x, w_t, b)
    assert out.shape == (B, S, N), out.shape
    assert jnp.allclose(out, ref, atol=1e-3, rtol=1e-3), float(
        jnp.max(jnp.abs(out - ref))
    )
    print("KERNEL_OK")
</pallas_src>

<mosaic_0001>
module attributes {stable_mosaic.version = 11 : i64} {
  func.func @gelu_linear_kernel(%arg0: i32, %arg1: i32, %arg2: memref<192x1024xf32, #tpu.memory_space<vmem>>, %arg3: memref<1024x768xf32, #tpu.memory_space<vmem>>, %arg4: memref<1x768xf32, #tpu.memory_space<vmem>>, %arg5: memref<192x768xf32, #tpu.memory_space<vmem>>) attributes {dimension_semantics = [#tpu.dimension_semantics<parallel>, #tpu.dimension_semantics<arbitrary>], iteration_bounds = array<i64: 2, 3>, scalar_prefetch = 0 : i64, scratch_operands = 0 : i64, tpu.core_type = #tpu.core_type<tc>, window_params = [{transform_indices = @transform_0, window_bounds = array<i64: 192, 1024>}, {transform_indices = @transform_1, window_bounds = array<i64: 1024, 768>}, {pipeline_mode = #tpu.pipeline_mode<synchronous>, transform_indices = @transform_2, window_bounds = array<i64: 1, 768>}, {transform_indices = @transform_3, window_bounds = array<i64: 192, 768>}]} {
    %c0_i32 = arith.constant 0 : i32
    %0 = arith.cmpi eq, %arg1, %c0_i32 : i32
    %1 = arith.extui %0 : i1 to i32
    %c0_i32_0 = arith.constant 0 : i32
    %2 = arith.cmpi ne, %1, %c0_i32_0 : i32
    scf.if %2 {
      %c0_12 = arith.constant 0 : index
      %c0_13 = arith.constant 0 : index
      %19 = vector.load %arg4[%c0_12, %c0_13] : memref<1x768xf32, #tpu.memory_space<vmem>>, vector<1x768xf32>
      %20 = vector.shape_cast %19 : vector<1x768xf32> to vector<1x768xf32>
      %21 = vector.broadcast %20 : vector<1x768xf32> to vector<192x768xf32>
      %c0_14 = arith.constant 0 : index
      %c0_15 = arith.constant 0 : index
      %22 = vector.load %arg5[%c0_14, %c0_15] : memref<192x768xf32, #tpu.memory_space<vmem>>, vector<192x768xf32>
      tpu.vector_store %arg5[%c0_14, %c0_15], %21 {strides = array<i32>} : memref<192x768xf32, #tpu.memory_space<vmem>>, vector<192x768xf32>,
    } else {
    }
    %c0 = arith.constant 0 : index
    %c0_1 = arith.constant 0 : index
    %3 = vector.load %arg2[%c0, %c0_1] : memref<192x1024xf32, #tpu.memory_space<vmem>>, vector<192x1024xf32>
    %cst = arith.constant 5.000000e-01 : f32
    %4 = vector.broadcast %cst : f32 to vector<192x1024xf32>
    %5 = arith.mulf %4, %3 : vector<192x1024xf32>
    %cst_2 = arith.constant 2.000000e+00 : f32
    %6 = math.sqrt %cst_2 : f32
    %cst_3 = arith.constant 1.000000e+00 : f32
    %7 = arith.divf %cst_3, %6 : f32
    %8 = vector.broadcast %7 : f32 to vector<192x1024xf32>
    %9 = arith.mulf %3, %8 : vector<192x1024xf32>
    %10 = math.erf %9 : vector<192x1024xf32>
    %cst_4 = arith.constant 1.000000e+00 : f32
    %11 = vector.broadcast %cst_4 : f32 to vector<192x1024xf32>
    %12 = arith.addf %11, %10 : vector<192x1024xf32>
    %13 = arith.mulf %5, %12 : vector<192x1024xf32>
    %c0_5 = arith.constant 0 : index
    %c0_6 = arith.constant 0 : index
    %14 = vector.load %arg5[%c0_5, %c0_6] : memref<192x768xf32, #tpu.memory_space<vmem>>, vector<192x768xf32>
    %c0_7 = arith.constant 0 : index
    %c0_8 = arith.constant 0 : index
    %15 = vector.load %arg3[%c0_7, %c0_8] : memref<1024x768xf32, #tpu.memory_space<vmem>>, vector<1024x768xf32>
    %cst_9 = arith.constant dense<0.000000e+00> : vector<192x768xf32>
    %16 = tpu.matmul %13, %15, %cst_9 {dimension_numbers = #tpu.dot_dimension_numbers<[1], [0], [0], [1], [0, 0, 1, 1], [], []>} : vector<192x1024xf32>, vector<1024x768xf32>, vector<192x768xf32> -> vector<192x768xf32>
    %17 = arith.addf %14, %16 : vector<192x768xf32>
    %c0_10 = arith.constant 0 : index
    %c0_11 = arith.constant 0 : index
    %18 = vector.load %arg5[%c0_10, %c0_11] : memref<192x768xf32, #tpu.memory_space<vmem>>, vector<192x768xf32>
    tpu.vector_store %arg5[%c0_10, %c0_11], %17 {strides = array<i32>} : memref<192x768xf32, #tpu.memory_space<vmem>>, vector<192x768xf32>,
    return
  }
  func.func @transform_0(%arg0: i32, %arg1: i32) -> (i32, i32) {
    %c0_i32 = arith.constant 0 : i32
    return %arg0, %arg1 : i32, i32
  }
  func.func @transform_1(%arg0: i32, %arg1: i32) -> (i32, i32) {
    %c0_i32 = arith.constant 0 : i32
    %c0_i32_0 = arith.constant 0 : i32
    return %arg1, %c0_i32 : i32, i32
  }
  func.func @transform_2(%arg0: i32, %arg1: i32) -> (i32, i32) {
    %c0_i32 = arith.constant 0 : i32
    %c0_i32_0 = arith.constant 0 : i32
    %c0_i32_1 = arith.constant 0 : i32
    return %c0_i32, %c0_i32_0 : i32, i32
  }
  func.func @transform_3(%arg0: i32, %arg1: i32) -> (i32, i32) {
    %c0_i32 = arith.constant 0 : i32
    %c0_i32_0 = arith.constant 0 : i32
    return %arg0, %c0_i32 : i32, i32
  }
}

</mosaic_0001>

<bundles_post_ra>
// kernel: gelu_linear_dropout.1
= control target key start
LH: loop header
LB: loop body
LE: loop exit
PB: predicated region body
PF: predicated region fallthrough
CT: control target
= control target key end

     0   :  { %s11333_s0 = inlined_call_operand.hbm [shape: f32[384,3072], index: 0, kind: input, shape index: {}]   ;;  %s11334_s1 = inlined_call_operand.hbm [shape: f32[3072,768], index: 1, kind: input, shape index: {}]   ;;  %s11335_s2 = inlined_call_operand.vmem [shape: f32[1,768], index: 2, kind: input, shape index: {}]   ;;  %s11336_s3 = inlined_call_operand.hbm [shape: f32[384,768], index: 3, kind: output, shape index: {}]  }
   0x1   :  { %11647 = sst [smem:[#allocation166_spill]] %s11333_s0 }
   0x2   :  { %11648 = sst [smem:[#allocation167_spill]] %s11335_s2 }
   0x3   :  { %11649 = sst [smem:[#allocation168_spill]] %s11336_s3 }
   0x4   :  { %8 = vsyncpa [#allocation3], 0 }
   0x5   :  { %10 = vsyncpa [#allocation3 + $0x1], 0 }
   0x6   :  { %11 = vsyncpa [#allocation6], 0 }
   0x7   :  { %13 = vsyncpa [#allocation6 + $0x1], 0 }
   0x8   :  { %14 = vsyncpa [#allocation4], 0 }
   0x9   :  { %16 = vsyncpa [#allocation4 + $0x1], 0  ;;  %s7404_s12 = smov 0   ;;  %s7406_s13 = smov 0  }
   0xa   :  { %s7408_s14 = smov 0   ;;  %s7410_s15 = smov 0  }
   0xb   :  { %s7412_s16 = smov 0   ;;  %s7414_s17 = smov 0  }
   0xc   :  { %s7416_s18 = smov 0   ;;  %s7418_s19 = smov 0  }
   0xd   :  { %s7420_s20 = smov 0   ;;  %s7422_s21 = smov 0  }
   0xe   :  { %s7424_s22 = smov 0   ;;  %s7426_s23 = smov 0  }
   0xf   :  { %s7428_s24 = smov 0   ;;  %s7430_s25 = smov 0  }
  0x10 LB: > { %11650 = sst [smem:[#allocation11_spill]] %s7360_s22  ;;  %s31_s26 = sadd.s32 1, %s7364_s23  ;;  %s7372_s25 = sphi %s7430_s25, %s22_s25   ;;  %s7368_s24 = sphi %s7428_s24, %s11994_s24   ;;  %s7364_s23 = sphi %s7426_s23, %s11993_s23   ;;  %s7360_s22 = sphi %s7424_s22, %s11992_s22   ;;  %s7356_s21 = sphi %s7422_s21, %s11991_s21   ;;  %s7352_s20 = sphi %s7420_s20, %s12003_s20   ;;  %s7348_s19 = sphi %s7418_s19, %s12002_s19   ;;  %s7344_s18 = sphi %s7416_s18, %s12001_s18   ;;  %s7340_s17 = sphi %s7414_s17, %s12000_s17   ;;  %s7336_s16 = sphi %s7412_s16, %s11999_s16   ;;  %s7332_s15 = sphi %s7410_s15, %s11998_s15   ;;  %s7328_s14 = sphi %s7408_s14, %s11997_s14   ;;  %s7324_s13 = sphi %s7406_s13, %s11996_s13   ;;  %s7320_s12 = sphi %s7404_s12, %s11995_s12  }
  0x11   : > { %11651 = sst [smem:[#allocation12_spill]] %s7364_s23  ;;  %s34_s27 = sadd.s32 1, %s7368_s24 }
  0x12   : > { %11652 = sst [smem:[#allocation13_spill]] %s7368_s24  ;;  %p32_p0 = scmp.ge.s32.totalorder %s31_s26, 3 }
  0x13   : > { %s43_s28 = sadd.s32 1, %s7352_s20  ;;  %p50_p1 = scmp.ne.s32.totalorder %s7352_s20, %s7348_s19 }
  0x14   : > { %p11341_p2 = scmp.eq.s32.totalorder %s7372_s25, 0  ;;  %s12005_s26 = smov (%p32_p0, %s31_s26), 0 }
  0x15   : > { %11653 = sst [smem:[#allocation14_spill]] %s12005_s26  ;;  %s12007_s27 = smov (!%p32_p0, %s34_s27), %s7368_s24 }
  0x16   : > { %s7485_s29 = ssub.s32 %s7364_s23, %s12005_s26  ;;  %p7489_p3 = por %p11341_p2, %p50_p1 }
  0x17   : > { %p36_p4 = scmp.ge.s32.totalorder %s12007_s27, 2  ;;  %p56_p5 = scmp.ne.s32.totalorder %s7348_s19, %s7344_s18 }
  0x18   : > { %s116_s4 = sadd.s32 1, %s7328_s14  ;;  %p11340_p6 = scmp.lt.s32.totalorder %s7372_s25, 6 }
  0x19   : > { %s12009_s27 = smov (%p36_p4, %s12007_s27), 0  ;;  %s156_s5 = sand.u32 1, %s7352_s20  }
  0x1a   : > { %11655 = sst [smem:[#allocation15_spill]] %s12009_s27  ;;  %s38_s6 = ssub.s32 %s7368_s24, %s12009_s27 }
  0x1b   : > { %s40_s7 = sor.u32 %s7485_s29, %s38_s6  ;;  %p114_p7 = scmp.eq.s32.totalorder %s38_s6, 0 }
  0x1c   : > { %p41_p8 = scmp.eq.s32.totalorder %s40_s7, 0  ;;  %s6630_s8 = smul.u32 1536, %s156_s5 }
  0x1d   : > { %s7504_s9 = scalar_select %p114_p7, %s7328_s14, %s116_s4  }
  0x1e   : > { %s7507_s10 = scalar_select %p41_p8, %s7352_s20, %s43_s28  }
  0x1f   : > { %s5420_s11 = sshll.u32 %s7364_s23, 3  ;;  %s6656_s26 = smul.u32 576, %s7368_s24 }
  0x20   : > { %s160_s3 = scalar_lea.vmem [#allocation2], %s6630_s8  ;;  %p7515_p9 = pnand %p11340_p6, %p7489_p3 }
  0x21   : > { %s170_s22 = sshll.u32 %s160_s3, 4  ;;  %s167_s27 = sadd.s32 %s6656_s26, %s5420_s11  ;;  %s7519_s22 = int_to_ptr.vmem [resolvable:$true] %s170_s22 }
  0x22   : > { %s5421_s6 = sshll.u32 %s167_s27, 7  ;;  %s11657_s0 = sld [smem:[#allocation166_spill]] }
  0x23   : > { %s7526_s3 = scalar_lea.sflag [#allocation3], %s156_s5  ;;  %p7164_p11 = pneg %p7515_p9 }
  0x28   : > { %s7524_s28 = scalar_lea.hbm %s11657_s0, %s5421_s6  ;;  %s7167_s8 = scalar_lea.hbm %s11657_s0, 147456 }
  0x29   : > { %s7162_s30 = scalar_lea.hbm %s7524_s28, 24576  ;;  %p7168_p0 = scmp.lt.u32.totalorder %s7524_s28, %s11657_s0 }
  0x2a   : > { %p7163_p10 = scmp.ne.s32.totalorder %s7524_s28, %s7162_s30  ;;  %p7169_p1 = scmp.lt.u32.totalorder %s7167_s8, %s7162_s30 }
  0x2b   : > { %p7171_p4 = scmp.lt.u32.totalorder %s7162_s30, %s7524_s28 }
  0x2c   : > { %p7165_p12 = pnand %p7164_p11, %p7163_p10  ;;  %p7170_p3 = por %p7169_p1, %p7168_p0 }
  0x2e   : > { %p7166_p13 = pneg %p7165_p12  ;;  %p7172_p7 = por %p7171_p4, %p7170_p3 }
  0x30   : > { %p7173_p8 = pnand %p7172_p7, %p7166_p13 }
  0x32   : > { %7176 = shalt.err (!%p7173_p8)
}
  0x33   : > { %s7177_s5 = scalar_lea.vmem %s7519_s22, 24576  ;;  %s7374_s4 = smov [#allocation2]  }
  0x34   : > { %p7178_p10 = scmp.ne.s32.totalorder %s7519_s22, %s7177_s5  ;;  %s7182_s7 = sshll.u32 %s7374_s4, 4  ;;  %s7183_s7 = int_to_ptr.vmem [resolvable:$false] %s7182_s7 }
  0x35   : > { %s7184_s26 = scalar_lea.vmem %s7183_s7, 49152  ;;  %p7185_p2 = scmp.lt.s32.totalorder %s7519_s22, %s7183_s7 }
  0x36   : > { %p7180_p12 = pnand %p7178_p10, %p7164_p11  ;;  %p7186_p0 = scmp.lt.s32.totalorder %s7184_s26, %s7177_s5 }
  0x38   : > { %p7181_p6 = pneg %p7180_p12  ;;  %p7187_p1 = por %p7186_p0, %p7185_p2 }
  0x3a   : > { %p7188_p3 = pnand %p7187_p1, %p7181_p6 }
  0x3c   : > { %7191 = shalt.err (!%p7188_p3)
}
  0x3d   : > { %s7375_s30 = smov 3072   ;;  %s7376_s27 = smov 1024  }
  0x3e   : > { %s7377_s8 = smov 64   ;;  %p5425_p2 = scmp.ge.s32.totalorder %s7372_s25, 1 }
  0x3f   : > { %6647 = dma.hbm_to_vmem [thread:$0]  (!%p7515_p9), %s7524_s28, 24576, %s7519_s22, %s7526_s3, %s7375_s30, %s7376_s27, %s7377_s8  }
  0x40   : > { %p200_p6 = scmp.lt.s32.totalorder %s7372_s25, 7  ;;  %s5416_s6 = sadd.s32 4294967295, %s7372_s25  }
  0x41   : > { %s5417_s5 = sadd.s32 4294967294, %s7372_s25   ;;  %p57_p13 = scmp.eq.s32.totalorder %s5416_s6, 0 }
  0x42   : > { %p7556_p11 = pnand %p5425_p2, %p200_p6  ;;  %p67_p4 = scmp.eq.s32.totalorder %s7485_s29, 0 }
  0x43   : > { %s69_s4 = sadd.s32 1, %s7340_s17  ;;  %p7567_p7 = por %p57_p13, %p56_p5 }
  0x44   : > { %p76_p9 = scmp.ne.s32.totalorder %s7340_s17, %s7336_s16  ;;  %p11660_p8 = scmp.eq.s32.totalorder %s7372_s25, 0 }
  0x45   : > { %s11659_s7 = scalar_select %p7567_p7, 1, 0 }
  0x46   : > { %s7574_s2 = scalar_select %p67_p4, %s7340_s17, %s69_s4  }
  0x47   : > { %p7578_p10 = por %p76_p9, %p11660_p8  ;;  %p82_p12 = scmp.ne.s32.totalorder %s7336_s16, %s7332_s15 }
  0x48   : > { %p126_p0 = scmp.ne.s32.totalorder %s7328_s14, %s7324_s13  ;;  %p127_p1 = scmp.eq.s32.totalorder %s5416_s6, 5 }
  0x49   : > { %p7586_p3 = por %p82_p12, %p57_p13  ;;  %p132_p5 = scmp.ne.s32.totalorder %s7324_s13, %s7320_s12 }
  0x4a   : > { %p7592_p2 = por %p127_p1, %p126_p0  ;;  %p133_p6 = scmp.eq.s32.totalorder %s5417_s5, 5 }
  0x4b   : > { %s11662_s29 = scalar_select %p7586_p3, 1, 0 }
  0x4c   : > { %s11663_s18 = scalar_select %p7592_p2, 1, 0 }
  0x4d   : > { %s180_s28 = sand.u32 1, %s7340_s17   ;;  %s6633_s3 = smul.u32 98304, %s7364_s23 }
  0x4e   : > { %p7598_p4 = por %p133_p6, %p132_p5  ;;  %s6632_s30 = smul.u32 6144, %s180_s28 }
  0x4f   : > { %s7605_s8 = scalar_lea.hbm %s11334_s1, %s6633_s3  ;;  %p11665_p13 = scmp.lt.s32.totalorder %s7372_s25, 6 }
  0x50   : > { %s11664_s26 = scalar_select %p7598_p4, 1, 0 }
  0x51   : > { %p7611_p9 = pnand %p11665_p13, %p7578_p10  ;;  %s184_s5 = scalar_lea.vmem [#allocation5], %s6632_s30 }
  0x52   : > { %s192_s4 = sshll.u32 %s184_s5, 4  ;;  %s7617_s0 = scalar_lea.sflag [#allocation6], %s180_s28  ;;  %s7615_s4 = int_to_ptr.vmem [resolvable:$true] %s192_s4 }
  0x53   : > { %s7192_s3 = scalar_lea.hbm %s7605_s8, 98304  ;;  %p7194_p12 = pneg %p7611_p9 }
  0x54   : > { %p7193_p8 = scmp.ne.s32.totalorder %s7605_s8, %s7192_s3  ;;  %s7197_s27 = scalar_lea.hbm %s11334_s1, 294912 }
  0x55   : > { %p7198_p10 = scmp.lt.u32.totalorder %s7605_s8, %s11334_s1  ;;  %p7199_p5 = scmp.lt.u32.totalorder %s7197_s27, %s7192_s3 }
  0x56   : > { %p7195_p0 = pnand %p7194_p12, %p7193_p8  ;;  %p7201_p13 = scmp.lt.u32.totalorder %s7192_s3, %s7605_s8 }
  0x57   : > { %p7200_p6 = por %p7199_p5, %p7198_p10 }
  0x58   : > { %p7196_p1 = pneg %p7195_p0 }
  0x59   : > { %p7202_p4 = por %p7201_p13, %p7200_p6 }
  0x5b   : > { %p7203_p2 = pnand %p7202_p4, %p7196_p1 }
  0x5d   : > { %7206 = shalt.err (!%p7203_p2)
}
  0x5e   : > { %s7207_s28 = scalar_lea.vmem %s7615_s4, 98304  ;;  %s7378_s30 = smov [#allocation5]  }
  0x5f   : > { %p7208_p8 = scmp.ne.s32.totalorder %s7615_s4, %s7207_s28  ;;  %s7212_s5 = sshll.u32 %s7378_s30, 4  ;;  %s7213_s5 = int_to_ptr.vmem [resolvable:$false] %s7212_s5 }
  0x60   : > { %s7214_s23 = scalar_lea.vmem %s7213_s5, 196608  ;;  %p7215_p7 = scmp.lt.s32.totalorder %s7615_s4, %s7213_s5 }
  0x61   : > { %p7210_p0 = pnand %p7208_p8, %p7194_p12  ;;  %p7216_p10 = scmp.lt.s32.totalorder %s7214_s23, %s7207_s28 }
  0x63   : > { %p7211_p3 = pneg %p7210_p0  ;;  %p7217_p5 = por %p7216_p10, %p7215_p7 }
  0x65   : > { %p7218_p6 = pnand %p7217_p5, %p7211_p3 }
  0x67   : > { %7221 = shalt.err (!%p7218_p6)
}
  0x68   : > { %s7379_s24 = smov 768   ;;  %s7380_s3 = smov 48  }
  0x69   : > { %6650 = dma.hbm_to_vmem [thread:$0]  (!%p7611_p9), %s7605_s8, 98304, %s7615_s4, %s7617_s0, %s7379_s24, %s7379_s24, %s7380_s3  }
  0x6a   : > { %204 = sbr.rel (%p7556_p11) target bundleno = 1147 (0x47b), region = 32 }
  0x71   : > { %s206_s22 = sand.u32 1, %s7348_s19   ;;  %p11667_p7 = scmp.ne.s32.totalorder %s11659_s7, 0 }
  0x72   : > { %s6634_s15 = smul.u32 1536, %s206_s22  ;;  %s207_s27 = scalar_lea.sflag [#allocation3], %s206_s22 }
  0x74   : > { %s7648_s28 = scalar_lea.vmem [#allocation2], %s6634_s15 }
  0x75   : > { %7307 = dma.done.wait (%p11667_p7), %s207_s27, 24576  }
  0x76   : > { %7309 = vsyncadd (%p11667_p7), %s207_s27, 4294942720  ;;  %s215_s30 = sand.u32 1, %s7336_s16   ;;  %p11668_p11 = scmp.ne.s32.totalorder %s11662_s29, 0 }
  0x77   : > { %s6635_s6 = smul.u32 6144, %s215_s30  ;;  %s216_s0 = scalar_lea.sflag [#allocation6], %s215_s30 }
  0x79   : > { %s7655_s8 = scalar_lea.vmem [#allocation5], %s6635_s6 }
  0x7a   : > { %7311 = dma.done.wait (%p11668_p11), %s216_s0, 98304  }
  0x7b   : > { %7313 = vsyncadd (%p11668_p11), %s216_s0, 4294868992  ;;  %s244_s11 = sand.u32 1, %s7324_s13   ;;  %p5426_p3 = scmp.ne.s32.totalorder %s7356_s21, 0 }
  0x7c   : > { %s6636_s4 = smul.u32 1152, %s244_s11  ;;  %v257_v0 = vlaneseq (!%p5426_p3)  ;;  %s11669_s24 = sld [smem:[#allocation167_spill]] (!%p5426_p3) }
  0x7d   : > { %254 = sbr.rel (%p5426_p3) target bundleno = 205 (0xcd), region = 44 }
  0x7e   : > { %s7664_s5 = scalar_lea.vmem [#allocation7], %s6636_s4  ;;  %v258_v1 = vshrl.u32 (!%p5426_p3), %v257_v0, 7 }
  0x80   : > { %v259_v3 = vsub.s32 (!%p5426_p3), 0, %v258_v1  ;;  %v263_v4 = vsub.s32 (!%p5426_p3), 1, %v258_v1  ;;  %v267_v5 = vsub.s32 (!%p5426_p3), 2, %v258_v1  ;;  %v271_v6 = vsub.s32 (!%p5426_p3), 3, %v258_v1 }
  0x81   : > { %v275_v7 = vsub.s32 (!%p5426_p3), 4, %v258_v1  ;;  %v279_v8 = vsub.s32 (!%p5426_p3), 5, %v258_v1 }
  0x82   : > { %v255_v2 = vld [vmem:[%s11669_s24] sm:$0x3f] (!%p5426_p3) }
  0x83   : > { %v260_v9 = vrot.slane (!%p5426_p3), %v255_v2, %v259_v3  ;;  %v264_v10 = vrot.slane (!%p5426_p3), %v255_v2, %v263_v4  ;;  %v7670_v11 = vrot.slane (!%p5426_p3), %v255_v2, %v267_v5  ;;  %v7672_v12 = vrot.slane (!%p5426_p3), %v255_v2, %v271_v6 }
  0x84   : > { %v7674_v13 = vrot.slane %v255_v2, %v275_v7  ;;  %v7676_v14 = vrot.slane %v255_v2, %v279_v8 }
  0x85   : > { %287 = vst [vmem:[%s7664_s5] sm:$0xff] %v260_v9  ;;  %293 = vst [vmem:[%s7664_s5 + $0x30] sm:$0xff] %v260_v9 }
  0x86   : > { %299 = vst [vmem:[%s7664_s5 + $0x60] sm:$0xff] %v260_v9  ;;  %305 = vst [vmem:[%s7664_s5 + $0x90] sm:$0xff] %v260_v9 }
  0x87   : > { %311 = vst [vmem:[%s7664_s5 + $0xc0] sm:$0xff] %v260_v9  ;;  %317 = vst [vmem:[%s7664_s5 + $0xf0] sm:$0xff] %v260_v9 }
  0x88   : > { %323 = vst [vmem:[%s7664_s5 + $0x120] sm:$0xff] %v260_v9  ;;  %329 = vst [vmem:[%s7664_s5 + $0x150] sm:$0xff] %v260_v9 }
  0x89   : > { %335 = vst [vmem:[%s7664_s5 + $0x180] sm:$0xff] %v260_v9  ;;  %341 = vst [vmem:[%s7664_s5 + $0x1b0] sm:$0xff] %v260_v9 }
  0x8a   : > { %347 = vst [vmem:[%s7664_s5 + $0x1e0] sm:$0xff] %v260_v9  ;;  %353 = vst [vmem:[%s7664_s5 + $0x210] sm:$0xff] %v260_v9 }
  0x8b   : > { %359 = vst [vmem:[%s7664_s5 + $0x240] sm:$0xff] %v260_v9  ;;  %365 = vst [vmem:[%s7664_s5 + $0x270] sm:$0xff] %v260_v9 }
  0x8c   : > { %371 = vst [vmem:[%s7664_s5 + $0x2a0] sm:$0xff] %v260_v9  ;;  %377 = vst [vmem:[%s7664_s5 + $0x2d0] sm:$0xff] %v260_v9 }
  0x8d   : > { %383 = vst [vmem:[%s7664_s5 + $0x300] sm:$0xff] %v260_v9  ;;  %389 = vst [vmem:[%s7664_s5 + $0x330] sm:$0xff] %v260_v9 }
  0x8e   : > { %395 = vst [vmem:[%s7664_s5 + $0x360] sm:$0xff] %v260_v9  ;;  %401 = vst [vmem:[%s7664_s5 + $0x390] sm:$0xff] %v260_v9 }
  0x8f   : > { %407 = vst [vmem:[%s7664_s5 + $0x3c0] sm:$0xff] %v260_v9  ;;  %413 = vst [vmem:[%s7664_s5 + $0x3f0] sm:$0xff] %v260_v9 }
  0x90   : > { %419 = vst [vmem:[%s7664_s5 + $0x420] sm:$0xff] %v260_v9  ;;  %425 = vst [vmem:[%s7664_s5 + $0x450] sm:$0xff] %v260_v9 }
  0x91   : > { %288 = vst [vmem:[%s7664_s5 + $0x8] sm:$0xff] %v264_v10  ;;  %294 = vst [vmem:[%s7664_s5 + $0x38] sm:$0xff] %v264_v10 }
  0x92   : > { %300 = vst [vmem:[%s7664_s5 + $0x68] sm:$0xff] %v264_v10  ;;  %306 = vst [vmem:[%s7664_s5 + $0x98] sm:$0xff] %v264_v10 }
  0x93   : > { %312 = vst [vmem:[%s7664_s5 + $0xc8] sm:$0xff] %v264_v10  ;;  %318 = vst [vmem:[%s7664_s5 + $0xf8] sm:$0xff] %v264_v10 }
  0x94   : > { %324 = vst [vmem:[%s7664_s5 + $0x128] sm:$0xff] %v264_v10  ;;  %330 = vst [vmem:[%s7664_s5 + $0x158] sm:$0xff] %v264_v10 }
  0x95   : > { %336 = vst [vmem:[%s7664_s5 + $0x188] sm:$0xff] %v264_v10  ;;  %342 = vst [vmem:[%s7664_s5 + $0x1b8] sm:$0xff] %v264_v10 }
  0x96   : > { %348 = vst [vmem:[%s7664_s5 + $0x1e8] sm:$0xff] %v264_v10  ;;  %354 = vst [vmem:[%s7664_s5 + $0x218] sm:$0xff] %v264_v10 }
  0x97   : > { %360 = vst [vmem:[%s7664_s5 + $0x248] sm:$0xff] %v264_v10  ;;  %366 = vst [vmem:[%s7664_s5 + $0x278] sm:$0xff] %v264_v10 }
  0x98   : > { %372 = vst [vmem:[%s7664_s5 + $0x2a8] sm:$0xff] %v264_v10  ;;  %378 = vst [vmem:[%s7664_s5 + $0x2d8] sm:$0xff] %v264_v10 }
  0x99   : > { %384 = vst [vmem:[%s7664_s5 + $0x308] sm:$0xff] %v264_v10  ;;  %390 = vst [vmem:[%s7664_s5 + $0x338] sm:$0xff] %v264_v10 }
  0x9a   : > { %396 = vst [vmem:[%s7664_s5 + $0x368] sm:$0xff] %v264_v10  ;;  %402 = vst [vmem:[%s7664_s5 + $0x398] sm:$0xff] %v264_v10 }
  0x9b   : > { %408 = vst [vmem:[%s7664_s5 + $0x3c8] sm:$0xff] %v264_v10  ;;  %414 = vst [vmem:[%s7664_s5 + $0x3f8] sm:$0xff] %v264_v10 }
  0x9c   : > { %420 = vst [vmem:[%s7664_s5 + $0x428] sm:$0xff] %v264_v10  ;;  %426 = vst [vmem:[%s7664_s5 + $0x458] sm:$0xff] %v264_v10 }
  0x9d   : > { %289 = vst [vmem:[%s7664_s5 + $0x10] sm:$0xff] %v7670_v11  ;;  %295 = vst [vmem:[%s7664_s5 + $0x40] sm:$0xff] %v7670_v11 }
  0x9e   : > { %301 = vst [vmem:[%s7664_s5 + $0x70] sm:$0xff] %v7670_v11  ;;  %307 = vst [vmem:[%s7664_s5 + $0xa0] sm:$0xff] %v7670_v11 }
  0x9f   : > { %313 = vst [vmem:[%s7664_s5 + $0xd0] sm:$0xff] %v7670_v11  ;;  %319 = vst [vmem:[%s7664_s5 + $0x100] sm:$0xff] %v7670_v11 }
  0xa0   : > { %325 = vst [vmem:[%s7664_s5 + $0x130] sm:$0xff] %v7670_v11  ;;  %331 = vst [vmem:[%s7664_s5 + $0x160] sm:$0xff] %v7670_v11 }
  0xa1   : > { %337 = vst [vmem:[%s7664_s5 + $0x190] sm:$0xff] %v7670_v11  ;;  %343 = vst [vmem:[%s7664_s5 + $0x1c0] sm:$0xff] %v7670_v11 }
  0xa2   : > { %349 = vst [vmem:[%s7664_s5 + $0x1f0] sm:$0xff] %v7670_v11  ;;  %355 = vst [vmem:[%s7664_s5 + $0x220] sm:$0xff] %v7670_v11 }
  0xa3   : > { %361 = vst [vmem:[%s7664_s5 + $0x250] sm:$0xff] %v7670_v11  ;;  %367 = vst [vmem:[%s7664_s5 + $0x280] sm:$0xff] %v7670_v11 }
  0xa4   : > { %373 = vst [vmem:[%s7664_s5 + $0x2b0] sm:$0xff] %v7670_v11  ;;  %379 = vst [vmem:[%s7664_s5 + $0x2e0] sm:$0xff] %v7670_v11 }
  0xa5   : > { %385 = vst [vmem:[%s7664_s5 + $0x310] sm:$0xff] %v7670_v11  ;;  %391 = vst [vmem:[%s7664_s5 + $0x340] sm:$0xff] %v7670_v11 }
  0xa6   : > { %397 = vst [vmem:[%s7664_s5 + $0x370] sm:$0xff] %v7670_v11  ;;  %403 = vst [vmem:[%s7664_s5 + $0x3a0] sm:$0xff] %v7670_v11 }
  0xa7   : > { %409 = vst [vmem:[%s7664_s5 + $0x3d0] sm:$0xff] %v7670_v11  ;;  %415 = vst [vmem:[%s7664_s5 + $0x400] sm:$0xff] %v7670_v11 }
  0xa8   : > { %421 = vst [vmem:[%s7664_s5 + $0x430] sm:$0xff] %v7670_v11  ;;  %427 = vst [vmem:[%s7664_s5 + $0x460] sm:$0xff] %v7670_v11 }
  0xa9   : > { %290 = vst [vmem:[%s7664_s5 + $0x18] sm:$0xff] %v7672_v12  ;;  %296 = vst [vmem:[%s7664_s5 + $0x48] sm:$0xff] %v7672_v12 }
  0xaa   : > { %302 = vst [vmem:[%s7664_s5 + $0x78] sm:$0xff] %v7672_v12  ;;  %308 = vst [vmem:[%s7664_s5 + $0xa8] sm:$0xff] %v7672_v12 }
  0xab   : > { %314 = vst [vmem:[%s7664_s5 + $0xd8] sm:$0xff] %v7672_v12  ;;  %320 = vst [vmem:[%s7664_s5 + $0x108] sm:$0xff] %v7672_v12 }
  0xac   : > { %326 = vst [vmem:[%s7664_s5 + $0x138] sm:$0xff] %v7672_v12  ;;  %332 = vst [vmem:[%s7664_s5 + $0x168] sm:$0xff] %v7672_v12 }
  0xad   : > { %338 = vst [vmem:[%s7664_s5 + $0x198] sm:$0xff] %v7672_v12  ;;  %344 = vst [vmem:[%s7664_s5 + $0x1c8] sm:$0xff] %v7672_v12 }
  0xae   : > { %350 = vst [vmem:[%s7664_s5 + $0x1f8] sm:$0xff] %v7672_v12  ;;  %356 = vst [vmem:[%s7664_s5 + $0x228] sm:$0xff] %v7672_v12 }
  0xaf   : > { %362 = vst [vmem:[%s7664_s5 + $0x258] sm:$0xff] %v7672_v12  ;;  %368 = vst [vmem:[%s7664_s5 + $0x288] sm:$0xff] %v7672_v12 }
  0xb0   : > { %374 = vst [vmem:[%s7664_s5 + $0x2b8] sm:$0xff] %v7672_v12  ;;  %380 = vst [vmem:[%s7664_s5 + $0x2e8] sm:$0xff] %v7672_v12 }
  0xb1   : > { %386 = vst [vmem:[%s7664_s5 + $0x318] sm:$0xff] %v7672_v12  ;;  %392 = vst [vmem:[%s7664_s5 + $0x348] sm:$0xff] %v7672_v12 }
  0xb2   : > { %398 = vst [vmem:[%s7664_s5 + $0x378] sm:$0xff] %v7672_v12  ;;  %404 = vst [vmem:[%s7664_s5 + $0x3a8] sm:$0xff] %v7672_v12 }
  0xb3   : > { %410 = vst [vmem:[%s7664_s5 + $0x3d8] sm:$0xff] %v7672_v12  ;;  %416 = vst [vmem:[%s7664_s5 + $0x408] sm:$0xff] %v7672_v12 }
  0xb4   : > { %422 = vst [vmem:[%s7664_s5 + $0x438] sm:$0xff] %v7672_v12  ;;  %428 = vst [vmem:[%s7664_s5 + $0x468] sm:$0xff] %v7672_v12 }
  0xb5   : > { %291 = vst [vmem:[%s7664_s5 + $0x20] sm:$0xff] %v7674_v13  ;;  %297 = vst [vmem:[%s7664_s5 + $0x50] sm:$0xff] %v7674_v13 }
  0xb6   : > { %303 = vst [vmem:[%s7664_s5 + $0x80] sm:$0xff] %v7674_v13  ;;  %309 = vst [vmem:[%s7664_s5 + $0xb0] sm:$0xff] %v7674_v13 }
  0xb7   : > { %315 = vst [vmem:[%s7664_s5 + $0xe0] sm:$0xff] %v7674_v13  ;;  %321 = vst [vmem:[%s7664_s5 + $0x110] sm:$0xff] %v7674_v13 }
  0xb8   : > { %327 = vst [vmem:[%s7664_s5 + $0x140] sm:$0xff] %v7674_v13  ;;  %333 = vst [vmem:[%s7664_s5 + $0x170] sm:$0xff] %v7674_v13 }
  0xb9   : > { %339 = vst [vmem:[%s7664_s5 + $0x1a0] sm:$0xff] %v7674_v13  ;;  %345 = vst [vmem:[%s7664_s5 + $0x1d0] sm:$0xff] %v7674_v13 }
  0xba   : > { %351 = vst [vmem:[%s7664_s5 + $0x200] sm:$0xff] %v7674_v13  ;;  %357 = vst [vmem:[%s7664_s5 + $0x230] sm:$0xff] %v7674_v13 }
  0xbb   : > { %363 = vst [vmem:[%s7664_s5 + $0x260] sm:$0xff] %v7674_v13  ;;  %369 = vst [vmem:[%s7664_s5 + $0x290] sm:$0xff] %v7674_v13 }
  0xbc   : > { %375 = vst [vmem:[%s7664_s5 + $0x2c0] sm:$0xff] %v7674_v13  ;;  %381 = vst [vmem:[%s7664_s5 + $0x2f0] sm:$0xff] %v7674_v13 }
  0xbd   : > { %387 = vst [vmem:[%s7664_s5 + $0x320] sm:$0xff] %v7674_v13  ;;  %393 = vst [vmem:[%s7664_s5 + $0x350] sm:$0xff] %v7674_v13 }
  0xbe   : > { %399 = vst [vmem:[%s7664_s5 + $0x380] sm:$0xff] %v7674_v13  ;;  %405 = vst [vmem:[%s7664_s5 + $0x3b0] sm:$0xff] %v7674_v13 }
  0xbf   : > { %411 = vst [vmem:[%s7664_s5 + $0x3e0] sm:$0xff] %v7674_v13  ;;  %417 = vst [vmem:[%s7664_s5 + $0x410] sm:$0xff] %v7674_v13 }
  0xc0   : > { %423 = vst [vmem:[%s7664_s5 + $0x440] sm:$0xff] %v7674_v13  ;;  %429 = vst [vmem:[%s7664_s5 + $0x470] sm:$0xff] %v7674_v13 }
  0xc1   : > { %292 = vst [vmem:[%s7664_s5 + $0x28] sm:$0xff] %v7676_v14  ;;  %298 = vst [vmem:[%s7664_s5 + $0x58] sm:$0xff] %v7676_v14 }
  0xc2   : > { %304 = vst [vmem:[%s7664_s5 + $0x88] sm:$0xff] %v7676_v14  ;;  %310 = vst [vmem:[%s7664_s5 + $0xb8] sm:$0xff] %v7676_v14 }
  0xc3   : > { %316 = vst [vmem:[%s7664_s5 + $0xe8] sm:$0xff] %v7676_v14  ;;  %322 = vst [vmem:[%s7664_s5 + $0x118] sm:$0xff] %v7676_v14 }
  0xc4   : > { %328 = vst [vmem:[%s7664_s5 + $0x148] sm:$0xff] %v7676_v14  ;;  %334 = vst [vmem:[%s7664_s5 + $0x178] sm:$0xff] %v7676_v14 }
  0xc5   : > { %340 = vst [vmem:[%s7664_s5 + $0x1a8] sm:$0xff] %v7676_v14  ;;  %346 = vst [vmem:[%s7664_s5 + $0x1d8] sm:$0xff] %v7676_v14 }
  0xc6   : > { %352 = vst [vmem:[%s7664_s5 + $0x208] sm:$0xff] %v7676_v14  ;;  %358 = vst [vmem:[%s7664_s5 + $0x238] sm:$0xff] %v7676_v14 }
  0xc7   : > { %364 = vst [vmem:[%s7664_s5 + $0x268] sm:$0xff] %v7676_v14  ;;  %370 = vst [vmem:[%s7664_s5 + $0x298] sm:$0xff] %v7676_v14 }
  0xc8   : > { %376 = vst [vmem:[%s7664_s5 + $0x2c8] sm:$0xff] %v7676_v14  ;;  %382 = vst [vmem:[%s7664_s5 + $0x2f8] sm:$0xff] %v7676_v14 }
  0xc9   : > { %388 = vst [vmem:[%s7664_s5 + $0x328] sm:$0xff] %v7676_v14  ;;  %394 = vst [vmem:[%s7664_s5 + $0x358] sm:$0xff] %v7676_v14 }
  0xca   : > { %400 = vst [vmem:[%s7664_s5 + $0x388] sm:$0xff] %v7676_v14  ;;  %406 = vst [vmem:[%s7664_s5 + $0x3b8] sm:$0xff] %v7676_v14 }
  0xcb   : > { %412 = vst [vmem:[%s7664_s5 + $0x3e8] sm:$0xff] %v7676_v14  ;;  %418 = vst [vmem:[%s7664_s5 + $0x418] sm:$0xff] %v7676_v14 }
  0xcc   : > { %424 = vst [vmem:[%s7664_s5 + $0x448] sm:$0xff] %v7676_v14  ;;  %430 = vst [vmem:[%s7664_s5 + $0x478] sm:$0xff] %v7676_v14 }
  0xcd PF: > { %v1728_v15 = vld [vmem:[%s7655_s8 + $0x8] sm:$0xff]  ;;  %v1734_v16 = vld [vmem:[%s7655_s8 + $0x38] sm:$0xff]  ;;  %v1727_v20 = vld [vmem:[%s7655_s8] sm:$0xff]  ;;  %s11986_s21 = sld [smem:[#allocation11_spill]]  ;;  %s5306_s3 = sshll.u32 %s7664_s5, 4  ;;  %s11249_s3 = int_to_ptr.vmem [resolvable:$true] %s5306_s3 }
  0xce   : > { %v2112_v17 = vld [vmem:[%s7655_s8 + $0xc08] sm:$0xff]  ;;  %v5430_v18 = vpack.c.bf16 %v1734_v16, %v1728_v15  ;;  %v2118_v19 = vld [vmem:[%s7655_s8 + $0xc38] sm:$0xff]  ;;  %v1733_v21 = vld [vmem:[%s7655_s8 + $0x30] sm:$0xff]  ;;  %s11987_s27 = sld [smem:[#allocation168_spill]]  ;;  %s11257_s30 = scalar_lea.sflag [#allocation4], %s244_s11 }
  0xcf   : > { %v5558_v22 = vpack.c.bf16 %v2118_v19, %v2112_v17  ;;  %v5432_v23 = vpack.c.bf16 %v1733_v21, %v1727_v20  ;;  %v2111_v24 = vld [vmem:[%s7655_s8 + $0xc00] sm:$0xff]  ;;  %v2117_v25 = vld [vmem:[%s7655_s8 + $0xc30] sm:$0xff]  ;;  %v1740_v26 = vld [vmem:[%s7655_s8 + $0x68] sm:$0xff]  ;;  %s7222_s6 = scalar_lea.vmem %s11249_s3, 18432  ;;  %p11988_p4 = scmp.ne.s32.totalorder %s11663_s18, 0 }
  0xd0   : > { %5431 = vmatprep.subr.bf16.mxu1 %v5430_v18  ;;  %v5560_v27 = vpack.c.bf16 %v2117_v25, %v2111_v24  ;;  %v1746_v28 = vld [vmem:[%s7655_s8 + $0x98] sm:$0xff]  ;;  %v2124_v29 = vld [vmem:[%s7655_s8 + $0xc68] sm:$0xff]  ;;  %v1739_v33 = vld [vmem:[%s7655_s8 + $0x60] sm:$0xff]  ;;  %p7223_p2 = scmp.ne.s32.totalorder %s11249_s3, %s7222_s6  ;;  %s7381_s0 = smov [#allocation7]  }
  0xd1   : > { %v2130_v30 = vld [vmem:[%s7655_s8 + $0xc98] sm:$0xff]  ;;  %5559 = vmatprep.subr.bf16.mxu0 %v5558_v22  ;;  %5433 = vmatpush1.bf16.msra.mxu1 %v5432_v23  ;;  %v5434_v31 = vpack.c.bf16 %v1746_v28, %v1740_v26  ;;  %v1745_v34 = vld [vmem:[%s7655_s8 + $0x90] sm:$0xff]  ;;  %v2123_v35 = vld [vmem:[%s7655_s8 + $0xc60] sm:$0xff] }
  0xd2   : > { %v5562_v32 = vpack.c.bf16 %v2130_v30, %v2124_v29  ;;  %5561 = vmatpush1.bf16.msra.mxu0 %v5560_v27  ;;  %v5436_v36 = vpack.c.bf16 %v1745_v34, %v1739_v33  ;;  %v2129_v37 = vld [vmem:[%s7655_s8 + $0xc90] sm:$0xff]  ;;  %v1752_v38 = vld [vmem:[%s7655_s8 + $0xc8] sm:$0xff]  ;;  %v1758_v39 = vld [vmem:[%s7655_s8 + $0xf8] sm:$0xff]  ;;  %p7224_p9 = pnand %p7223_p2, %p11988_p4 }
  0xd3   : > { %5435 = vmatprep.subr.bf16.mxu1 %v5434_v31  ;;  %v5564_v40 = vpack.c.bf16 %v2129_v37, %v2123_v35  ;;  %v5438_v41 = vpack.c.bf16 %v1758_v39, %v1752_v38  ;;  %v2136_v42 = vld [vmem:[%s7655_s8 + $0xcc8] sm:$0xff]  ;;  %v2142_v43 = vld [vmem:[%s7655_s8 + $0xcf8] sm:$0xff]  ;;  %v1751_v44 = vld [vmem:[%s7655_s8 + $0xc0] sm:$0xff]  ;;  %s6657_s29 = smul.u32 18432, %s11986_s21 }
  0xd4   : > { %5563 = vmatprep.subr.bf16.mxu0 %v5562_v32  ;;  %v5566_v45 = vpack.c.bf16 %v2142_v43, %v2136_v42  ;;  %v1757_v46 = vld [vmem:[%s7655_s8 + $0xf0] sm:$0xff]  ;;  %v2135_v47 = vld [vmem:[%s7655_s8 + $0xcc0] sm:$0xff]  ;;  %v1764_v50 = vld [vmem:[%s7655_s8 + $0x128] sm:$0xff]  ;;  %p7225_p12 = pneg %p7224_p9 }
  0xd5   : > { %v2141_v48 = vld [vmem:[%s7655_s8 + $0xcf0] sm:$0xff]  ;;  %5437 = vmatpush1.bf16.msra.mxu1 %v5436_v36  ;;  %v5440_v49 = vpack.c.bf16 %v1757_v46, %v1751_v44  ;;  %v1770_v51 = vld [vmem:[%s7655_s8 + $0x158] sm:$0xff]  ;;  %v2148_v52 = vld [vmem:[%s7655_s8 + $0xd28] sm:$0xff] }
  0xd6   : > { %5565 = vmatpush1.bf16.msra.mxu0 %v5564_v40  ;;  %5439 = vmatprep.subr.bf16.mxu1 %v5438_v41  ;;  %v5568_v53 = vpack.c.bf16 %v2141_v48, %v2135_v47  ;;  %v5442_v54 = vpack.c.bf16 %v1770_v51, %v1764_v50  ;;  %v2154_v55 = vld [vmem:[%s7655_s8 + $0xd58] sm:$0xff]  ;;  %v1763_v56 = vld [vmem:[%s7655_s8 + $0x120] sm:$0xff]  ;;  %v1769_v57 = vld [vmem:[%s7655_s8 + $0x150] sm:$0xff] }
  0xd7   : > { %5567 = vmatprep.subr.bf16.mxu0 %v5566_v45  ;;  %v5570_v58 = vpack.c.bf16 %v2154_v55, %v2148_v52  ;;  %v2147_v59 = vld [vmem:[%s7655_s8 + $0xd20] sm:$0xff]  ;;  %v2153_v60 = vld [vmem:[%s7655_s8 + $0xd50] sm:$0xff]  ;;  %v1776_v61 = vld [vmem:[%s7655_s8 + $0x188] sm:$0xff]  ;;  %v5444_v1 = vpack.c.bf16 %v1769_v57, %v1763_v56 }
  0xd8   : > { %v1782_v62 = vld [vmem:[%s7655_s8 + $0x1b8] sm:$0xff]  ;;  %v2160_v63 = vld [vmem:[%s7655_s8 + $0xd88] sm:$0xff]  ;;  %v5572_v2 = vpack.c.bf16 %v2153_v60, %v2147_v59  ;;  %v1775_v4 = vld [vmem:[%s7655_s8 + $0x180] sm:$0xff] }
  0xd9   : > { %v2166_v0 = vld [vmem:[%s7655_s8 + $0xdb8] sm:$0xff]  ;;  %5441 = vmatpush1.bf16.msra.mxu1 %v5440_v49  ;;  %v5446_v3 = vpack.c.bf16 %v1782_v62, %v1776_v61  ;;  %v1781_v5 = vld [vmem:[%s7655_s8 + $0x1b0] sm:$0xff]  ;;  %v2159_v6 = vld [vmem:[%s7655_s8 + $0xd80] sm:$0xff] }
  0xda   : > { %5569 = vmatpush1.bf16.msra.mxu0 %v5568_v53  ;;  %5443 = vmatprep.subr.bf16.mxu1 %v5442_v54  ;;  %v5574_v7 = vpack.c.bf16 %v2166_v0, %v2160_v63  ;;  %v2165_v8 = vld [vmem:[%s7655_s8 + $0xdb0] sm:$0xff]  ;;  %v1788_v9 = vld [vmem:[%s7655_s8 + $0x1e8] sm:$0xff]  ;;  %v1794_v10 = vld [vmem:[%s7655_s8 + $0x218] sm:$0xff]  ;;  %v5448_v13 = vpack.c.bf16 %v1781_v5, %v1775_v4 }
  0xdb   : > { %5571 = vmatprep.subr.bf16.mxu0 %v5570_v58  ;;  %v2172_v11 = vld [vmem:[%s7655_s8 + $0xde8] sm:$0xff]  ;;  %v2178_v12 = vld [vmem:[%s7655_s8 + $0xe18] sm:$0xff]  ;;  %v5576_v14 = vpack.c.bf16 %v2165_v8, %v2159_v6  ;;  %v5450_v15 = vpack.c.bf16 %v1794_v10, %v1788_v9  ;;  %v1787_v16 = vld [vmem:[%s7655_s8 + $0x1e0] sm:$0xff] }
  0xdc   : > { %v1793_v17 = vld [vmem:[%s7655_s8 + $0x210] sm:$0xff]  ;;  %v2171_v18 = vld [vmem:[%s7655_s8 + $0xde0] sm:$0xff]  ;;  %v5578_v19 = vpack.c.bf16 %v2178_v12, %v2172_v11  ;;  %v1800_v21 = vld [vmem:[%s7655_s8 + $0x248] sm:$0xff] }
  0xdd   : > { %5445 = vmatpush1.bf16.msra.mxu1 %v5444_v1  ;;  %v2177_v20 = vld [vmem:[%s7655_s8 + $0xe10] sm:$0xff]  ;;  %v1806_v22 = vld [vmem:[%s7655_s8 + $0x278] sm:$0xff]  ;;  %v2184_v23 = vld [vmem:[%s7655_s8 + $0xe48] sm:$0xff]  ;;  %v5452_v25 = vpack.c.bf16 %v1793_v17, %v1787_v16 }
  0xde   : > { %5573 = vmatpush1.bf16.msra.mxu0 %v5572_v2  ;;  %5447 = vmatprep.subr.bf16.mxu1 %v5446_v3  ;;  %v2190_v24 = vld [vmem:[%s7655_s8 + $0xe78] sm:$0xff]  ;;  %v5580_v26 = vpack.c.bf16 %v2177_v20, %v2171_v18  ;;  %v5454_v27 = vpack.c.bf16 %v1806_v22, %v1800_v21  ;;  %v1799_v28 = vld [vmem:[%s7655_s8 + $0x240] sm:$0xff]  ;;  %v1805_v29 = vld [vmem:[%s7655_s8 + $0x270] sm:$0xff] }
  0xdf   : > { %5575 = vmatprep.subr.bf16.mxu0 %v5574_v7  ;;  %v2183_v30 = vld [vmem:[%s7655_s8 + $0xe40] sm:$0xff]  ;;  %v5582_v31 = vpack.c.bf16 %v2190_v24, %v2184_v23  ;;  %v2189_v32 = vld [vmem:[%s7655_s8 + $0xe70] sm:$0xff]  ;;  %v1812_v33 = vld [vmem:[%s7655_s8 + $0x2a8] sm:$0xff]  ;;  %v5456_v37 = vpack.c.bf16 %v1805_v29, %v1799_v28 }
  0xe0   : > { %v1818_v34 = vld [vmem:[%s7655_s8 + $0x2d8] sm:$0xff]  ;;  %v2196_v35 = vld [vmem:[%s7655_s8 + $0xea8] sm:$0xff]  ;;  %v5584_v38 = vpack.c.bf16 %v2189_v32, %v2183_v30  ;;  %v1811_v40 = vld [vmem:[%s7655_s8 + $0x2a0] sm:$0xff] }
  0xe1   : > { %5449 = vmatpush1.bf16.msra.mxu1 %v5448_v13  ;;  %v2202_v36 = vld [vmem:[%s7655_s8 + $0xed8] sm:$0xff]  ;;  %v5458_v39 = vpack.c.bf16 %v1818_v34, %v1812_v33  ;;  %v1817_v41 = vld [vmem:[%s7655_s8 + $0x2d0] sm:$0xff]  ;;  %v2195_v42 = vld [vmem:[%s7655_s8 + $0xea0] sm:$0xff] }
  0xe2   : > { %5577 = vmatpush1.bf16.msra.mxu0 %v5576_v14  ;;  %5451 = vmatprep.subr.bf16.mxu1 %v5450_v15  ;;  %v5586_v43 = vpack.c.bf16 %v2202_v36, %v2196_v35  ;;  %v2201_v44 = vld [vmem:[%s7655_s8 + $0xed0] sm:$0xff]  ;;  %v1824_v45 = vld [vmem:[%s7655_s8 + $0x308] sm:$0xff]  ;;  %v1830_v46 = vld [vmem:[%s7655_s8 + $0x338] sm:$0xff]  ;;  %v5460_v49 = vpack.c.bf16 %v1817_v41, %v1811_v40 }
  0xe3   : > { %5579 = vmatprep.subr.bf16.mxu0 %v5578_v19  ;;  %v2208_v47 = vld [vmem:[%s7655_s8 + $0xf08] sm:$0xff]  ;;  %v2214_v48 = vld [vmem:[%s7655_s8 + $0xf38] sm:$0xff]  ;;  %v5588_v50 = vpack.c.bf16 %v2201_v44, %v2195_v42  ;;  %v5462_v51 = vpack.c.bf16 %v1830_v46, %v1824_v45  ;;  %v1823_v52 = vld [vmem:[%s7655_s8 + $0x300] sm:$0xff] }
  0xe4   : > { %v1829_v53 = vld [vmem:[%s7655_s8 + $0x330] sm:$0xff]  ;;  %v2207_v54 = vld [vmem:[%s7655_s8 + $0xf00] sm:$0xff]  ;;  %v5590_v55 = vpack.c.bf16 %v2214_v48, %v2208_v47  ;;  %v1836_v57 = vld [vmem:[%s7655_s8 + $0x368] sm:$0xff] }
  0xe5   : > { %5453 = vmatpush1.bf16.msra.mxu1 %v5452_v25  ;;  %v2213_v56 = vld [vmem:[%s7655_s8 + $0xf30] sm:$0xff]  ;;  %v1842_v58 = vld [vmem:[%s7655_s8 + $0x398] sm:$0xff]  ;;  %v2220_v59 = vld [vmem:[%s7655_s8 + $0xf68] sm:$0xff]  ;;  %v5464_v61 = vpack.c.bf16 %v1829_v53, %v1823_v52 }
  0xe6   : > { %5581 = vmatpush1.bf16.msra.mxu0 %v5580_v26  ;;  %5455 = vmatprep.subr.bf16.mxu1 %v5454_v27  ;;  %v2226_v60 = vld [vmem:[%s7655_s8 + $0xf98] sm:$0xff]  ;;  %v1835_v62 = vld [vmem:[%s7655_s8 + $0x360] sm:$0xff]  ;;  %v5592_v63 = vpack.c.bf16 %v2213_v56, %v2207_v54  ;;  %v5466_v0 = vpack.c.bf16 %v1842_v58, %v1836_v57  ;;  %v1841_v1 = vld [vmem:[%s7655_s8 + $0x390] sm:$0xff] }
  0xe7   : > { %5583 = vmatprep.subr.bf16.mxu0 %v5582_v31  ;;  %v2219_v2 = vld [vmem:[%s7655_s8 + $0xf60] sm:$0xff]  ;;  %v2225_v3 = vld [vmem:[%s7655_s8 + $0xf90] sm:$0xff]  ;;  %v5594_v4 = vpack.c.bf16 %v2226_v60, %v2220_v59  ;;  %v1848_v5 = vld [vmem:[%s7655_s8 + $0x3c8] sm:$0xff]  ;;  %v5468_v11 = vpack.c.bf16 %v1841_v1, %v1835_v62 }
  0xe8   : > { %v1854_v6 = vld [vmem:[%s7655_s8 + $0x3f8] sm:$0xff]  ;;  %v2232_v7 = vld [vmem:[%s7655_s8 + $0xfc8] sm:$0xff]  ;;  %v8003_v9 = vld [vmem:[%s7655_s8 + $0x3c0] sm:$0xff]  ;;  %v5596_v16 = vpack.c.bf16 %v2225_v3, %v2219_v2 }
  0xe9   : > { %5457 = vmatpush1.bf16.msra.mxu1 %v5456_v37  ;;  %v2238_v8 = vld [vmem:[%s7655_s8 + $0xff8] sm:$0xff]  ;;  %v8006_v10 = vld [vmem:[%s7655_s8 + $0x3f0] sm:$0xff]  ;;  %v8009_v12 = vld [vmem:[%s7655_s8 + $0xfc0] sm:$0xff]  ;;  %v5470_v17 = vpack.c.bf16 %v1854_v6, %v1848_v5 }
  0xea   : > { %5585 = vmatpush1.bf16.msra.mxu0 %v5584_v38  ;;  %5459 = vmatprep.subr.bf16.mxu1 %v5458_v39  ;;  %v8012_v13 = vld [vmem:[%s7655_s8 + $0xff0] sm:$0xff]  ;;  %v8015_v14 = vld [vmem:[%s7655_s8 + $0x428] sm:$0xff]  ;;  %v8018_v15 = vld [vmem:[%s7655_s8 + $0x458] sm:$0xff]  ;;  %v5598_v26 = vpack.c.bf16 %v2238_v8, %v2232_v7  ;;  %v5472_v37 = vpack.c.bf16 %v8006_v10, %v8003_v9 }
  0xeb   : > { %5587 = vmatprep.subr.bf16.mxu0 %v5586_v43  ;;  %v8021_v18 = vld [vmem:[%s7655_s8 + $0x1028] sm:$0xff]  ;;  %v8024_v19 = vld [vmem:[%s7655_s8 + $0x1058] sm:$0xff]  ;;  %v8027_v20 = vld [vmem:[%s7655_s8 + $0x420] sm:$0xff]  ;;  %v5600_v44 = vpack.c.bf16 %v8012_v13, %v8009_v12  ;;  %v5474_v45 = vpack.c.bf16 %v8018_v15, %v8015_v14 }
  0xec   : > { %v8030_v21 = vld [vmem:[%s7655_s8 + $0x450] sm:$0xff]  ;;  %v8033_v22 = vld [vmem:[%s7655_s8 + $0x1020] sm:$0xff]  ;;  %v8039_v24 = vld [vmem:[%s7655_s8 + $0x488] sm:$0xff] }
  0xed   : > { %5461 = vmatpush1.bf16.msra.mxu1 %v5460_v49  ;;  %v8036_v23 = vld [vmem:[%s7655_s8 + $0x1050] sm:$0xff]  ;;  %v8042_v25 = vld [vmem:[%s7655_s8 + $0x4b8] sm:$0xff]  ;;  %v8045_v27 = vld [vmem:[%s7655_s8 + $0x1088] sm:$0xff] }
  0xee   : > { %5589 = vmatpush1.bf16.msra.mxu0 %v5588_v50  ;;  %5463 = vmatprep.subr.bf16.mxu1 %v5462_v51  ;;  %v8048_v28 = vld [vmem:[%s7655_s8 + $0x10b8] sm:$0xff]  ;;  %v8051_v29 = vld [vmem:[%s7655_s8 + $0x480] sm:$0xff]  ;;  %v8054_v30 = vld [vmem:[%s7655_s8 + $0x4b0] sm:$0xff]  ;;  %v5602_v50 = vpack.c.bf16 %v8024_v19, %v8021_v18  ;;  %v5476_v51 = vpack.c.bf16 %v8030_v21, %v8027_v20  ;;  %v5604_v52 = vpack.c.bf16 %v8036_v23, %v8033_v22 }
  0xef   : > { %5591 = vmatprep.subr.bf16.mxu0 %v5590_v55  ;;  %v8057_v31 = vld [vmem:[%s7655_s8 + $0x1080] sm:$0xff]  ;;  %v8060_v32 = vld [vmem:[%s7655_s8 + $0x10b0] sm:$0xff]  ;;  %v8063_v33 = vld [vmem:[%s7655_s8 + $0x4e8] sm:$0xff]  ;;  %v5478_v53 = vpack.c.bf16 %v8042_v25, %v8039_v24  ;;  %v5606_v59 = vpack.c.bf16 %v8048_v28, %v8045_v27  ;;  %v5480_v60 = vpack.c.bf16 %v8054_v30, %v8051_v29 }
  0xf0   : > { %v8066_v34 = vld [vmem:[%s7655_s8 + $0x518] sm:$0xff]  ;;  %v8069_v35 = vld [vmem:[%s7655_s8 + $0x10e8] sm:$0xff]  ;;  %v8077_v38 = vld [vmem:[%s7655_s8 + $0x4e0] sm:$0xff] }
  0xf1   : > { %5465 = vmatpush1.bf16.msra.mxu1 %v5464_v61  ;;  %v8072_v36 = vld [vmem:[%s7655_s8 + $0x1118] sm:$0xff]  ;;  %v8080_v39 = vld [vmem:[%s7655_s8 + $0x510] sm:$0xff]  ;;  %v8083_v40 = vld [vmem:[%s7655_s8 + $0x10e0] sm:$0xff]  ;;  %v5608_v61 = vpack.c.bf16 %v8060_v32, %v8057_v31  ;;  %v5482_v3 = vpack.c.bf16 %v8066_v34, %v8063_v33 }
  0xf2   : > { %5593 = vmatpush1.bf16.msra.mxu0 %v5592_v63  ;;  %5467 = vmatprep.subr.bf16.mxu1 %v5466_v0  ;;  %v8086_v41 = vld [vmem:[%s7655_s8 + $0x1110] sm:$0xff]  ;;  %v8089_v42 = vld [vmem:[%s7655_s8 + $0x548] sm:$0xff]  ;;  %v8092_v43 = vld [vmem:[%s7655_s8 + $0x578] sm:$0xff]  ;;  %v5484_v10 = vpack.c.bf16 %v8080_v39, %v8077_v38 }
  0xf3   : > { %5595 = vmatprep.subr.bf16.mxu0 %v5594_v4  ;;  %v8099_v46 = vld [vmem:[%s7655_s8 + $0x1148] sm:$0xff]  ;;  %v8102_v47 = vld [vmem:[%s7655_s8 + $0x1178] sm:$0xff]  ;;  %v8105_v48 = vld [vmem:[%s7655_s8 + $0x540] sm:$0xff]  ;;  %v5610_v4 = vpack.c.bf16 %v8072_v36, %v8069_v35  ;;  %v5486_v12 = vpack.c.bf16 %v8092_v43, %v8089_v42 }
  0xf4   : > { %v8108_v49 = vld [vmem:[%s7655_s8 + $0x570] sm:$0xff]  ;;  %v8119_v54 = vld [vmem:[%s7655_s8 + $0x1140] sm:$0xff]  ;;  %v8125_v56 = vld [vmem:[%s7655_s8 + $0x5a8] sm:$0xff] }
  0xf5   : > { %5469 = vmatpush1.bf16.msra.mxu1 %v5468_v11  ;;  %v8122_v55 = vld [vmem:[%s7655_s8 + $0x1170] sm:$0xff]  ;;  %v8128_v57 = vld [vmem:[%s7655_s8 + $0x5d8] sm:$0xff]  ;;  %v432_v58 = vld [vmem:[%s7648_s28 + $0x8] sm:$0xff]  ;;  %v5612_v11 = vpack.c.bf16 %v8086_v41, %v8083_v40 }
  0xf6   : > { %5597 = vmatpush1.bf16.msra.mxu0 %v5596_v16  ;;  %5471 = vmatprep.subr.bf16.mxu1 %v5470_v17  ;;  %v8138_v62 = vld [vmem:[%s7655_s8 + $0x11a8] sm:$0xff]  ;;  %v8141_v63 = vld [vmem:[%s7655_s8 + $0x11d8] sm:$0xff]  ;;  %v816_v0 = vmul.f32 0.70710677, %v432_v58  ;;  %v431_v2 = vld [vmem:[%s7648_s28] sm:$0xff]  ;;  %v5614_v16 = vpack.c.bf16 %v8102_v47, %v8099_v46  ;;  %v5488_v17 = vpack.c.bf16 %v8108_v49, %v8105_v48  ;;  %v8188_v24 = vmul.f32 0.5, %v432_v58 }
  0xf7   : > { %5599 = vmatprep.subr.bf16.mxu0 %v5598_v26  ;;  %v436_v1 = vld [vmem:[%s7648_s28 + $0x28] sm:$0xff]  ;;  %v8150_v5 = vld [vmem:[%s7655_s8 + $0x5a0] sm:$0xff]  ;;  %v8153_v6 = vld [vmem:[%s7655_s8 + $0x5d0] sm:$0xff]  ;;  %v815_v9 = vmul.f32 0.70710677, %v431_v2  ;;  %v8214_v28 = vmul.f32 0.5, %v431_v2  ;;  %v11671_v48 = vpack.c.bf16 %v8122_v55, %v8119_v54  ;;  %v11672_v49 = vpack.c.bf16 %v8128_v57, %v8125_v56 }
  0xf8   : > { %v8156_v7 = vld [vmem:[%s7655_s8 + $0x11a0] sm:$0xff]  ;;  %v820_v8 = vmul.f32 0.70710677, %v436_v1  ;;  %v8165_v13 = vld [vmem:[%s7655_s8 + $0x11d0] sm:$0xff]  ;;  %6778 = verf.f32 %v816_v0  ;;  %v8168_v14 = vld [vmem:[%s7655_s8 + $0x608] sm:$0xff]  ;;  %v11673_v56 = vpack.c.bf16 %v8141_v63, %v8138_v62 }
  0xf9   : > { %5473 = vmatpush1.bf16.msra.mxu1 %v5472_v37  ;;  %v435_v15 = vld [vmem:[%s7648_s28 + $0x20] sm:$0xff]  ;;  %v8176_v18 = vld [vmem:[%s7655_s8 + $0x638] sm:$0xff]  ;;  %v8179_v20 = vld [vmem:[%s7655_s8 + $0x1208] sm:$0xff]  ;;  %v8199_v37 = vmul.f32 0.5, %v436_v1 }
  0xfa   : > { %5601 = vmatpush1.bf16.msra.mxu0 %v5600_v44  ;;  %5475 = vmatprep.subr.bf16.mxu1 %v5474_v45  ;;  %6780 = verf.f32 %v820_v8  ;;  %v819_v19 = vmul.f32 0.70710677, %v435_v15  ;;  %v8182_v21 = vld [vmem:[%s7655_s8 + $0x1238] sm:$0xff]  ;;  %v8191_v25 = vld [vmem:[%s7655_s8 + $0x600] sm:$0xff]  ;;  %v8194_v26 = vld [vmem:[%s7655_s8 + $0x630] sm:$0xff]  ;;  %v8218_v0 = vmul.f32 0.5, %v435_v15 }
  0xfb   : > { %5603 = vmatprep.subr.bf16.mxu0 %v5602_v50  ;;  %6782 = verf.f32 %v815_v9  ;;  %v440_v27 = vld [vmem:[%s7648_s28 + $0x48] sm:$0xff]  ;;  %v439_v50 = vld [vmem:[%s7648_s28 + $0x40] sm:$0xff]  ;;  %v8212_v1 = vld [vmem:[%s7655_s8 + $0x1230] sm:$0xff] }
  0xfc   : > { %6784 = verf.f32 %v819_v19  ;;  %v824_v44 = vmul.f32 0.70710677, %v440_v27  ;;  %v444_v45 = vld [vmem:[%s7648_s28 + $0x68] sm:$0xff]  ;;  %v443_v58 = vld [vmem:[%s7648_s28 + $0x60] sm:$0xff]  ;;  %v823_v19 = vmul.f32 0.70710677, %v439_v50 }
  0xfd   : > { %5477 = vmatpush1.bf16.msra.mxu1 %v5476_v51  ;;  %v8209_v8 = vld [vmem:[%s7655_s8 + $0x1200] sm:$0xff]  ;;  %v828_v9 = vmul.f32 0.70710677, %v444_v45  ;;  %v8228_v2 = vld [vmem:[%s7655_s8 + $0x698] sm:$0xff]  ;;  %v448_v22 = vld [vmem:[%s7648_s28 + $0x88] sm:$0xff]  ;;  %v8251_v29 = vmul.f32 0.5, %v444_v45 }
  0xfe   : > { %5605 = vmatpush1.bf16.msra.mxu0 %v5604_v52  ;;  %5479 = vmatprep.subr.bf16.mxu1 %v5478_v53  ;;  %6786 = verf.f32 %v824_v44  ;;  %v827_v53 = vmul.f32 0.70710677, %v443_v58  ;;  %v5624_v15 = vpack.c.bf16 %v8212_v1, %v8209_v8  ;;  %v8236_v44 = vmul.f32 0.5, %v440_v27  ;;  %v8239_v51 = vld [vmem:[%s7655_s8 + $0x1268] sm:$0xff]  ;;  %v447_v27 = vld [vmem:[%s7648_s28 + $0x80] sm:$0xff]  ;;  %v8286_v39 = vld [vmem:[%s7655_s8 + $0x690] sm:$0xff] }
  0xff   : > { %5607 = vmatprep.subr.bf16.mxu0 %v5606_v59  ;;  %6788 = verf.f32 %v828_v9  ;;  %v8225_v59 = vld [vmem:[%s7655_s8 + $0x668] sm:$0xff]  ;;  %v8242_v9 = vld [vmem:[%s7655_s8 + $0x1298] sm:$0xff]  ;;  %v832_v23 = vmul.f32 0.70710677, %v448_v22  ;;  %v8253_v30 = vmul.f32 0.5, %v439_v50  ;;  %v8260_v31 = vmul.f32 0.5, %v443_v58 }
 0x100   : > { %6790 = verf.f32 %v823_v19  ;;  %v452_v52 = vld [vmem:[%s7648_s28 + $0xa8] sm:$0xff]  ;;  %v451_v19 = vld [vmem:[%s7648_s28 + $0xa0] sm:$0xff]  ;;  %v5498_v32 = vpack.c.bf16 %v8228_v2, %v8225_v59  ;;  %v831_v33 = vmul.f32 0.70710677, %v447_v27  ;;  %v8268_v50 = vmul.f32 0.5, %v448_v22  ;;  %v8301_v43 = vld [vmem:[%s7655_s8 + $0x1290] sm:$0xff] }
 0x101   : > { %5481 = vmatpush1.bf16.msra.mxu1 %v5480_v60  ;;  %6792 = verf.f32 %v827_v53  ;;  %v836_v60 = vmul.f32 0.70710677, %v452_v52  ;;  %v456_v34 = vld [vmem:[%s7648_s28 + $0xc8] sm:$0xff]  ;;  %v835_v35 = vmul.f32 0.70710677, %v451_v19  ;;  %v455_v36 = vld [vmem:[%s7648_s28 + $0xc0] sm:$0xff] }
 0x102   : > { %5609 = vmatpush1.bf16.msra.mxu0 %v5608_v61  ;;  %5483 = vmatprep.subr.bf16.mxu1 %v5482_v3  ;;  %6794 = verf.f32 %v832_v23  ;;  %v460_v61 = vld [vmem:[%s7648_s28 + $0xe8] sm:$0xff]  ;;  %v6779_v3 = vpop.eup %6778  ;;  %v8275_v58 = vld [vmem:[%s7655_s8 + $0x660] sm:$0xff]  ;;  %v8277_v53 = vmul.f32 0.5, %v452_v52  ;;  %v840_v45 = vmul.f32 0.70710677, %v456_v34  ;;  %v8312_v47 = vld [vmem:[%s7655_s8 + $0x6f8] sm:$0xff] }
 0x103   : > { %5611 = vmatprep.subr.bf16.mxu0 %v5610_v4  ;;  %6796 = verf.f32 %v836_v60  ;;  %v1200_v23 = vadd.f32 1.0, %v6779_v3  ;;  %v844_v52 = vmul.f32 0.70710677, %v460_v61  ;;  %v459_v60 = vld [vmem:[%s7648_s28 + $0xe0] sm:$0xff]  ;;  %v8306_v3 = vmul.f32 0.5, %v451_v19  ;;  %v8309_v46 = vld [vmem:[%s7655_s8 + $0x6c8] sm:$0xff] }
 0x104   : > { %v6781_v4 = vpop.eup %6780  ;;  %6798 = verf.f32 %v831_v33  ;;  %v8298_v42 = vld [vmem:[%s7655_s8 + $0x1260] sm:$0xff]  ;;  %v843_v19 = vmul.f32 0.70710677, %v459_v60  ;;  %v468_v54 = vld [vmem:[%s7648_s28 + $0x128] sm:$0xff]  ;;  %v8367_v63 = vld [vmem:[%s7655_s8 + $0x12f0] sm:$0xff] }
 0x105   : > { %5485 = vmatpush1.bf16.msra.mxu1 %v5484_v10  ;;  %v6783_v22 = vpop.eup %6782  ;;  %v1204_v38 = vadd.f32 1.0, %v6781_v4  ;;  %v8288_v10 = vmul.f32 0.5, %v447_v27  ;;  %6800 = verf.f32 %v835_v35  ;;  %v8295_v40 = vmul.f32 %v1200_v23, %v8188_v24  ;;  %v8326_v35 = vld [vmem:[%s7655_s8 + $0x12f8] sm:$0xff]  ;;  %v464_v4 = vld [vmem:[%s7648_s28 + $0x108] sm:$0xff]  ;;  %v8364_v62 = vld [vmem:[%s7655_s8 + $0x12c0] sm:$0xff] }
 0x106   : > { %5613 = vmatpush1.bf16.msra.mxu0 %v5612_v11  ;;  %5487 = vmatprep.subr.bf16.mxu1 %v5486_v12  ;;  %v6785_v33 = vpop.eup %6784  ;;  %v1199_v41 = vadd.f32 1.0, %v6783_v22  ;;  %6802 = verf.f32 %v840_v45  ;;  %v839_v11 = vmul.f32 0.70710677, %v455_v36  ;;  %v8323_v45 = vld [vmem:[%s7655_s8 + $0x12c8] sm:$0xff]  ;;  %v8337_v22 = vmul.f32 0.5, %v460_v61 }
 0x107   : > { %5615 = vmatprep.subr.bf16.mxu0 %v5614_v16  ;;  %v8304_v12 = vmul.f32 %v1204_v38, %v8199_v37  ;;  %v1203_v27 = vadd.f32 1.0, %v6785_v33  ;;  %6804 = verf.f32 %v844_v52  ;;  %2559 = vmatprep.mubr.f32.mxu1 %v8295_v40  ;;  %v8320_v37 = vmul.f32 0.5, %v456_v34  ;;  %v8342_v52 = vld [vmem:[%s7655_s8 + $0x6c0] sm:$0xff]  ;;  %v8345_v33 = vld [vmem:[%s7655_s8 + $0x6f0] sm:$0xff] }
 0x108   : > { %v6787_v16 = vpop.eup %6786  ;;  %6806 = verf.f32 %v839_v11  ;;  %v8339_v38 = vmul.f32 0.5, %v455_v36  ;;  %v8353_v57 = vmul.f32 %v1199_v41, %v8214_v28  ;;  %v463_v11 = vld [vmem:[%s7648_s28 + $0x100] sm:$0xff]  ;;  %v8361_v34 = vmul.f32 0.5, %v459_v60 }
 0x109   : > { %11670 = vst [vmem:[#allocation16_spill] sm:$0xff] %v8304_v12  ;;  %5489 = vmatpush1.bf16.msra.mxu1 %v5488_v17  ;;  %v6789_v23 = vpop.eup %6788  ;;  %v1208_v17 = vadd.f32 1.0, %v6787_v16  ;;  %2977 = vmatprep.mubr.f32.mxu0 %v8304_v12  ;;  %6808 = verf.f32 %v843_v19  ;;  %v848_v28 = vmul.f32 0.70710677, %v464_v4  ;;  %v467_v60 = vld [vmem:[%s7648_s28 + $0x120] sm:$0xff]  ;;  %v11676_v36 = vpack.c.bf16 %v8165_v13, %v8156_v7 }
 0x10a   : > { %5617 = vmatpush1.bf16.msra.mxu0 %v11671_v48  ;;  %5491 = vmatprep.subr.bf16.mxu1 %v11672_v49  ;;  %v6791_v55 = vpop.eup %6790  ;;  %v1212_v61 = vadd.f32 1.0, %v6789_v23  ;;  %v8359_v48 = vmul.f32 %v1203_v27, %v8218_v0  ;;  %v11675_v23 = vpack.c.bf16 %v8153_v6, %v8150_v5  ;;  %v852_v27 = vmul.f32 0.70710677, %v468_v54 }
 0x10b   : > { %5619 = vmatprep.subr.bf16.mxu0 %v11673_v56  ;;  %v6793_v16 = vpop.eup %6792  ;;  %v1207_v49 = vadd.f32 1.0, %v6791_v55  ;;  %v11677_v24 = vpack.c.bf16 %v8176_v18, %v8168_v14  ;;  %v8384_v5 = vmul.f32 %v1208_v17, %v8236_v44  ;;  %6810 = verf.f32 %v848_v28  ;;  %v8415_v28 = vld [vmem:[%s7655_s8 + $0x758] sm:$0xff] }
 0x10c   : > { %11674 = vst [vmem:[#allocation17_spill] sm:$0xff] %v8359_v48  ;;  %v6795_v41 = vpop.eup %6794  ;;  %v1211_v56 = vadd.f32 1.0, %v6793_v16  ;;  %v847_v16 = vmul.f32 0.70710677, %v463_v11  ;;  %v11678_v0 = vpack.c.bf16 %v8182_v21, %v8179_v20  ;;  %v8390_v19 = vmul.f32 %v1212_v61, %v8251_v29  ;;  %v472_v21 = vld [vmem:[%s7648_s28 + $0x148] sm:$0xff] }
 0x10d   : > { %5493 = vmatpush1.bf16.msra.mxu1 %v11675_v23  ;;  %v6797_v55 = vpop.eup %6796  ;;  %v1216_v6 = vadd.f32 1.0, %v6795_v41  ;;  %v5632_v13 = vpack.c.bf16 %v8367_v63, %v8364_v62  ;;  %6812 = verf.f32 %v852_v27  ;;  %v8396_v18 = vmul.f32 %v1207_v49, %v8253_v30  ;;  %v8412_v49 = vld [vmem:[%s7655_s8 + $0x728] sm:$0xff]  ;;  %v8445_v27 = vld [vmem:[%s7648_s28 + $0x140] sm:$0xff] }
 0x10e   : > { %5621 = vmatpush1.bf16.msra.mxu0 %v11676_v36  ;;  %5495 = vmatprep.subr.bf16.mxu1 %v11677_v24  ;;  %v6799_v23 = vpop.eup %6798  ;;  %11679 = vst [vmem:[#allocation18_spill] sm:$0xff] %v8390_v19  ;;  %v1220_v7 = vadd.f32 1.0, %v6797_v55  ;;  %6814 = verf.f32 %v847_v16  ;;  %v851_v20 = vmul.f32 0.70710677, %v467_v60  ;;  %v11680_v24 = vpack.c.bf16 %v8194_v26, %v8191_v25  ;;  %v476_v41 = vld [vmem:[%s7648_s28 + $0x168] sm:$0xff] }
 0x10f   : > { %5623 = vmatprep.subr.bf16.mxu0 %v11678_v0  ;;  %v6801_v14 = vpop.eup %6800  ;;  %v1215_v44 = vadd.f32 1.0, %v6799_v23  ;;  %v8404_v17 = vmul.f32 %v1211_v56, %v8260_v31  ;;  %v8407_v30 = vmul.f32 %v1216_v6, %v8268_v50  ;;  %v8409_v36 = vmul.f32 0.5, %v464_v4  ;;  %v8428_v50 = vld [vmem:[%s7655_s8 + $0x1328] sm:$0xff]  ;;  %v8431_v4 = vld [vmem:[%s7655_s8 + $0x1358] sm:$0xff]  ;;  %v8434_v56 = vld [vmem:[%s7655_s8 + $0x720] sm:$0xff] }
 0x110   : > { %2560 = vmatmul.mubr.f32.vlgmr.msra.gmra.mrb[0].mxu1 %v8353_v57  ;;  %v6803_v29 = vpop.eup %6802  ;;  %v1219_v61 = vadd.f32 1.0, %v6801_v14  ;;  %v8423_v25 = vmul.f32 %v1220_v7, %v8277_v53  ;;  %v8425_v31 = vmul.f32 0.5, %v468_v54  ;;  %6816 = verf.f32 %v851_v20  ;;  %v8463_v16 = vld [vmem:[%s7648_s28 + $0x188] sm:$0xff]  ;;  %v8476_v7 = vld [vmem:[%s7655_s8 + $0x1320] sm:$0xff]  ;;  %v8489_v20 = vld [vmem:[%s7655_s8 + $0x1350] sm:$0xff] }
 0x111   : > { %2978 = vmatmul.mubr.f32.vlgmr.msra.gmra.mrb[0].mxu0 %v8359_v48  ;;  %5497 = vmatpush1.bf16.msra.mxu1 %v11680_v24  ;;  %11681 = vst [vmem:[#allocation19_spill] sm:$0xff] %v8404_v17  ;;  %v6805_v0 = vpop.eup %6804  ;;  %v1224_v26 = vadd.f32 1.0, %v6803_v29  ;;  %v8442_v53 = vmul.f32 0.5, %v467_v60  ;;  %v856_v54 = vmul.f32 0.70710677, %v472_v21  ;;  %v11683_v55 = vpack.c.bf16 %v8242_v9, %v8239_v51  ;;  %v8460_v60 = vld [vmem:[%s7648_s28 + $0x160] sm:$0xff] }
 0x112   : > { %5625 = vmatpush1.bf16.msra.mxu0 %v5624_v15  ;;  %2565 = vmatprep.mubr.f32.mxu1 %v8384_v5  ;;  %11682 = vst [vmem:[#allocation20_spill] sm:$0xff] %v8423_v25  ;;  %v6807_v8 = vpop.eup %6806  ;;  %v1228_v1 = vadd.f32 1.0, %v6805_v0  ;;  %v8440_v15 = vmul.f32 0.5, %v463_v11  ;;  %v8452_v6 = vmul.f32 %v1215_v44, %v8288_v10  ;;  %v5506_v2 = vpack.c.bf16 %v8415_v28, %v8412_v49  ;;  %v8479_v14 = vld [vmem:[%s7648_s28 + $0x1a8] sm:$0xff]  ;;  %v8493_v24 = vld [vmem:[%s7648_s28 + $0x180] sm:$0xff]  ;;  %v2453_v48 = vld [vmem:[%s7655_s8 + $0x16b0] sm:$0xff] }
 0x113   : > { %2983 = vmatprep.mubr.f32.mxu0 %v8390_v19  ;;  %5499 = vmatprep.subr.bf16.mxu1 %v5498_v32  ;;  %v1223_v59 = vadd.f32 1.0, %v6807_v8  ;;  %v8457_v32 = vld [vmem:[%s7655_s8 + $0x750] sm:$0xff]  ;;  %v860_v11 = vmul.f32 0.70710677, %v476_v41  ;;  %v6809_v23 = vpop.eup %6808  ;;  %v8468_v51 = vmul.f32 %v1219_v61, %v8306_v3  ;;  %v8471_v9 = vmul.f32 %v1224_v26, %v8320_v37  ;;  %v8496_v61 = vld [vmem:[%s7655_s8 + $0x788] sm:$0xff]  ;;  %v8511_v26 = vld [vmem:[%s7655_s8 + $0x7b8] sm:$0xff] }
 0x114   : > { %2566 = vmatmul.mubr.f32.gmra.mrb[2].mxu1 %v8396_v18  ;;  %5627 = vmatprep.subr.bf16.mxu0 %v11683_v55  ;;  %v5634_v10 = vpack.c.bf16 %v8431_v4, %v8428_v50  ;;  %6818 = verf.f32 %v856_v54  ;;  %v11685_v44 = vpack.c.bf16 %v8286_v39, %v8275_v58  ;;  %v8486_v3 = vmul.f32 %v1228_v1, %v8337_v22 }
 0x115   : > { %2984 = vmatmul.mubr.f32.gmra.mrb[2].mxu0 %v8404_v17  ;;  %2571 = vmatprep.mubr.f32.mxu1 %v8407_v30  ;;  %11684 = vst [vmem:[#allocation21_spill] sm:$0xff] %v8468_v51  ;;  %v1227_v37 = vadd.f32 1.0, %v6809_v23  ;;  %6820 = verf.f32 %v860_v11  ;;  %v855_v29 = vmul.f32 0.70710677, %v8445_v27  ;;  %v11687_v58 = vpack.c.bf16 %v8301_v43, %v8298_v42  ;;  %v6811_v50 = vpop.eup %6810  ;;  %v8556_v23 = vld [vmem:[%s7655_s8 + $0x1380] sm:$0xff] }
 0x116   : > { %5501 = vmatpush1.bf16.msra.mxu1 %v11685_v44  ;;  %2989 = vmatprep.mubr.f32.mxu0 %v8423_v25  ;;  %11686 = vst [vmem:[#allocation22_spill] sm:$0xff] %v8486_v3  ;;  %v11688_v39 = vpack.c.bf16 %v8312_v47, %v8309_v46  ;;  %v8504_v22 = vmul.f32 0.5, %v472_v21  ;;  %v5508_v49 = vpack.c.bf16 %v8457_v32, %v8434_v56  ;;  %v859_v28 = vmul.f32 0.70710677, %v8460_v60  ;;  %v8524_v21 = vld [vmem:[%s7648_s28 + $0x1a0] sm:$0xff]  ;;  %v8546_v32 = vld [vmem:[%s7655_s8 + $0x7b0] sm:$0xff] }
 0x117   : > { %5629 = vmatpush1.bf16.msra.mxu0 %v11687_v58  ;;  %v864_v0 = vmul.f32 0.70710677, %v8463_v16  ;;  %v8515_v42 = vmul.f32 %v1223_v59, %v8339_v38  ;;  %v11689_v43 = vpack.c.bf16 %v8326_v35, %v8323_v45  ;;  %v8520_v46 = vmul.f32 0.5, %v476_v41  ;;  %v6813_v4 = vpop.eup %6812  ;;  %v2352_v35 = vld [vmem:[%s7655_s8 + $0x1388] sm:$0xff]  ;;  %v2358_v41 = vld [vmem:[%s7655_s8 + $0x13b8] sm:$0xff]  ;;  %v8543_v59 = vld [vmem:[%s7655_s8 + $0x780] sm:$0xff] }
 0x118   : > { %5503 = vmatprep.subr.bf16.mxu1 %v11688_v39  ;;  %2572 = vmatmul.mubr.f32.gmra.mrb[4].mxu1 %v8452_v6  ;;  %6822 = verf.f32 %v855_v29  ;;  %v868_v47 = vmul.f32 0.70710677, %v8479_v14  ;;  %v8529_v38 = vmul.f32 %v1227_v37, %v8361_v34  ;;  %v1232_v56 = vadd.f32 1.0, %v6811_v50  ;;  %v6815_v8 = vpop.eup %6814  ;;  %v8562_v44 = vld [vmem:[%s7648_s28 + $0x1e8] sm:$0xff] }
 0x119   : > { %5631 = vmatprep.subr.bf16.mxu0 %v11689_v43  ;;  %2990 = vmatmul.mubr.f32.gmra.mrb[4].mxu0 %v8468_v51  ;;  %6824 = verf.f32 %v859_v28  ;;  %v863_v45 = vmul.f32 0.70710677, %v8493_v24  ;;  %v11691_v1 = vpack.c.bf16 %v8345_v33, %v8342_v52  ;;  %v1236_v54 = vadd.f32 1.0, %v6813_v4  ;;  %v2364_v58 = vld [vmem:[%s7655_s8 + $0x13e8] sm:$0xff]  ;;  %v1979_v4 = vld [vmem:[%s7655_s8 + $0x7e0] sm:$0xff] }
 0x11a   : > { %2577 = vmatprep.mubr.f32.mxu1 %v8471_v9  ;;  %11690 = vst [vmem:[#allocation23_spill] sm:$0xff] %v8529_v38  ;;  %2995 = vmatprep.mubr.f32.mxu0 %v8486_v3  ;;  %v5636_v34 = vpack.c.bf16 %v8489_v20, %v8476_v7  ;;  %6826 = verf.f32 %v864_v0  ;;  %v5510_v55 = vpack.c.bf16 %v8511_v26, %v8496_v61  ;;  %v1231_v33 = vadd.f32 1.0, %v6815_v8  ;;  %v8559_v7 = vld [vmem:[%s7648_s28 + $0x1c8] sm:$0xff]  ;;  %v6817_v37 = vpop.eup %6816  ;;  %v8576_v20 = vld [vmem:[%s7648_s28 + $0x1e0] sm:$0xff]  ;;  %v1986_v61 = vld [vmem:[%s7655_s8 + $0x818] sm:$0xff] }
 0x11b   : > { %5505 = vmatpush1.bf16.msra.mxu1 %v11691_v1  ;;  %5633 = vmatpush1.bf16.msra.mxu0 %v5632_v13  ;;  %v8552_v52 = vmul.f32 %v1232_v56, %v8409_v36  ;;  %6828 = verf.f32 %v868_v47  ;;  %v867_v11 = vmul.f32 0.70710677, %v8524_v21  ;;  %v8566_v62 = vmul.f32 %v1236_v54, %v8425_v31  ;;  %v2357_v36 = vld [vmem:[%s7655_s8 + $0x13b0] sm:$0xff]  ;;  %v2370_v0 = vld [vmem:[%s7655_s8 + $0x1418] sm:$0xff]  ;;  %v8607_v47 = vld [vmem:[%s7648_s28 + $0x208] sm:$0xff] }
 0x11c   : > { %5507 = vmatprep.subr.bf16.mxu1 %v5506_v2  ;;  %2578 = vmatmul.mubr.f32.gmra.mrb[6].mxu1 %v8515_v42  ;;  %v8569_v63 = vmul.f32 0.5, %v8445_v27  ;;  %6830 = verf.f32 %v863_v45  ;;  %v5638_v13 = vpack.c.bf16 %v2358_v41, %v2352_v35  ;;  %v8573_v2 = vld [vmem:[%s7648_s28 + $0x1c0] sm:$0xff]  ;;  %v8581_v31 = vmul.f32 %v1231_v33, %v8440_v15  ;;  %v1980_v27 = vld [vmem:[%s7655_s8 + $0x7e8] sm:$0xff]  ;;  %v1985_v56 = vld [vmem:[%s7655_s8 + $0x810] sm:$0xff] }
 0x11d   : > { %11692 = vst [vmem:[#allocation24_spill] sm:$0xff] %v8566_v62  ;;  %5635 = vmatprep.subr.bf16.mxu0 %v5634_v10  ;;  %2996 = vmatmul.mubr.f32.gmra.mrb[6].mxu0 %v8529_v38  ;;  %v1235_v29 = vadd.f32 1.0, %v6817_v37  ;;  %v8584_v10 = vmul.f32 0.5, %v8460_v60  ;;  %6832 = verf.f32 %v867_v11  ;;  %v8591_v39 = vmul.f32 0.5, %v8463_v16  ;;  %v8616_v54 = vld [vmem:[%s7648_s28 + $0x228] sm:$0xff] }
 0x11e   : > { %2583 = vmatprep.mubr.f32.mxu1 %v8552_v52  ;;  %3001 = vmatprep.mubr.f32.mxu0 %v8566_v62  ;;  %v5512_v15 = vpack.c.bf16 %v8546_v32, %v8543_v59  ;;  %v872_v28 = vmul.f32 0.70710677, %v8559_v7  ;;  %v876_v60 = vmul.f32 0.70710677, %v8562_v44  ;;  %v6819_v26 = vpop.eup %6818  ;;  %v8602_v43 = vmul.f32 0.5, %v8479_v14  ;;  %v8814_v62 = vld [vmem:[%s7648_s28 + $0x340] sm:$0xff] }
 0x11f   : > { %5509 = vmatpush1.bf16.msra.mxu1 %v5508_v49  ;;  %v8599_v50 = vmul.f32 %v1235_v29, %v8442_v53  ;;  %5637 = vmatpush1.bf16.msra.mxu0 %v5636_v34  ;;  %v5640_v16 = vpack.c.bf16 %v2357_v36, %v8556_v23  ;;  %v871_v49 = vmul.f32 0.70710677, %v8573_v2  ;;  %v6821_v45 = vpop.eup %6820  ;;  %v1240_v53 = vadd.f32 1.0, %v6819_v26  ;;  %v2363_v34 = vld [vmem:[%s7655_s8 + $0x13e0] sm:$0xff]  ;;  %v8919_v51 = vld [vmem:[%s7648_s28 + $0x408] sm:$0xff] }
 0x120   : > { %5511 = vmatprep.subr.bf16.mxu1 %v5510_v55  ;;  %2584 = vmatmul.mubr.f32.gmra.mrb[8].mxu1 %v8581_v31  ;;  %6834 = verf.f32 %v872_v28  ;;  %v875_v14 = vmul.f32 0.70710677, %v8576_v20  ;;  %v5514_v35 = vpack.c.bf16 %v1986_v61, %v1980_v27  ;;  %v1244_v41 = vadd.f32 1.0, %v6821_v45  ;;  %v2369_v55 = vld [vmem:[%s7655_s8 + $0x1410] sm:$0xff]  ;;  %v8625_v23 = vld [vmem:[%s7648_s28 + $0x200] sm:$0xff] }
 0x121   : > { %11693 = vst [vmem:[#allocation25_spill] sm:$0xff] %v8599_v50  ;;  %5639 = vmatprep.subr.bf16.mxu0 %v5638_v13  ;;  %3002 = vmatmul.mubr.f32.gmra.mrb[8].mxu0 %v8599_v50  ;;  %v671_v8 = vmul.f32 0.5, %v8493_v24  ;;  %6836 = verf.f32 %v876_v60  ;;  %v5642_v1 = vpack.c.bf16 %v2370_v0, %v2364_v58  ;;  %v8621_v32 = vmul.f32 %v1240_v53, %v8504_v22  ;;  %v8634_v58 = vld [vmem:[%s7648_s28 + $0x220] sm:$0xff]  ;;  %v8643_v0 = vld [vmem:[%s7648_s28 + $0x248] sm:$0xff] }
 0x122   : > { %v6823_v59 = vpop.eup %6822  ;;  %6838 = verf.f32 %v871_v49  ;;  %v880_v33 = vmul.f32 0.70710677, %v8607_v47  ;;  %v5516_v11 = vpack.c.bf16 %v1985_v56, %v1979_v4  ;;  %v8628_v24 = vmul.f32 %v1244_v41, %v8520_v46  ;;  %v1992_v53 = vld [vmem:[%s7655_s8 + $0x848] sm:$0xff] }
 0x123   : > { %5513 = vmatpush1.bf16.msra.mxu1 %v5512_v15  ;;  %v6825_v37 = vpop.eup %6824  ;;  %v1239_v13 = vadd.f32 1.0, %v6823_v59  ;;  %v675_v36 = vmul.f32 0.5, %v8524_v21  ;;  %5641 = vmatpush1.bf16.msra.mxu0 %v5640_v16  ;;  %6840 = verf.f32 %v875_v14  ;;  %v884_v27 = vmul.f32 0.70710677, %v8616_v54 }
 0x124   : > { %11694 = vst [vmem:[#allocation26_spill] sm:$0xff] %v8628_v24  ;;  %5515 = vmatprep.subr.bf16.mxu1 %v5514_v35  ;;  %v6827_v22 = vpop.eup %6826  ;;  %2589 = vmatprep.mubr.f32.mxu1 %v8621_v32  ;;  %v1243_v29 = vadd.f32 1.0, %v6825_v37  ;;  %6842 = verf.f32 %v880_v33  ;;  %v5644_v61 = vpack.c.bf16 %v2369_v55, %v2363_v34  ;;  %v680_v28 = vmul.f32 0.5, %v8559_v7  ;;  %v8669_v34 = vld [vmem:[%s7648_s28 + $0x260] sm:$0xff]  ;;  %v2376_v33 = vld [vmem:[%s7655_s8 + $0x1448] sm:$0xff] }
 0x125   : > { %5643 = vmatprep.subr.bf16.mxu0 %v5642_v1  ;;  %v6829_v46 = vpop.eup %6828  ;;  %3007 = vmatprep.mubr.f32.mxu0 %v8628_v24  ;;  %v8638_v21 = vmul.f32 %v1239_v13, %v8569_v63  ;;  %v1248_v15 = vadd.f32 1.0, %v6827_v22  ;;  %v879_v60 = vmul.f32 0.70710677, %v8625_v23  ;;  %v684_v4 = vmul.f32 0.5, %v8562_v44  ;;  %v8650_v63 = vld [vmem:[%s7648_s28 + $0x268] sm:$0xff]  ;;  %v8658_v44 = vld [vmem:[%s7648_s28 + $0x240] sm:$0xff] }
 0x126   : > { %v6831_v26 = vpop.eup %6830  ;;  %v8646_v16 = vmul.f32 %v1243_v29, %v8584_v10  ;;  %v1252_v49 = vadd.f32 1.0, %v6829_v46  ;;  %6844 = verf.f32 %v884_v27  ;;  %v883_v10 = vmul.f32 0.70710677, %v8634_v58  ;;  %v1998_v1 = vld [vmem:[%s7655_s8 + $0x878] sm:$0xff]  ;;  %v2375_v27 = vld [vmem:[%s7655_s8 + $0x1440] sm:$0xff] }
 0x127   : > { %5517 = vmatpush1.bf16.msra.mxu1 %v5516_v11  ;;  %v6833_v7 = vpop.eup %6832  ;;  %v8654_v56 = vmul.f32 %v1248_v15, %v8591_v39  ;;  %v1247_v45 = vadd.f32 1.0, %v6831_v26  ;;  %5645 = vmatpush1.bf16.msra.mxu0 %v5644_v61  ;;  %6846 = verf.f32 %v879_v60  ;;  %v679_v39 = vmul.f32 0.5, %v8573_v2  ;;  %v2382_v11 = vld [vmem:[%s7655_s8 + $0x1478] sm:$0xff]  ;;  %v1991_v2 = vld [vmem:[%s7655_s8 + $0x840] sm:$0xff] }
 0x128   : > { %11695 = vst [vmem:[#allocation27_spill] sm:$0xff] %v8646_v16  ;;  %2590 = vmatmul.mubr.f32.gmra.mrb[10].mxu1 %v8638_v21  ;;  %3008 = vmatmul.mubr.f32.gmra.mrb[10].mxu0 %v8646_v16  ;;  %v8663_v14 = vmul.f32 %v1252_v49, %v8602_v43  ;;  %v1251_v35 = vadd.f32 1.0, %v6833_v7  ;;  %v888_v41 = vmul.f32 0.70710677, %v8643_v0  ;;  %v683_v59 = vmul.f32 0.5, %v8576_v20  ;;  %v2381_v20 = vld [vmem:[%s7655_s8 + $0x1470] sm:$0xff] }
 0x129   : > { %2595 = vmatprep.mubr.f32.mxu1 %v8654_v56  ;;  %v8672_v55 = vmul.f32 %v1247_v45, %v671_v8  ;;  %6848 = verf.f32 %v883_v10  ;;  %v892_v43 = vmul.f32 0.70710677, %v8650_v63  ;;  %v688_v22 = vmul.f32 0.5, %v8607_v47  ;;  %v1997_v8 = vld [vmem:[%s7655_s8 + $0x870] sm:$0xff]  ;;  %v8692_v7 = vld [vmem:[%s7648_s28 + $0x288] sm:$0xff] }
 0x12a   : > { %11696 = vst [vmem:[#allocation28_spill] sm:$0xff] %v8663_v14  ;;  %v6835_v37 = vpop.eup %6834  ;;  %3013 = vmatprep.mubr.f32.mxu0 %v8663_v14  ;;  %v8680_v13 = vmul.f32 %v1251_v35, %v675_v36  ;;  %6850 = verf.f32 %v888_v41  ;;  %v887_v29 = vmul.f32 0.70710677, %v8658_v44  ;;  %v692_v15 = vmul.f32 0.5, %v8616_v54 }
 0x12b   : > { %v6837_v61 = vpop.eup %6836  ;;  %v1256_v46 = vadd.f32 1.0, %v6835_v37  ;;  %6852 = verf.f32 %v892_v43  ;;  %v5518_v36 = vpack.c.bf16 %v1998_v1, %v1992_v53  ;;  %v891_v26 = vmul.f32 0.70710677, %v8669_v34  ;;  %v8697_v53 = vld [vmem:[%s7648_s28 + $0x2a8] sm:$0xff]  ;;  %v8700_v1 = vld [vmem:[%s7648_s28 + $0x280] sm:$0xff] }
 0x12c   : > { %11697 = vst [vmem:[#allocation29_spill] sm:$0xff] %v8680_v13  ;;  %2596 = vmatmul.mubr.f32.gmra.mrb[12].mxu1 %v8672_v55  ;;  %v6839_v60 = vpop.eup %6838  ;;  %3014 = vmatmul.mubr.f32.gmra.mrb[12].mxu0 %v8680_v13  ;;  %v1260_v47 = vadd.f32 1.0, %v6837_v61  ;;  %6854 = verf.f32 %v887_v29  ;;  %v5646_v49 = vpack.c.bf16 %v2382_v11, %v2376_v33  ;;  %v5520_v35 = vpack.c.bf16 %v1997_v8, %v1991_v2  ;;  %v2004_v29 = vld [vmem:[%s7655_s8 + $0x8a8] sm:$0xff]  ;;  %v2405_v13 = vld [vmem:[%s7655_s8 + $0x1530] sm:$0xff] }
 0x12d   : > { %v6841_v45 = vpop.eup %6840  ;;  %v8694_v10 = vmul.f32 %v1256_v46, %v680_v28  ;;  %v1255_v54 = vadd.f32 1.0, %v6839_v60  ;;  %5519 = vmatprep.subr.bf16.mxu1 %v5518_v36  ;;  %v5648_v41 = vpack.c.bf16 %v2381_v20, %v2375_v27  ;;  %v687_v11 = vmul.f32 0.5, %v8625_v23  ;;  %v8706_v28 = vld [vmem:[%s7648_s28 + $0x2a0] sm:$0xff]  ;;  %v2010_v20 = vld [vmem:[%s7655_s8 + $0x8d8] sm:$0xff]  ;;  %v2388_v61 = vld [vmem:[%s7655_s8 + $0x14a8] sm:$0xff] }
 0x12e   : > { %v6843_v43 = vpop.eup %6842  ;;  %v8702_v37 = vmul.f32 %v1260_v47, %v684_v4  ;;  %v1259_v33 = vadd.f32 1.0, %v6841_v45  ;;  %6856 = verf.f32 %v891_v26  ;;  %5647 = vmatprep.subr.bf16.mxu0 %v5646_v49  ;;  %v691_v27 = vmul.f32 0.5, %v8634_v58  ;;  %5521 = vmatpush1.bf16.msra.mxu1 %v5520_v35  ;;  %v2394_v60 = vld [vmem:[%s7655_s8 + $0x14d8] sm:$0xff] }
 0x12f   : > { %2601 = vmatprep.mubr.f32.mxu1 %v8694_v10  ;;  %v8710_v2 = vmul.f32 %v1255_v54, %v679_v39  ;;  %v1264_v8 = vadd.f32 1.0, %v6843_v43  ;;  %v896_v4 = vmul.f32 0.70710677, %v8692_v7  ;;  %v696_v36 = vmul.f32 0.5, %v8643_v0  ;;  %5649 = vmatpush1.bf16.msra.mxu0 %v5648_v41  ;;  %v8728_v0 = vld [vmem:[%s7648_s28 + $0x2c8] sm:$0xff]  ;;  %v2003_v41 = vld [vmem:[%s7655_s8 + $0x8a0] sm:$0xff] }
 0x130   : > { %11698 = vst [vmem:[#allocation30_spill] sm:$0xff] %v8702_v37  ;;  %v6845_v23 = vpop.eup %6844  ;;  %3019 = vmatprep.mubr.f32.mxu0 %v8702_v37  ;;  %v8717_v46 = vmul.f32 %v1259_v33, %v683_v59  ;;  %v900_v39 = vmul.f32 0.70710677, %v8697_v53  ;;  %v895_v58 = vmul.f32 0.70710677, %v8700_v1  ;;  %v700_v59 = vmul.f32 0.5, %v8650_v63 }
 0x131   : > { %v6847_v47 = vpop.eup %6846  ;;  %2602 = vmatmul.mubr.f32.gmra.mrb[14].mxu1 %v8710_v2  ;;  %v8724_v26 = vmul.f32 %v1264_v8, %v688_v22  ;;  %v1268_v49 = vadd.f32 1.0, %v6845_v23  ;;  %6858 = verf.f32 %v896_v4  ;;  %v899_v54 = vmul.f32 0.70710677, %v8706_v28  ;;  %v2009_v43 = vld [vmem:[%s7655_s8 + $0x8d0] sm:$0xff]  ;;  %v8735_v33 = vld [vmem:[%s7648_s28 + $0x2e8] sm:$0xff]  ;;  %v2387_v23 = vld [vmem:[%s7655_s8 + $0x14a0] sm:$0xff] }
 0x132   : > { %11699 = vst [vmem:[#allocation31_spill] sm:$0xff] %v8717_v46  ;;  %3020 = vmatmul.mubr.f32.gmra.mrb[14].mxu0 %v8717_v46  ;;  %v1263_v45 = vadd.f32 1.0, %v6847_v47  ;;  %6860 = verf.f32 %v900_v39  ;;  %v5522_v35 = vpack.c.bf16 %v2010_v20, %v2004_v29  ;;  %v695_v8 = vmul.f32 0.5, %v8658_v44  ;;  %v2393_v39 = vld [vmem:[%s7655_s8 + $0x14d0] sm:$0xff] }
 0x133   : > { %v6849_v22 = vpop.eup %6848  ;;  %2607 = vmatprep.mubr.f32.mxu1 %v8724_v26  ;;  %v8738_v63 = vmul.f32 %v1268_v49, %v692_v15  ;;  %6862 = verf.f32 %v895_v58  ;;  %v5650_v4 = vpack.c.bf16 %v2394_v60, %v2388_v61  ;;  %v904_v20 = vmul.f32 0.70710677, %v8728_v0  ;;  %v8753_v60 = vld [vmem:[%s7648_s28 + $0x2e0] sm:$0xff] }
 0x134   : > { %v6851_v47 = vpop.eup %6850  ;;  %v8743_v46 = vmul.f32 %v1263_v45, %v687_v11  ;;  %v1267_v29 = vadd.f32 1.0, %v6849_v22  ;;  %6864 = verf.f32 %v899_v54  ;;  %5523 = vmatprep.subr.bf16.mxu1 %v5522_v35  ;;  %v699_v15 = vmul.f32 0.5, %v8669_v34  ;;  %v8750_v11 = vld [vmem:[%s7648_s28 + $0x2c0] sm:$0xff]  ;;  %v8759_v34 = vld [vmem:[%s7648_s28 + $0x308] sm:$0xff] }
 0x135   : > { %11700 = vst [vmem:[#allocation32_spill] sm:$0xff] %v8738_v63  ;;  %v6853_v37 = vpop.eup %6852  ;;  %3025 = vmatprep.mubr.f32.mxu0 %v8738_v63  ;;  %v1272_v44 = vadd.f32 1.0, %v6851_v47  ;;  %5651 = vmatprep.subr.bf16.mxu0 %v5650_v4  ;;  %v5524_v61 = vpack.c.bf16 %v2009_v43, %v2003_v41  ;;  %v908_v58 = vmul.f32 0.70710677, %v8735_v33  ;;  %6866 = verf.f32 %v904_v20  ;;  %v8762_v41 = vld [vmem:[%s7648_s28 + $0x328] sm:$0xff]  ;;  %v8768_v47 = vld [vmem:[%s7648_s28 + $0x300] sm:$0xff] }
 0x136   : > { %v6855_v49 = vpop.eup %6854  ;;  %2608 = vmatmul.mubr.f32.gmra.mrb[16].mxu1 %v8743_v46  ;;  %v8756_v45 = vmul.f32 %v1267_v29, %v691_v27  ;;  %v1276_v54 = vadd.f32 1.0, %v6853_v37  ;;  %v5652_v35 = vpack.c.bf16 %v2393_v39, %v2387_v23  ;;  %v704_v4 = vmul.f32 0.5, %v8692_v7  ;;  %v2016_v27 = vld [vmem:[%s7655_s8 + $0x908] sm:$0xff]  ;;  %v2022_v37 = vld [vmem:[%s7655_s8 + $0x938] sm:$0xff]  ;;  %v8779_v20 = vld [vmem:[%s7648_s28 + $0x320] sm:$0xff] }
 0x137   : > { %v8764_v43 = vmul.f32 %v1272_v44, %v696_v36  ;;  %v1271_v22 = vadd.f32 1.0, %v6855_v49  ;;  %5525 = vmatpush1.bf16.msra.mxu1 %v5524_v61  ;;  %6868 = verf.f32 %v908_v58  ;;  %v708_v39 = vmul.f32 0.5, %v8697_v53  ;;  %v2400_v53 = vld [vmem:[%s7655_s8 + $0x1508] sm:$0xff]  ;;  %v2406_v49 = vld [vmem:[%s7655_s8 + $0x1538] sm:$0xff] }
 0x138   : > { %11701 = vst [vmem:[#allocation33_spill] sm:$0xff] %v8756_v45  ;;  %v6857_v29 = vpop.eup %6856  ;;  %3026 = vmatmul.mubr.f32.gmra.mrb[16].mxu0 %v8756_v45  ;;  %v8773_v23 = vmul.f32 %v1276_v54, %v700_v59  ;;  %v903_v36 = vmul.f32 0.70710677, %v8750_v11  ;;  %v907_v7 = vmul.f32 0.70710677, %v8753_v60  ;;  %v703_v58 = vmul.f32 0.5, %v8700_v1 }
 0x139   : > { %2613 = vmatprep.mubr.f32.mxu1 %v8764_v43  ;;  %v8782_v44 = vmul.f32 %v1271_v22, %v695_v8  ;;  %v1275_v61 = vadd.f32 1.0, %v6857_v29  ;;  %5653 = vmatpush1.bf16.msra.mxu0 %v5652_v35  ;;  %v912_v59 = vmul.f32 0.70710677, %v8759_v34  ;;  %v707_v54 = vmul.f32 0.5, %v8706_v28  ;;  %v2015_v22 = vld [vmem:[%s7655_s8 + $0x900] sm:$0xff]  ;;  %v2021_v29 = vld [vmem:[%s7655_s8 + $0x930] sm:$0xff] }
 0x13a   : > { %11702 = vst [vmem:[#allocation34_spill] sm:$0xff] %v8773_v23  ;;  %3031 = vmatprep.mubr.f32.mxu0 %v8773_v23  ;;  %v8791_v45 = vmul.f32 0.5, %v8728_v0  ;;  %6870 = verf.f32 %v903_v36  ;;  %v916_v8 = vmul.f32 0.70710677, %v8762_v41  ;;  %v911_v63 = vmul.f32 0.70710677, %v8768_v47 }
 0x13b   : > { %v6859_v1 = vpop.eup %6858  ;;  %2614 = vmatmul.mubr.f32.gmra.mrb[18].mxu1 %v8782_v44  ;;  %v8797_v35 = vmul.f32 %v1275_v61, %v699_v15  ;;  %6872 = verf.f32 %v907_v7  ;;  %v5526_v23 = vpack.c.bf16 %v2022_v37, %v2016_v27  ;;  %v2399_v28 = vld [vmem:[%s7655_s8 + $0x1500] sm:$0xff]  ;;  %v716_v36 = vmul.f32 0.5, %v8735_v33  ;;  %v8806_v37 = vld [vmem:[%s7648_s28 + $0x348] sm:$0xff] }
 0x13c   : > { %v6861_v0 = vpop.eup %6860  ;;  %v1280_v14 = vadd.f32 1.0, %v6859_v1  ;;  %6874 = verf.f32 %v912_v59  ;;  %v915_v16 = vmul.f32 0.70710677, %v8779_v20  ;;  %v5654_v7 = vpack.c.bf16 %v2406_v49, %v2400_v53  ;;  %v8809_v61 = vld [vmem:[%s7648_s28 + $0x368] sm:$0xff] }
 0x13d   : > { %11703 = vst [vmem:[#allocation35_spill] sm:$0xff] %v8797_v35  ;;  %v6863_v24 = vpop.eup %6862  ;;  %3032 = vmatmul.mubr.f32.gmra.mrb[18].mxu0 %v8797_v35  ;;  %v1284_v15 = vadd.f32 1.0, %v6861_v0  ;;  %6876 = verf.f32 %v916_v8  ;;  %5527 = vmatprep.subr.bf16.mxu1 %v5526_v23  ;;  %v5528_v27 = vpack.c.bf16 %v2021_v29, %v2015_v22  ;;  %v5656_v50 = vpack.c.bf16 %v2405_v13, %v2399_v28  ;;  %v8817_v0 = vld [vmem:[%s7648_s28 + $0x360] sm:$0xff]  ;;  %v2028_v8 = vld [vmem:[%s7655_s8 + $0x968] sm:$0xff]  ;;  %v2034_v22 = vld [vmem:[%s7655_s8 + $0x998] sm:$0xff] }
 0x13e   : > { %v6865_v33 = vpop.eup %6864  ;;  %v8811_v59 = vmul.f32 %v1280_v14, %v704_v4  ;;  %v1279_v1 = vadd.f32 1.0, %v6863_v24  ;;  %6878 = verf.f32 %v911_v63  ;;  %v711_v49 = vmul.f32 0.5, %v8750_v11  ;;  %5655 = vmatprep.subr.bf16.mxu0 %v5654_v7  ;;  %v2412_v14 = vld [vmem:[%s7655_s8 + $0x1568] sm:$0xff]  ;;  %v2418_v11 = vld [vmem:[%s7655_s8 + $0x1598] sm:$0xff] }
 0x13f   : > { %v8819_v23 = vmul.f32 %v1284_v15, %v708_v39  ;;  %v1283_v53 = vadd.f32 1.0, %v6865_v33  ;;  %6880 = verf.f32 %v915_v16  ;;  %5529 = vmatpush1.bf16.msra.mxu1 %v5528_v27  ;;  %v6867_v24 = vpop.eup %6866  ;;  %v715_v63 = vmul.f32 0.5, %v8753_v60  ;;  %5657 = vmatpush1.bf16.msra.mxu0 %v5656_v50  ;;  %v8838_v50 = vld [vmem:[%s7648_s28 + $0x388] sm:$0xff]  ;;  %v2033_v33 = vld [vmem:[%s7655_s8 + $0x990] sm:$0xff] }
 0x140   : > { %2619 = vmatprep.mubr.f32.mxu1 %v8811_v59  ;;  %v8826_v13 = vmul.f32 %v1279_v1, %v703_v58  ;;  %v920_v4 = vmul.f32 0.70710677, %v8806_v37  ;;  %v924_v16 = vmul.f32 0.70710677, %v8809_v61  ;;  %v1288_v28 = vadd.f32 1.0, %v6867_v24  ;;  %v8850_v24 = vld [vmem:[%s7648_s28 + $0x3a8] sm:$0xff] }
 0x141   : > { %11704 = vst [vmem:[#allocation36_spill] sm:$0xff] %v8819_v23  ;;  %v6869_v39 = vpop.eup %6868  ;;  %3037 = vmatprep.mubr.f32.mxu0 %v8819_v23  ;;  %v8833_v29 = vmul.f32 %v1283_v53, %v707_v54  ;;  %v720_v58 = vmul.f32 0.5, %v8759_v34  ;;  %v919_v60 = vmul.f32 0.70710677, %v8814_v62  ;;  %v724_v7 = vmul.f32 0.5, %v8762_v41  ;;  %v2027_v54 = vld [vmem:[%s7655_s8 + $0x960] sm:$0xff] }
 0x142   : > { %2620 = vmatmul.mubr.f32.gmra.mrb[20].mxu1 %v8826_v13  ;;  %v1292_v15 = vadd.f32 1.0, %v6869_v39  ;;  %6882 = verf.f32 %v920_v4  ;;  %v923_v27 = vmul.f32 0.70710677, %v8817_v0  ;;  %v8847_v34 = vmul.f32 %v1288_v28, %v8791_v45  ;;  %v2411_v23 = vld [vmem:[%s7655_s8 + $0x1560] sm:$0xff]  ;;  %v2417_v39 = vld [vmem:[%s7655_s8 + $0x1590] sm:$0xff] }
 0x143   : > { %11705 = vst [vmem:[#allocation37_spill] sm:$0xff] %v8833_v29  ;;  %3038 = vmatmul.mubr.f32.gmra.mrb[20].mxu0 %v8833_v29  ;;  %6884 = verf.f32 %v924_v16  ;;  %v5530_v1 = vpack.c.bf16 %v2034_v22, %v2028_v8  ;;  %v5658_v53 = vpack.c.bf16 %v2418_v11, %v2412_v14  ;;  %v719_v4 = vmul.f32 0.5, %v8768_v47  ;;  %v8859_v29 = vld [vmem:[%s7648_s28 + $0x380] sm:$0xff] }
 0x144   : > { %v6871_v35 = vpop.eup %6870  ;;  %v8854_v41 = vmul.f32 %v1292_v15, %v716_v36  ;;  %6886 = verf.f32 %v919_v60  ;;  %v928_v38 = vmul.f32 0.70710677, %v8838_v50  ;;  %2625 = vmatprep.mubr.f32.mxu1 %v8847_v34  ;;  %v723_v22 = vmul.f32 0.5, %v8779_v20  ;;  %v8866_v28 = vld [vmem:[%s7648_s28 + $0x3a0] sm:$0xff] }
 0x145   : > { %v6873_v45 = vpop.eup %6872  ;;  %v1287_v8 = vadd.f32 1.0, %v6871_v35  ;;  %6888 = verf.f32 %v923_v27  ;;  %5531 = vmatprep.subr.bf16.mxu1 %v5530_v1  ;;  %v5532_v14 = vpack.c.bf16 %v2033_v33, %v2027_v54  ;;  %5659 = vmatprep.subr.bf16.mxu0 %v5658_v53  ;;  %v932_v16 = vmul.f32 0.70710677, %v8850_v24  ;;  %v8873_v54 = vld [vmem:[%s7648_s28 + $0x3c8] sm:$0xff] }
 0x146   : > { %11706 = vst [vmem:[#allocation38_spill] sm:$0xff] %v8854_v41  ;;  %v6875_v36 = vpop.eup %6874  ;;  %3043 = vmatprep.mubr.f32.mxu0 %v8854_v41  ;;  %v1291_v47 = vadd.f32 1.0, %v6873_v45  ;;  %6890 = verf.f32 %v928_v38  ;;  %v5660_v11 = vpack.c.bf16 %v2417_v39, %v2411_v23  ;;  %v728_v15 = vmul.f32 0.5, %v8806_v37  ;;  %v8886_v45 = vld [vmem:[%s7648_s28 + $0x3c0] sm:$0xff] }
 0x147   : > { %v6877_v60 = vpop.eup %6876  ;;  %v8868_v35 = vmul.f32 %v1287_v8, %v711_v49  ;;  %v1296_v20 = vadd.f32 1.0, %v6875_v36  ;;  %5533 = vmatpush1.bf16.msra.mxu1 %v5532_v14  ;;  %v927_v27 = vmul.f32 0.70710677, %v8859_v29  ;;  %v732_v23 = vmul.f32 0.5, %v8809_v61  ;;  %v8879_v49 = vld [vmem:[%s7648_s28 + $0x3e8] sm:$0xff] }
 0x148   : > { %v6879_v38 = vpop.eup %6878  ;;  %v8875_v33 = vmul.f32 %v1291_v47, %v715_v63  ;;  %v1300_v1 = vadd.f32 1.0, %v6877_v60  ;;  %6892 = verf.f32 %v932_v16  ;;  %5661 = vmatpush1.bf16.msra.mxu0 %v5660_v11  ;;  %v931_v63 = vmul.f32 0.70710677, %v8866_v28  ;;  %v2040_v61 = vld [vmem:[%s7655_s8 + $0x9c8] sm:$0xff]  ;;  %v2046_v47 = vld [vmem:[%s7655_s8 + $0x9f8] sm:$0xff]  ;;  %v8896_v16 = vld [vmem:[%s7648_s28 + $0x3e0] sm:$0xff] }
 0x149   : > { %v6881_v37 = vpop.eup %6880  ;;  %2626 = vmatmul.mubr.f32.gmra.mrb[22].mxu1 %v8868_v35  ;;  %v8882_v53 = vmul.f32 %v1296_v20, %v720_v58  ;;  %v1295_v39 = vadd.f32 1.0, %v6879_v38  ;;  %6894 = verf.f32 %v927_v27  ;;  %v727_v36 = vmul.f32 0.5, %v8814_v62  ;;  %v2424_v20 = vld [vmem:[%s7655_s8 + $0x15c8] sm:$0xff]  ;;  %v2430_v27 = vld [vmem:[%s7655_s8 + $0x15f8] sm:$0xff]  ;;  %v2039_v62 = vld [vmem:[%s7655_s8 + $0x9c0] sm:$0xff] }
 0x14a   : > { %11707 = vst [vmem:[#allocation39_spill] sm:$0xff] %v8875_v33  ;;  %3044 = vmatmul.mubr.f32.gmra.mrb[22].mxu0 %v8875_v33  ;;  %v8890_v8 = vmul.f32 %v1300_v1, %v724_v7  ;;  %v1299_v14 = vadd.f32 1.0, %v6881_v37  ;;  %v936_v58 = vmul.f32 0.70710677, %v8873_v54  ;;  %v731_v60 = vmul.f32 0.5, %v8817_v0  ;;  %v2429_v0 = vld [vmem:[%s7655_s8 + $0x15f0] sm:$0xff] }
 0x14b   : > { %2631 = vmatprep.mubr.f32.mxu1 %v8882_v53  ;;  %v8899_v11 = vmul.f32 %v1295_v39, %v719_v4  ;;  %6896 = verf.f32 %v931_v63  ;;  %v940_v7 = vmul.f32 0.70710677, %v8879_v49  ;;  %v736_v37 = vmul.f32 0.5, %v8838_v50  ;;  %v2045_v4 = vld [vmem:[%s7655_s8 + $0x9f0] sm:$0xff]  ;;  %v2423_v39 = vld [vmem:[%s7655_s8 + $0x15c0] sm:$0xff] }
 0x14c   : > { %11708 = vst [vmem:[#allocation40_spill] sm:$0xff] %v8890_v8  ;;  %v6883_v38 = vpop.eup %6882  ;;  %3049 = vmatprep.mubr.f32.mxu0 %v8890_v8  ;;  %v8907_v1 = vmul.f32 %v1299_v14, %v723_v22  ;;  %6898 = verf.f32 %v936_v58  ;;  %v935_v33 = vmul.f32 0.70710677, %v8886_v45  ;;  %v740_v3 = vmul.f32 0.5, %v8850_v24 }
 0x14d   : > { %v6885_v63 = vpop.eup %6884  ;;  %2632 = vmatmul.mubr.f32.gmra.mrb[24].mxu1 %v8899_v11  ;;  %v1304_v41 = vadd.f32 1.0, %v6883_v38  ;;  %6900 = verf.f32 %v940_v7  ;;  %v5534_v22 = vpack.c.bf16 %v2046_v47, %v2040_v61  ;;  %v939_v58 = vmul.f32 0.70710677, %v8896_v16  ;;  %v8924_v61 = vld [vmem:[%s7648_s28 + $0x428] sm:$0xff]  ;;  %v8927_v47 = vld [vmem:[%s7648_s28 + $0x400] sm:$0xff] }
 0x14e   : > { %11709 = vst [vmem:[#allocation41_spill] sm:$0xff] %v8907_v1  ;;  %v6887_v14 = vpop.eup %6886  ;;  %3050 = vmatmul.mubr.f32.gmra.mrb[24].mxu0 %v8907_v1  ;;  %v1308_v50 = vadd.f32 1.0, %v6885_v63  ;;  %6902 = verf.f32 %v935_v33  ;;  %v5662_v8 = vpack.c.bf16 %v2430_v27, %v2424_v20  ;;  %v5536_v7 = vpack.c.bf16 %v2045_v4, %v2039_v62  ;;  %v8962_v1 = vld [vmem:[%s7648_s28 + $0x468] sm:$0xff] }
 0x14f   : > { %v6889_v25 = vpop.eup %6888  ;;  %v8921_v38 = vmul.f32 %v1304_v41, %v728_v15  ;;  %v1303_v24 = vadd.f32 1.0, %v6887_v14  ;;  %5535 = vmatprep.subr.bf16.mxu1 %v5534_v22  ;;  %v5664_v17 = vpack.c.bf16 %v2429_v0, %v2423_v39  ;;  %v735_v27 = vmul.f32 0.5, %v8859_v29  ;;  %v8933_v41 = vld [vmem:[%s7648_s28 + $0x420] sm:$0xff]  ;;  %v2052_v15 = vld [vmem:[%s7655_s8 + $0xa28] sm:$0xff]  ;;  %v2058_v0 = vld [vmem:[%s7655_s8 + $0xa58] sm:$0xff] }
 0x150   : > { %v6891_v33 = vpop.eup %6890  ;;  %v8929_v63 = vmul.f32 %v1308_v50, %v732_v23  ;;  %v1307_v20 = vadd.f32 1.0, %v6889_v25  ;;  %6904 = verf.f32 %v939_v58  ;;  %5663 = vmatprep.subr.bf16.mxu0 %v5662_v8  ;;  %v739_v39 = vmul.f32 0.5, %v8866_v28  ;;  %5537 = vmatpush1.bf16.msra.mxu1 %v5536_v7  ;;  %v2436_v25 = vld [vmem:[%s7655_s8 + $0x1628] sm:$0xff]  ;;  %v2442_v14 = vld [vmem:[%s7655_s8 + $0x1658] sm:$0xff] }
 0x151   : > { %2637 = vmatprep.mubr.f32.mxu1 %v8921_v38  ;;  %v8937_v62 = vmul.f32 %v1303_v24, %v727_v36  ;;  %v1312_v4 = vadd.f32 1.0, %v6891_v33  ;;  %v944_v23 = vmul.f32 0.70710677, %v8919_v51  ;;  %v744_v22 = vmul.f32 0.5, %v8873_v54  ;;  %5665 = vmatpush1.bf16.msra.mxu0 %v5664_v17  ;;  %v8955_v54 = vld [vmem:[%s7648_s28 + $0x448] sm:$0xff] }
 0x152   : > { %11710 = vst [vmem:[#allocation42_spill] sm:$0xff] %v8929_v63  ;;  %v6893_v29 = vpop.eup %6892  ;;  %3055 = vmatprep.mubr.f32.mxu0 %v8929_v63  ;;  %v8944_v8 = vmul.f32 %v1307_v20, %v731_v60  ;;  %v948_v36 = vmul.f32 0.70710677, %v8924_v61  ;;  %v943_v28 = vmul.f32 0.70710677, %v8927_v47  ;;  %v748_v60 = vmul.f32 0.5, %v8879_v49 }
 0x153   : > { %11711 = vst [vmem:[#allocation43_spill] sm:$0xff] %v8937_v62  ;;  %v6895_v50 = vpop.eup %6894  ;;  %2638 = vmatmul.mubr.f32.gmra.mrb[26].mxu1 %v8937_v62  ;;  %v8951_v58 = vmul.f32 %v1312_v4, %v736_v37  ;;  %v1316_v24 = vadd.f32 1.0, %v6893_v29  ;;  %6906 = verf.f32 %v944_v23  ;;  %v947_v7 = vmul.f32 0.70710677, %v8933_v41  ;;  %v2051_v20 = vld [vmem:[%s7655_s8 + $0xa20] sm:$0xff]  ;;  %v2057_v63 = vld [vmem:[%s7655_s8 + $0xa50] sm:$0xff] }
 0x154   : > { %11712 = vst [vmem:[#allocation44_spill] sm:$0xff] %v8944_v8  ;;  %3056 = vmatmul.mubr.f32.gmra.mrb[26].mxu0 %v8944_v8  ;;  %v1311_v17 = vadd.f32 1.0, %v6895_v50  ;;  %6908 = verf.f32 %v948_v36  ;;  %v5538_v33 = vpack.c.bf16 %v2058_v0, %v2052_v15  ;;  %v743_v4 = vmul.f32 0.5, %v8886_v45  ;;  %v2435_v29 = vld [vmem:[%s7655_s8 + $0x1620] sm:$0xff]  ;;  %v2441_v36 = vld [vmem:[%s7655_s8 + $0x1650] sm:$0xff] }
 0x155   : > { %11713 = vst [vmem:[#allocation45_spill] sm:$0xff] %v8951_v58  ;;  %v6897_v37 = vpop.eup %6896  ;;  %2643 = vmatprep.mubr.f32.mxu1 %v8951_v58  ;;  %v8965_v49 = vmul.f32 %v1316_v24, %v740_v3  ;;  %6910 = verf.f32 %v943_v28  ;;  %v5666_v23 = vpack.c.bf16 %v2442_v14, %v2436_v25  ;;  %v952_v0 = vmul.f32 0.70710677, %v8955_v54  ;;  %v8980_v14 = vld [vmem:[%s7648_s28 + $0x460] sm:$0xff] }
 0x156   : > { %v6899_v50 = vpop.eup %6898  ;;  %v8970_v8 = vmul.f32 %v1311_v17, %v735_v27  ;;  %v1315_v15 = vadd.f32 1.0, %v6897_v37  ;;  %6912 = verf.f32 %v947_v7  ;;  %5539 = vmatprep.subr.bf16.mxu1 %v5538_v33  ;;  %v747_v45 = vmul.f32 0.5, %v8896_v16  ;;  %v8977_v27 = vld [vmem:[%s7648_s28 + $0x440] sm:$0xff]  ;;  %v8986_v16 = vld [vmem:[%s7648_s28 + $0x488] sm:$0xff] }
 0x157   : > { %11714 = vst [vmem:[#allocation46_spill] sm:$0xff] %v8965_v49  ;;  %v6901_v19 = vpop.eup %6900  ;;  %3061 = vmatprep.mubr.f32.mxu0 %v8965_v49  ;;  %v1320_v3 = vadd.f32 1.0, %v6899_v50  ;;  %5667 = vmatprep.subr.bf16.mxu0 %v5666_v23  ;;  %v5540_v25 = vpack.c.bf16 %v2057_v63, %v2051_v20  ;;  %v956_v28 = vmul.f32 0.70710677, %v8962_v1  ;;  %6914 = verf.f32 %v952_v0  ;;  %v8989_v63 = vld [vmem:[%s7648_s28 + $0x4a8] sm:$0xff]  ;;  %v8995_v50 = vld [vmem:[%s7648_s28 + $0x480] sm:$0xff] }
 0x158   : > { %11715 = vst [vmem:[#allocation47_spill] sm:$0xff] %v8970_v8  ;;  %v6903_v24 = vpop.eup %6902  ;;  %2644 = vmatmul.mubr.f32.gmra.mrb[28].mxu1 %v8970_v8  ;;  %v8983_v17 = vmul.f32 %v1315_v15, %v739_v39  ;;  %v1324_v7 = vadd.f32 1.0, %v6901_v19  ;;  %v5668_v33 = vpack.c.bf16 %v2441_v36, %v2435_v29  ;;  %v752_v23 = vmul.f32 0.5, %v8919_v51  ;;  %v2064_v39 = vld [vmem:[%s7655_s8 + $0xa88] sm:$0xff]  ;;  %v2070_v19 = vld [vmem:[%s7655_s8 + $0xab8] sm:$0xff]  ;;  %v9006_v0 = vld [vmem:[%s7648_s28 + $0x4a0] sm:$0xff] }
 0x159   : > { %v8991_v20 = vmul.f32 %v1320_v3, %v744_v22  ;;  %v1319_v37 = vadd.f32 1.0, %v6903_v24  ;;  %5541 = vmatpush1.bf16.msra.mxu1 %v5540_v25  ;;  %6916 = verf.f32 %v956_v28  ;;  %v756_v36 = vmul.f32 0.5, %v8924_v61  ;;  %v2448_v61 = vld [vmem:[%s7655_s8 + $0x1688] sm:$0xff]  ;;  %v2454_v24 = vld [vmem:[%s7655_s8 + $0x16b8] sm:$0xff]  ;;  %v9041_v58 = vld [vmem:[%s7648_s28 + $0x4c0] sm:$0xff] }
 0x15a   : > { %11716 = vst [vmem:[#allocation48_spill] sm:$0xff] %v8983_v17  ;;  %v6905_v15 = vpop.eup %6904  ;;  %3062 = vmatmul.mubr.f32.gmra.mrb[28].mxu0 %v8983_v17  ;;  %v9000_v29 = vmul.f32 %v1324_v7, %v748_v60  ;;  %v951_v22 = vmul.f32 0.70710677, %v8977_v27  ;;  %v955_v51 = vmul.f32 0.70710677, %v8980_v14  ;;  %v751_v28 = vmul.f32 0.5, %v8927_v47 }
 0x15b   : > { %11717 = vst [vmem:[#allocation49_spill] sm:$0xff] %v8991_v20  ;;  %2649 = vmatprep.mubr.f32.mxu1 %v8991_v20  ;;  %v9009_v3 = vmul.f32 %v1319_v37, %v743_v4  ;;  %v1323_v25 = vadd.f32 1.0, %v6905_v15  ;;  %5669 = vmatpush1.bf16.msra.mxu0 %v5668_v33  ;;  %v960_v60 = vmul.f32 0.70710677, %v8986_v16  ;;  %v755_v7 = vmul.f32 0.5, %v8933_v41  ;;  %v2063_v37 = vld [vmem:[%s7655_s8 + $0xa80] sm:$0xff] }
 0x15c   : > { %11718 = vst [vmem:[#allocation50_spill] sm:$0xff] %v9000_v29  ;;  %3067 = vmatprep.mubr.f32.mxu0 %v9000_v29  ;;  %v9018_v17 = vmul.f32 0.5, %v8955_v54  ;;  %6918 = verf.f32 %v951_v22  ;;  %v964_v4 = vmul.f32 0.70710677, %v8989_v63  ;;  %v2069_v15 = vld [vmem:[%s7655_s8 + $0xab0] sm:$0xff]  ;;  %v5542_v29 = vpack.c.bf16 %v2070_v19, %v2064_v39  ;;  %v2447_v41 = vld [vmem:[%s7655_s8 + $0x1680] sm:$0xff] }
 0x15d   : > { %11719 = vst [vmem:[#allocation51_spill] sm:$0xff] %v9009_v3  ;;  %v6907_v47 = vpop.eup %6906  ;;  %2650 = vmatmul.mubr.f32.gmra.mrb[30].mxu1 %v9009_v3  ;;  %v9024_v33 = vmul.f32 %v1323_v25, %v747_v45  ;;  %6920 = verf.f32 %v955_v51  ;;  %v959_v49 = vmul.f32 0.70710677, %v8995_v50  ;;  %v764_v22 = vmul.f32 0.5, %v8962_v1  ;;  %v9033_v19 = vld [vmem:[%s7648_s28 + $0x4c8] sm:$0xff]  ;;  %v9345_v62 = vld [vmem:[%s7655_s8 + $0x80] sm:$0xff] }
 0x15e   : > { %v6909_v54 = vpop.eup %6908  ;;  %v1328_v12 = vadd.f32 1.0, %v6907_v47  ;;  %6922 = verf.f32 %v960_v60  ;;  %v963_v20 = vmul.f32 0.70710677, %v9006_v0  ;;  %5543 = vmatprep.subr.bf16.mxu1 %v5542_v29  ;;  %v5670_v51 = vpack.c.bf16 %v2454_v24, %v2448_v61  ;;  %v9036_v25 = vld [vmem:[%s7648_s28 + $0x4e8] sm:$0xff] }
 0x15f   : > { %11720 = vst [vmem:[#allocation52_spill] sm:$0xff] %v9024_v33  ;;  %v6911_v3 = vpop.eup %6910  ;;  %3068 = vmatmul.mubr.f32.gmra.mrb[30].mxu0 %v9024_v33  ;;  %v1332_v45 = vadd.f32 1.0, %v6909_v54  ;;  %6924 = verf.f32 %v964_v4  ;;  %v5544_v39 = vpack.c.bf16 %v2069_v15, %v2063_v37  ;;  %v5672_v8 = vpack.c.bf16 %v2453_v48, %v2447_v41  ;;  %v9044_v54 = vld [vmem:[%s7648_s28 + $0x4e0] sm:$0xff]  ;;  %v2076_v4 = vld [vmem:[%s7655_s8 + $0xae8] sm:$0xff]  ;;  %v2082_v37 = vld [vmem:[%s7655_s8 + $0xb18] sm:$0xff] }
 0x160   : > { %v6913_v1 = vpop.eup %6912  ;;  %v9038_v60 = vmul.f32 %v1328_v12, %v752_v23  ;;  %v1327_v47 = vadd.f32 1.0, %v6911_v3  ;;  %6926 = verf.f32 %v959_v49  ;;  %v759_v24 = vmul.f32 0.5, %v8977_v27  ;;  %5671 = vmatprep.subr.bf16.mxu0 %v5670_v51  ;;  %v2460_v12 = vld [vmem:[%s7655_s8 + $0x16e8] sm:$0xff] }
 0x161   : > { %v9046_v29 = vmul.f32 %v1332_v45, %v756_v36  ;;  %v1331_v61 = vadd.f32 1.0, %v6913_v1  ;;  %6928 = verf.f32 %v963_v20  ;;  %5545 = vmatpush1.bf16.msra.mxu1 %v5544_v39  ;;  %v6915_v23 = vpop.eup %6914  ;;  %v763_v49 = vmul.f32 0.5, %v8980_v14  ;;  %5673 = vmatpush1.bf16.msra.mxu0 %v5672_v8  ;;  %v2466_v20 = vld [vmem:[%s7655_s8 + $0x1718] sm:$0xff]  ;;  %v9065_v8 = vld [vmem:[%s7648_s28 + $0x508] sm:$0xff]  ;;  %v2081_v1 = vld [vmem:[%s7655_s8 + $0xb10] sm:$0xff] }
 0x162   : > { %11721 = vst [vmem:[#allocation53_spill] sm:$0xff] %v9038_v60  ;;  %2655 = vmatprep.mubr.f32.mxu1 %v9038_v60  ;;  %v9053_v48 = vmul.f32 %v1327_v47, %v751_v28  ;;  %v968_v36 = vmul.f32 0.70710677, %v9033_v19  ;;  %v972_v27 = vmul.f32 0.70710677, %v9036_v25  ;;  %v1336_v41 = vadd.f32 1.0, %v6915_v23 }
 0x163   : > { %11722 = vst [vmem:[#allocation54_spill] sm:$0xff] %v9046_v29  ;;  %v6917_v3 = vpop.eup %6916  ;;  %3073 = vmatprep.mubr.f32.mxu0 %v9046_v29  ;;  %v9060_v15 = vmul.f32 %v1331_v61, %v755_v7  ;;  %v768_v28 = vmul.f32 0.5, %v8986_v16  ;;  %v967_v14 = vmul.f32 0.70710677, %v9041_v58  ;;  %v772_v51 = vmul.f32 0.5, %v8989_v63  ;;  %v2075_v7 = vld [vmem:[%s7655_s8 + $0xae0] sm:$0xff] }
 0x164   : > { %11723 = vst [vmem:[#allocation55_spill] sm:$0xff] %v9053_v48  ;;  %2656 = vmatmul.mubr.f32.gmra.mrb[32].mxu1 %v9053_v48  ;;  %v1340_v45 = vadd.f32 1.0, %v6917_v3  ;;  %6930 = verf.f32 %v968_v36  ;;  %v971_v39 = vmul.f32 0.70710677, %v9044_v54  ;;  %v9074_v16 = vmul.f32 %v1336_v41, %v9018_v17  ;;  %v9077_v23 = vld [vmem:[%s7648_s28 + $0x528] sm:$0xff]  ;;  %v2459_v29 = vld [vmem:[%s7655_s8 + $0x16e0] sm:$0xff] }
 0x165   : > { %11724 = vst [vmem:[#allocation56_spill] sm:$0xff] %v9060_v15  ;;  %3074 = vmatmul.mubr.f32.gmra.mrb[32].mxu0 %v9060_v15  ;;  %6932 = verf.f32 %v972_v27  ;;  %v5546_v47 = vpack.c.bf16 %v2082_v37, %v2076_v4  ;;  %v5674_v61 = vpack.c.bf16 %v2466_v20, %v2460_v12  ;;  %v2465_v3 = vld [vmem:[%s7655_s8 + $0x1710] sm:$0xff]  ;;  %v767_v36 = vmul.f32 0.5, %v8995_v50  ;;  %v9086_v15 = vld [vmem:[%s7648_s28 + $0x500] sm:$0xff] }
 0x166   : > { %11725 = vst [vmem:[#allocation57_spill] sm:$0xff] %v9074_v16  ;;  %v6919_v33 = vpop.eup %6918  ;;  %v9081_v63 = vmul.f32 %v1340_v45, %v764_v22  ;;  %6934 = verf.f32 %v967_v14  ;;  %v976_v48 = vmul.f32 0.70710677, %v9065_v8  ;;  %2661 = vmatprep.mubr.f32.mxu1 %v9074_v16  ;;  %v771_v37 = vmul.f32 0.5, %v9006_v0  ;;  %v9093_v41 = vld [vmem:[%s7648_s28 + $0x520] sm:$0xff] }
 0x167   : > { %v6921_v17 = vpop.eup %6920  ;;  %v1335_v4 = vadd.f32 1.0, %v6919_v33  ;;  %6936 = verf.f32 %v971_v39  ;;  %5547 = vmatprep.subr.bf16.mxu1 %v5546_v47  ;;  %v5548_v12 = vpack.c.bf16 %v2081_v1, %v2075_v7  ;;  %5675 = vmatprep.subr.bf16.mxu0 %v5674_v61  ;;  %v980_v27 = vmul.f32 0.70710677, %v9077_v23  ;;  %v9100_v7 = vld [vmem:[%s7648_s28 + $0x548] sm:$0xff] }
 0x168   : > { %11726 = vst [vmem:[#allocation58_spill] sm:$0xff] %v9081_v63  ;;  %v6923_v22 = vpop.eup %6922  ;;  %3079 = vmatprep.mubr.f32.mxu0 %v9081_v63  ;;  %v1339_v50 = vadd.f32 1.0, %v6921_v17  ;;  %6938 = verf.f32 %v976_v48  ;;  %v5676_v20 = vpack.c.bf16 %v2465_v3, %v2459_v29  ;;  %v776_v45 = vmul.f32 0.5, %v9033_v19  ;;  %v9113_v17 = vld [vmem:[%s7648_s28 + $0x540] sm:$0xff] }
 0x169   : > { %v6925_v14 = vpop.eup %6924  ;;  %v9095_v33 = vmul.f32 %v1335_v4, %v759_v24  ;;  %v1344_v0 = vadd.f32 1.0, %v6923_v22  ;;  %5549 = vmatpush1.bf16.msra.mxu1 %v5548_v12  ;;  %v975_v39 = vmul.f32 0.70710677, %v9086_v15  ;;  %v780_v29 = vmul.f32 0.5, %v9036_v25  ;;  %v9106_v24 = vld [vmem:[%s7648_s28 + $0x568] sm:$0xff] }
 0x16a   : > { %v6927_v48 = vpop.eup %6926  ;;  %v9102_v1 = vmul.f32 %v1339_v50, %v763_v49  ;;  %v1348_v47 = vadd.f32 1.0, %v6925_v14  ;;  %6940 = verf.f32 %v980_v27  ;;  %5677 = vmatpush1.bf16.msra.mxu0 %v5676_v20  ;;  %v979_v49 = vmul.f32 0.70710677, %v9093_v41  ;;  %v2088_v25 = vld [vmem:[%s7655_s8 + $0xb48] sm:$0xff]  ;;  %v2094_v50 = vld [vmem:[%s7655_s8 + $0xb78] sm:$0xff]  ;;  %v9123_v27 = vld [vmem:[%s7648_s28 + $0x560] sm:$0xff] }
 0x16b   : > { %11727 = vst [vmem:[#allocation59_spill] sm:$0xff] %v9095_v33  ;;  %v6929_v19 = vpop.eup %6928  ;;  %2662 = vmatmul.mubr.f32.gmra.mrb[34].mxu1 %v9095_v33  ;;  %v9109_v61 = vmul.f32 %v1344_v0, %v768_v28  ;;  %v1343_v3 = vadd.f32 1.0, %v6927_v48  ;;  %6942 = verf.f32 %v975_v39  ;;  %v775_v22 = vmul.f32 0.5, %v9041_v58  ;;  %v2472_v0 = vld [vmem:[%s7655_s8 + $0x1748] sm:$0xff]  ;;  %v2478_v39 = vld [vmem:[%s7655_s8 + $0x1778] sm:$0xff]  ;;  %v2087_v58 = vld [vmem:[%s7655_s8 + $0xb40] sm:$0xff] }
 0x16c   : > { %11728 = vst [vmem:[#allocation60_spill] sm:$0xff] %v9102_v1  ;;  %3080 = vmatmul.mubr.f32.gmra.mrb[34].mxu0 %v9102_v1  ;;  %v9117_v4 = vmul.f32 %v1348_v47, %v772_v51  ;;  %v1347_v12 = vadd.f32 1.0, %v6929_v19  ;;  %v984_v28 = vmul.f32 0.70710677, %v9100_v7  ;;  %v779_v14 = vmul.f32 0.5, %v9044_v54  ;;  %v2477_v54 = vld [vmem:[%s7655_s8 + $0x1770] sm:$0xff] }
 0x16d   : > { %11729 = vst [vmem:[#allocation61_spill] sm:$0xff] %v9109_v61  ;;  %2667 = vmatprep.mubr.f32.mxu1 %v9109_v61  ;;  %v9126_v20 = vmul.f32 %v1343_v3, %v767_v36  ;;  %6944 = verf.f32 %v979_v49  ;;  %v988_v51 = vmul.f32 0.70710677, %v9106_v24  ;;  %v784_v19 = vmul.f32 0.5, %v9065_v8  ;;  %v2093_v36 = vld [vmem:[%s7655_s8 + $0xb70] sm:$0xff]  ;;  %v2471_v3 = vld [vmem:[%s7655_s8 + $0x1740] sm:$0xff] }
 0x16e   : > { %11730 = vst [vmem:[#allocation62_spill] sm:$0xff] %v9117_v4  ;;  %v6931_v48 = vpop.eup %6930  ;;  %3085 = vmatprep.mubr.f32.mxu0 %v9117_v4  ;;  %v9134_v47 = vmul.f32 %v1347_v12, %v771_v37  ;;  %6946 = verf.f32 %v984_v28  ;;  %v983_v1 = vmul.f32 0.70710677, %v9113_v17  ;;  %v788_v61 = vmul.f32 0.5, %v9077_v23  ;;  %v9146_v33 = vld [vmem:[%s7648_s28 + $0x588] sm:$0xff] }
 0x16f   : > { %11731 = vst [vmem:[#allocation63_spill] sm:$0xff] %v9126_v20  ;;  %v6933_v49 = vpop.eup %6932  ;;  %2668 = vmatmul.mubr.f32.gmra.mrb[36].mxu1 %v9126_v20  ;;  %v1352_v63 = vadd.f32 1.0, %v6931_v48  ;;  %6948 = verf.f32 %v988_v51  ;;  %v5550_v37 = vpack.c.bf16 %v2094_v50, %v2088_v25  ;;  %v987_v28 = vmul.f32 0.70710677, %v9123_v27  ;;  %v9151_v25 = vld [vmem:[%s7648_s28 + $0x5a8] sm:$0xff]  ;;  %v9154_v50 = vld [vmem:[%s7648_s28 + $0x580] sm:$0xff] }
 0x170   : > { %11732 = vst [vmem:[#allocation64_spill] sm:$0xff] %v9134_v47  ;;  %v6935_v12 = vpop.eup %6934  ;;  %3086 = vmatmul.mubr.f32.gmra.mrb[36].mxu0 %v9134_v47  ;;  %v1356_v8 = vadd.f32 1.0, %v6933_v49  ;;  %6950 = verf.f32 %v983_v1  ;;  %v5678_v4 = vpack.c.bf16 %v2478_v39, %v2472_v0  ;;  %v5552_v51 = vpack.c.bf16 %v2093_v36, %v2087_v58  ;;  %v9187_v47 = vld [vmem:[%s7648_s28 + $0x5e8] sm:$0xff] }
 0x171   : > { %v6937_v20 = vpop.eup %6936  ;;  %v9148_v48 = vmul.f32 %v1352_v63, %v776_v45  ;;  %v1351_v23 = vadd.f32 1.0, %v6935_v12  ;;  %5551 = vmatprep.subr.bf16.mxu1 %v5550_v37  ;;  %v5680_v16 = vpack.c.bf16 %v2477_v54, %v2471_v3  ;;  %v783_v39 = vmul.f32 0.5, %v9086_v15  ;;  %v9160_v63 = vld [vmem:[%s7648_s28 + $0x5a0] sm:$0xff]  ;;  %v2100_v45 = vld [vmem:[%s7655_s8 + $0xba8] sm:$0xff]  ;;  %v2106_v54 = vld [vmem:[%s7655_s8 + $0xbd8] sm:$0xff] }
 0x172   : > { %v6939_v1 = vpop.eup %6938  ;;  %v9156_v49 = vmul.f32 %v1356_v8, %v780_v29  ;;  %v1355_v0 = vadd.f32 1.0, %v6937_v20  ;;  %6952 = verf.f32 %v987_v28  ;;  %5679 = vmatprep.subr.bf16.mxu0 %v5678_v4  ;;  %v787_v3 = vmul.f32 0.5, %v9093_v41  ;;  %5553 = vmatpush1.bf16.msra.mxu1 %v5552_v51  ;;  %v2484_v20 = vld [vmem:[%s7655_s8 + $0x17a8] sm:$0xff]  ;;  %v2490_v12 = vld [vmem:[%s7655_s8 + $0x17d8] sm:$0xff] }
 0x173   : > { %11733 = vst [vmem:[#allocation65_spill] sm:$0xff] %v9148_v48  ;;  %2673 = vmatprep.mubr.f32.mxu1 %v9148_v48  ;;  %v9164_v58 = vmul.f32 %v1351_v23, %v775_v22  ;;  %v1360_v36 = vadd.f32 1.0, %v6939_v1  ;;  %v992_v29 = vmul.f32 0.70710677, %v9146_v33  ;;  %v792_v37 = vmul.f32 0.5, %v9100_v7  ;;  %5681 = vmatpush1.bf16.msra.mxu0 %v5680_v16  ;;  %v616_v7 = vld [vmem:[%s7648_s28 + $0x5c8] sm:$0xff] }
 0x174   : > { %11734 = vst [vmem:[#allocation66_spill] sm:$0xff] %v9156_v49  ;;  %v6941_v15 = vpop.eup %6940  ;;  %3091 = vmatprep.mubr.f32.mxu0 %v9156_v49  ;;  %v9171_v4 = vmul.f32 %v1355_v0, %v779_v14  ;;  %v996_v22 = vmul.f32 0.70710677, %v9151_v25  ;;  %v991_v41 = vmul.f32 0.70710677, %v9154_v50  ;;  %v796_v14 = vmul.f32 0.5, %v9106_v24 }
 0x175   : > { %11735 = vst [vmem:[#allocation67_spill] sm:$0xff] %v9164_v58  ;;  %v6943_v8 = vpop.eup %6942  ;;  %2674 = vmatmul.mubr.f32.gmra.mrb[38].mxu1 %v9164_v58  ;;  %v9178_v28 = vmul.f32 %v1360_v36, %v784_v19  ;;  %v1364_v23 = vadd.f32 1.0, %v6941_v15  ;;  %6954 = verf.f32 %v992_v29  ;;  %v995_v51 = vmul.f32 0.70710677, %v9160_v63  ;;  %v2099_v0 = vld [vmem:[%s7655_s8 + $0xba0] sm:$0xff]  ;;  %v2105_v49 = vld [vmem:[%s7655_s8 + $0xbd0] sm:$0xff] }
 0x176   : > { %11736 = vst [vmem:[#allocation68_spill] sm:$0xff] %v9171_v4  ;;  %3092 = vmatmul.mubr.f32.gmra.mrb[38].mxu0 %v9171_v4  ;;  %v1359_v16 = vadd.f32 1.0, %v6943_v8  ;;  %6956 = verf.f32 %v996_v22  ;;  %v5554_v1 = vpack.c.bf16 %v2106_v54, %v2100_v45  ;;  %v791_v24 = vmul.f32 0.5, %v9113_v17  ;;  %v2483_v15 = vld [vmem:[%s7655_s8 + $0x17a0] sm:$0xff]  ;;  %v2489_v22 = vld [vmem:[%s7655_s8 + $0x17d0] sm:$0xff] }
 0x177   : > { %11737 = vst [vmem:[#allocation69_spill] sm:$0xff] %v9178_v28  ;;  %v6945_v19 = vpop.eup %6944  ;;  %2679 = vmatprep.mubr.f32.mxu1 %v9178_v28  ;;  %v9190_v36 = vmul.f32 %v1364_v23, %v788_v61  ;;  %6958 = verf.f32 %v991_v41  ;;  %v5682_v29 = vpack.c.bf16 %v2490_v12, %v2484_v20  ;;  %v1000_v54 = vmul.f32 0.70710677, %v616_v7  ;;  %v615_v12 = vld [vmem:[%s7648_s28 + $0x5c0] sm:$0xff] }
 0x178   : > { %v6947_v8 = vpop.eup %6946  ;;  %v9195_v4 = vmul.f32 %v1359_v16, %v783_v39  ;;  %v1363_v45 = vadd.f32 1.0, %v6945_v19  ;;  %6960 = verf.f32 %v995_v51  ;;  %5555 = vmatprep.subr.bf16.mxu1 %v5554_v1  ;;  %v795_v17 = vmul.f32 0.5, %v9123_v27  ;;  %v619_v39 = vld [vmem:[%s7648_s28 + $0x5e0] sm:$0xff]  ;;  %v434_v19 = vld [vmem:[%s7648_s28 + $0x18] sm:$0xff] }
 0x179   : > { %11738 = vst [vmem:[#allocation70_spill] sm:$0xff] %v9190_v36  ;;  %v6949_v58 = vpop.eup %6948  ;;  %3097 = vmatprep.mubr.f32.mxu0 %v9190_v36  ;;  %v1368_v61 = vadd.f32 1.0, %v6947_v8  ;;  %5683 = vmatprep.subr.bf16.mxu0 %v5682_v29  ;;  %v5556_v20 = vpack.c.bf16 %v2105_v49, %v2099_v0  ;;  %v1004_v41 = vmul.f32 0.70710677, %v9187_v47  ;;  %6962 = verf.f32 %v1000_v54  ;;  %v438_v0 = vld [vmem:[%s7648_s28 + $0x38] sm:$0xff]  ;;  %v9211_v29 = vld [vmem:[%s7648_s28 + $0x10] sm:$0xff] }
 0x17a   : > { %11739 = vst [vmem:[#allocation71_spill] sm:$0xff] %v9195_v4  ;;  %v6951_v23 = vpop.eup %6950  ;;  %2680 = vmatmul.mubr.f32.gmra.mrb[40].mxu1 %v9195_v4  ;;  %v9203_v16 = vmul.f32 %v1363_v45, %v787_v3  ;;  %v1372_v51 = vadd.f32 1.0, %v6949_v58  ;;  %v5684_v1 = vpack.c.bf16 %v2489_v22, %v2483_v15  ;;  %v800_v49 = vmul.f32 0.5, %v9146_v33  ;;  %v9218_v22 = vld [vmem:[%s7648_s28 + $0x30] sm:$0xff] }
 0x17b   : > { %v9206_v8 = vmul.f32 %v1368_v61, %v792_v37  ;;  %v1367_v27 = vadd.f32 1.0, %v6951_v23  ;;  %5557 = vmatpush1.bf16.msra.mxu1 %v5556_v20  ;;  %6964 = verf.f32 %v1004_v41  ;;  %v804_v3 = vmul.f32 0.5, %v9151_v25  ;;  %v1730_v20 = vld [vmem:[%s7655_s8 + $0x18] sm:$0xff] }
 0x17c   : > { %11740 = vst [vmem:[#allocation72_spill] sm:$0xff] %v9203_v16  ;;  %v6953_v36 = vpop.eup %6952  ;;  %3098 = vmatmul.mubr.f32.gmra.mrb[40].mxu0 %v9203_v16  ;;  %v9214_v58 = vmul.f32 %v1372_v51, %v796_v14  ;;  %v999_v15 = vmul.f32 0.70710677, %v615_v12  ;;  %v1003_v37 = vmul.f32 0.70710677, %v619_v39  ;;  %v799_v54 = vmul.f32 0.5, %v9154_v50 }
 0x17d   : > { %11741 = vst [vmem:[#allocation73_spill] sm:$0xff] %v9206_v8  ;;  %2685 = vmatprep.mubr.f32.mxu1 %v9206_v8  ;;  %v9221_v33 = vmul.f32 %v1367_v27, %v791_v24  ;;  %v1371_v45 = vadd.f32 1.0, %v6953_v36  ;;  %5685 = vmatpush1.bf16.msra.mxu0 %v5684_v1  ;;  %v818_v61 = vmul.f32 0.70710677, %v434_v19  ;;  %v1736_v14 = vld [vmem:[%s7655_s8 + $0x48] sm:$0xff]  ;;  %v803_v25 = vmul.f32 0.5, %v9160_v63 }
 0x17e   : > { %11742 = vst [vmem:[#allocation74_spill] sm:$0xff] %v9214_v58  ;;  %3103 = vmatprep.mubr.f32.mxu0 %v9214_v58  ;;  %v808_v41 = vmul.f32 0.5, %v616_v7  ;;  %6966 = verf.f32 %v999_v15  ;;  %v822_v23 = vmul.f32 0.70710677, %v438_v0  ;;  %v1732_v51 = vld [vmem:[%s7655_s8 + $0x28] sm:$0xff]  ;;  %v1738_v16 = vld [vmem:[%s7655_s8 + $0x58] sm:$0xff]  ;;  %v5686_v7 = vpack.c.bf16 %v1736_v14, %v1730_v20 }
 0x17f   : > { %11743 = vst [vmem:[#allocation75_spill] sm:$0xff] %v9221_v33  ;;  %v6955_v4 = vpop.eup %6954  ;;  %2686 = vmatmul.mubr.f32.gmra.mrb[42].mxu1 %v9221_v33  ;;  %v9231_v36 = vmul.f32 %v1371_v45, %v795_v17  ;;  %v812_v50 = vmul.f32 0.5, %v9187_v47  ;;  %6968 = verf.f32 %v1003_v37  ;;  %v817_v24 = vmul.f32 0.70710677, %v9211_v29  ;;  %v442_v47 = vld [vmem:[%s7648_s28 + $0x58] sm:$0xff]  ;;  %v9246_v20 = vld [vmem:[%s7655_s8 + $0x10] sm:$0xff] }
 0x180   : > { %v6957_v1 = vpop.eup %6956  ;;  %v1376_v27 = vadd.f32 1.0, %v6955_v4  ;;  %6970 = verf.f32 %v818_v61  ;;  %v821_v63 = vmul.f32 0.70710677, %v9218_v22  ;;  %v9237_v17 = vmul.f32 0.5, %v615_v12  ;;  %v446_v37 = vld [vmem:[%s7648_s28 + $0x78] sm:$0xff]  ;;  %5687 = vmatprep.subr.bf16.mxu1 %v5686_v7  ;;  %v441_v12 = vld [vmem:[%s7648_s28 + $0x50] sm:$0xff] }
 0x181   : > { %11744 = vst [vmem:[#allocation76_spill] sm:$0xff] %v9231_v36  ;;  %v6959_v15 = vpop.eup %6958  ;;  %3104 = vmatmul.mubr.f32.gmra.mrb[42].mxu0 %v9231_v36  ;;  %v1380_v58 = vadd.f32 1.0, %v6957_v1  ;;  %6972 = verf.f32 %v822_v23  ;;  %v5942_v45 = vpack.c.bf16 %v1738_v16, %v1732_v51  ;;  %v9243_v8 = vmul.f32 0.5, %v619_v39  ;;  %v9254_v51 = vld [vmem:[%s7655_s8 + $0x40] sm:$0xff]  ;;  %v445_v39 = vld [vmem:[%s7648_s28 + $0x70] sm:$0xff]  ;;  %v450_v36 = vld [vmem:[%s7648_s28 + $0x98] sm:$0xff] }
 0x182   : > { %v6961_v4 = vpop.eup %6960  ;;  %v9241_v61 = vmul.f32 %v1376_v27, %v800_v49  ;;  %v1375_v33 = vadd.f32 1.0, %v6959_v15  ;;  %6974 = verf.f32 %v817_v24  ;;  %v9251_v23 = vmul.f32 0.5, %v434_v19  ;;  %v9257_v49 = vld [vmem:[%s7655_s8 + $0x20] sm:$0xff] }
 0x183   : > { %v9249_v14 = vmul.f32 %v1380_v58, %v804_v3  ;;  %v1379_v16 = vadd.f32 1.0, %v6961_v4  ;;  %6976 = verf.f32 %v821_v63  ;;  %5943 = vmatprep.subr.bf16.mxu0 %v5942_v45  ;;  %v6963_v1 = vpop.eup %6962  ;;  %v9263_v27 = vmul.f32 0.5, %v438_v0  ;;  %v9266_v58 = vld [vmem:[%s7655_s8 + $0x50] sm:$0xff] }
 0x184   : > { %11745 = vst [vmem:[#allocation77_spill] sm:$0xff] %v9241_v61  ;;  %2691 = vmatprep.mubr.f32.mxu1 %v9241_v61  ;;  %v9261_v24 = vmul.f32 %v1375_v33, %v799_v54  ;;  %v826_v19 = vmul.f32 0.70710677, %v442_v47  ;;  %v830_v3 = vmul.f32 0.70710677, %v446_v37  ;;  %v1384_v15 = vadd.f32 1.0, %v6963_v1 }
 0x185   : > { %11746 = vst [vmem:[#allocation78_spill] sm:$0xff] %v9249_v14  ;;  %v6965_v63 = vpop.eup %6964  ;;  %3109 = vmatprep.mubr.f32.mxu0 %v9249_v14  ;;  %v9269_v7 = vmul.f32 %v1379_v16, %v803_v25  ;;  %v9272_v45 = vmul.f32 0.5, %v9211_v29  ;;  %v825_v4 = vmul.f32 0.70710677, %v441_v12  ;;  %v9277_v33 = vmul.f32 0.5, %v9218_v22  ;;  %v454_v14 = vld [vmem:[%s7648_s28 + $0xb8] sm:$0xff] }
 0x186   : > { %11747 = vst [vmem:[#allocation79_spill] sm:$0xff] %v9261_v24  ;;  %2692 = vmatmul.mubr.f32.gmra.mrb[44].mxu1 %v9261_v24  ;;  %v1388_v0 = vadd.f32 1.0, %v6965_v63  ;;  %6978 = verf.f32 %v826_v19  ;;  %v829_v54 = vmul.f32 0.70710677, %v445_v39  ;;  %v9281_v25 = vmul.f32 %v1384_v15, %v808_v41  ;;  %v9292_v19 = vld [vmem:[%s7655_s8 + $0x78] sm:$0xff]  ;;  %v9298_v41 = vld [vmem:[%s7655_s8 + $0x88] sm:$0xff] }
 0x187   : > { %11748 = vst [vmem:[#allocation80_spill] sm:$0xff] %v9269_v7  ;;  %3110 = vmatmul.mubr.f32.gmra.mrb[44].mxu0 %v9269_v7  ;;  %6980 = verf.f32 %v830_v3  ;;  %v9289_v22 = vmul.f32 0.5, %v442_v47  ;;  %v9295_v7 = vld [vmem:[%s7655_s8 + $0xa8] sm:$0xff]  ;;  %v834_v15 = vmul.f32 0.70710677, %v450_v36  ;;  %v9301_v3 = vmul.f32 0.5, %v446_v37 }
 0x188   : > { %11749 = vst [vmem:[#allocation81_spill] sm:$0xff] %v9281_v25  ;;  %v6967_v1 = vpop.eup %6966  ;;  %v9287_v63 = vmul.f32 %v1388_v0, %v812_v50  ;;  %6982 = verf.f32 %v825_v4  ;;  %2697 = vmatprep.mubr.f32.mxu1 %v9281_v25  ;;  %v9304_v50 = vld [vmem:[%s7655_s8 + $0xb8] sm:$0xff]  ;;  %v838_v47 = vmul.f32 0.70710677, %v454_v14  ;;  %v449_v4 = vld [vmem:[%s7648_s28 + $0x90] sm:$0xff]  ;;  %v9308_v61 = vmul.f32 0.5, %v441_v12 }
 0x189   : > { %v6969_v29 = vpop.eup %6968  ;;  %v1383_v16 = vadd.f32 1.0, %v6967_v1  ;;  %6984 = verf.f32 %v829_v54  ;;  %v9310_v28 = vmul.f32 0.5, %v445_v39  ;;  %v453_v1 = vld [vmem:[%s7648_s28 + $0xb0] sm:$0xff]  ;;  %v5690_v48 = vpack.c.bf16 %v9295_v7, %v9292_v19 }
 0x18a   : > { %11750 = vst [vmem:[#allocation82_spill] sm:$0xff] %v9287_v63  ;;  %v6971_v0 = vpop.eup %6970  ;;  %3115 = vmatprep.mubr.f32.mxu0 %v9287_v63  ;;  %v1387_v24 = vadd.f32 1.0, %v6969_v29  ;;  %6986 = verf.f32 %v834_v15  ;;  %v458_v63 = vld [vmem:[%s7648_s28 + $0xd8] sm:$0xff]  ;;  %v5946_v15 = vpack.c.bf16 %v9304_v50, %v9298_v41 }
 0x18b   : > { %v6973_v37 = vpop.eup %6972  ;;  %v9314_v54 = vmul.f32 %v1383_v16, %v9237_v17  ;;  %v1202_v25 = vadd.f32 1.0, %v6971_v0  ;;  %6988 = verf.f32 %v838_v47  ;;  %v9325_v17 = vld [vmem:[%s7655_s8 + $0x70] sm:$0xff]  ;;  %v833_v16 = vmul.f32 0.70710677, %v449_v4  ;;  %v462_v0 = vld [vmem:[%s7648_s28 + $0xf8] sm:$0xff] }
 0x18c   : > { %v6975_v29 = vpop.eup %6974  ;;  %v9320_v12 = vmul.f32 %v1387_v24, %v9243_v8  ;;  %v1206_v39 = vadd.f32 1.0, %v6973_v37  ;;  %v9332_v8 = vmul.f32 0.5, %v450_v36  ;;  %v9335_v24 = vld [vmem:[%s7655_s8 + $0xa0] sm:$0xff]  ;;  %v837_v47 = vmul.f32 0.70710677, %v453_v1  ;;  %v9338_v37 = vld [vmem:[%s7648_s28 + $0xd0] sm:$0xff] }
 0x18d   : > { %11751 = vst [vmem:[#allocation83_spill] sm:$0xff] %v9314_v54  ;;  %v6977_v60 = vpop.eup %6976  ;;  %2698 = vmatmul.mubr.f32.gmra.mrb[46].mxu1 %v9314_v54  ;;  %v9330_v7 = vmul.f32 %v1202_v25, %v9251_v23  ;;  %v1201_v19 = vadd.f32 1.0, %v6975_v29  ;;  %v9348_v54 = vld [vmem:[%s7655_s8 + $0xb0] sm:$0xff]  ;;  %6990 = verf.f32 %v833_v16  ;;  %v842_v23 = vmul.f32 0.70710677, %v458_v63 }
 0x18e   : > { %11752 = vst [vmem:[#allocation84_spill] sm:$0xff] %v9320_v12  ;;  %3116 = vmatmul.mubr.f32.gmra.mrb[46].mxu0 %v9320_v12  ;;  %v9342_v41 = vmul.f32 %v1206_v39, %v9263_v27  ;;  %v1205_v50 = vadd.f32 1.0, %v6977_v60  ;;  %v9351_v25 = vld [vmem:[%s7648_s28 + $0xf0] sm:$0xff]  ;;  %v9357_v29 = vmul.f32 0.5, %v454_v14  ;;  %6992 = verf.f32 %v837_v47  ;;  %v1754_v47 = vld [vmem:[%s7655_s8 + $0xd8] sm:$0xff] }
 0x18f   : > { %11753 = vst [vmem:[#allocation85_spill] sm:$0xff] %v9330_v7  ;;  %2768 = vmatprep.mubr.f32.mxu1 %v9330_v7  ;;  %v9355_v36 = vmul.f32 %v1201_v19, %v9272_v45  ;;  %v846_v27 = vmul.f32 0.70710677, %v462_v0  ;;  %v5692_v16 = vpack.c.bf16 %v9335_v24, %v9325_v17  ;;  %6994 = verf.f32 %v842_v23 }
 0x190   : > { %11754 = vst [vmem:[#allocation86_spill] sm:$0xff] %v9342_v41  ;;  %v6979_v60 = vpop.eup %6978  ;;  %3186 = vmatprep.mubr.f32.mxu0 %v9342_v41  ;;  %v9361_v39 = vmul.f32 %v1205_v50, %v9277_v33  ;;  %v841_v12 = vmul.f32 0.70710677, %v9338_v37  ;;  %v5948_v19 = vpack.c.bf16 %v9348_v54, %v9345_v62  ;;  %v845_v33 = vmul.f32 0.70710677, %v9351_v25  ;;  %v1760_v50 = vld [vmem:[%s7655_s8 + $0x108] sm:$0xff] }
 0x191   : > { %11755 = vst [vmem:[#allocation87_spill] sm:$0xff] %v9355_v36  ;;  %v6981_v45 = vpop.eup %6980  ;;  %2769 = vmatmul.mubr.f32.vlgmr.msra.gmra.mrb[0].mxu1 %v9355_v36  ;;  %v1210_v14 = vadd.f32 1.0, %v6979_v60  ;;  %6996 = verf.f32 %v846_v27  ;;  %v11757_v17 = vpack.c.bf16 %v9254_v51, %v9246_v20  ;;  %v9376_v23 = vmul.f32 0.5, %v449_v4  ;;  %v1756_v62 = vld [vmem:[%s7655_s8 + $0xe8] sm:$0xff]  ;;  %v1762_v54 = vld [vmem:[%s7655_s8 + $0x118] sm:$0xff] }
 0x192   : > { %11756 = vst [vmem:[#allocation88_spill] sm:$0xff] %v9361_v39  ;;  %v6983_v41 = vpop.eup %6982  ;;  %3187 = vmatmul.mubr.f32.vlgmr.msra.gmra.mrb[0].mxu0 %v9361_v39  ;;  %v1214_v24 = vadd.f32 1.0, %v6981_v45  ;;  %v9378_v60 = vmul.f32 0.5, %v453_v1  ;;  %6998 = verf.f32 %v841_v12  ;;  %v9383_v27 = vld [vmem:[%s7648_s28 + $0x118] sm:$0xff]  ;;  %v11758_v39 = vpack.c.bf16 %v9266_v58, %v9257_v49  ;;  %v1753_v1 = vld [vmem:[%s7655_s8 + $0xd0] sm:$0xff]  ;;  %v1759_v12 = vld [vmem:[%s7655_s8 + $0x100] sm:$0xff] }
 0x193   : > { %5689 = vmatpush1.bf16.msra.mxu1 %v11757_v17  ;;  %v6985_v36 = vpop.eup %6984  ;;  %v9389_v20 = vmul.f32 %v1210_v14, %v9289_v22  ;;  %v1209_v51 = vadd.f32 1.0, %v6983_v41  ;;  %v9391_v4 = vmul.f32 0.5, %v458_v63  ;;  %7000 = verf.f32 %v845_v33  ;;  %v9396_v45 = vld [vmem:[%s7648_s28 + $0x138] sm:$0xff]  ;;  %v1761_v63 = vld [vmem:[%s7655_s8 + $0x110] sm:$0xff] }
 0x194   : > { %5945 = vmatpush1.bf16.msra.mxu0 %v11758_v39  ;;  %5691 = vmatprep.subr.bf16.mxu1 %v5690_v48  ;;  %v6987_v17 = vpop.eup %6986  ;;  %v9399_v49 = vmul.f32 %v1214_v24, %v9301_v3  ;;  %v1213_v58 = vadd.f32 1.0, %v6985_v36  ;;  %v9401_v22 = vmul.f32 0.5, %v462_v0  ;;  %v5694_v41 = vpack.c.bf16 %v1760_v50, %v1754_v47  ;;  %v1755_v48 = vld [vmem:[%s7655_s8 + $0xe0] sm:$0xff]  ;;  %v9406_v39 = vld [vmem:[%s7648_s28 + $0x110] sm:$0xff]  ;;  %v1766_v0 = vld [vmem:[%s7655_s8 + $0x138] sm:$0xff] }
 0x195   : > { %11759 = vst [vmem:[#allocation89_spill] sm:$0xff] %v9389_v20  ;;  %5947 = vmatprep.subr.bf16.mxu0 %v5946_v15  ;;  %v6989_v14 = vpop.eup %6988  ;;  %2774 = vmatprep.mubr.f32.mxu1 %v9389_v20  ;;  %v9410_v33 = vmul.f32 %v1209_v51, %v9308_v61  ;;  %v1218_v3 = vadd.f32 1.0, %v6987_v17  ;;  %v5950_v24 = vpack.c.bf16 %v1762_v54, %v1756_v62  ;;  %v850_v36 = vmul.f32 0.70710677, %v9383_v27  ;;  %v9414_v15 = vld [vmem:[%s7648_s28 + $0x130] sm:$0xff]  ;;  %v1772_v47 = vld [vmem:[%s7655_s8 + $0x168] sm:$0xff] }
 0x196   : > { %11760 = vst [vmem:[#allocation90_spill] sm:$0xff] %v9399_v49  ;;  %3192 = vmatprep.mubr.f32.mxu0 %v9399_v49  ;;  %v9420_v50 = vmul.f32 %v1213_v58, %v9310_v28  ;;  %v1222_v7 = vadd.f32 1.0, %v6989_v14  ;;  %v5696_v20 = vpack.c.bf16 %v1759_v12, %v1753_v1  ;;  %v854_v61 = vmul.f32 0.70710677, %v9396_v45  ;;  %v1768_v51 = vld [vmem:[%s7655_s8 + $0x148] sm:$0xff]  ;;  %v1774_v62 = vld [vmem:[%s7655_s8 + $0x178] sm:$0xff] }
 0x197   : > { %11761 = vst [vmem:[#allocation91_spill] sm:$0xff] %v9410_v33  ;;  %5693 = vmatpush1.bf16.msra.mxu1 %v5692_v16  ;;  %v9427_v54 = vmul.f32 %v1218_v3, %v9332_v8  ;;  %v5952_v17 = vpack.c.bf16 %v1761_v63, %v1755_v48  ;;  %7002 = verf.f32 %v850_v36  ;;  %v849_v28 = vmul.f32 0.70710677, %v9406_v39  ;;  %v9431_v58 = vld [vmem:[%s7648_s28 + $0x158] sm:$0xff]  ;;  %v6991_v16 = vpop.eup %6990  ;;  %v1765_v48 = vld [vmem:[%s7655_s8 + $0x130] sm:$0xff]  ;;  %v1771_v63 = vld [vmem:[%s7655_s8 + $0x160] sm:$0xff] }
 0x198   : > { %11762 = vst [vmem:[#allocation92_spill] sm:$0xff] %v9420_v50  ;;  %2775 = vmatmul.mubr.f32.gmra.mrb[2].mxu1 %v9410_v33  ;;  %5949 = vmatpush1.bf16.msra.mxu0 %v5948_v19  ;;  %v9435_v1 = vmul.f32 %v1222_v7, %v9357_v29  ;;  %7004 = verf.f32 %v854_v61  ;;  %v853_v8 = vmul.f32 0.70710677, %v9414_v15  ;;  %v5698_v12 = vpack.c.bf16 %v1772_v47, %v1766_v0  ;;  %v9439_v19 = vld [vmem:[%s7648_s28 + $0x178] sm:$0xff]  ;;  %v6993_v14 = vpop.eup %6992  ;;  %v1767_v29 = vld [vmem:[%s7655_s8 + $0x140] sm:$0xff] }
 0x199   : > { %11763 = vst [vmem:[#allocation93_spill] sm:$0xff] %v9427_v54  ;;  %3193 = vmatmul.mubr.f32.gmra.mrb[2].mxu0 %v9420_v50  ;;  %5695 = vmatprep.subr.bf16.mxu1 %v5694_v41  ;;  %v1217_v3 = vadd.f32 1.0, %v6991_v16  ;;  %v649_v36 = vmul.f32 0.5, %v9338_v37  ;;  %7006 = verf.f32 %v849_v28  ;;  %v5954_v7 = vpack.c.bf16 %v1774_v62, %v1768_v51  ;;  %v1773_v41 = vld [vmem:[%s7655_s8 + $0x170] sm:$0xff]  ;;  %v6995_v61 = vpop.eup %6994 }
 0x19a   : > { %11764 = vst [vmem:[#allocation94_spill] sm:$0xff] %v9435_v1  ;;  %2780 = vmatprep.mubr.f32.mxu1 %v9427_v54  ;;  %5951 = vmatprep.subr.bf16.mxu0 %v5950_v24  ;;  %v1221_v0 = vadd.f32 1.0, %v6993_v14  ;;  %v653_v47 = vmul.f32 0.5, %v9351_v25  ;;  %7008 = verf.f32 %v853_v8  ;;  %v858_v50 = vmul.f32 0.70710677, %v9431_v58  ;;  %v9455_v28 = vld [vmem:[%s7648_s28 + $0x150] sm:$0xff] }
 0x19b   : > { %3198 = vmatprep.mubr.f32.mxu0 %v9435_v1  ;;  %5697 = vmatpush1.bf16.msra.mxu1 %v5696_v20  ;;  %v6997_v16 = vpop.eup %6996  ;;  %v9451_v37 = vmul.f32 %v1217_v3, %v9376_v23  ;;  %v1226_v24 = vadd.f32 1.0, %v6995_v61  ;;  %v862_v51 = vmul.f32 0.70710677, %v9439_v19  ;;  %v5700_v62 = vpack.c.bf16 %v1771_v63, %v1765_v48  ;;  %v9461_v14 = vld [vmem:[%s7648_s28 + $0x170] sm:$0xff]  ;;  %v9472_v3 = vld [vmem:[%s7648_s28 + $0x1b8] sm:$0xff] }
 0x19c   : > { %5953 = vmatpush1.bf16.msra.mxu0 %v5952_v17  ;;  %5699 = vmatprep.subr.bf16.mxu1 %v5698_v12  ;;  %v6999_v25 = vpop.eup %6998  ;;  %v9458_v20 = vmul.f32 %v1221_v0, %v9378_v60  ;;  %v1230_v8 = vadd.f32 1.0, %v6997_v16  ;;  %7010 = verf.f32 %v858_v50  ;;  %v5956_v23 = vpack.c.bf16 %v1773_v41, %v1767_v29  ;;  %v9464_v17 = vld [vmem:[%s7648_s28 + $0x198] sm:$0xff]  ;;  %v9475_v50 = vld [vmem:[%s7648_s28 + $0x190] sm:$0xff]  ;;  %v1784_v0 = vld [vmem:[%s7655_s8 + $0x1c8] sm:$0xff] }
 0x19d   : > { %11765 = vst [vmem:[#allocation95_spill] sm:$0xff] %v9451_v37  ;;  %5955 = vmatprep.subr.bf16.mxu0 %v5954_v7  ;;  %v7001_v12 = vpop.eup %7000  ;;  %2781 = vmatmul.mubr.f32.gmra.mrb[4].mxu1 %v9451_v37  ;;  %v9468_v48 = vmul.f32 %v1226_v24, %v9391_v4  ;;  %v1225_v63 = vadd.f32 1.0, %v6999_v25  ;;  %v658_v60 = vmul.f32 0.5, %v9383_v27  ;;  %7012 = verf.f32 %v862_v51  ;;  %v9478_v7 = vld [vmem:[%s7648_s28 + $0x1b0] sm:$0xff]  ;;  %v1778_v61 = vld [vmem:[%s7655_s8 + $0x198] sm:$0xff] }
 0x19e   : > { %11766 = vst [vmem:[#allocation96_spill] sm:$0xff] %v9458_v20  ;;  %3199 = vmatmul.mubr.f32.gmra.mrb[4].mxu0 %v9458_v20  ;;  %v9482_v29 = vmul.f32 %v1230_v8, %v9401_v22  ;;  %v1229_v41 = vadd.f32 1.0, %v7001_v12  ;;  %v662_v4 = vmul.f32 0.5, %v9396_v45  ;;  %v857_v27 = vmul.f32 0.70710677, %v9455_v28  ;;  %v1780_v45 = vld [vmem:[%s7655_s8 + $0x1a8] sm:$0xff] }
 0x19f   : > { %11767 = vst [vmem:[#allocation97_spill] sm:$0xff] %v9468_v48  ;;  %5701 = vmatpush1.bf16.msra.mxu1 %v5700_v62  ;;  %2786 = vmatprep.mubr.f32.mxu1 %v9468_v48  ;;  %v9489_v16 = vmul.f32 %v1225_v63, %v649_v36  ;;  %v657_v24 = vmul.f32 0.5, %v9406_v39  ;;  %v861_v22 = vmul.f32 0.70710677, %v9461_v14  ;;  %v866_v51 = vmul.f32 0.70710677, %v9464_v17 }
 0x1a0   : > { %11768 = vst [vmem:[#allocation98_spill] sm:$0xff] %v9482_v29  ;;  %5957 = vmatpush1.bf16.msra.mxu0 %v5956_v23  ;;  %3204 = vmatprep.mubr.f32.mxu0 %v9482_v29  ;;  %v9496_v62 = vmul.f32 %v1229_v41, %v653_v47  ;;  %v661_v25 = vmul.f32 0.5, %v9414_v15  ;;  %7014 = verf.f32 %v857_v27  ;;  %v870_v36 = vmul.f32 0.70710677, %v9472_v3  ;;  %v1786_v8 = vld [vmem:[%s7655_s8 + $0x1d8] sm:$0xff]  ;;  %v1777_v12 = vld [vmem:[%s7655_s8 + $0x190] sm:$0xff] }
 0x1a1   : > { %11769 = vst [vmem:[#allocation99_spill] sm:$0xff] %v9489_v16  ;;  %v1783_v39 = vld [vmem:[%s7655_s8 + $0x1c0] sm:$0xff]  ;;  %v7003_v23 = vpop.eup %7002  ;;  %2787 = vmatmul.mubr.f32.gmra.mrb[6].mxu1 %v9489_v16  ;;  %v666_v63 = vmul.f32 0.5, %v9431_v58  ;;  %v9506_v20 = vmul.f32 0.5, %v9439_v19  ;;  %7016 = verf.f32 %v861_v22  ;;  %v865_v47 = vmul.f32 0.70710677, %v9475_v50 }
 0x1a2   : > { %11770 = vst [vmem:[#allocation100_spill] sm:$0xff] %v9496_v62  ;;  %v1779_v15 = vld [vmem:[%s7655_s8 + $0x1a0] sm:$0xff]  ;;  %v1785_v41 = vld [vmem:[%s7655_s8 + $0x1d0] sm:$0xff]  ;;  %v7005_v27 = vpop.eup %7004  ;;  %3205 = vmatmul.mubr.f32.gmra.mrb[6].mxu0 %v9496_v62  ;;  %v1234_v29 = vadd.f32 1.0, %v7003_v23  ;;  %7018 = verf.f32 %v866_v51  ;;  %v869_v1 = vmul.f32 0.70710677, %v9478_v7  ;;  %v5702_v58 = vpack.c.bf16 %v1784_v0, %v1778_v61 }
 0x1a3   : > { %v7007_v49 = vpop.eup %7006  ;;  %v1238_v19 = vadd.f32 1.0, %v7005_v27  ;;  %7020 = verf.f32 %v870_v36  ;;  %v5958_v16 = vpack.c.bf16 %v1786_v8, %v1780_v45  ;;  %v5704_v22 = vpack.c.bf16 %v1783_v39, %v1777_v12  ;;  %v9514_v48 = vld [vmem:[%s7648_s28 + $0x1d8] sm:$0xff]  ;;  %v9522_v61 = vld [vmem:[%s7648_s28 + $0x1d0] sm:$0xff] }
 0x1a4   : > { %v9517_v37 = vld [vmem:[%s7648_s28 + $0x1f8] sm:$0xff]  ;;  %v7009_v54 = vpop.eup %7008  ;;  %v9519_v23 = vmul.f32 %v1234_v29, %v658_v60  ;;  %v1233_v51 = vadd.f32 1.0, %v7007_v49  ;;  %7022 = verf.f32 %v865_v47  ;;  %5703 = vmatprep.subr.bf16.mxu1 %v5702_v58  ;;  %v5960_v62 = vpack.c.bf16 %v1785_v41, %v1779_v15  ;;  %v9525_v0 = vld [vmem:[%s7648_s28 + $0x1f0] sm:$0xff]  ;;  %v1796_v60 = vld [vmem:[%s7655_s8 + $0x228] sm:$0xff] }
 0x1a5   : > { %v9527_v45 = vmul.f32 %v1238_v19, %v662_v4  ;;  %v1237_v36 = vadd.f32 1.0, %v7009_v54  ;;  %v665_v8 = vmul.f32 0.5, %v9455_v28  ;;  %7024 = verf.f32 %v869_v1  ;;  %5959 = vmatprep.subr.bf16.mxu0 %v5958_v16  ;;  %5705 = vmatpush1.bf16.msra.mxu1 %v5704_v22  ;;  %v1790_v12 = vld [vmem:[%s7655_s8 + $0x1f8] sm:$0xff]  ;;  %v1792_v49 = vld [vmem:[%s7655_s8 + $0x208] sm:$0xff]  ;;  %v1789_v19 = vld [vmem:[%s7655_s8 + $0x1f0] sm:$0xff] }
 0x1a6   : > { %11771 = vst [vmem:[#allocation101_spill] sm:$0xff] %v9519_v23  ;;  %v7011_v29 = vpop.eup %7010  ;;  %2792 = vmatprep.mubr.f32.mxu1 %v9519_v23  ;;  %v9534_v39 = vmul.f32 %v1233_v51, %v657_v24  ;;  %v669_v47 = vmul.f32 0.5, %v9461_v14  ;;  %5961 = vmatpush1.bf16.msra.mxu0 %v5960_v62  ;;  %v874_v54 = vmul.f32 0.70710677, %v9514_v48  ;;  %v878_v1 = vmul.f32 0.70710677, %v9517_v37 }
 0x1a7   : > { %11772 = vst [vmem:[#allocation102_spill] sm:$0xff] %v9527_v45  ;;  %v1798_v28 = vld [vmem:[%s7655_s8 + $0x238] sm:$0xff]  ;;  %v7013_v4 = vpop.eup %7012  ;;  %3210 = vmatprep.mubr.f32.mxu0 %v9527_v45  ;;  %v9541_v16 = vmul.f32 %v1237_v36, %v661_v25  ;;  %v1242_v15 = vadd.f32 1.0, %v7011_v29  ;;  %v674_v24 = vmul.f32 0.5, %v9464_v17  ;;  %v873_v14 = vmul.f32 0.70710677, %v9522_v61 }
 0x1a8   : > { %11773 = vst [vmem:[#allocation103_spill] sm:$0xff] %v9534_v39  ;;  %v9546_v62 = vld [vmem:[%s7648_s28 + $0x218] sm:$0xff]  ;;  %2793 = vmatmul.mubr.f32.gmra.mrb[8].mxu1 %v9534_v39  ;;  %v1246_v41 = vadd.f32 1.0, %v7013_v4  ;;  %v678_v27 = vmul.f32 0.5, %v9472_v3  ;;  %7026 = verf.f32 %v874_v54  ;;  %v877_v58 = vmul.f32 0.70710677, %v9525_v0 }
 0x1a9   : > { %11774 = vst [vmem:[#allocation104_spill] sm:$0xff] %v9541_v16  ;;  %v9552_v25 = vld [vmem:[%s7648_s28 + $0x238] sm:$0xff]  ;;  %3211 = vmatmul.mubr.f32.gmra.mrb[8].mxu0 %v9541_v16  ;;  %v9556_v17 = vmul.f32 %v1242_v15, %v666_v63  ;;  %7028 = verf.f32 %v878_v1  ;;  %v5706_v22 = vpack.c.bf16 %v1796_v60, %v1790_v12  ;;  %v5962_v51 = vpack.c.bf16 %v1798_v28, %v1792_v49  ;;  %v1795_v36 = vld [vmem:[%s7655_s8 + $0x220] sm:$0xff]  ;;  %v1797_v45 = vld [vmem:[%s7655_s8 + $0x230] sm:$0xff] }
 0x1aa   : > { %v1791_v29 = vld [vmem:[%s7655_s8 + $0x200] sm:$0xff]  ;;  %v7015_v4 = vpop.eup %7014  ;;  %v9562_v3 = vmul.f32 %v1246_v41, %v9506_v20  ;;  %v673_v54 = vmul.f32 0.5, %v9475_v50  ;;  %7030 = verf.f32 %v873_v14  ;;  %v882_v39 = vmul.f32 0.70710677, %v9546_v62  ;;  %v9570_v49 = vld [vmem:[%s7648_s28 + $0x210] sm:$0xff] }
 0x1ab   : > { %11775 = vst [vmem:[#allocation105_spill] sm:$0xff] %v9556_v17  ;;  %v7017_v16 = vpop.eup %7016  ;;  %2798 = vmatprep.mubr.f32.mxu1 %v9556_v17  ;;  %v1241_v63 = vadd.f32 1.0, %v7015_v4  ;;  %v677_v12 = vmul.f32 0.5, %v9478_v7  ;;  %7032 = verf.f32 %v877_v58  ;;  %5707 = vmatprep.subr.bf16.mxu1 %v5706_v22  ;;  %v886_v60 = vmul.f32 0.70710677, %v9552_v25  ;;  %v9574_v15 = vld [vmem:[%s7648_s28 + $0x230] sm:$0xff] }
 0x1ac   : > { %11776 = vst [vmem:[#allocation106_spill] sm:$0xff] %v9562_v3  ;;  %v7019_v20 = vpop.eup %7018  ;;  %3216 = vmatprep.mubr.f32.mxu0 %v9562_v3  ;;  %v1245_v50 = vadd.f32 1.0, %v7017_v16  ;;  %5963 = vmatprep.subr.bf16.mxu0 %v5962_v51  ;;  %7034 = verf.f32 %v882_v39  ;;  %v5708_v1 = vpack.c.bf16 %v1795_v36, %v1789_v19  ;;  %v5964_v28 = vpack.c.bf16 %v1797_v45, %v1791_v29  ;;  %v9580_v22 = vld [vmem:[%s7648_s28 + $0x258] sm:$0xff]  ;;  %v9595_v36 = vld [vmem:[%s7648_s28 + $0x250] sm:$0xff] }
 0x1ad   : > { %v7021_v14 = vpop.eup %7020  ;;  %v9576_v7 = vmul.f32 %v1241_v63, %v665_v8  ;;  %v1250_v41 = vadd.f32 1.0, %v7019_v20  ;;  %v682_v58 = vmul.f32 0.5, %v9514_v48  ;;  %7036 = verf.f32 %v886_v60  ;;  %v9587_v8 = vld [vmem:[%s7648_s28 + $0x278] sm:$0xff] }
 0x1ae   : > { %v7023_v4 = vpop.eup %7022  ;;  %v9582_v3 = vmul.f32 %v1245_v50, %v669_v47  ;;  %v1254_v16 = vadd.f32 1.0, %v7021_v14  ;;  %v686_v39 = vmul.f32 0.5, %v9517_v37  ;;  %5709 = vmatpush1.bf16.msra.mxu1 %v5708_v1  ;;  %5965 = vmatpush1.bf16.msra.mxu0 %v5964_v28  ;;  %v881_v45 = vmul.f32 0.70710677, %v9570_v49  ;;  %v1802_v20 = vld [vmem:[%s7655_s8 + $0x258] sm:$0xff]  ;;  %v1804_v28 = vld [vmem:[%s7655_s8 + $0x268] sm:$0xff] }
 0x1af   : > { %11777 = vst [vmem:[#allocation107_spill] sm:$0xff] %v9576_v7  ;;  %v7025_v19 = vpop.eup %7024  ;;  %2799 = vmatmul.mubr.f32.gmra.mrb[10].mxu1 %v9576_v7  ;;  %v9590_v48 = vmul.f32 %v1250_v41, %v674_v24  ;;  %v1249_v51 = vadd.f32 1.0, %v7023_v4  ;;  %v681_v47 = vmul.f32 0.5, %v9522_v61  ;;  %v885_v37 = vmul.f32 0.70710677, %v9574_v15  ;;  %v9602_v24 = vld [vmem:[%s7648_s28 + $0x270] sm:$0xff] }
 0x1b0   : > { %11778 = vst [vmem:[#allocation108_spill] sm:$0xff] %v9582_v3  ;;  %3217 = vmatmul.mubr.f32.gmra.mrb[10].mxu0 %v9582_v3  ;;  %v9598_v29 = vmul.f32 %v1254_v16, %v678_v27  ;;  %v1253_v63 = vadd.f32 1.0, %v7025_v19  ;;  %7038 = verf.f32 %v881_v45  ;;  %v890_v60 = vmul.f32 0.70710677, %v9580_v22  ;;  %v1808_v27 = vld [vmem:[%s7655_s8 + $0x288] sm:$0xff]  ;;  %v1810_v14 = vld [vmem:[%s7655_s8 + $0x298] sm:$0xff] }
 0x1b1   : > { %11779 = vst [vmem:[#allocation109_spill] sm:$0xff] %v9590_v48  ;;  %2804 = vmatprep.mubr.f32.mxu1 %v9590_v48  ;;  %v9606_v61 = vmul.f32 %v1249_v51, %v673_v54  ;;  %v685_v50 = vmul.f32 0.5, %v9525_v0  ;;  %7040 = verf.f32 %v885_v37  ;;  %v894_v1 = vmul.f32 0.70710677, %v9587_v8  ;;  %v1801_v45 = vld [vmem:[%s7655_s8 + $0x250] sm:$0xff]  ;;  %v1807_v0 = vld [vmem:[%s7655_s8 + $0x280] sm:$0xff] }
 0x1b2   : > { %11780 = vst [vmem:[#allocation110_spill] sm:$0xff] %v9598_v29  ;;  %v7027_v41 = vpop.eup %7026  ;;  %3222 = vmatprep.mubr.f32.mxu0 %v9598_v29  ;;  %v9614_v4 = vmul.f32 %v1253_v63, %v677_v12  ;;  %v690_v16 = vmul.f32 0.5, %v9546_v62  ;;  %7042 = verf.f32 %v890_v60  ;;  %v889_v54 = vmul.f32 0.70710677, %v9595_v36  ;;  %v1803_v12 = vld [vmem:[%s7655_s8 + $0x260] sm:$0xff]  ;;  %v1809_v63 = vld [vmem:[%s7655_s8 + $0x290] sm:$0xff] }
 0x1b3   : > { %11781 = vst [vmem:[#allocation111_spill] sm:$0xff] %v9606_v61  ;;  %v7029_v19 = vpop.eup %7028  ;;  %2805 = vmatmul.mubr.f32.gmra.mrb[12].mxu1 %v9606_v61  ;;  %v1258_v51 = vadd.f32 1.0, %v7027_v41  ;;  %v694_v37 = vmul.f32 0.5, %v9552_v25  ;;  %7044 = verf.f32 %v894_v1  ;;  %v893_v29 = vmul.f32 0.70710677, %v9602_v24  ;;  %v9627_v7 = vld [vmem:[%s7648_s28 + $0x298] sm:$0xff] }
 0x1b4   : > { %11782 = vst [vmem:[#allocation112_spill] sm:$0xff] %v9614_v4  ;;  %v7031_v3 = vpop.eup %7030  ;;  %3223 = vmatmul.mubr.f32.gmra.mrb[12].mxu0 %v9614_v4  ;;  %v1262_v62 = vadd.f32 1.0, %v7029_v19  ;;  %7046 = verf.f32 %v889_v54  ;;  %v5710_v60 = vpack.c.bf16 %v1808_v27, %v1802_v20  ;;  %v5966_v48 = vpack.c.bf16 %v1810_v14, %v1804_v28  ;;  %v9632_v17 = vld [vmem:[%s7648_s28 + $0x2b8] sm:$0xff]  ;;  %v9638_v28 = vld [vmem:[%s7648_s28 + $0x290] sm:$0xff] }
 0x1b5   : > { %v7033_v41 = vpop.eup %7032  ;;  %v9629_v61 = vmul.f32 %v1258_v51, %v682_v58  ;;  %v1257_v25 = vadd.f32 1.0, %v7031_v3  ;;  %7048 = verf.f32 %v893_v29  ;;  %v5712_v1 = vpack.c.bf16 %v1807_v0, %v1801_v45  ;;  %v9641_v58 = vld [vmem:[%s7648_s28 + $0x2b0] sm:$0xff]  ;;  %v1820_v45 = vld [vmem:[%s7655_s8 + $0x2e8] sm:$0xff] }
 0x1b6   : > { %v7035_v23 = vpop.eup %7034  ;;  %v9634_v33 = vmul.f32 %v1262_v62, %v686_v39  ;;  %v1261_v54 = vadd.f32 1.0, %v7033_v41  ;;  %v689_v20 = vmul.f32 0.5, %v9570_v49  ;;  %5711 = vmatprep.subr.bf16.mxu1 %v5710_v60  ;;  %5967 = vmatprep.subr.bf16.mxu0 %v5966_v48  ;;  %v5968_v27 = vpack.c.bf16 %v1809_v63, %v1803_v12  ;;  %v1814_v48 = vld [vmem:[%s7655_s8 + $0x2b8] sm:$0xff] }
 0x1b7   : > { %11783 = vst [vmem:[#allocation113_spill] sm:$0xff] %v9629_v61  ;;  %v7037_v3 = vpop.eup %7036  ;;  %2810 = vmatprep.mubr.f32.mxu1 %v9629_v61  ;;  %v9644_v29 = vmul.f32 %v1257_v25, %v681_v47  ;;  %v1266_v39 = vadd.f32 1.0, %v7035_v23  ;;  %v693_v14 = vmul.f32 0.5, %v9574_v15  ;;  %5713 = vmatpush1.bf16.msra.mxu1 %v5712_v1  ;;  %v898_v49 = vmul.f32 0.70710677, %v9627_v7  ;;  %v1816_v23 = vld [vmem:[%s7655_s8 + $0x2c8] sm:$0xff] }
 0x1b8   : > { %11784 = vst [vmem:[#allocation114_spill] sm:$0xff] %v9634_v33  ;;  %3228 = vmatprep.mubr.f32.mxu0 %v9634_v33  ;;  %v9651_v0 = vmul.f32 %v1261_v54, %v685_v50  ;;  %v1270_v19 = vadd.f32 1.0, %v7037_v3  ;;  %v698_v51 = vmul.f32 0.5, %v9580_v22  ;;  %5969 = vmatpush1.bf16.msra.mxu0 %v5968_v27  ;;  %v902_v47 = vmul.f32 0.70710677, %v9632_v17  ;;  %v1822_v15 = vld [vmem:[%s7655_s8 + $0x2f8] sm:$0xff] }
 0x1b9   : > { %11785 = vst [vmem:[#allocation115_spill] sm:$0xff] %v9644_v29  ;;  %2811 = vmatmul.mubr.f32.gmra.mrb[14].mxu1 %v9644_v29  ;;  %v9658_v12 = vmul.f32 %v1266_v39, %v690_v16  ;;  %v702_v63 = vmul.f32 0.5, %v9587_v8  ;;  %7050 = verf.f32 %v898_v49  ;;  %v897_v50 = vmul.f32 0.70710677, %v9638_v28  ;;  %v9663_v62 = vld [vmem:[%s7648_s28 + $0x2d8] sm:$0xff]  ;;  %v1813_v1 = vld [vmem:[%s7655_s8 + $0x2b0] sm:$0xff] }
 0x1ba   : > { %11786 = vst [vmem:[#allocation116_spill] sm:$0xff] %v9651_v0  ;;  %v7039_v22 = vpop.eup %7038  ;;  %3229 = vmatmul.mubr.f32.gmra.mrb[14].mxu0 %v9651_v0  ;;  %v9666_v60 = vmul.f32 %v1270_v19, %v694_v37  ;;  %7052 = verf.f32 %v902_v47  ;;  %v901_v41 = vmul.f32 0.70710677, %v9641_v58  ;;  %v5714_v25 = vpack.c.bf16 %v1820_v45, %v1814_v48  ;;  %v9670_v16 = vld [vmem:[%s7648_s28 + $0x2f8] sm:$0xff]  ;;  %v1819_v8 = vld [vmem:[%s7655_s8 + $0x2e0] sm:$0xff]  ;;  %v1821_v37 = vld [vmem:[%s7655_s8 + $0x2f0] sm:$0xff] }
 0x1bb   : > { %11787 = vst [vmem:[#allocation117_spill] sm:$0xff] %v9658_v12  ;;  %v7041_v54 = vpop.eup %7040  ;;  %2816 = vmatprep.mubr.f32.mxu1 %v9658_v12  ;;  %v1265_v27 = vadd.f32 1.0, %v7039_v22  ;;  %v697_v3 = vmul.f32 0.5, %v9595_v36  ;;  %7054 = verf.f32 %v897_v50  ;;  %v5970_v39 = vpack.c.bf16 %v1822_v15, %v1816_v23  ;;  %v1815_v49 = vld [vmem:[%s7655_s8 + $0x2c0] sm:$0xff]  ;;  %v9685_v50 = vld [vmem:[%s7648_s28 + $0x2d0] sm:$0xff]  ;;  %v9744_v12 = vld [vmem:[%s7648_s28 + $0x378] sm:$0xff] }
 0x1bc   : > { %11788 = vst [vmem:[#allocation118_spill] sm:$0xff] %v9666_v60  ;;  %v7043_v19 = vpop.eup %7042  ;;  %3234 = vmatprep.mubr.f32.mxu0 %v9666_v60  ;;  %v1269_v47 = vadd.f32 1.0, %v7041_v54  ;;  %v701_v48 = vmul.f32 0.5, %v9602_v24  ;;  %7056 = verf.f32 %v901_v41  ;;  %5715 = vmatprep.subr.bf16.mxu1 %v5714_v25  ;;  %v906_v45 = vmul.f32 0.70710677, %v9663_v62  ;;  %v9690_v60 = vld [vmem:[%s7648_s28 + $0x2f0] sm:$0xff] }
 0x1bd   : > { %v7045_v22 = vpop.eup %7044  ;;  %v9681_v0 = vmul.f32 %v1265_v27, %v689_v20  ;;  %v1274_v36 = vadd.f32 1.0, %v7043_v19  ;;  %5971 = vmatprep.subr.bf16.mxu0 %v5970_v39  ;;  %v910_v23 = vmul.f32 0.70710677, %v9670_v16  ;;  %v5716_v15 = vpack.c.bf16 %v1819_v8, %v1813_v1  ;;  %v9693_v20 = vld [vmem:[%s7648_s28 + $0x318] sm:$0xff]  ;;  %v9703_v19 = vld [vmem:[%s7648_s28 + $0x310] sm:$0xff] }
 0x1be   : > { %v7047_v24 = vpop.eup %7046  ;;  %v9687_v54 = vmul.f32 %v1269_v47, %v693_v14  ;;  %v1278_v41 = vadd.f32 1.0, %v7045_v22  ;;  %7058 = verf.f32 %v906_v45  ;;  %v5972_v25 = vpack.c.bf16 %v1821_v37, %v1815_v49  ;;  %v9700_v14 = vld [vmem:[%s7648_s28 + $0x338] sm:$0xff]  ;;  %v9706_v49 = vld [vmem:[%s7648_s28 + $0x330] sm:$0xff]  ;;  %v1832_v22 = vld [vmem:[%s7655_s8 + $0x348] sm:$0xff] }
 0x1bf   : > { %11789 = vst [vmem:[#allocation119_spill] sm:$0xff] %v9681_v0  ;;  %v7049_v27 = vpop.eup %7048  ;;  %2817 = vmatmul.mubr.f32.gmra.mrb[16].mxu1 %v9681_v0  ;;  %v9696_v1 = vmul.f32 %v1274_v36, %v698_v51  ;;  %v1273_v8 = vadd.f32 1.0, %v7047_v24  ;;  %v706_v39 = vmul.f32 0.5, %v9627_v7  ;;  %7060 = verf.f32 %v910_v23  ;;  %v1826_v7 = vld [vmem:[%s7655_s8 + $0x318] sm:$0xff] }
 0x1c0   : > { %11790 = vst [vmem:[#allocation120_spill] sm:$0xff] %v9687_v54  ;;  %3235 = vmatmul.mubr.f32.gmra.mrb[16].mxu0 %v9687_v54  ;;  %v9709_v37 = vmul.f32 %v1278_v41, %v702_v63  ;;  %v1277_v47 = vadd.f32 1.0, %v7049_v27  ;;  %v710_v45 = vmul.f32 0.5, %v9632_v17  ;;  %5717 = vmatpush1.bf16.msra.mxu1 %v5716_v15  ;;  %v905_v51 = vmul.f32 0.70710677, %v9685_v50  ;;  %v1828_v17 = vld [vmem:[%s7655_s8 + $0x328] sm:$0xff] }
 0x1c1   : > { %11791 = vst [vmem:[#allocation121_spill] sm:$0xff] %v9696_v1  ;;  %2822 = vmatprep.mubr.f32.mxu1 %v9696_v1  ;;  %v9716_v36 = vmul.f32 %v1273_v8, %v697_v3  ;;  %v705_v23 = vmul.f32 0.5, %v9638_v28  ;;  %5973 = vmatpush1.bf16.msra.mxu0 %v5972_v25  ;;  %v909_v63 = vmul.f32 0.70710677, %v9690_v60  ;;  %v914_v24 = vmul.f32 0.70710677, %v9693_v20 }
 0x1c2   : > { %11792 = vst [vmem:[#allocation122_spill] sm:$0xff] %v9709_v37  ;;  %3240 = vmatprep.mubr.f32.mxu0 %v9709_v37  ;;  %v9723_v15 = vmul.f32 %v1277_v47, %v701_v48  ;;  %v709_v41 = vmul.f32 0.5, %v9641_v58  ;;  %7062 = verf.f32 %v905_v51  ;;  %v918_v3 = vmul.f32 0.70710677, %v9700_v14  ;;  %v1834_v27 = vld [vmem:[%s7655_s8 + $0x358] sm:$0xff]  ;;  %v1825_v8 = vld [vmem:[%s7655_s8 + $0x310] sm:$0xff] }
 0x1c3   : > { %11793 = vst [vmem:[#allocation123_spill] sm:$0xff] %v9716_v36  ;;  %v1831_v28 = vld [vmem:[%s7655_s8 + $0x340] sm:$0xff]  ;;  %v7051_v25 = vpop.eup %7050  ;;  %2823 = vmatmul.mubr.f32.gmra.mrb[18].mxu1 %v9716_v36  ;;  %v714_v54 = vmul.f32 0.5, %v9663_v62  ;;  %v9733_v33 = vmul.f32 0.5, %v9670_v16  ;;  %7064 = verf.f32 %v909_v63  ;;  %v913_v48 = vmul.f32 0.70710677, %v9703_v19 }
 0x1c4   : > { %11794 = vst [vmem:[#allocation124_spill] sm:$0xff] %v9723_v15  ;;  %v1827_v58 = vld [vmem:[%s7655_s8 + $0x320] sm:$0xff]  ;;  %v1833_v47 = vld [vmem:[%s7655_s8 + $0x350] sm:$0xff]  ;;  %v7053_v51 = vpop.eup %7052  ;;  %3241 = vmatmul.mubr.f32.gmra.mrb[18].mxu0 %v9723_v15  ;;  %v1282_v37 = vadd.f32 1.0, %v7051_v25  ;;  %7066 = verf.f32 %v914_v24  ;;  %v917_v4 = vmul.f32 0.70710677, %v9706_v49  ;;  %v5718_v62 = vpack.c.bf16 %v1832_v22, %v1826_v7 }
 0x1c5   : > { %v7055_v36 = vpop.eup %7054  ;;  %v1286_v16 = vadd.f32 1.0, %v7053_v51  ;;  %7068 = verf.f32 %v918_v3  ;;  %v5974_v1 = vpack.c.bf16 %v1834_v27, %v1828_v17  ;;  %v5720_v63 = vpack.c.bf16 %v1831_v28, %v1825_v8  ;;  %v9741_v0 = vld [vmem:[%s7648_s28 + $0x358] sm:$0xff]  ;;  %v9749_v7 = vld [vmem:[%s7648_s28 + $0x350] sm:$0xff] }
 0x1c6   : > { %v7057_v29 = vpop.eup %7056  ;;  %v9746_v25 = vmul.f32 %v1282_v37, %v706_v39  ;;  %v1281_v24 = vadd.f32 1.0, %v7055_v36  ;;  %7070 = verf.f32 %v913_v48  ;;  %5719 = vmatprep.subr.bf16.mxu1 %v5718_v62  ;;  %v5976_v15 = vpack.c.bf16 %v1833_v47, %v1827_v58  ;;  %v9752_v22 = vld [vmem:[%s7648_s28 + $0x370] sm:$0xff]  ;;  %v1838_v8 = vld [vmem:[%s7655_s8 + $0x378] sm:$0xff]  ;;  %v1844_v39 = vld [vmem:[%s7655_s8 + $0x3a8] sm:$0xff] }
 0x1c7   : > { %v9754_v17 = vmul.f32 %v1286_v16, %v710_v45  ;;  %v1285_v3 = vadd.f32 1.0, %v7057_v29  ;;  %v713_v27 = vmul.f32 0.5, %v9685_v50  ;;  %7072 = verf.f32 %v917_v4  ;;  %5975 = vmatprep.subr.bf16.mxu0 %v5974_v1  ;;  %5721 = vmatpush1.bf16.msra.mxu1 %v5720_v63  ;;  %v1840_v37 = vld [vmem:[%s7655_s8 + $0x388] sm:$0xff]  ;;  %v1846_v50 = vld [vmem:[%s7655_s8 + $0x3b8] sm:$0xff]  ;;  %v1837_v16 = vld [vmem:[%s7655_s8 + $0x370] sm:$0xff] }
 0x1c8   : > { %11795 = vst [vmem:[#allocation125_spill] sm:$0xff] %v9746_v25  ;;  %v7059_v36 = vpop.eup %7058  ;;  %2828 = vmatprep.mubr.f32.mxu1 %v9746_v25  ;;  %v9761_v28 = vmul.f32 %v1281_v24, %v705_v23  ;;  %v717_v48 = vmul.f32 0.5, %v9690_v60  ;;  %5977 = vmatpush1.bf16.msra.mxu0 %v5976_v15  ;;  %v922_v29 = vmul.f32 0.70710677, %v9741_v0  ;;  %v926_v4 = vmul.f32 0.70710677, %v9744_v12 }
 0x1c9   : > { %11796 = vst [vmem:[#allocation126_spill] sm:$0xff] %v9754_v17  ;;  %v7061_v1 = vpop.eup %7060  ;;  %3246 = vmatprep.mubr.f32.mxu0 %v9754_v17  ;;  %v9768_v45 = vmul.f32 %v1285_v3, %v709_v41  ;;  %v1290_v58 = vadd.f32 1.0, %v7059_v36  ;;  %v722_v23 = vmul.f32 0.5, %v9693_v20  ;;  %v921_v60 = vmul.f32 0.70710677, %v9749_v7  ;;  %v9773_v15 = vld [vmem:[%s7648_s28 + $0x398] sm:$0xff] }
 0x1ca   : > { %11797 = vst [vmem:[#allocation127_spill] sm:$0xff] %v9761_v28  ;;  %2829 = vmatmul.mubr.f32.gmra.mrb[20].mxu1 %v9761_v28  ;;  %v1294_v47 = vadd.f32 1.0, %v7061_v1  ;;  %v726_v51 = vmul.f32 0.5, %v9700_v14  ;;  %7074 = verf.f32 %v922_v29  ;;  %v925_v62 = vmul.f32 0.70710677, %v9752_v22  ;;  %v9779_v41 = vld [vmem:[%s7648_s28 + $0x3b8] sm:$0xff] }
 0x1cb   : > { %11798 = vst [vmem:[#allocation128_spill] sm:$0xff] %v9768_v45  ;;  %3247 = vmatmul.mubr.f32.gmra.mrb[20].mxu0 %v9768_v45  ;;  %v9783_v20 = vmul.f32 %v1290_v58, %v714_v54  ;;  %7076 = verf.f32 %v926_v4  ;;  %v5722_v63 = vpack.c.bf16 %v1844_v39, %v1838_v8  ;;  %v5978_v24 = vpack.c.bf16 %v1846_v50, %v1840_v37  ;;  %v1843_v3 = vld [vmem:[%s7655_s8 + $0x3a0] sm:$0xff]  ;;  %v1845_v17 = vld [vmem:[%s7655_s8 + $0x3b0] sm:$0xff] }
 0x1cc   : > { %v1839_v36 = vld [vmem:[%s7655_s8 + $0x380] sm:$0xff]  ;;  %v7063_v1 = vpop.eup %7062  ;;  %v9789_v14 = vmul.f32 %v1294_v47, %v9733_v33  ;;  %v721_v29 = vmul.f32 0.5, %v9703_v19  ;;  %7078 = verf.f32 %v921_v60  ;;  %v930_v28 = vmul.f32 0.70710677, %v9773_v15  ;;  %v9797_v37 = vld [vmem:[%s7648_s28 + $0x390] sm:$0xff] }
 0x1cd   : > { %11799 = vst [vmem:[#allocation129_spill] sm:$0xff] %v9783_v20  ;;  %v7065_v45 = vpop.eup %7064  ;;  %2834 = vmatprep.mubr.f32.mxu1 %v9783_v20  ;;  %v1289_v54 = vadd.f32 1.0, %v7063_v1  ;;  %v725_v8 = vmul.f32 0.5, %v9706_v49  ;;  %7080 = verf.f32 %v925_v62  ;;  %5723 = vmatprep.subr.bf16.mxu1 %v5722_v63  ;;  %v934_v39 = vmul.f32 0.70710677, %v9779_v41  ;;  %v9801_v58 = vld [vmem:[%s7648_s28 + $0x3b0] sm:$0xff] }
 0x1ce   : > { %11800 = vst [vmem:[#allocation130_spill] sm:$0xff] %v9789_v14  ;;  %v7067_v33 = vpop.eup %7066  ;;  %3252 = vmatprep.mubr.f32.mxu0 %v9789_v14  ;;  %v1293_v19 = vadd.f32 1.0, %v7065_v45  ;;  %5979 = vmatprep.subr.bf16.mxu0 %v5978_v24  ;;  %7082 = verf.f32 %v930_v28  ;;  %v5724_v4 = vpack.c.bf16 %v1843_v3, %v1837_v16  ;;  %v5980_v50 = vpack.c.bf16 %v1845_v17, %v1839_v36  ;;  %v9807_v63 = vld [vmem:[%s7648_s28 + $0x3d8] sm:$0xff]  ;;  %v9822_v3 = vld [vmem:[%s7648_s28 + $0x3d0] sm:$0xff] }
 0x1cf   : > { %v7069_v60 = vpop.eup %7068  ;;  %v9803_v49 = vmul.f32 %v1289_v54, %v713_v27  ;;  %v1298_v47 = vadd.f32 1.0, %v7067_v33  ;;  %v730_v62 = vmul.f32 0.5, %v9741_v0  ;;  %7084 = verf.f32 %v934_v39  ;;  %v9814_v27 = vld [vmem:[%s7648_s28 + $0x3f8] sm:$0xff] }
 0x1d0   : > { %v7071_v1 = vpop.eup %7070  ;;  %v9809_v14 = vmul.f32 %v1293_v19, %v717_v48  ;;  %v1302_v45 = vadd.f32 1.0, %v7069_v60  ;;  %v734_v28 = vmul.f32 0.5, %v9744_v12  ;;  %5725 = vmatpush1.bf16.msra.mxu1 %v5724_v4  ;;  %5981 = vmatpush1.bf16.msra.mxu0 %v5980_v50  ;;  %v929_v17 = vmul.f32 0.70710677, %v9797_v37  ;;  %v1850_v33 = vld [vmem:[%s7655_s8 + $0x3d8] sm:$0xff]  ;;  %v1852_v50 = vld [vmem:[%s7655_s8 + $0x3e8] sm:$0xff] }
 0x1d1   : > { %11801 = vst [vmem:[#allocation131_spill] sm:$0xff] %v9803_v49  ;;  %v7073_v16 = vpop.eup %7072  ;;  %2835 = vmatmul.mubr.f32.gmra.mrb[22].mxu1 %v9803_v49  ;;  %v9817_v0 = vmul.f32 %v1298_v47, %v722_v23  ;;  %v1297_v24 = vadd.f32 1.0, %v7071_v1  ;;  %v729_v48 = vmul.f32 0.5, %v9749_v7  ;;  %v933_v12 = vmul.f32 0.70710677, %v9801_v58  ;;  %v9829_v23 = vld [vmem:[%s7648_s28 + $0x3f0] sm:$0xff] }
 0x1d2   : > { %11802 = vst [vmem:[#allocation132_spill] sm:$0xff] %v9809_v14  ;;  %3253 = vmatmul.mubr.f32.gmra.mrb[22].mxu0 %v9809_v14  ;;  %v9825_v36 = vmul.f32 %v1302_v45, %v726_v51  ;;  %v1301_v54 = vadd.f32 1.0, %v7073_v16  ;;  %7086 = verf.f32 %v929_v17  ;;  %v938_v39 = vmul.f32 0.70710677, %v9807_v63  ;;  %v1856_v51 = vld [vmem:[%s7655_s8 + $0x408] sm:$0xff]  ;;  %v1858_v60 = vld [vmem:[%s7655_s8 + $0x418] sm:$0xff] }
 0x1d3   : > { %11803 = vst [vmem:[#allocation133_spill] sm:$0xff] %v9817_v0  ;;  %2840 = vmatprep.mubr.f32.mxu1 %v9817_v0  ;;  %v9833_v7 = vmul.f32 %v1297_v24, %v721_v29  ;;  %v733_v19 = vmul.f32 0.5, %v9752_v22  ;;  %7088 = verf.f32 %v933_v12  ;;  %v942_v4 = vmul.f32 0.70710677, %v9814_v27  ;;  %v1849_v17 = vld [vmem:[%s7655_s8 + $0x3d0] sm:$0xff]  ;;  %v1855_v22 = vld [vmem:[%s7655_s8 + $0x400] sm:$0xff] }
 0x1d4   : > { %11804 = vst [vmem:[#allocation134_spill] sm:$0xff] %v9825_v36  ;;  %v7075_v47 = vpop.eup %7074  ;;  %3258 = vmatprep.mubr.f32.mxu0 %v9825_v36  ;;  %v9841_v1 = vmul.f32 %v1301_v54, %v725_v8  ;;  %v738_v45 = vmul.f32 0.5, %v9773_v15  ;;  %7090 = verf.f32 %v938_v39  ;;  %v937_v29 = vmul.f32 0.70710677, %v9822_v3  ;;  %v1851_v8 = vld [vmem:[%s7655_s8 + $0x3e0] sm:$0xff]  ;;  %v1857_v54 = vld [vmem:[%s7655_s8 + $0x410] sm:$0xff] }
 0x1d5   : > { %11805 = vst [vmem:[#allocation135_spill] sm:$0xff] %v9833_v7  ;;  %v7077_v16 = vpop.eup %7076  ;;  %2841 = vmatmul.mubr.f32.gmra.mrb[24].mxu1 %v9833_v7  ;;  %v1306_v24 = vadd.f32 1.0, %v7075_v47  ;;  %v742_v12 = vmul.f32 0.5, %v9779_v41  ;;  %7092 = verf.f32 %v942_v4  ;;  %v941_v36 = vmul.f32 0.70710677, %v9829_v23  ;;  %v9854_v49 = vld [vmem:[%s7648_s28 + $0x418] sm:$0xff] }
 0x1d6   : > { %11806 = vst [vmem:[#allocation136_spill] sm:$0xff] %v9841_v1  ;;  %v7079_v14 = vpop.eup %7078  ;;  %3259 = vmatmul.mubr.f32.gmra.mrb[24].mxu0 %v9841_v1  ;;  %v1310_v15 = vadd.f32 1.0, %v7077_v16  ;;  %7094 = verf.f32 %v937_v29  ;;  %v5726_v39 = vpack.c.bf16 %v1856_v51, %v1850_v33  ;;  %v5982_v0 = vpack.c.bf16 %v1858_v60, %v1852_v50  ;;  %v9859_v20 = vld [vmem:[%s7648_s28 + $0x438] sm:$0xff]  ;;  %v9865_v50 = vld [vmem:[%s7648_s28 + $0x410] sm:$0xff] }
 0x1d7   : > { %v7081_v47 = vpop.eup %7080  ;;  %v9856_v7 = vmul.f32 %v1306_v24, %v730_v62  ;;  %v1305_v41 = vadd.f32 1.0, %v7079_v14  ;;  %7096 = verf.f32 %v941_v36  ;;  %v5728_v4 = vpack.c.bf16 %v1855_v22, %v1849_v17  ;;  %v9868_v62 = vld [vmem:[%s7648_s28 + $0x430] sm:$0xff]  ;;  %v1868_v17 = vld [vmem:[%s7655_s8 + $0x468] sm:$0xff] }
 0x1d8   : > { %v7083_v25 = vpop.eup %7082  ;;  %v9861_v61 = vmul.f32 %v1310_v15, %v734_v28  ;;  %v1309_v29 = vadd.f32 1.0, %v7081_v47  ;;  %v737_v33 = vmul.f32 0.5, %v9797_v37  ;;  %5727 = vmatprep.subr.bf16.mxu1 %v5726_v39  ;;  %5983 = vmatprep.subr.bf16.mxu0 %v5982_v0  ;;  %v5984_v51 = vpack.c.bf16 %v1857_v54, %v1851_v8  ;;  %v1862_v0 = vld [vmem:[%s7655_s8 + $0x438] sm:$0xff] }
 0x1d9   : > { %11807 = vst [vmem:[#allocation137_spill] sm:$0xff] %v9856_v7  ;;  %v7085_v14 = vpop.eup %7084  ;;  %2846 = vmatprep.mubr.f32.mxu1 %v9856_v7  ;;  %v9871_v36 = vmul.f32 %v1305_v41, %v729_v48  ;;  %v1314_v28 = vadd.f32 1.0, %v7083_v25  ;;  %v741_v60 = vmul.f32 0.5, %v9801_v58  ;;  %5729 = vmatpush1.bf16.msra.mxu1 %v5728_v4  ;;  %v946_v37 = vmul.f32 0.70710677, %v9854_v49  ;;  %v1864_v25 = vld [vmem:[%s7655_s8 + $0x448] sm:$0xff] }
 0x1da   : > { %11808 = vst [vmem:[#allocation138_spill] sm:$0xff] %v9861_v61  ;;  %3264 = vmatprep.mubr.f32.mxu0 %v9861_v61  ;;  %v9878_v22 = vmul.f32 %v1309_v29, %v733_v19  ;;  %v1318_v16 = vadd.f32 1.0, %v7085_v14  ;;  %v746_v24 = vmul.f32 0.5, %v9807_v63  ;;  %5985 = vmatpush1.bf16.msra.mxu0 %v5984_v51  ;;  %v950_v48 = vmul.f32 0.70710677, %v9859_v20  ;;  %v1870_v58 = vld [vmem:[%s7655_s8 + $0x478] sm:$0xff] }
 0x1db   : > { %11809 = vst [vmem:[#allocation139_spill] sm:$0xff] %v9871_v36  ;;  %2847 = vmatmul.mubr.f32.gmra.mrb[26].mxu1 %v9871_v36  ;;  %v9885_v8 = vmul.f32 %v1314_v28, %v738_v45  ;;  %v750_v54 = vmul.f32 0.5, %v9814_v27  ;;  %7098 = verf.f32 %v946_v37  ;;  %v945_v19 = vmul.f32 0.70710677, %v9865_v50  ;;  %v9890_v15 = vld [vmem:[%s7648_s28 + $0x458] sm:$0xff]  ;;  %v1861_v4 = vld [vmem:[%s7655_s8 + $0x430] sm:$0xff] }
 0x1dc   : > { %11810 = vst [vmem:[#allocation140_spill] sm:$0xff] %v9878_v22  ;;  %v7087_v63 = vpop.eup %7086  ;;  %3265 = vmatmul.mubr.f32.gmra.mrb[26].mxu0 %v9878_v22  ;;  %v9893_v39 = vmul.f32 %v1318_v16, %v742_v12  ;;  %7100 = verf.f32 %v950_v48  ;;  %v949_v47 = vmul.f32 0.70710677, %v9868_v62  ;;  %v5730_v41 = vpack.c.bf16 %v1868_v17, %v1862_v0  ;;  %v9897_v45 = vld [vmem:[%s7648_s28 + $0x478] sm:$0xff]  ;;  %v1867_v27 = vld [vmem:[%s7655_s8 + $0x460] sm:$0xff]  ;;  %v1869_v12 = vld [vmem:[%s7655_s8 + $0x470] sm:$0xff] }
 0x1dd   : > { %11811 = vst [vmem:[#allocation141_spill] sm:$0xff] %v9885_v8  ;;  %v7089_v29 = vpop.eup %7088  ;;  %2852 = vmatprep.mubr.f32.mxu1 %v9885_v8  ;;  %v1313_v51 = vadd.f32 1.0, %v7087_v63  ;;  %v745_v14 = vmul.f32 0.5, %v9822_v3  ;;  %7102 = verf.f32 %v945_v19  ;;  %v5986_v28 = vpack.c.bf16 %v1870_v58, %v1864_v25  ;;  %v1863_v37 = vld [vmem:[%s7655_s8 + $0x440] sm:$0xff]  ;;  %v9912_v19 = vld [vmem:[%s7648_s28 + $0x450] sm:$0xff]  ;;  %v9971_v8 = vld [vmem:[%s7648_s28 + $0x4f8] sm:$0xff] }
 0x1de   : > { %11812 = vst [vmem:[#allocation142_spill] sm:$0xff] %v9893_v39  ;;  %v7091_v16 = vpop.eup %7090  ;;  %3270 = vmatprep.mubr.f32.mxu0 %v9893_v39  ;;  %v1317_v48 = vadd.f32 1.0, %v7089_v29  ;;  %v749_v0 = vmul.f32 0.5, %v9829_v23  ;;  %7104 = verf.f32 %v949_v47  ;;  %5731 = vmatprep.subr.bf16.mxu1 %v5730_v41  ;;  %v954_v17 = vmul.f32 0.70710677, %v9890_v15  ;;  %v9917_v39 = vld [vmem:[%s7648_s28 + $0x470] sm:$0xff] }
 0x1df   : > { %v7093_v63 = vpop.eup %7092  ;;  %v9908_v22 = vmul.f32 %v1313_v51, %v737_v33  ;;  %v1322_v3 = vadd.f32 1.0, %v7091_v16  ;;  %5987 = vmatprep.subr.bf16.mxu0 %v5986_v28  ;;  %v958_v25 = vmul.f32 0.70710677, %v9897_v45  ;;  %v5732_v58 = vpack.c.bf16 %v1867_v27, %v1861_v4  ;;  %v9920_v33 = vld [vmem:[%s7648_s28 + $0x498] sm:$0xff]  ;;  %v9930_v16 = vld [vmem:[%s7648_s28 + $0x490] sm:$0xff] }
 0x1e0   : > { %v7095_v23 = vpop.eup %7094  ;;  %v9914_v29 = vmul.f32 %v1317_v48, %v741_v60  ;;  %v1326_v47 = vadd.f32 1.0, %v7093_v63  ;;  %7106 = verf.f32 %v954_v17  ;;  %v5988_v41 = vpack.c.bf16 %v1869_v12, %v1863_v37  ;;  %v9927_v60 = vld [vmem:[%s7648_s28 + $0x4b8] sm:$0xff]  ;;  %v9933_v37 = vld [vmem:[%s7648_s28 + $0x4b0] sm:$0xff]  ;;  %v1880_v63 = vld [vmem:[%s7655_s8 + $0x4c8] sm:$0xff] }
 0x1e1   : > { %11813 = vst [vmem:[#allocation143_spill] sm:$0xff] %v9908_v22  ;;  %v7097_v51 = vpop.eup %7096  ;;  %2853 = vmatmul.mubr.f32.gmra.mrb[28].mxu1 %v9908_v22  ;;  %v9923_v4 = vmul.f32 %v1322_v3, %v746_v24  ;;  %v1321_v27 = vadd.f32 1.0, %v7095_v23  ;;  %v754_v28 = vmul.f32 0.5, %v9854_v49  ;;  %7108 = verf.f32 %v958_v25  ;;  %v1874_v49 = vld [vmem:[%s7655_s8 + $0x498] sm:$0xff] }
 0x1e2   : > { %11814 = vst [vmem:[#allocation144_spill] sm:$0xff] %v9914_v29  ;;  %3271 = vmatmul.mubr.f32.gmra.mrb[28].mxu0 %v9914_v29  ;;  %v9936_v12 = vmul.f32 %v1326_v47, %v750_v54  ;;  %v1325_v48 = vadd.f32 1.0, %v7097_v51  ;;  %v758_v17 = vmul.f32 0.5, %v9859_v20  ;;  %5733 = vmatpush1.bf16.msra.mxu1 %v5732_v58  ;;  %v953_v24 = vmul.f32 0.70710677, %v9912_v19  ;;  %v1876_v20 = vld [vmem:[%s7655_s8 + $0x4a8] sm:$0xff] }
 0x1e3   : > { %11815 = vst [vmem:[#allocation145_spill] sm:$0xff] %v9923_v4  ;;  %2858 = vmatprep.mubr.f32.mxu1 %v9923_v4  ;;  %v9943_v3 = vmul.f32 %v1321_v27, %v745_v14  ;;  %v753_v25 = vmul.f32 0.5, %v9865_v50  ;;  %5989 = vmatpush1.bf16.msra.mxu0 %v5988_v41  ;;  %v957_v54 = vmul.f32 0.70710677, %v9917_v39  ;;  %v962_v23 = vmul.f32 0.70710677, %v9920_v33 }
 0x1e4   : > { %11816 = vst [vmem:[#allocation146_spill] sm:$0xff] %v9936_v12  ;;  %3276 = vmatprep.mubr.f32.mxu0 %v9936_v12  ;;  %v9950_v58 = vmul.f32 %v1325_v48, %v749_v0  ;;  %v757_v47 = vmul.f32 0.5, %v9868_v62  ;;  %7110 = verf.f32 %v953_v24  ;;  %v966_v14 = vmul.f32 0.70710677, %v9927_v60  ;;  %v1882_v51 = vld [vmem:[%s7655_s8 + $0x4d8] sm:$0xff]  ;;  %v1873_v27 = vld [vmem:[%s7655_s8 + $0x490] sm:$0xff] }
 0x1e5   : > { %11817 = vst [vmem:[#allocation147_spill] sm:$0xff] %v9943_v3  ;;  %v1879_v50 = vld [vmem:[%s7655_s8 + $0x4c0] sm:$0xff]  ;;  %v7099_v41 = vpop.eup %7098  ;;  %2859 = vmatmul.mubr.f32.gmra.mrb[30].mxu1 %v9943_v3  ;;  %v762_v29 = vmul.f32 0.5, %v9890_v15  ;;  %v9960_v61 = vmul.f32 0.5, %v9897_v45  ;;  %7112 = verf.f32 %v957_v54  ;;  %v961_v0 = vmul.f32 0.70710677, %v9930_v16 }
 0x1e6   : > { %11818 = vst [vmem:[#allocation148_spill] sm:$0xff] %v9950_v58  ;;  %v1875_v62 = vld [vmem:[%s7655_s8 + $0x4a0] sm:$0xff]  ;;  %v1881_v48 = vld [vmem:[%s7655_s8 + $0x4d0] sm:$0xff]  ;;  %v7101_v24 = vpop.eup %7100  ;;  %3277 = vmatmul.mubr.f32.gmra.mrb[30].mxu0 %v9950_v58  ;;  %v1330_v12 = vadd.f32 1.0, %v7099_v41  ;;  %7114 = verf.f32 %v962_v23  ;;  %v965_v1 = vmul.f32 0.70710677, %v9933_v37  ;;  %v5734_v15 = vpack.c.bf16 %v1880_v63, %v1874_v49 }
 0x1e7   : > { %v7103_v3 = vpop.eup %7102  ;;  %v1334_v45 = vadd.f32 1.0, %v7101_v24  ;;  %7116 = verf.f32 %v966_v14  ;;  %v5990_v4 = vpack.c.bf16 %v1882_v51, %v1876_v20  ;;  %v5736_v54 = vpack.c.bf16 %v1879_v50, %v1873_v27  ;;  %v9968_v22 = vld [vmem:[%s7648_s28 + $0x4d8] sm:$0xff]  ;;  %v9976_v49 = vld [vmem:[%s7648_s28 + $0x4d0] sm:$0xff] }
 0x1e8   : > { %v7105_v36 = vpop.eup %7104  ;;  %v9973_v41 = vmul.f32 %v1330_v12, %v754_v28  ;;  %v1329_v23 = vadd.f32 1.0, %v7103_v3  ;;  %7118 = verf.f32 %v961_v0  ;;  %5735 = vmatprep.subr.bf16.mxu1 %v5734_v15  ;;  %v5992_v58 = vpack.c.bf16 %v1881_v48, %v1875_v62  ;;  %v9979_v63 = vld [vmem:[%s7648_s28 + $0x4f0] sm:$0xff]  ;;  %v1886_v27 = vld [vmem:[%s7655_s8 + $0x4f8] sm:$0xff]  ;;  %v1892_v28 = vld [vmem:[%s7655_s8 + $0x528] sm:$0xff] }
 0x1e9   : > { %v9981_v20 = vmul.f32 %v1334_v45, %v758_v17  ;;  %v1333_v14 = vadd.f32 1.0, %v7105_v36  ;;  %v761_v51 = vmul.f32 0.5, %v9912_v19  ;;  %7120 = verf.f32 %v965_v1  ;;  %5991 = vmatprep.subr.bf16.mxu0 %v5990_v4  ;;  %5737 = vmatpush1.bf16.msra.mxu1 %v5736_v54  ;;  %v1888_v12 = vld [vmem:[%s7655_s8 + $0x508] sm:$0xff]  ;;  %v1894_v19 = vld [vmem:[%s7655_s8 + $0x538] sm:$0xff]  ;;  %v1885_v45 = vld [vmem:[%s7655_s8 + $0x4f0] sm:$0xff] }
 0x1ea   : > { %11819 = vst [vmem:[#allocation149_spill] sm:$0xff] %v9973_v41  ;;  %v7107_v3 = vpop.eup %7106  ;;  %2864 = vmatprep.mubr.f32.mxu1 %v9973_v41  ;;  %v9988_v50 = vmul.f32 %v1329_v23, %v753_v25  ;;  %v765_v0 = vmul.f32 0.5, %v9917_v39  ;;  %5993 = vmatpush1.bf16.msra.mxu0 %v5992_v58  ;;  %v970_v36 = vmul.f32 0.70710677, %v9968_v22  ;;  %v974_v1 = vmul.f32 0.70710677, %v9971_v8 }
 0x1eb   : > { %11820 = vst [vmem:[#allocation150_spill] sm:$0xff] %v9981_v20  ;;  %v7109_v4 = vpop.eup %7108  ;;  %3282 = vmatprep.mubr.f32.mxu0 %v9981_v20  ;;  %v9995_v17 = vmul.f32 %v1333_v14, %v757_v47  ;;  %v1338_v62 = vadd.f32 1.0, %v7107_v3  ;;  %v770_v25 = vmul.f32 0.5, %v9920_v33  ;;  %v969_v39 = vmul.f32 0.70710677, %v9976_v49  ;;  %v10000_v58 = vld [vmem:[%s7648_s28 + $0x518] sm:$0xff] }
 0x1ec   : > { %11821 = vst [vmem:[#allocation151_spill] sm:$0xff] %v9988_v50  ;;  %2865 = vmatmul.mubr.f32.gmra.mrb[32].mxu1 %v9988_v50  ;;  %v1342_v48 = vadd.f32 1.0, %v7109_v4  ;;  %v774_v24 = vmul.f32 0.5, %v9927_v60  ;;  %7122 = verf.f32 %v970_v36  ;;  %v973_v15 = vmul.f32 0.70710677, %v9979_v63  ;;  %v10006_v47 = vld [vmem:[%s7648_s28 + $0x538] sm:$0xff] }
 0x1ed   : > { %11822 = vst [vmem:[#allocation152_spill] sm:$0xff] %v9995_v17  ;;  %3283 = vmatmul.mubr.f32.gmra.mrb[32].mxu0 %v9995_v17  ;;  %v10010_v33 = vmul.f32 %v1338_v62, %v762_v29  ;;  %7124 = verf.f32 %v974_v1  ;;  %v5738_v54 = vpack.c.bf16 %v1892_v28, %v1886_v27  ;;  %v5994_v23 = vpack.c.bf16 %v1894_v19, %v1888_v12  ;;  %v1891_v14 = vld [vmem:[%s7655_s8 + $0x520] sm:$0xff]  ;;  %v1893_v20 = vld [vmem:[%s7655_s8 + $0x530] sm:$0xff] }
 0x1ee   : > { %v1887_v3 = vld [vmem:[%s7655_s8 + $0x500] sm:$0xff]  ;;  %v7111_v4 = vpop.eup %7110  ;;  %v10016_v60 = vmul.f32 %v1342_v48, %v9960_v61  ;;  %v769_v36 = vmul.f32 0.5, %v9930_v16  ;;  %7126 = verf.f32 %v969_v39  ;;  %v978_v50 = vmul.f32 0.70710677, %v10000_v58  ;;  %v10024_v12 = vld [vmem:[%s7648_s28 + $0x510] sm:$0xff] }
 0x1ef   : > { %11823 = vst [vmem:[#allocation153_spill] sm:$0xff] %v10010_v33  ;;  %v7113_v17 = vpop.eup %7112  ;;  %2870 = vmatprep.mubr.f32.mxu1 %v10010_v33  ;;  %v1337_v29 = vadd.f32 1.0, %v7111_v4  ;;  %v773_v27 = vmul.f32 0.5, %v9933_v37  ;;  %7128 = verf.f32 %v973_v15  ;;  %5739 = vmatprep.subr.bf16.mxu1 %v5738_v54  ;;  %v982_v28 = vmul.f32 0.70710677, %v10006_v47  ;;  %v10028_v62 = vld [vmem:[%s7648_s28 + $0x530] sm:$0xff] }
 0x1f0   : > { %11824 = vst [vmem:[#allocation154_spill] sm:$0xff] %v10016_v60  ;;  %v7115_v61 = vpop.eup %7114  ;;  %3288 = vmatprep.mubr.f32.mxu0 %v10016_v60  ;;  %v1341_v16 = vadd.f32 1.0, %v7113_v17  ;;  %5995 = vmatprep.subr.bf16.mxu0 %v5994_v23  ;;  %7130 = verf.f32 %v978_v50  ;;  %v5740_v1 = vpack.c.bf16 %v1891_v14, %v1885_v45  ;;  %v5996_v19 = vpack.c.bf16 %v1893_v20, %v1887_v3  ;;  %v10034_v54 = vld [vmem:[%s7648_s28 + $0x558] sm:$0xff]  ;;  %v10049_v14 = vld [vmem:[%s7648_s28 + $0x550] sm:$0xff] }
 0x1f1   : > { %v7117_v39 = vpop.eup %7116  ;;  %v10030_v37 = vmul.f32 %v1337_v29, %v761_v51  ;;  %v1346_v48 = vadd.f32 1.0, %v7115_v61  ;;  %v778_v15 = vmul.f32 0.5, %v9968_v22  ;;  %7132 = verf.f32 %v982_v28  ;;  %v10041_v51 = vld [vmem:[%s7648_s28 + $0x578] sm:$0xff] }
 0x1f2   : > { %v7119_v4 = vpop.eup %7118  ;;  %v10036_v60 = vmul.f32 %v1341_v16, %v765_v0  ;;  %v1350_v17 = vadd.f32 1.0, %v7117_v39  ;;  %v782_v50 = vmul.f32 0.5, %v9971_v8  ;;  %5741 = vmatpush1.bf16.msra.mxu1 %v5740_v1  ;;  %5997 = vmatpush1.bf16.msra.mxu0 %v5996_v19  ;;  %v977_v20 = vmul.f32 0.70710677, %v10024_v12  ;;  %v1898_v61 = vld [vmem:[%s7655_s8 + $0x558] sm:$0xff]  ;;  %v1900_v19 = vld [vmem:[%s7655_s8 + $0x568] sm:$0xff] }
 0x1f3   : > { %11825 = vst [vmem:[#allocation155_spill] sm:$0xff] %v10030_v37  ;;  %v7121_v45 = vpop.eup %7120  ;;  %2871 = vmatmul.mubr.f32.gmra.mrb[34].mxu1 %v10030_v37  ;;  %v10044_v22 = vmul.f32 %v1346_v48, %v770_v25  ;;  %v1345_v23 = vadd.f32 1.0, %v7119_v4  ;;  %v777_v0 = vmul.f32 0.5, %v9976_v49  ;;  %v981_v8 = vmul.f32 0.70710677, %v10028_v62  ;;  %v10056_v25 = vld [vmem:[%s7648_s28 + $0x570] sm:$0xff] }
 0x1f4   : > { %11826 = vst [vmem:[#allocation156_spill] sm:$0xff] %v10036_v60  ;;  %3289 = vmatmul.mubr.f32.gmra.mrb[34].mxu0 %v10036_v60  ;;  %v10052_v3 = vmul.f32 %v1350_v17, %v774_v24  ;;  %v1349_v29 = vadd.f32 1.0, %v7121_v45  ;;  %7134 = verf.f32 %v977_v20  ;;  %v986_v28 = vmul.f32 0.70710677, %v10034_v54  ;;  %v1904_v24 = vld [vmem:[%s7655_s8 + $0x588] sm:$0xff]  ;;  %v1906_v39 = vld [vmem:[%s7655_s8 + $0x598] sm:$0xff] }
 0x1f5   : > { %11827 = vst [vmem:[#allocation157_spill] sm:$0xff] %v10044_v22  ;;  %2876 = vmatprep.mubr.f32.mxu1 %v10044_v22  ;;  %v10060_v49 = vmul.f32 %v1345_v23, %v769_v36  ;;  %v781_v16 = vmul.f32 0.5, %v9979_v63  ;;  %7136 = verf.f32 %v981_v8  ;;  %v990_v1 = vmul.f32 0.70710677, %v10041_v51  ;;  %v1897_v20 = vld [vmem:[%s7655_s8 + $0x550] sm:$0xff]  ;;  %v1903_v63 = vld [vmem:[%s7655_s8 + $0x580] sm:$0xff] }
 0x1f6   : > { %11828 = vst [vmem:[#allocation158_spill] sm:$0xff] %v10052_v3  ;;  %v7123_v48 = vpop.eup %7122  ;;  %3294 = vmatprep.mubr.f32.mxu0 %v10052_v3  ;;  %v10068_v4 = vmul.f32 %v1349_v29, %v773_v27  ;;  %v786_v17 = vmul.f32 0.5, %v10000_v58  ;;  %7138 = verf.f32 %v986_v28  ;;  %v985_v36 = vmul.f32 0.70710677, %v10049_v14  ;;  %v1899_v27 = vld [vmem:[%s7655_s8 + $0x560] sm:$0xff]  ;;  %v1905_v29 = vld [vmem:[%s7655_s8 + $0x590] sm:$0xff] }
 0x1f7   : > { %11829 = vst [vmem:[#allocation159_spill] sm:$0xff] %v10060_v49  ;;  %v7125_v45 = vpop.eup %7124  ;;  %2877 = vmatmul.mubr.f32.gmra.mrb[36].mxu1 %v10060_v49  ;;  %v1354_v23 = vadd.f32 1.0, %v7123_v48  ;;  %v790_v8 = vmul.f32 0.5, %v10006_v47  ;;  %7140 = verf.f32 %v990_v1  ;;  %v989_v3 = vmul.f32 0.70710677, %v10056_v25  ;;  %v10081_v37 = vld [vmem:[%s7648_s28 + $0x598] sm:$0xff] }
 0x1f8   : > { %11830 = vst [vmem:[#allocation160_spill] sm:$0xff] %v10068_v4  ;;  %v7127_v60 = vpop.eup %7126  ;;  %3295 = vmatmul.mubr.f32.gmra.mrb[36].mxu0 %v10068_v4  ;;  %v1358_v58 = vadd.f32 1.0, %v7125_v45  ;;  %7142 = verf.f32 %v985_v36  ;;  %v5742_v28 = vpack.c.bf16 %v1904_v24, %v1898_v61  ;;  %v5998_v22 = vpack.c.bf16 %v1906_v39, %v1900_v19  ;;  %v10086_v33 = vld [vmem:[%s7648_s28 + $0x5b8] sm:$0xff]  ;;  %v10092_v19 = vld [vmem:[%s7648_s28 + $0x590] sm:$0xff]  ;;  %v1928_v4 = vld [vmem:[%s7655_s8 + $0x648] sm:$0xff] }
 0x1f9   : > { %v7129_v48 = vpop.eup %7128  ;;  %v10083_v49 = vmul.f32 %v1354_v23, %v778_v15  ;;  %v1353_v47 = vadd.f32 1.0, %v7127_v60  ;;  %7144 = verf.f32 %v989_v3  ;;  %v5744_v1 = vpack.c.bf16 %v1903_v63, %v1897_v20  ;;  %v10095_v15 = vld [vmem:[%s7648_s28 + $0x5b0] sm:$0xff]  ;;  %v1916_v20 = vld [vmem:[%s7655_s8 + $0x5e8] sm:$0xff] }
 0x1fa   : > { %v7131_v41 = vpop.eup %7130  ;;  %v10088_v7 = vmul.f32 %v1358_v58, %v782_v50  ;;  %v1357_v36 = vadd.f32 1.0, %v7129_v48  ;;  %v785_v61 = vmul.f32 0.5, %v10024_v12  ;;  %5743 = vmatprep.subr.bf16.mxu1 %v5742_v28  ;;  %5999 = vmatprep.subr.bf16.mxu0 %v5998_v22  ;;  %v6000_v24 = vpack.c.bf16 %v1905_v29, %v1899_v27  ;;  %v1910_v22 = vld [vmem:[%s7655_s8 + $0x5b8] sm:$0xff] }
 0x1fb   : > { %v7133_v60 = vpop.eup %7132  ;;  %2882 = vmatprep.mubr.f32.mxu1 %v10083_v49  ;;  %v10098_v3 = vmul.f32 %v1353_v47, %v777_v0  ;;  %v1362_v50 = vadd.f32 1.0, %v7131_v41  ;;  %v789_v39 = vmul.f32 0.5, %v10028_v62  ;;  %5745 = vmatpush1.bf16.msra.mxu1 %v5744_v1  ;;  %v994_v12 = vmul.f32 0.70710677, %v10081_v37  ;;  %v1912_v41 = vld [vmem:[%s7655_s8 + $0x5c8] sm:$0xff]  ;;  %v1918_v62 = vld [vmem:[%s7655_s8 + $0x5f8] sm:$0xff] }
 0x1fc   : > { %11831 = vst [vmem:[#allocation161_spill] sm:$0xff] %v10088_v7  ;;  %3300 = vmatprep.mubr.f32.mxu0 %v10088_v7  ;;  %v10105_v63 = vmul.f32 %v1357_v36, %v781_v16  ;;  %v1366_v45 = vadd.f32 1.0, %v7133_v60  ;;  %v794_v23 = vmul.f32 0.5, %v10034_v54  ;;  %6001 = vmatpush1.bf16.msra.mxu0 %v6000_v24  ;;  %v998_v0 = vmul.f32 0.70710677, %v10086_v33  ;;  %v10117_v58 = vld [vmem:[%s7648_s28 + $0x5d8] sm:$0xff] }
 0x1fd   : > { %11832 = vst [vmem:[#allocation162_spill] sm:$0xff] %v10098_v3  ;;  %2883 = vmatmul.mubr.f32.gmra.mrb[38].mxu1 %v10098_v3  ;;  %v10112_v27 = vmul.f32 %v1362_v50, %v786_v17  ;;  %v798_v29 = vmul.f32 0.5, %v10041_v51  ;;  %7146 = verf.f32 %v994_v12  ;;  %v993_v16 = vmul.f32 0.70710677, %v10092_v19  ;;  %v10124_v17 = vld [vmem:[%s7648_s28 + $0x5f8] sm:$0xff]  ;;  %v1909_v1 = vld [vmem:[%s7655_s8 + $0x5b0] sm:$0xff] }
 0x1fe   : > { %11833 = vst [vmem:[#allocation163_spill] sm:$0xff] %v10105_v63  ;;  %v7135_v54 = vpop.eup %7134  ;;  %3301 = vmatmul.mubr.f32.gmra.mrb[38].mxu0 %v10105_v63  ;;  %v10120_v28 = vmul.f32 %v1366_v45, %v790_v8  ;;  %7148 = verf.f32 %v998_v0  ;;  %v997_v48 = vmul.f32 0.70710677, %v10095_v15  ;;  %v5746_v47 = vpack.c.bf16 %v1916_v20, %v1910_v22  ;;  %v1915_v51 = vld [vmem:[%s7655_s8 + $0x5e0] sm:$0xff]  ;;  %v1917_v8 = vld [vmem:[%s7655_s8 + $0x5f0] sm:$0xff]  ;;  %v1930_v3 = vld [vmem:[%s7655_s8 + $0x658] sm:$0xff] }
 0x1ff   : > { %11834 = vst [vmem:[#allocation164_spill] sm:$0xff] %v10112_v27  ;;  %v7137_v36 = vpop.eup %7136  ;;  %2888 = vmatprep.mubr.f32.mxu1 %v10112_v27  ;;  %v1361_v24 = vadd.f32 1.0, %v7135_v54  ;;  %v793_v60 = vmul.f32 0.5, %v10049_v14  ;;  %7150 = verf.f32 %v993_v16  ;;  %v6002_v50 = vpack.c.bf16 %v1918_v62, %v1912_v41  ;;  %v1911_v12 = vld [vmem:[%s7655_s8 + $0x5c0] sm:$0xff]  ;;  %v617_v63 = vld [vmem:[%s7648_s28 + $0x5d0] sm:$0xff]  ;;  %v1924_v27 = vld [vmem:[%s7655_s8 + $0x628] sm:$0xff] }
 0x200   : > { %11835 = vst [vmem:[#allocation165_spill] sm:$0xff] %v10120_v28  ;;  %v7139_v45 = vpop.eup %7138  ;;  %3306 = vmatprep.mubr.f32.mxu0 %v10120_v28  ;;  %v1365_v22 = vadd.f32 1.0, %v7137_v36  ;;  %v797_v20 = vmul.f32 0.5, %v10056_v25  ;;  %7152 = verf.f32 %v997_v48  ;;  %5747 = vmatprep.subr.bf16.mxu1 %v5746_v47  ;;  %v1002_v0 = vmul.f32 0.70710677, %v10117_v58  ;;  %v10140_v28 = vld [vmem:[%s7648_s28 + $0x5f0] sm:$0xff]  ;;  %s11247_s28 = scalar_lea.hbm %s11987_s27, %s6657_s29 }
 0x201   : > { %v7141_v14 = vpop.eup %7140  ;;  %v10135_v41 = vmul.f32 %v1361_v24, %v785_v61  ;;  %v1370_v62 = vadd.f32 1.0, %v7139_v45  ;;  %6003 = vmatprep.subr.bf16.mxu0 %v6002_v50  ;;  %v1006_v16 = vmul.f32 0.70710677, %v10124_v17  ;;  %v5748_v54 = vpack.c.bf16 %v1915_v51, %v1909_v1  ;;  %v1922_v36 = vld [vmem:[%s7655_s8 + $0x618] sm:$0xff] }
 0x202   : > { %v7143_v25 = vpop.eup %7142  ;;  %v10143_v48 = vmul.f32 %v1365_v22, %v789_v39  ;;  %v1374_v47 = vadd.f32 1.0, %v7141_v14  ;;  %7154 = verf.f32 %v1002_v0  ;;  %v6004_v7 = vpack.c.bf16 %v1917_v8, %v1911_v12 }
 0x203   : > { %v7145_v61 = vpop.eup %7144  ;;  %2889 = vmatmul.mubr.f32.gmra.mrb[40].mxu1 %v10135_v41  ;;  %v10149_v24 = vmul.f32 %v1370_v62, %v794_v23  ;;  %v1369_v50 = vadd.f32 1.0, %v7143_v25  ;;  %7156 = verf.f32 %v1006_v16  ;;  %v1001_v39 = vmul.f32 0.70710677, %v617_v63 }
 0x204   : > { %3307 = vmatmul.mubr.f32.gmra.mrb[40].mxu0 %v10143_v48  ;;  %v10152_v1 = vmul.f32 %v1374_v47, %v798_v29  ;;  %v1373_v51 = vadd.f32 1.0, %v7145_v61  ;;  %5749 = vmatpush1.bf16.msra.mxu1 %v5748_v54  ;;  %v1005_v8 = vmul.f32 0.70710677, %v10140_v28  ;;  %v5750_v45 = vpack.c.bf16 %v1928_v4, %v1922_v36 }
 0x205   : > { %2894 = vmatprep.mubr.f32.mxu1 %v10149_v24  ;;  %v10155_v12 = vmul.f32 %v1369_v50, %v793_v60  ;;  %6005 = vmatpush1.bf16.msra.mxu0 %v6004_v7  ;;  %v6006_v22 = vpack.c.bf16 %v1930_v3, %v1924_v27  ;;  %v802_v0 = vmul.f32 0.5, %v10081_v37  ;;  %7158 = verf.f32 %v1001_v39 }
 0x206   : > { %3312 = vmatprep.mubr.f32.mxu0 %v10152_v1  ;;  %v10159_v23 = vmul.f32 %v1373_v51, %v797_v20  ;;  %v806_v14 = vmul.f32 0.5, %v10086_v33  ;;  %7160 = verf.f32 %v1005_v8  ;;  %5751 = vmatprep.subr.bf16.mxu1 %v5750_v45  ;;  %v801_v4 = vmul.f32 0.5, %v10092_v19 }
 0x207   : > { %v7147_v29 = vpop.eup %7146  ;;  %2895 = vmatmul.mubr.f32.gmra.mrb[42].mxu1 %v10155_v12  ;;  %6007 = vmatprep.subr.bf16.mxu0 %v6006_v22  ;;  %v805_v20 = vmul.f32 0.5, %v10095_v15  ;;  %v810_v36 = vmul.f32 0.5, %v10117_v58  ;;  %v814_v19 = vmul.f32 0.5, %v10124_v17  ;;  %v809_v39 = vmul.f32 0.5, %v617_v63  ;;  %v1927_v63 = vld [vmem:[%s7655_s8 + $0x640] sm:$0xff] }
 0x208   : > { %v7149_v60 = vpop.eup %7148  ;;  %3313 = vmatmul.mubr.f32.gmra.mrb[42].mxu0 %v10159_v23  ;;  %v1378_v7 = vadd.f32 1.0, %v7147_v29  ;;  %v813_v45 = vmul.f32 0.5, %v10140_v28  ;;  %v1929_v28 = vld [vmem:[%s7655_s8 + $0x650] sm:$0xff] }
 0x209   : > { %v7151_v3 = vpop.eup %7150  ;;  %v1382_v27 = vadd.f32 1.0, %v7149_v60  ;;  %v1921_v60 = vld [vmem:[%s7655_s8 + $0x610] sm:$0xff] }
 0x20a   : > { %v7153_v37 = vpop.eup %7152  ;;  %v10167_v62 = vmul.f32 %v1378_v7, %v802_v0  ;;  %v1377_v16 = vadd.f32 1.0, %v7151_v3  ;;  %v1934_v3 = vld [vmem:[%s7655_s8 + $0x678] sm:$0xff] }
 0x20b   : > { %v10169_v54 = vmul.f32 %v1382_v27, %v806_v14  ;;  %v1381_v33 = vadd.f32 1.0, %v7153_v37  ;;  %v1940_v27 = vld [vmem:[%s7655_s8 + $0x6a8] sm:$0xff] }
 0x20c   : > { %v7155_v25 = vpop.eup %7154  ;;  %2900 = vmatprep.mubr.f32.mxu1 %v10167_v62  ;;  %v10173_v47 = vmul.f32 %v1377_v16, %v801_v4  ;;  %v1923_v4 = vld [vmem:[%s7655_s8 + $0x620] sm:$0xff]  ;;  %v1936_v37 = vld [vmem:[%s7655_s8 + $0x688] sm:$0xff]  ;;  %v1942_v16 = vld [vmem:[%s7655_s8 + $0x6b8] sm:$0xff] }
 0x20d   : > { %v7157_v61 = vpop.eup %7156  ;;  %3318 = vmatprep.mubr.f32.mxu0 %v10169_v54  ;;  %v10177_v15 = vmul.f32 %v1381_v33, %v805_v20  ;;  %v1386_v50 = vadd.f32 1.0, %v7155_v25  ;;  %v5752_v20 = vpack.c.bf16 %v1927_v63, %v1921_v60  ;;  %v6008_v33 = vpack.c.bf16 %v1929_v28, %v1923_v4  ;;  %v1933_v25 = vld [vmem:[%s7655_s8 + $0x670] sm:$0xff]  ;;  %v1951_v63 = vld [vmem:[%s7655_s8 + $0x700] sm:$0xff] }
 0x20e   : > { %2901 = vmatmul.mubr.f32.gmra.mrb[44].mxu1 %v10173_v47  ;;  %v1390_v51 = vadd.f32 1.0, %v7157_v61  ;;  %v1935_v61 = vld [vmem:[%s7655_s8 + $0x680] sm:$0xff]  ;;  %v1945_v60 = vld [vmem:[%s7655_s8 + $0x6d0] sm:$0xff] }
 0x20f   : > { %3319 = vmatmul.mubr.f32.gmra.mrb[44].mxu0 %v10177_v15  ;;  %v10181_v58 = vmul.f32 %v1386_v50, %v810_v36  ;;  %v7159_v17 = vpop.eup %7158  ;;  %v5754_v36 = vpack.c.bf16 %v1940_v27, %v1934_v3  ;;  %v6010_v50 = vpack.c.bf16 %v1942_v16, %v1936_v37  ;;  %v1953_v28 = vld [vmem:[%s7655_s8 + $0x710] sm:$0xff]  ;;  %v1958_v3 = vld [vmem:[%s7655_s8 + $0x738] sm:$0xff]  ;;  %v1964_v27 = vld [vmem:[%s7655_s8 + $0x768] sm:$0xff]  ;;  %v5760_v37 = vpack.c.bf16 %v1951_v63, %v1945_v60 }
 0x210   : > { %v10183_v8 = vmul.f32 %v1390_v51, %v814_v19  ;;  %v7161_v22 = vpop.eup %7160  ;;  %v1385_v0 = vadd.f32 1.0, %v7159_v17  ;;  %v1939_v19 = vld [vmem:[%s7655_s8 + $0x6a0] sm:$0xff]  ;;  %v1941_v51 = vld [vmem:[%s7655_s8 + $0x6b0] sm:$0xff]  ;;  %v1952_v17 = vld [vmem:[%s7655_s8 + $0x708] sm:$0xff] }
 0x211   : > { %2906 = vmatprep.mubr.f32.mxu1 %v10181_v58  ;;  %v1389_v29 = vadd.f32 1.0, %v7161_v22  ;;  %v5756_v22 = vpack.c.bf16 %v1939_v19, %v1933_v25  ;;  %v1963_v25 = vld [vmem:[%s7655_s8 + $0x760] sm:$0xff]  ;;  %v1977_v60 = vld [vmem:[%s7655_s8 + $0x7d0] sm:$0xff]  ;;  %v1988_v63 = vld [vmem:[%s7655_s8 + $0x828] sm:$0xff] }
 0x212   : > { %3324 = vmatprep.mubr.f32.mxu0 %v10183_v8  ;;  %v10188_v14 = vmul.f32 %v1385_v0, %v809_v39  ;;  %v1946_v39 = vld [vmem:[%s7655_s8 + $0x6d8] sm:$0xff]  ;;  %v6012_v0 = vpack.c.bf16 %v1941_v51, %v1935_v61  ;;  %v1965_v61 = vld [vmem:[%s7655_s8 + $0x770] sm:$0xff]  ;;  %v1972_v51 = vld [vmem:[%s7655_s8 + $0x7a8] sm:$0xff] }
 0x213   : > { %v10192_v7 = vmul.f32 %v1389_v29, %v813_v45  ;;  %v1948_v45 = vld [vmem:[%s7655_s8 + $0x6e8] sm:$0xff]  ;;  %v5758_v29 = vpack.c.bf16 %v1952_v17, %v1946_v39  ;;  %v1978_v39 = vld [vmem:[%s7655_s8 + $0x7d8] sm:$0xff] }
 0x214   : > { %2907 = vmatmul.mubr.f32.gmra.mrb[46].mxu1 %v10188_v14 }
 0x215   : > { %3325 = vmatmul.mubr.f32.gmra.mrb[46].mxu0 %v10192_v7  ;;  %3395 = vmatprep.mubr.f32.mxu1 %v8295_v40 }
 0x216   : > { %4231 = vmatprep.mubr.f32.mxu0 %v8295_v40  ;;  %v1954_v40 = vld [vmem:[%s7655_s8 + $0x718] sm:$0xff] }
 0x217   : > { %v6014_v4 = vpack.c.bf16 %v1954_v40, %v1948_v45 }
 0x218   : > { %3396 = vmatmul.mubr.f32.vlgmr.msra.gmra.mrb[48].mxu1 %v8353_v57 }
 0x219   : > { %4232 = vmatmul.mubr.f32.vlgmr.msra.gmra.mrb[48].mxu0 %v8353_v57  ;;  %5753 = vmatpush1.bf16.msra.mxu1 %v5752_v20  ;;  %v1947_v57 = vld [vmem:[%s7655_s8 + $0x6e0] sm:$0xff]  ;;  %v1966_v20 = vld [vmem:[%s7655_s8 + $0x778] sm:$0xff] }
 0x21a   : > { %6009 = vmatpush1.bf16.msra.mxu0 %v6008_v33  ;;  %3401 = vmatprep.mubr.f32.mxu1 %v8384_v5  ;;  %v6016_v16 = vpack.c.bf16 %v1953_v28, %v1947_v57  ;;  %v5762_v33 = vpack.c.bf16 %v1964_v27, %v1958_v3  ;;  %v1984_v57 = vld [vmem:[%s7655_s8 + $0x808] sm:$0xff] }
 0x21b   : > { %4237 = vmatprep.mubr.f32.mxu0 %v8384_v5  ;;  %5755 = vmatprep.subr.bf16.mxu1 %v5754_v36  ;;  %v1960_v5 = vld [vmem:[%s7655_s8 + $0x748] sm:$0xff]  ;;  %v1957_v36 = vld [vmem:[%s7655_s8 + $0x730] sm:$0xff] }
 0x21c   : > { %3402 = vmatmul.mubr.f32.gmra.mrb[50].mxu1 %v8396_v18  ;;  %6011 = vmatprep.subr.bf16.mxu0 %v6010_v50  ;;  %v6018_v19 = vpack.c.bf16 %v1966_v20, %v1960_v5  ;;  %v1970_v50 = vld [vmem:[%s7655_s8 + $0x798] sm:$0xff]  ;;  %v5764_v17 = vpack.c.bf16 %v1963_v25, %v1957_v36  ;;  %v1981_v5 = vld [vmem:[%s7655_s8 + $0x7f0] sm:$0xff]  ;;  %v1987_v20 = vld [vmem:[%s7655_s8 + $0x820] sm:$0xff] }
 0x21d   : > { %4238 = vmatmul.mubr.f32.gmra.mrb[50].mxu0 %v8396_v18  ;;  %3407 = vmatprep.mubr.f32.mxu1 %v8407_v30  ;;  %v1959_v18 = vld [vmem:[%s7655_s8 + $0x740] sm:$0xff]  ;;  %v1996_v36 = vld [vmem:[%s7655_s8 + $0x868] sm:$0xff]  ;;  %v2002_v25 = vld [vmem:[%s7655_s8 + $0x898] sm:$0xff] }
 0x21e   : > { %5757 = vmatpush1.bf16.msra.mxu1 %v5756_v22  ;;  %4243 = vmatprep.mubr.f32.mxu0 %v8407_v30  ;;  %v1976_v30 = vld [vmem:[%s7655_s8 + $0x7c8] sm:$0xff]  ;;  %v6020_v45 = vpack.c.bf16 %v1965_v61, %v1959_v18  ;;  %v1969_v22 = vld [vmem:[%s7655_s8 + $0x790] sm:$0xff]  ;;  %v5772_v18 = vpack.c.bf16 %v1987_v20, %v1981_v5 }
 0x21f   : > { %6013 = vmatpush1.bf16.msra.mxu0 %v6012_v0  ;;  %5759 = vmatprep.subr.bf16.mxu1 %v5758_v29  ;;  %v5766_v40 = vpack.c.bf16 %v1976_v30, %v1970_v50  ;;  %v1975_v0 = vld [vmem:[%s7655_s8 + $0x7c0] sm:$0xff]  ;;  %v6022_v29 = vpack.c.bf16 %v1978_v39, %v1972_v51  ;;  %v1993_v50 = vld [vmem:[%s7655_s8 + $0x850] sm:$0xff]  ;;  %v6030_v51 = vpack.c.bf16 %v2002_v25, %v1996_v36  ;;  %v2038_v36 = vld [vmem:[%s7655_s8 + $0x9b8] sm:$0xff] }
 0x220   : > { %3408 = vmatmul.mubr.f32.gmra.mrb[52].mxu1 %v8452_v6  ;;  %6015 = vmatprep.subr.bf16.mxu0 %v6014_v4  ;;  %v1990_v4 = vld [vmem:[%s7655_s8 + $0x838] sm:$0xff]  ;;  %v5768_v28 = vpack.c.bf16 %v1975_v0, %v1969_v22  ;;  %v1999_v30 = vld [vmem:[%s7655_s8 + $0x880] sm:$0xff]  ;;  %v2001_v39 = vld [vmem:[%s7655_s8 + $0x890] sm:$0xff] }
 0x221   : > { %4244 = vmatmul.mubr.f32.gmra.mrb[52].mxu0 %v8452_v6  ;;  %3413 = vmatprep.mubr.f32.mxu1 %v8471_v9  ;;  %v1971_v6 = vld [vmem:[%s7655_s8 + $0x7a0] sm:$0xff]  ;;  %v5776_v22 = vpack.c.bf16 %v1999_v30, %v1993_v50  ;;  %v2017_v20 = vld [vmem:[%s7655_s8 + $0x910] sm:$0xff] }
 0x222   : > { %4249 = vmatprep.mubr.f32.mxu0 %v8471_v9  ;;  %5761 = vmatpush1.bf16.msra.mxu1 %v5760_v37  ;;  %v1982_v9 = vld [vmem:[%s7655_s8 + $0x7f8] sm:$0xff]  ;;  %v6024_v3 = vpack.c.bf16 %v1977_v60, %v1971_v6  ;;  %v6026_v37 = vpack.c.bf16 %v1990_v4, %v1984_v57  ;;  %v2011_v60 = vld [vmem:[%s7655_s8 + $0x8e0] sm:$0xff]  ;;  %v2024_v57 = vld [vmem:[%s7655_s8 + $0x948] sm:$0xff] }
 0x223   : > { %6017 = vmatpush1.bf16.msra.mxu0 %v6016_v16  ;;  %5763 = vmatprep.subr.bf16.mxu1 %v5762_v33  ;;  %v5770_v27 = vpack.c.bf16 %v1988_v63, %v1982_v9  ;;  %v1989_v16 = vld [vmem:[%s7655_s8 + $0x830] sm:$0xff]  ;;  %v2000_v33 = vld [vmem:[%s7655_s8 + $0x888] sm:$0xff]  ;;  %v2035_v50 = vld [vmem:[%s7655_s8 + $0x9a0] sm:$0xff] }
 0x224   : > { %3414 = vmatmul.mubr.f32.gmra.mrb[54].mxu1 %v8515_v42  ;;  %6019 = vmatprep.subr.bf16.mxu0 %v6018_v19  ;;  %v2013_v63 = vld [vmem:[%s7655_s8 + $0x8f0] sm:$0xff]  ;;  %v2020_v4 = vld [vmem:[%s7655_s8 + $0x928] sm:$0xff] }
 0x225   : > { %4250 = vmatmul.mubr.f32.gmra.mrb[54].mxu0 %v8515_v42  ;;  %3419 = vmatprep.mubr.f32.mxu1 %v8552_v52  ;;  %v1983_v42 = vld [vmem:[%s7655_s8 + $0x800] sm:$0xff] }
 0x226   : > { %4255 = vmatprep.mubr.f32.mxu0 %v8552_v52  ;;  %5765 = vmatpush1.bf16.msra.mxu1 %v5764_v17  ;;  %v1994_v52 = vld [vmem:[%s7655_s8 + $0x858] sm:$0xff]  ;;  %v6028_v19 = vpack.c.bf16 %v1989_v16, %v1983_v42  ;;  %v2012_v17 = vld [vmem:[%s7655_s8 + $0x8e8] sm:$0xff]  ;;  %v2023_v42 = vld [vmem:[%s7655_s8 + $0x940] sm:$0xff] }
 0x227   : > { %6021 = vmatpush1.bf16.msra.mxu0 %v6020_v45  ;;  %5767 = vmatprep.subr.bf16.mxu1 %v5766_v40  ;;  %v5774_v61 = vpack.c.bf16 %v2000_v33, %v1994_v52  ;;  %v2008_v45 = vld [vmem:[%s7655_s8 + $0x8c8] sm:$0xff]  ;;  %v2014_v40 = vld [vmem:[%s7655_s8 + $0x8f8] sm:$0xff]  ;;  %v2025_v16 = vld [vmem:[%s7655_s8 + $0x950] sm:$0xff]  ;;  %v5784_v25 = vpack.c.bf16 %v2023_v42, %v2017_v20 }
 0x228   : > { %3420 = vmatmul.mubr.f32.gmra.mrb[56].mxu1 %v8581_v31  ;;  %6023 = vmatprep.subr.bf16.mxu0 %v6022_v29  ;;  %v2005_v29 = vld [vmem:[%s7655_s8 + $0x8b0] sm:$0xff]  ;;  %v6034_v9 = vpack.c.bf16 %v2014_v40, %v2008_v45  ;;  %v2036_v52 = vld [vmem:[%s7655_s8 + $0x9a8] sm:$0xff]  ;;  %v2074_v42 = vld [vmem:[%s7655_s8 + $0xad8] sm:$0xff] }
 0x229   : > { %4256 = vmatmul.mubr.f32.gmra.mrb[56].mxu0 %v8581_v31  ;;  %3425 = vmatprep.mubr.f32.mxu1 %v8621_v32  ;;  %v1995_v31 = vld [vmem:[%s7655_s8 + $0x860] sm:$0xff]  ;;  %v2032_v33 = vld [vmem:[%s7655_s8 + $0x988] sm:$0xff] }
 0x22a   : > { %4261 = vmatprep.mubr.f32.mxu0 %v8621_v32  ;;  %5769 = vmatpush1.bf16.msra.mxu1 %v5768_v28  ;;  %v2006_v32 = vld [vmem:[%s7655_s8 + $0x8b8] sm:$0xff]  ;;  %v6032_v0 = vpack.c.bf16 %v2001_v39, %v1995_v31  ;;  %v6042_v30 = vpack.c.bf16 %v2038_v36, %v2032_v33  ;;  %v2037_v31 = vld [vmem:[%s7655_s8 + $0x9b0] sm:$0xff]  ;;  %v2044_v39 = vld [vmem:[%s7655_s8 + $0x9e8] sm:$0xff] }
 0x22b   : > { %6025 = vmatpush1.bf16.msra.mxu0 %v6024_v3  ;;  %5771 = vmatprep.subr.bf16.mxu1 %v5770_v27  ;;  %v5778_v6 = vpack.c.bf16 %v2012_v17, %v2006_v32  ;;  %v2026_v28 = vld [vmem:[%s7655_s8 + $0x958] sm:$0xff]  ;;  %v5780_v3 = vpack.c.bf16 %v2011_v60, %v2005_v29  ;;  %v2049_v29 = vld [vmem:[%s7655_s8 + $0xa10] sm:$0xff]  ;;  %v2060_v60 = vld [vmem:[%s7655_s8 + $0xa68] sm:$0xff] }
 0x22c   : > { %3426 = vmatmul.mubr.f32.gmra.mrb[58].mxu1 %v8638_v21  ;;  %6027 = vmatprep.subr.bf16.mxu0 %v6026_v37  ;;  %v6038_v37 = vpack.c.bf16 %v2026_v28, %v2020_v4  ;;  %v2050_v32 = vld [vmem:[%s7655_s8 + $0xa18] sm:$0xff]  ;;  %v2053_v4 = vld [vmem:[%s7655_s8 + $0xa30] sm:$0xff]  ;;  %v2059_v28 = vld [vmem:[%s7655_s8 + $0xa60] sm:$0xff] }
 0x22d   : > { %4262 = vmatmul.mubr.f32.gmra.mrb[58].mxu0 %v8638_v21  ;;  %3431 = vmatprep.mubr.f32.mxu1 %v8654_v56  ;;  %v2007_v21 = vld [vmem:[%s7655_s8 + $0x8c0] sm:$0xff]  ;;  %v2068_v20 = vld [vmem:[%s7655_s8 + $0xaa8] sm:$0xff]  ;;  %v2073_v36 = vld [vmem:[%s7655_s8 + $0xad0] sm:$0xff] }
 0x22e   : > { %4267 = vmatprep.mubr.f32.mxu0 %v8654_v56  ;;  %5773 = vmatpush1.bf16.msra.mxu1 %v5772_v18  ;;  %v2018_v56 = vld [vmem:[%s7655_s8 + $0x918] sm:$0xff]  ;;  %v6036_v27 = vpack.c.bf16 %v2013_v63, %v2007_v21  ;;  %v2056_v21 = vld [vmem:[%s7655_s8 + $0xa48] sm:$0xff]  ;;  %v6054_v33 = vpack.c.bf16 %v2074_v42, %v2068_v20 }
 0x22f   : > { %6029 = vmatpush1.bf16.msra.mxu0 %v6028_v19  ;;  %5775 = vmatprep.subr.bf16.mxu1 %v5774_v61  ;;  %v5782_v5 = vpack.c.bf16 %v2024_v57, %v2018_v56  ;;  %v2029_v61 = vld [vmem:[%s7655_s8 + $0x970] sm:$0xff]  ;;  %v2114_v20 = vld [vmem:[%s7655_s8 + $0xc18] sm:$0xff]  ;;  %v2120_v42 = vld [vmem:[%s7655_s8 + $0xc48] sm:$0xff] }
 0x230   : > { %3432 = vmatmul.mubr.f32.gmra.mrb[60].mxu1 %v8672_v55  ;;  %6031 = vmatprep.subr.bf16.mxu0 %v6030_v51  ;;  %v2048_v51 = vld [vmem:[%s7655_s8 + $0xa08] sm:$0xff]  ;;  %v5788_v17 = vpack.c.bf16 %v2035_v50, %v2029_v61 }
 0x231   : > { %4268 = vmatmul.mubr.f32.gmra.mrb[60].mxu0 %v8672_v55  ;;  %3437 = vmatprep.mubr.f32.mxu1 %v8694_v10  ;;  %v2019_v55 = vld [vmem:[%s7655_s8 + $0x920] sm:$0xff] }
 0x232   : > { %4273 = vmatprep.mubr.f32.mxu0 %v8694_v10  ;;  %5777 = vmatpush1.bf16.msra.mxu1 %v5776_v22  ;;  %v2030_v10 = vld [vmem:[%s7655_s8 + $0x978] sm:$0xff]  ;;  %v6040_v18 = vpack.c.bf16 %v2025_v16, %v2019_v55  ;;  %v2041_v22 = vld [vmem:[%s7655_s8 + $0x9d0] sm:$0xff]  ;;  %v5796_v55 = vpack.c.bf16 %v2059_v28, %v2053_v4 }
 0x233   : > { %6033 = vmatpush1.bf16.msra.mxu0 %v6032_v0  ;;  %5779 = vmatprep.subr.bf16.mxu1 %v5778_v6  ;;  %v5786_v19 = vpack.c.bf16 %v2036_v52, %v2030_v10  ;;  %v2047_v0 = vld [vmem:[%s7655_s8 + $0xa00] sm:$0xff]  ;;  %v6046_v6 = vpack.c.bf16 %v2050_v32, %v2044_v39  ;;  %v2065_v10 = vld [vmem:[%s7655_s8 + $0xa90] sm:$0xff]  ;;  %v2096_v39 = vld [vmem:[%s7655_s8 + $0xb88] sm:$0xff] }
 0x234   : > { %3438 = vmatmul.mubr.f32.gmra.mrb[62].mxu1 %v8710_v2  ;;  %6035 = vmatprep.subr.bf16.mxu0 %v6034_v9  ;;  %v2062_v9 = vld [vmem:[%s7655_s8 + $0xa78] sm:$0xff]  ;;  %v5792_v63 = vpack.c.bf16 %v2047_v0, %v2041_v22  ;;  %v2071_v52 = vld [vmem:[%s7655_s8 + $0xac0] sm:$0xff]  ;;  %v2092_v32 = vld [vmem:[%s7655_s8 + $0xb68] sm:$0xff] }
 0x235   : > { %4274 = vmatmul.mubr.f32.gmra.mrb[62].mxu0 %v8710_v2  ;;  %3443 = vmatprep.mubr.f32.mxu1 %v8724_v26  ;;  %v2031_v2 = vld [vmem:[%s7655_s8 + $0x980] sm:$0xff]  ;;  %v5800_v61 = vpack.c.bf16 %v2071_v52, %v2065_v10  ;;  %v2089_v0 = vld [vmem:[%s7655_s8 + $0xb50] sm:$0xff] }
 0x236   : > { %4279 = vmatprep.mubr.f32.mxu0 %v8724_v26  ;;  %5781 = vmatpush1.bf16.msra.mxu1 %v5780_v3  ;;  %v2042_v26 = vld [vmem:[%s7655_s8 + $0x9d8] sm:$0xff]  ;;  %v6044_v45 = vpack.c.bf16 %v2037_v31, %v2031_v2  ;;  %v6050_v3 = vpack.c.bf16 %v2062_v9, %v2056_v21  ;;  %v2083_v31 = vld [vmem:[%s7655_s8 + $0xb20] sm:$0xff]  ;;  %v11837_v21 = vld [vmem:[#allocation45_spill] sm:$0xff] }
 0x237   : > { %6037 = vmatpush1.bf16.msra.mxu0 %v6036_v27  ;;  %5783 = vmatprep.subr.bf16.mxu1 %v5782_v5  ;;  %v5790_v40 = vpack.c.bf16 %v2048_v51, %v2042_v26  ;;  %v2061_v27 = vld [vmem:[%s7655_s8 + $0xa70] sm:$0xff]  ;;  %v2072_v5 = vld [vmem:[%s7655_s8 + $0xac8] sm:$0xff] }
 0x238   : > { %3444 = vmatmul.mubr.f32.gmra.mrb[64].mxu1 %v8743_v46  ;;  %6039 = vmatprep.subr.bf16.mxu0 %v6038_v37  ;;  %v2085_v51 = vld [vmem:[%s7655_s8 + $0xb30] sm:$0xff]  ;;  %v2104_v9 = vld [vmem:[%s7655_s8 + $0xbc8] sm:$0xff] }
 0x239   : > { %4280 = vmatmul.mubr.f32.gmra.mrb[64].mxu0 %v8743_v46  ;;  %3449 = vmatprep.mubr.f32.mxu1 %v8764_v43  ;;  %v2043_v46 = vld [vmem:[%s7655_s8 + $0x9e0] sm:$0xff]  ;;  %v2101_v28 = vld [vmem:[%s7655_s8 + $0xbb0] sm:$0xff] }
 0x23a   : > { %4285 = vmatprep.mubr.f32.mxu0 %v8764_v43  ;;  %5785 = vmatpush1.bf16.msra.mxu1 %v5784_v25  ;;  %v2054_v43 = vld [vmem:[%s7655_s8 + $0xa38] sm:$0xff]  ;;  %v6048_v56 = vpack.c.bf16 %v2049_v29, %v2043_v46  ;;  %v2084_v25 = vld [vmem:[%s7655_s8 + $0xb28] sm:$0xff]  ;;  %v2095_v46 = vld [vmem:[%s7655_s8 + $0xb80] sm:$0xff] }
 0x23b   : > { %6041 = vmatpush1.bf16.msra.mxu0 %v6040_v18  ;;  %5787 = vmatprep.subr.bf16.mxu1 %v5786_v19  ;;  %v5794_v57 = vpack.c.bf16 %v2060_v60, %v2054_v43  ;;  %v2080_v18 = vld [vmem:[%s7655_s8 + $0xb08] sm:$0xff]  ;;  %v2086_v19 = vld [vmem:[%s7655_s8 + $0xb38] sm:$0xff]  ;;  %v2097_v43 = vld [vmem:[%s7655_s8 + $0xb90] sm:$0xff] }
 0x23c   : > { %3450 = vmatmul.mubr.f32.gmra.mrb[66].mxu1 %v8782_v44  ;;  %6043 = vmatprep.subr.bf16.mxu0 %v6042_v30  ;;  %v2077_v30 = vld [vmem:[%s7655_s8 + $0xaf0] sm:$0xff]  ;;  %v6058_v26 = vpack.c.bf16 %v2086_v19, %v2080_v18  ;;  %v2108_v60 = vld [vmem:[%s7655_s8 + $0xbe8] sm:$0xff]  ;;  %v11844_v19 = vld [vmem:[#allocation59_spill] sm:$0xff] }
 0x23d   : > { %4286 = vmatmul.mubr.f32.gmra.mrb[66].mxu0 %v8782_v44  ;;  %3455 = vmatprep.mubr.f32.mxu1 %v8811_v59  ;;  %v2055_v44 = vld [vmem:[%s7655_s8 + $0xa40] sm:$0xff]  ;;  %v11843_v18 = vld [vmem:[#allocation57_spill] sm:$0xff] }
 0x23e   : > { %4291 = vmatprep.mubr.f32.mxu0 %v8811_v59  ;;  %5789 = vmatpush1.bf16.msra.mxu1 %v5788_v17  ;;  %v2066_v59 = vld [vmem:[%s7655_s8 + $0xa98] sm:$0xff]  ;;  %v6052_v37 = vpack.c.bf16 %v2061_v27, %v2055_v44  ;;  %v2107_v44 = vld [vmem:[%s7655_s8 + $0xbe0] sm:$0xff] }
 0x23f   : > { %6045 = vmatpush1.bf16.msra.mxu0 %v6044_v45  ;;  %5791 = vmatprep.subr.bf16.mxu1 %v5790_v40  ;;  %v5798_v16 = vpack.c.bf16 %v2072_v5, %v2066_v59  ;;  %v2098_v17 = vld [vmem:[%s7655_s8 + $0xb98] sm:$0xff]  ;;  %v5804_v45 = vpack.c.bf16 %v2083_v31, %v2077_v30  ;;  %v2109_v5 = vld [vmem:[%s7655_s8 + $0xbf0] sm:$0xff]  ;;  %v5812_v10 = vpack.c.bf16 %v2107_v44, %v2101_v28 }
 0x240   : > { %3456 = vmatmul.mubr.f32.gmra.mrb[68].mxu1 %v8826_v13  ;;  %6047 = vmatprep.subr.bf16.mxu0 %v6046_v6  ;;  %v11836_v6 = vld [vmem:[#allocation43_spill] sm:$0xff]  ;;  %v6062_v29 = vpack.c.bf16 %v2098_v17, %v2092_v32  ;;  %v1584_v32 = vld [vmem:[%s7664_s5 + $0x8] sm:$0xff] }
 0x241   : > { %4292 = vmatmul.mubr.f32.gmra.mrb[68].mxu0 %v8826_v13  ;;  %3461 = vmatprep.mubr.f32.mxu1 %v8847_v34  ;;  %v2067_v13 = vld [vmem:[%s7655_s8 + $0xaa0] sm:$0xff]  ;;  %v11838_v27 = vld [vmem:[#allocation47_spill] sm:$0xff] }
 0x242   : > { %4297 = vmatprep.mubr.f32.mxu0 %v8847_v34  ;;  %5793 = vmatpush1.bf16.msra.mxu1 %v5792_v63  ;;  %v2078_v34 = vld [vmem:[%s7655_s8 + $0xaf8] sm:$0xff]  ;;  %v6056_v50 = vpack.c.bf16 %v2073_v36, %v2067_v13  ;;  %v5814_v13 = vpack.c.bf16 %v2120_v42, %v2114_v20  ;;  %v1596_v42 = vld [vmem:[%s7664_s5 + $0x68] sm:$0xff] }
 0x243   : > { %6049 = vmatpush1.bf16.msra.mxu0 %v6048_v56  ;;  %5795 = vmatprep.subr.bf16.mxu1 %v5794_v57  ;;  %v5802_v2 = vpack.c.bf16 %v2084_v25, %v2078_v34  ;;  %v2110_v63 = vld [vmem:[%s7655_s8 + $0xbf8] sm:$0xff]  ;;  %v5808_v56 = vpack.c.bf16 %v2095_v46, %v2089_v0  ;;  %v11841_v34 = vld [vmem:[#allocation53_spill] sm:$0xff] }
 0x244   : > { %3462 = vmatmul.mubr.f32.gmra.mrb[70].mxu1 %v8868_v35  ;;  %6051 = vmatprep.subr.bf16.mxu0 %v6050_v3  ;;  %v2103_v3 = vld [vmem:[%s7655_s8 + $0xbc0] sm:$0xff]  ;;  %v6066_v59 = vpack.c.bf16 %v2110_v63, %v2104_v9  ;;  %v11842_v25 = vld [vmem:[#allocation55_spill] sm:$0xff]  ;;  %v11851_v46 = vld [vmem:[#allocation73_spill] sm:$0xff] }
 0x245   : > { %4298 = vmatmul.mubr.f32.gmra.mrb[70].mxu0 %v8868_v35  ;;  %3467 = vmatprep.mubr.f32.mxu1 %v8882_v53  ;;  %v2079_v35 = vld [vmem:[%s7655_s8 + $0xb00] sm:$0xff]  ;;  %v6068_v52 = vpack.c.bf16 %v2109_v5, %v2103_v3  ;;  %v11848_v31 = vld [vmem:[#allocation67_spill] sm:$0xff]  ;;  %v11855_v5 = vld [vmem:[#allocation81_spill] sm:$0xff] }
 0x246   : > { %4303 = vmatprep.mubr.f32.mxu0 %v8882_v53  ;;  %5797 = vmatpush1.bf16.msra.mxu1 %v5796_v55  ;;  %v2090_v53 = vld [vmem:[%s7655_s8 + $0xb58] sm:$0xff]  ;;  %v6060_v40 = vpack.c.bf16 %v2085_v51, %v2079_v35  ;;  %v11839_v55 = vld [vmem:[#allocation49_spill] sm:$0xff]  ;;  %v1583_v35 = vld [vmem:[%s7664_s5] sm:$0xff] }
 0x247   : > { %6053 = vmatpush1.bf16.msra.mxu0 %v6052_v37  ;;  %5799 = vmatprep.subr.bf16.mxu1 %v5798_v16  ;;  %v5806_v22 = vpack.c.bf16 %v2096_v39, %v2090_v53  ;;  %v2116_v37 = vld [vmem:[%s7655_s8 + $0xc28] sm:$0xff]  ;;  %v2122_v16 = vld [vmem:[%s7655_s8 + $0xc58] sm:$0xff]  ;;  %v1595_v3 = vld [vmem:[%s7664_s5 + $0x60] sm:$0xff] }
 0x248   : > { %3468 = vmatmul.mubr.f32.gmra.mrb[72].mxu1 %v8899_v11  ;;  %6055 = vmatprep.subr.bf16.mxu0 %v6054_v33  ;;  %v11840_v33 = vld [vmem:[#allocation51_spill] sm:$0xff]  ;;  %v6070_v36 = vpack.c.bf16 %v2122_v16, %v2116_v37  ;;  %v11849_v53 = vld [vmem:[#allocation69_spill] sm:$0xff]  ;;  %v2113_v37 = vld [vmem:[%s7655_s8 + $0xc10] sm:$0xff] }
 0x249   : > { %4304 = vmatmul.mubr.f32.gmra.mrb[72].mxu0 %v8899_v11  ;;  %3473 = vmatprep.mubr.f32.mxu1 %v8921_v38  ;;  %v2091_v11 = vld [vmem:[%s7655_s8 + $0xb60] sm:$0xff]  ;;  %v11852_v9 = vld [vmem:[#allocation75_spill] sm:$0xff] }
 0x24a   : > { %4309 = vmatprep.mubr.f32.mxu0 %v8921_v38  ;;  %5801 = vmatpush1.bf16.msra.mxu1 %v5800_v61  ;;  %v2102_v38 = vld [vmem:[%s7655_s8 + $0xbb8] sm:$0xff]  ;;  %v6064_v57 = vpack.c.bf16 %v2097_v43, %v2091_v11  ;;  %v11845_v61 = vld [vmem:[#allocation61_spill] sm:$0xff]  ;;  %v2119_v16 = vld [vmem:[%s7655_s8 + $0xc40] sm:$0xff] }
 0x24b   : > { %6057 = vmatpush1.bf16.msra.mxu0 %v6056_v50  ;;  %5803 = vmatprep.subr.bf16.mxu1 %v5802_v2  ;;  %v5810_v4 = vpack.c.bf16 %v2108_v60, %v2102_v38  ;;  %v11846_v50 = vld [vmem:[#allocation63_spill] sm:$0xff]  ;;  %v11847_v2 = vld [vmem:[#allocation65_spill] sm:$0xff] }
 0x24c   : > { %3474 = vmatmul.mubr.f32.gmra.mrb[74].mxu1 %v11836_v6  ;;  %6059 = vmatprep.subr.bf16.mxu0 %v6058_v26  ;;  %v1590_v60 = vld [vmem:[%s7664_s5 + $0x38] sm:$0xff] }
 0x24d   : > { %4310 = vmatmul.mubr.f32.gmra.mrb[74].mxu0 %v11836_v6  ;;  %3479 = vmatprep.mubr.f32.mxu1 %v11837_v21  ;;  %v1589_v6 = vld [vmem:[%s7664_s5 + $0x30] sm:$0xff]  ;;  %v11854_v44 = vld [vmem:[#allocation79_spill] sm:$0xff] }
 0x24e   : > { %4315 = vmatprep.mubr.f32.mxu0 %v11837_v21  ;;  %5805 = vmatpush1.bf16.msra.mxu1 %v5804_v45 }
 0x24f   : > { %6061 = vmatpush1.bf16.msra.mxu0 %v6060_v40  ;;  %5807 = vmatprep.subr.bf16.mxu1 %v5806_v22  ;;  %v11850_v22 = vld [vmem:[#allocation71_spill] sm:$0xff] }
 0x250   : > { %3480 = vmatmul.mubr.f32.gmra.mrb[76].mxu1 %v11838_v27  ;;  %6063 = vmatprep.subr.bf16.mxu0 %v6062_v29 }
 0x251   : > { %4316 = vmatmul.mubr.f32.gmra.mrb[76].mxu0 %v11838_v27  ;;  %3485 = vmatprep.mubr.f32.mxu1 %v11839_v55 }
 0x252   : > { %4321 = vmatprep.mubr.f32.mxu0 %v11839_v55  ;;  %5809 = vmatpush1.bf16.msra.mxu1 %v5808_v56  ;;  %v11853_v56 = vld [vmem:[#allocation77_spill] sm:$0xff] }
 0x253   : > { %6065 = vmatpush1.bf16.msra.mxu0 %v6064_v57  ;;  %5811 = vmatprep.subr.bf16.mxu1 %v5810_v4 }
 0x254   : > { %3486 = vmatmul.mubr.f32.gmra.mrb[78].mxu1 %v11840_v33  ;;  %6067 = vmatprep.subr.bf16.mxu0 %v6066_v59 }
 0x255   : > { %4322 = vmatmul.mubr.f32.gmra.mrb[78].mxu0 %v11840_v33  ;;  %3491 = vmatprep.mubr.f32.mxu1 %v11841_v34 }
 0x256   : > { %4327 = vmatprep.mubr.f32.mxu0 %v11841_v34  ;;  %5813 = vmatpush1.bf16.msra.mxu1 %v5812_v10  ;;  %v11856_v34 = vld [vmem:[#allocation83_spill] sm:$0xff] }
 0x257   : > { %6069 = vmatpush1.bf16.msra.mxu0 %v6068_v52  ;;  %5815 = vmatprep.subr.bf16.mxu1 %v5814_v13  ;;  %v2115_v52 = vld [vmem:[%s7655_s8 + $0xc20] sm:$0xff]  ;;  %v2121_v13 = vld [vmem:[%s7655_s8 + $0xc50] sm:$0xff] }
 0x258   : > { %3492 = vmatmul.mubr.f32.gmra.mrb[80].mxu1 %v11842_v25  ;;  %6071 = vmatprep.subr.bf16.mxu0 %v6070_v36 }
 0x259   : > { %4328 = vmatmul.mubr.f32.gmra.mrb[80].mxu0 %v11842_v25  ;;  %3497 = vmatprep.mubr.f32.mxu1 %v11843_v18  ;;  %v2126_v25 = vld [vmem:[%s7655_s8 + $0xc78] sm:$0xff] }
 0x25a   : > { %4333 = vmatprep.mubr.f32.mxu0 %v11843_v18  ;;  %v2132_v18 = vld [vmem:[%s7655_s8 + $0xca8] sm:$0xff] }
 0x25c   : > { %3498 = vmatmul.mubr.f32.gmra.mrb[82].mxu1 %v11844_v19 }
 0x25d   : > { %4334 = vmatmul.mubr.f32.gmra.mrb[82].mxu0 %v11844_v19  ;;  %3503 = vmatprep.mubr.f32.mxu1 %v11845_v61 }
 0x25e   : > { %4339 = vmatprep.mubr.f32.mxu0 %v11845_v61  ;;  %v1601_v61 = vld [vmem:[%s7664_s5 + $0x90] sm:$0xff] }
 0x260   : > { %3504 = vmatmul.mubr.f32.gmra.mrb[84].mxu1 %v11846_v50 }
 0x261   : > { %4340 = vmatmul.mubr.f32.gmra.mrb[84].mxu0 %v11846_v50  ;;  %3509 = vmatprep.mubr.f32.mxu1 %v11847_v2 }
 0x262   : > { %4345 = vmatprep.mubr.f32.mxu0 %v11847_v2 }
 0x264   : > { %v2770_v30 = vpop.f32.mrb[0].mxu1  ;;  %3510 = vmatmul.mubr.f32.gmra.mrb[86].mxu1 %v11848_v31 }
 0x265   : > { %v3188_v26 = vpop.f32.mrb[0].mxu0  ;;  %v2772_v51 = vpop.f32.mrb[1].mxu1  ;;  %4346 = vmatmul.mubr.f32.gmra.mrb[86].mxu0 %v11848_v31  ;;  %3515 = vmatprep.mubr.f32.mxu1 %v11849_v53  ;;  %v5816_v31 = vpack.c.bf16 %v2119_v16, %v2113_v37  ;;  %v2150_v16 = vld [vmem:[%s7655_s8 + $0xd38] sm:$0xff] }
 0x266   : > { %v6198_v39 = vadd.f32 %v3188_v26, %v2770_v30  ;;  %v3190_v17 = vpop.f32.mrb[1].mxu0  ;;  %4351 = vmatprep.mubr.f32.mxu0 %v11849_v53  ;;  %v11857_v30 = vld [vmem:[#allocation85_spill] sm:$0xff]  ;;  %v2134_v26 = vld [vmem:[%s7655_s8 + $0xcb8] sm:$0xff] }
 0x267   : > { %v6199_v45 = vadd.f32 %v3190_v17, %v2772_v51  ;;  %v1602_v53 = vld [vmem:[%s7664_s5 + $0x98] sm:$0xff] }
 0x268   : > { %v5003_v40 = vadd.f32 %v6198_v39, %v1583_v35  ;;  %3516 = vmatmul.mubr.f32.gmra.mrb[88].mxu1 %v11850_v22  ;;  %v2128_v35 = vld [vmem:[%s7655_s8 + $0xc88] sm:$0xff] }
 0x269   : > { %v5004_v0 = vadd.f32 %v6199_v45, %v1584_v32  ;;  %4352 = vmatmul.mubr.f32.gmra.mrb[88].mxu0 %v11850_v22  ;;  %3521 = vmatprep.mubr.f32.mxu1 %v11851_v46  ;;  %v6072_v32 = vpack.c.bf16 %v2121_v13, %v2115_v52  ;;  %v5818_v45 = vpack.c.bf16 %v2132_v18, %v2126_v25  ;;  %v2131_v22 = vld [vmem:[%s7655_s8 + $0xca0] sm:$0xff]  ;;  %v1608_v13 = vld [vmem:[%s7664_s5 + $0xc8] sm:$0xff]  ;;  %v2158_v25 = vld [vmem:[%s7655_s8 + $0xd78] sm:$0xff] }
 0x26a   : > { %5147 = vst [vmem:[%s7664_s5] sm:$0xff] %v5003_v40  ;;  %4357 = vmatprep.mubr.f32.mxu0 %v11851_v46  ;;  %v2125_v40 = vld [vmem:[%s7655_s8 + $0xc70] sm:$0xff] }
 0x26b   : > { %v2776_v11 = vpop.f32.mrb[2].mxu1  ;;  %5148 = vst [vmem:[%s7664_s5 + $0x8] sm:$0xff] %v5004_v0  ;;  %v2127_v0 = vld [vmem:[%s7655_s8 + $0xc80] sm:$0xff] }
 0x26c   : > { %v3194_v29 = vpop.f32.mrb[2].mxu0  ;;  %v2778_v43 = vpop.f32.mrb[3].mxu1  ;;  %3522 = vmatmul.mubr.f32.gmra.mrb[90].mxu1 %v11852_v9 }
 0x26d   : > { %v6200_v38 = vadd.f32 %v3194_v29, %v2776_v11  ;;  %v3196_v21 = vpop.f32.mrb[3].mxu0  ;;  %4358 = vmatmul.mubr.f32.gmra.mrb[90].mxu0 %v11852_v9  ;;  %3527 = vmatprep.mubr.f32.mxu1 %v11853_v56  ;;  %v11858_v11 = vld [vmem:[#allocation87_spill] sm:$0xff]  ;;  %v2133_v29 = vld [vmem:[%s7655_s8 + $0xcb0] sm:$0xff] }
 0x26e   : > { %v6201_v63 = vadd.f32 %v3196_v21, %v2778_v43  ;;  %4363 = vmatprep.mubr.f32.mxu0 %v11853_v56  ;;  %v2138_v43 = vld [vmem:[%s7655_s8 + $0xcd8] sm:$0xff]  ;;  %v2140_v21 = vld [vmem:[%s7655_s8 + $0xce8] sm:$0xff]  ;;  %v5820_v56 = vpack.c.bf16 %v2131_v22, %v2125_v40 }
 0x26f   : > { %v5009_v57 = vadd.f32 %v6200_v38, %v1589_v6  ;;  %v6074_v6 = vpack.c.bf16 %v2134_v26, %v2128_v35  ;;  %v2144_v38 = vld [vmem:[%s7655_s8 + $0xd08] sm:$0xff]  ;;  %v2146_v9 = vld [vmem:[%s7655_s8 + $0xd18] sm:$0xff]  ;;  %v2151_v35 = vld [vmem:[%s7655_s8 + $0xd40] sm:$0xff] }
 0x270   : > { %v5010_v4 = vadd.f32 %v6201_v63, %v1590_v60  ;;  %v2782_v28 = vpop.f32.mrb[4].mxu1  ;;  %3528 = vmatmul.mubr.f32.gmra.mrb[92].mxu1 %v11854_v44  ;;  %v11859_v63 = vld [vmem:[#allocation89_spill] sm:$0xff]  ;;  %v6078_v37 = vpack.c.bf16 %v2146_v9, %v2140_v21  ;;  %v2170_v22 = vld [vmem:[%s7655_s8 + $0xdd8] sm:$0xff]  ;;  %v2167_v21 = vld [vmem:[%s7655_s8 + $0xdc0] sm:$0xff] }
 0x271   : > { %5153 = vst [vmem:[%s7664_s5 + $0x30] sm:$0xff] %v5009_v57  ;;  %v3200_v27 = vpop.f32.mrb[4].mxu0  ;;  %v2784_v59 = vpop.f32.mrb[5].mxu1  ;;  %4364 = vmatmul.mubr.f32.gmra.mrb[92].mxu0 %v11854_v44  ;;  %3533 = vmatprep.mubr.f32.mxu1 %v11855_v5  ;;  %v2137_v57 = vld [vmem:[%s7655_s8 + $0xcd0] sm:$0xff]  ;;  %v6076_v44 = vpack.c.bf16 %v2133_v29, %v2127_v0  ;;  %v2164_v40 = vld [vmem:[%s7655_s8 + $0xda8] sm:$0xff]  ;;  %v2163_v9 = vld [vmem:[%s7655_s8 + $0xda0] sm:$0xff] }
 0x272   : > { %5154 = vst [vmem:[%s7664_s5 + $0x38] sm:$0xff] %v5010_v4  ;;  %v6202_v20 = vadd.f32 %v3200_v27, %v2782_v28  ;;  %v3202_v55 = vpop.f32.mrb[5].mxu0  ;;  %4369 = vmatprep.mubr.f32.mxu0 %v11855_v5  ;;  %v2143_v4 = vld [vmem:[%s7655_s8 + $0xd00] sm:$0xff] }
 0x273   : > { %v6203_v10 = vadd.f32 %v3202_v55, %v2784_v59  ;;  %v2139_v27 = vld [vmem:[%s7655_s8 + $0xce0] sm:$0xff]  ;;  %v2145_v59 = vld [vmem:[%s7655_s8 + $0xd10] sm:$0xff]  ;;  %v11860_v55 = vld [vmem:[#allocation91_spill] sm:$0xff] }
 0x274   : > { %v5015_v33 = vadd.f32 %v6202_v20, %v1595_v3  ;;  %v2788_v36 = vpop.f32.mrb[6].mxu1  ;;  %3534 = vmatmul.mubr.f32.gmra.mrb[94].mxu1 %v11856_v34  ;;  %v5822_v3 = vpack.c.bf16 %v2144_v38, %v2138_v43  ;;  %v1607_v5 = vld [vmem:[%s7664_s5 + $0xc0] sm:$0xff] }
 0x275   : > { %v5016_v19 = vadd.f32 %v6203_v10, %v1596_v42  ;;  %v3206_v50 = vpop.f32.mrb[6].mxu0  ;;  %v2790_v2 = vpop.f32.mrb[7].mxu1  ;;  %4370 = vmatmul.mubr.f32.gmra.mrb[94].mxu0 %v11856_v34  ;;  %3604 = vmatprep.mubr.f32.mxu1 %v11857_v30  ;;  %v2156_v10 = vld [vmem:[%s7655_s8 + $0xd68] sm:$0xff] }
 0x276   : > { %5159 = vst [vmem:[%s7664_s5 + $0x60] sm:$0xff] %v5015_v33  ;;  %v6204_v51 = vadd.f32 %v3206_v50, %v2788_v36  ;;  %v3208_v39 = vpop.f32.mrb[7].mxu0  ;;  %4440 = vmatprep.mubr.f32.mxu0 %v11857_v30  ;;  %v11861_v36 = vld [vmem:[#allocation93_spill] sm:$0xff]  ;;  %v6080_v50 = vpack.c.bf16 %v2145_v59, %v2139_v27  ;;  %v2149_v30 = vld [vmem:[%s7655_s8 + $0xd30] sm:$0xff] }
 0x277   : > { %5160 = vst [vmem:[%s7664_s5 + $0x68] sm:$0xff] %v5016_v19  ;;  %v6205_v17 = vadd.f32 %v3208_v39, %v2790_v2  ;;  %v2152_v34 = vld [vmem:[%s7655_s8 + $0xd48] sm:$0xff]  ;;  %v5824_v19 = vpack.c.bf16 %v2143_v4, %v2137_v57  ;;  %v5826_v2 = vpack.c.bf16 %v2156_v10, %v2150_v16  ;;  %v2157_v39 = vld [vmem:[%s7655_s8 + $0xd70] sm:$0xff]  ;;  %v11864_v4 = vld [vmem:[#allocation99_spill] sm:$0xff] }
 0x278   : > { %v5021_v46 = vadd.f32 %v6204_v51, %v1601_v61  ;;  %3605 = vmatmul.mubr.f32.vlgmr.msra.gmra.mrb[48].mxu1 %v11858_v11  ;;  %v11862_v51 = vld [vmem:[#allocation95_spill] sm:$0xff]  ;;  %v6084_v38 = vpack.c.bf16 %v2157_v39, %v2151_v35  ;;  %v2180_v27 = vld [vmem:[%s7655_s8 + $0xe28] sm:$0xff]  ;;  %v2173_v10 = vld [vmem:[%s7655_s8 + $0xdf0] sm:$0xff] }
 0x279   : > { %v5022_v60 = vadd.f32 %v6205_v17, %v1602_v53  ;;  %4441 = vmatmul.mubr.f32.vlgmr.msra.gmra.mrb[48].mxu0 %v11858_v11  ;;  %5817 = vmatpush1.bf16.msra.mxu1 %v5816_v31  ;;  %v2155_v31 = vld [vmem:[%s7655_s8 + $0xd60] sm:$0xff]  ;;  %v6082_v53 = vpack.c.bf16 %v2158_v25, %v2152_v34  ;;  %v2168_v17 = vld [vmem:[%s7655_s8 + $0xdc8] sm:$0xff]  ;;  %v2161_v11 = vld [vmem:[%s7655_s8 + $0xd90] sm:$0xff] }
 0x27a   : > { %5165 = vst [vmem:[%s7664_s5 + $0x90] sm:$0xff] %v5021_v46  ;;  %6073 = vmatpush1.bf16.msra.mxu0 %v6072_v32  ;;  %3610 = vmatprep.mubr.f32.mxu1 %v11859_v63  ;;  %v2162_v32 = vld [vmem:[%s7655_s8 + $0xd98] sm:$0xff]  ;;  %v5828_v46 = vpack.c.bf16 %v2155_v31, %v2149_v30  ;;  %v5832_v16 = vpack.c.bf16 %v2167_v21, %v2161_v11  ;;  %v2181_v35 = vld [vmem:[%s7655_s8 + $0xe30] sm:$0xff]  ;;  %v11867_v39 = vld [vmem:[#allocation105_spill] sm:$0xff] }
 0x27b   : > { %5166 = vst [vmem:[%s7664_s5 + $0x98] sm:$0xff] %v5022_v60  ;;  %v2794_v28 = vpop.f32.mrb[8].mxu1  ;;  %4446 = vmatprep.mubr.f32.mxu0 %v11859_v63  ;;  %5819 = vmatprep.subr.bf16.mxu1 %v5818_v45  ;;  %v11863_v45 = vld [vmem:[#allocation97_spill] sm:$0xff]  ;;  %v5830_v60 = vpack.c.bf16 %v2168_v17, %v2162_v32  ;;  %v11866_v30 = vld [vmem:[#allocation103_spill] sm:$0xff] }
 0x27c   : > { %v3212_v20 = vpop.f32.mrb[8].mxu0  ;;  %v2796_v42 = vpop.f32.mrb[9].mxu1  ;;  %3611 = vmatmul.mubr.f32.gmra.mrb[50].mxu1 %v11860_v55  ;;  %6075 = vmatprep.subr.bf16.mxu0 %v6074_v6  ;;  %v1613_v6 = vld [vmem:[%s7664_s5 + $0xf0] sm:$0xff]  ;;  %v2188_v32 = vld [vmem:[%s7655_s8 + $0xe68] sm:$0xff]  ;;  %v2194_v17 = vld [vmem:[%s7655_s8 + $0xe98] sm:$0xff] }
 0x27d   : > { %v6206_v52 = vadd.f32 %v3212_v20, %v2794_v28  ;;  %v3214_v33 = vpop.f32.mrb[9].mxu0  ;;  %4447 = vmatmul.mubr.f32.gmra.mrb[50].mxu0 %v11860_v55  ;;  %3616 = vmatprep.mubr.f32.mxu1 %v11861_v36  ;;  %v6086_v28 = vpack.c.bf16 %v2170_v22, %v2164_v40  ;;  %v2176_v20 = vld [vmem:[%s7655_s8 + $0xe08] sm:$0xff]  ;;  %v2185_v22 = vld [vmem:[%s7655_s8 + $0xe50] sm:$0xff]  ;;  %v6094_v21 = vpack.c.bf16 %v2194_v17, %v2188_v32  ;;  %v2215_v17 = vld [vmem:[%s7655_s8 + $0xf40] sm:$0xff] }
 0x27e   : > { %v6207_v18 = vadd.f32 %v3214_v33, %v2796_v42  ;;  %5821 = vmatpush1.bf16.msra.mxu1 %v5820_v56  ;;  %4452 = vmatprep.mubr.f32.mxu0 %v11861_v36  ;;  %v1614_v56 = vld [vmem:[%s7664_s5 + $0xf8] sm:$0xff] }
 0x27f   : > { %v5027_v61 = vadd.f32 %v6206_v52, %v1607_v5  ;;  %6077 = vmatpush1.bf16.msra.mxu0 %v6076_v44  ;;  %5823 = vmatprep.subr.bf16.mxu1 %v5822_v3  ;;  %v2169_v44 = vld [vmem:[%s7655_s8 + $0xdd0] sm:$0xff]  ;;  %v2174_v3 = vld [vmem:[%s7655_s8 + $0xdf8] sm:$0xff]  ;;  %v11865_v5 = vld [vmem:[#allocation101_spill] sm:$0xff] }
 0x280   : > { %v5028_v26 = vadd.f32 %v6207_v18, %v1608_v13  ;;  %3617 = vmatmul.mubr.f32.gmra.mrb[52].mxu1 %v11862_v51  ;;  %6079 = vmatprep.subr.bf16.mxu0 %v6078_v37  ;;  %v2182_v42 = vld [vmem:[%s7655_s8 + $0xe38] sm:$0xff]  ;;  %v1619_v13 = vld [vmem:[%s7664_s5 + $0x120] sm:$0xff]  ;;  %v6088_v34 = vpack.c.bf16 %v2169_v44, %v2163_v9  ;;  %v5834_v25 = vpack.c.bf16 %v2180_v27, %v2174_v3  ;;  %v2200_v44 = vld [vmem:[%s7655_s8 + $0xec8] sm:$0xff] }
 0x281   : > { %5171 = vst [vmem:[%s7664_s5 + $0xc0] sm:$0xff] %v5027_v61  ;;  %4453 = vmatmul.mubr.f32.gmra.mrb[52].mxu0 %v11862_v51  ;;  %3622 = vmatprep.mubr.f32.mxu1 %v11863_v45  ;;  %v2179_v18 = vld [vmem:[%s7655_s8 + $0xe20] sm:$0xff]  ;;  %v6090_v31 = vpack.c.bf16 %v2182_v42, %v2176_v20  ;;  %v2192_v51 = vld [vmem:[%s7655_s8 + $0xe88] sm:$0xff]  ;;  %v2198_v9 = vld [vmem:[%s7655_s8 + $0xeb8] sm:$0xff] }
 0x282   : > { %5172 = vst [vmem:[%s7664_s5 + $0xc8] sm:$0xff] %v5028_v26  ;;  %v2800_v0 = vpop.f32.mrb[10].mxu1  ;;  %4458 = vmatprep.mubr.f32.mxu0 %v11863_v45  ;;  %5825 = vmatpush1.bf16.msra.mxu1 %v5824_v19  ;;  %v2175_v19 = vld [vmem:[%s7655_s8 + $0xe00] sm:$0xff]  ;;  %v2186_v26 = vld [vmem:[%s7655_s8 + $0xe58] sm:$0xff]  ;;  %v5836_v40 = vpack.c.bf16 %v2179_v18, %v2173_v10 }
 0x283   : > { %v3218_v29 = vpop.f32.mrb[10].mxu0  ;;  %v2802_v43 = vpop.f32.mrb[11].mxu1  ;;  %6081 = vmatpush1.bf16.msra.mxu0 %v6080_v50  ;;  %5827 = vmatprep.subr.bf16.mxu1 %v5826_v2  ;;  %v1620_v50 = vld [vmem:[%s7664_s5 + $0x128] sm:$0xff]  ;;  %v5838_v11 = vpack.c.bf16 %v2192_v51, %v2186_v26  ;;  %v2206_v3 = vld [vmem:[%s7655_s8 + $0xef8] sm:$0xff]  ;;  %v2203_v10 = vld [vmem:[%s7655_s8 + $0xee0] sm:$0xff] }
 0x284   : > { %v6208_v63 = vadd.f32 %v3218_v29, %v2800_v0  ;;  %v3220_v57 = vpop.f32.mrb[11].mxu0  ;;  %3623 = vmatmul.mubr.f32.gmra.mrb[54].mxu1 %v11864_v4  ;;  %6083 = vmatprep.subr.bf16.mxu0 %v6082_v53  ;;  %v2187_v29 = vld [vmem:[%s7655_s8 + $0xe60] sm:$0xff]  ;;  %v2210_v18 = vld [vmem:[%s7655_s8 + $0xf18] sm:$0xff] }
 0x285   : > { %v6209_v59 = vadd.f32 %v3220_v57, %v2802_v43  ;;  %4459 = vmatmul.mubr.f32.gmra.mrb[54].mxu0 %v11864_v4  ;;  %3628 = vmatprep.mubr.f32.mxu1 %v11865_v5  ;;  %v2193_v43 = vld [vmem:[%s7655_s8 + $0xe90] sm:$0xff]  ;;  %v1631_v26 = vld [vmem:[%s7664_s5 + $0x180] sm:$0xff] }
 0x286   : > { %v5033_v55 = vadd.f32 %v6208_v63, %v1613_v6  ;;  %v2806_v37 = vpop.f32.mrb[12].mxu1  ;;  %4464 = vmatprep.mubr.f32.mxu0 %v11865_v5  ;;  %5829 = vmatpush1.bf16.msra.mxu1 %v5828_v46  ;;  %v6092_v46 = vpack.c.bf16 %v2181_v35, %v2175_v19  ;;  %v2191_v6 = vld [vmem:[%s7655_s8 + $0xe80] sm:$0xff]  ;;  %v2204_v63 = vld [vmem:[%s7655_s8 + $0xee8] sm:$0xff]  ;;  %v2209_v35 = vld [vmem:[%s7655_s8 + $0xf10] sm:$0xff] }
 0x287   : > { %v5034_v52 = vadd.f32 %v6209_v59, %v1614_v56  ;;  %v3224_v33 = vpop.f32.mrb[12].mxu0  ;;  %v2808_v36 = vpop.f32.mrb[13].mxu1  ;;  %6085 = vmatpush1.bf16.msra.mxu0 %v6084_v38  ;;  %5831 = vmatprep.subr.bf16.mxu1 %v5830_v60  ;;  %v11868_v60 = vld [vmem:[#allocation107_spill] sm:$0xff]  ;;  %v1625_v56 = vld [vmem:[%s7664_s5 + $0x150] sm:$0xff]  ;;  %v5840_v20 = vpack.c.bf16 %v2191_v6, %v2185_v22  ;;  %v2216_v19 = vld [vmem:[%s7655_s8 + $0xf48] sm:$0xff] }
 0x288   : > { %5177 = vst [vmem:[%s7664_s5 + $0xf0] sm:$0xff] %v5033_v55  ;;  %v6210_v61 = vadd.f32 %v3224_v33, %v2806_v37  ;;  %v3226_v2 = vpop.f32.mrb[13].mxu0  ;;  %3629 = vmatmul.mubr.f32.gmra.mrb[56].mxu1 %v11866_v30  ;;  %6087 = vmatprep.subr.bf16.mxu0 %v6086_v28  ;;  %v11869_v28 = vld [vmem:[#allocation109_spill] sm:$0xff]  ;;  %v1626_v59 = vld [vmem:[%s7664_s5 + $0x158] sm:$0xff]  ;;  %v6096_v55 = vpack.c.bf16 %v2193_v43, %v2187_v29  ;;  %v2217_v6 = vld [vmem:[%s7655_s8 + $0xf50] sm:$0xff] }
 0x289   : > { %5178 = vst [vmem:[%s7664_s5 + $0xf8] sm:$0xff] %v5034_v52  ;;  %v6211_v53 = vadd.f32 %v3226_v2, %v2808_v36  ;;  %4465 = vmatmul.mubr.f32.gmra.mrb[56].mxu0 %v11866_v30  ;;  %3634 = vmatprep.mubr.f32.mxu1 %v11867_v39  ;;  %v5842_v37 = vpack.c.bf16 %v2204_v63, %v2198_v9  ;;  %v2199_v52 = vld [vmem:[%s7655_s8 + $0xec0] sm:$0xff]  ;;  %v11870_v33 = vld [vmem:[#allocation111_spill] sm:$0xff]  ;;  %v1632_v22 = vld [vmem:[%s7664_s5 + $0x188] sm:$0xff] }
 0x28a   : > { %v5039_v45 = vadd.f32 %v6210_v61, %v1619_v13  ;;  %4470 = vmatprep.mubr.f32.mxu0 %v11867_v39  ;;  %5833 = vmatpush1.bf16.msra.mxu1 %v5832_v16  ;;  %v2197_v16 = vld [vmem:[%s7655_s8 + $0xeb0] sm:$0xff]  ;;  %v6098_v36 = vpack.c.bf16 %v2206_v3, %v2200_v44  ;;  %v11871_v61 = vld [vmem:[#allocation113_spill] sm:$0xff]  ;;  %v2218_v2 = vld [vmem:[%s7655_s8 + $0xf58] sm:$0xff]  ;;  %v5846_v32 = vpack.c.bf16 %v2216_v19, %v2210_v18 }
 0x28b   : > { %v5040_v0 = vadd.f32 %v6211_v53, %v1620_v50  ;;  %6089 = vmatpush1.bf16.msra.mxu0 %v6088_v34  ;;  %5835 = vmatprep.subr.bf16.mxu1 %v5834_v25  ;;  %v2205_v34 = vld [vmem:[%s7655_s8 + $0xef0] sm:$0xff]  ;;  %v2212_v50 = vld [vmem:[%s7655_s8 + $0xf28] sm:$0xff]  ;;  %v2222_v43 = vld [vmem:[%s7655_s8 + $0xf78] sm:$0xff] }
 0x28c   : > { %5183 = vst [vmem:[%s7664_s5 + $0x120] sm:$0xff] %v5039_v45  ;;  %v2812_v38 = vpop.f32.mrb[14].mxu1  ;;  %3635 = vmatmul.mubr.f32.gmra.mrb[58].mxu1 %v11868_v60  ;;  %6091 = vmatprep.subr.bf16.mxu0 %v6090_v31  ;;  %v5844_v31 = vpack.c.bf16 %v2203_v10, %v2197_v16  ;;  %v6100_v39 = vpack.c.bf16 %v2205_v34, %v2199_v52  ;;  %v2211_v45 = vld [vmem:[%s7655_s8 + $0xf20] sm:$0xff]  ;;  %v2224_v9 = vld [vmem:[%s7655_s8 + $0xf88] sm:$0xff]  ;;  %v2230_v63 = vld [vmem:[%s7655_s8 + $0xfb8] sm:$0xff] }
 0x28d   : > { %5184 = vst [vmem:[%s7664_s5 + $0x128] sm:$0xff] %v5040_v0  ;;  %v3230_v57 = vpop.f32.mrb[14].mxu0  ;;  %v2814_v4 = vpop.f32.mrb[15].mxu1  ;;  %4471 = vmatmul.mubr.f32.gmra.mrb[58].mxu0 %v11868_v60  ;;  %3640 = vmatprep.mubr.f32.mxu1 %v11869_v28  ;;  %v11873_v60 = vld [vmem:[#allocation117_spill] sm:$0xff]  ;;  %v2221_v3 = vld [vmem:[%s7655_s8 + $0xf70] sm:$0xff]  ;;  %v11874_v10 = vld [vmem:[#allocation119_spill] sm:$0xff]  ;;  %v6106_v52 = vpack.c.bf16 %v2230_v63, %v2224_v9 }
 0x28e   : > { %v6212_v27 = vadd.f32 %v3230_v57, %v2812_v38  ;;  %v3232_v5 = vpop.f32.mrb[15].mxu0  ;;  %4476 = vmatprep.mubr.f32.mxu0 %v11869_v28  ;;  %5837 = vmatpush1.bf16.msra.mxu1 %v5836_v40  ;;  %v2228_v38 = vld [vmem:[%s7655_s8 + $0xfa8] sm:$0xff]  ;;  %v5848_v57 = vpack.c.bf16 %v2215_v17, %v2209_v35  ;;  %v1637_v28 = vld [vmem:[%s7664_s5 + $0x1b0] sm:$0xff] }
 0x28f   : > { %v6213_v42 = vadd.f32 %v3232_v5, %v2814_v4  ;;  %6093 = vmatpush1.bf16.msra.mxu0 %v6092_v46  ;;  %5839 = vmatprep.subr.bf16.mxu1 %v5838_v11  ;;  %v11872_v46 = vld [vmem:[#allocation115_spill] sm:$0xff]  ;;  %v6102_v11 = vpack.c.bf16 %v2218_v2, %v2212_v50  ;;  %v5850_v5 = vpack.c.bf16 %v2228_v38, %v2222_v43  ;;  %v2240_v34 = vld [vmem:[%s7655_s8 + $0x1008] sm:$0xff]  ;;  %v2233_v35 = vld [vmem:[%s7655_s8 + $0xfd0] sm:$0xff] }
 0x290   : > { %v5045_v13 = vadd.f32 %v6212_v27, %v1625_v56  ;;  %3641 = vmatmul.mubr.f32.gmra.mrb[60].mxu1 %v11870_v33  ;;  %6095 = vmatprep.subr.bf16.mxu0 %v6094_v21  ;;  %v2236_v19 = vld [vmem:[%s7655_s8 + $0xfe8] sm:$0xff]  ;;  %v2241_v17 = vld [vmem:[%s7655_s8 + $0x1010] sm:$0xff] }
 0x291   : > { %v5046_v25 = vadd.f32 %v6213_v42, %v1626_v59  ;;  %4477 = vmatmul.mubr.f32.gmra.mrb[60].mxu0 %v11870_v33  ;;  %3646 = vmatprep.mubr.f32.mxu1 %v11871_v61  ;;  %v6104_v59 = vpack.c.bf16 %v2217_v6, %v2211_v45  ;;  %v2227_v42 = vld [vmem:[%s7655_s8 + $0xfa0] sm:$0xff]  ;;  %v2246_v45 = vld [vmem:[%s7655_s8 + $0x1038] sm:$0xff]  ;;  %v2248_v6 = vld [vmem:[%s7655_s8 + $0x1048] sm:$0xff] }
 0x292   : > { %5189 = vst [vmem:[%s7664_s5 + $0x150] sm:$0xff] %v5045_v13  ;;  %v2818_v30 = vpop.f32.mrb[16].mxu1  ;;  %4482 = vmatprep.mubr.f32.mxu0 %v11871_v61  ;;  %5841 = vmatpush1.bf16.msra.mxu1 %v5840_v20  ;;  %v2229_v13 = vld [vmem:[%s7655_s8 + $0xfb0] sm:$0xff]  ;;  %v2242_v61 = vld [vmem:[%s7655_s8 + $0x1018] sm:$0xff]  ;;  %v5852_v50 = vpack.c.bf16 %v2227_v42, %v2221_v3  ;;  %v1644_v38 = vld [vmem:[%s7664_s5 + $0x1e8] sm:$0xff] }
 0x293   : > { %5190 = vst [vmem:[%s7664_s5 + $0x158] sm:$0xff] %v5046_v25  ;;  %v3236_v51 = vpop.f32.mrb[16].mxu0  ;;  %v2820_v53 = vpop.f32.mrb[17].mxu1  ;;  %6097 = vmatpush1.bf16.msra.mxu0 %v6096_v55  ;;  %5843 = vmatprep.subr.bf16.mxu1 %v5842_v37  ;;  %v2223_v55 = vld [vmem:[%s7655_s8 + $0xf80] sm:$0xff]  ;;  %v1638_v37 = vld [vmem:[%s7664_s5 + $0x1b8] sm:$0xff]  ;;  %v11875_v25 = vld [vmem:[#allocation121_spill] sm:$0xff] }
 0x294   : > { %v6214_v40 = vadd.f32 %v3236_v51, %v2818_v30  ;;  %v3238_v0 = vpop.f32.mrb[17].mxu0  ;;  %3647 = vmatmul.mubr.f32.gmra.mrb[62].mxu1 %v11872_v46  ;;  %6099 = vmatprep.subr.bf16.mxu0 %v6098_v36  ;;  %v2234_v36 = vld [vmem:[%s7655_s8 + $0xfd8] sm:$0xff]  ;;  %v6108_v30 = vpack.c.bf16 %v2229_v13, %v2223_v55  ;;  %v2235_v51 = vld [vmem:[%s7655_s8 + $0xfe0] sm:$0xff]  ;;  %v11879_v42 = vld [vmem:[#allocation129_spill] sm:$0xff] }
 0x295   : > { %v6215_v29 = vadd.f32 %v3238_v0, %v2820_v53  ;;  %4483 = vmatmul.mubr.f32.gmra.mrb[62].mxu0 %v11872_v46  ;;  %3652 = vmatprep.mubr.f32.mxu1 %v11873_v60  ;;  %v11876_v53 = vld [vmem:[#allocation123_spill] sm:$0xff]  ;;  %v1643_v0 = vld [vmem:[%s7664_s5 + $0x1e0] sm:$0xff]  ;;  %v6112_v63 = vpack.c.bf16 %v2241_v17, %v2235_v51 }
 0x296   : > { %v5051_v21 = vadd.f32 %v6214_v40, %v1631_v26  ;;  %v2824_v56 = vpop.f32.mrb[18].mxu1  ;;  %4488 = vmatprep.mubr.f32.mxu0 %v11873_v60  ;;  %5845 = vmatpush1.bf16.msra.mxu1 %v5844_v31  ;;  %v5854_v31 = vpack.c.bf16 %v2240_v34, %v2234_v36  ;;  %v2239_v26 = vld [vmem:[%s7655_s8 + $0x1000] sm:$0xff]  ;;  %v2252_v40 = vld [vmem:[%s7655_s8 + $0x1068] sm:$0xff]  ;;  %v2257_v34 = vld [vmem:[%s7655_s8 + $0x1090] sm:$0xff] }
 0x297   : > { %v5052_v4 = vadd.f32 %v6215_v29, %v1632_v22  ;;  %v3242_v44 = vpop.f32.mrb[18].mxu0  ;;  %v2826_v27 = vpop.f32.mrb[19].mxu1  ;;  %6101 = vmatpush1.bf16.msra.mxu0 %v6100_v39  ;;  %5847 = vmatprep.subr.bf16.mxu1 %v5846_v32  ;;  %v6110_v32 = vpack.c.bf16 %v2242_v61, %v2236_v19  ;;  %v11877_v22 = vld [vmem:[#allocation125_spill] sm:$0xff]  ;;  %v2254_v29 = vld [vmem:[%s7655_s8 + $0x1078] sm:$0xff] }
 0x298   : > { %5195 = vst [vmem:[%s7664_s5 + $0x180] sm:$0xff] %v5051_v21  ;;  %v6216_v20 = vadd.f32 %v3242_v44, %v2824_v56  ;;  %v3244_v16 = vpop.f32.mrb[19].mxu0  ;;  %3653 = vmatmul.mubr.f32.gmra.mrb[64].mxu1 %v11874_v10  ;;  %6103 = vmatprep.subr.bf16.mxu0 %v6102_v11  ;;  %v5856_v21 = vpack.c.bf16 %v2239_v26, %v2233_v35  ;;  %v11878_v44 = vld [vmem:[#allocation127_spill] sm:$0xff]  ;;  %v2276_v35 = vld [vmem:[%s7655_s8 + $0x1128] sm:$0xff] }
 0x299   : > { %5196 = vst [vmem:[%s7664_s5 + $0x188] sm:$0xff] %v5052_v4  ;;  %v6217_v33 = vadd.f32 %v3244_v16, %v2826_v27  ;;  %4489 = vmatmul.mubr.f32.gmra.mrb[64].mxu0 %v11874_v10  ;;  %3658 = vmatprep.mubr.f32.mxu1 %v11875_v25  ;;  %v5858_v56 = vpack.c.bf16 %v2252_v40, %v2246_v45  ;;  %v2251_v4 = vld [vmem:[%s7655_s8 + $0x1060] sm:$0xff]  ;;  %v2266_v16 = vld [vmem:[%s7655_s8 + $0x10d8] sm:$0xff]  ;;  %v1649_v10 = vld [vmem:[%s7664_s5 + $0x210] sm:$0xff] }
 0x29a   : > { %v5057_v18 = vadd.f32 %v6216_v20, %v1637_v28  ;;  %4494 = vmatprep.mubr.f32.mxu0 %v11875_v25  ;;  %5849 = vmatpush1.bf16.msra.mxu1 %v5848_v57  ;;  %v2245_v57 = vld [vmem:[%s7655_s8 + $0x1030] sm:$0xff]  ;;  %v2247_v28 = vld [vmem:[%s7655_s8 + $0x1040] sm:$0xff]  ;;  %v6114_v27 = vpack.c.bf16 %v2254_v29, %v2248_v6  ;;  %v2264_v20 = vld [vmem:[%s7655_s8 + $0x10c8] sm:$0xff] }
 0x29b   : > { %v5058_v2 = vadd.f32 %v6217_v33, %v1638_v37  ;;  %6105 = vmatpush1.bf16.msra.mxu0 %v6104_v59  ;;  %5851 = vmatprep.subr.bf16.mxu1 %v5850_v5  ;;  %v2253_v59 = vld [vmem:[%s7655_s8 + $0x1070] sm:$0xff]  ;;  %v2258_v5 = vld [vmem:[%s7655_s8 + $0x1098] sm:$0xff]  ;;  %v2260_v37 = vld [vmem:[%s7655_s8 + $0x10a8] sm:$0xff] }
 0x29c   : > { %5201 = vst [vmem:[%s7664_s5 + $0x1b0] sm:$0xff] %v5057_v18  ;;  %3659 = vmatmul.mubr.f32.gmra.mrb[66].mxu1 %v11876_v53  ;;  %6107 = vmatprep.subr.bf16.mxu0 %v6106_v52  ;;  %v5860_v52 = vpack.c.bf16 %v2251_v4, %v2245_v57  ;;  %v6116_v33 = vpack.c.bf16 %v2253_v59, %v2247_v28  ;;  %v2263_v25 = vld [vmem:[%s7655_s8 + $0x10c0] sm:$0xff]  ;;  %v11880_v19 = vld [vmem:[#allocation131_spill] sm:$0xff]  ;;  %v11881_v26 = vld [vmem:[#allocation133_spill] sm:$0xff] }
 0x29d   : > { %5202 = vst [vmem:[%s7664_s5 + $0x1b8] sm:$0xff] %v5058_v2  ;;  %v2830_v39 = vpop.f32.mrb[20].mxu1  ;;  %4495 = vmatmul.mubr.f32.gmra.mrb[66].mxu0 %v11876_v53  ;;  %3664 = vmatprep.mubr.f32.mxu1 %v11877_v22  ;;  %v5862_v36 = vpack.c.bf16 %v2264_v20, %v2258_v5  ;;  %v2259_v18 = vld [vmem:[%s7655_s8 + $0x10a0] sm:$0xff]  ;;  %v6118_v2 = vpack.c.bf16 %v2266_v16, %v2260_v37  ;;  %v1650_v53 = vld [vmem:[%s7664_s5 + $0x218] sm:$0xff]  ;;  %v2269_v29 = vld [vmem:[%s7655_s8 + $0x10f0] sm:$0xff] }
 0x29e   : > { %v3248_v46 = vpop.f32.mrb[20].mxu0  ;;  %v2832_v11 = vpop.f32.mrb[21].mxu1  ;;  %4500 = vmatprep.mubr.f32.mxu0 %v11877_v22  ;;  %5853 = vmatpush1.bf16.msra.mxu1 %v5852_v50  ;;  %v2278_v17 = vld [vmem:[%s7655_s8 + $0x1138] sm:$0xff]  ;;  %v1655_v40 = vld [vmem:[%s7664_s5 + $0x240] sm:$0xff]  ;;  %v5864_v22 = vpack.c.bf16 %v2263_v25, %v2257_v34  ;;  %v2277_v57 = vld [vmem:[%s7655_s8 + $0x1130] sm:$0xff] }
 0x29f   : > { %v6218_v43 = vadd.f32 %v3248_v46, %v2830_v39  ;;  %v3250_v60 = vpop.f32.mrb[21].mxu0  ;;  %6109 = vmatpush1.bf16.msra.mxu0 %v6108_v30  ;;  %5855 = vmatprep.subr.bf16.mxu1 %v5854_v31  ;;  %v2265_v30 = vld [vmem:[%s7655_s8 + $0x10d0] sm:$0xff]  ;;  %v2270_v31 = vld [vmem:[%s7655_s8 + $0x10f8] sm:$0xff]  ;;  %v2288_v28 = vld [vmem:[%s7655_s8 + $0x1188] sm:$0xff] }
 0x2a0   : > { %v6219_v9 = vadd.f32 %v3250_v60, %v2832_v11  ;;  %3665 = vmatmul.mubr.f32.gmra.mrb[68].mxu1 %v11878_v44  ;;  %6111 = vmatprep.subr.bf16.mxu0 %v6110_v32  ;;  %v2272_v32 = vld [vmem:[%s7655_s8 + $0x1108] sm:$0xff]  ;;  %v6120_v11 = vpack.c.bf16 %v2265_v30, %v2259_v18  ;;  %v5866_v6 = vpack.c.bf16 %v2276_v35, %v2270_v31  ;;  %v11882_v60 = vld [vmem:[#allocation135_spill] sm:$0xff]  ;;  %v2289_v18 = vld [vmem:[%s7655_s8 + $0x1190] sm:$0xff] }
 0x2a1   : > { %v5063_v3 = vadd.f32 %v6218_v43, %v1643_v0  ;;  %4501 = vmatmul.mubr.f32.gmra.mrb[68].mxu0 %v11878_v44  ;;  %3670 = vmatprep.mubr.f32.mxu1 %v11879_v42  ;;  %v2275_v43 = vld [vmem:[%s7655_s8 + $0x1120] sm:$0xff]  ;;  %v2282_v4 = vld [vmem:[%s7655_s8 + $0x1158] sm:$0xff]  ;;  %v11883_v44 = vld [vmem:[#allocation137_spill] sm:$0xff] }
 0x2a2   : > { %v5064_v55 = vadd.f32 %v6219_v9, %v1644_v38  ;;  %4506 = vmatprep.mubr.f32.mxu0 %v11879_v42  ;;  %5857 = vmatpush1.bf16.msra.mxu1 %v5856_v21  ;;  %v2271_v38 = vld [vmem:[%s7655_s8 + $0x1100] sm:$0xff]  ;;  %v2284_v5 = vld [vmem:[%s7655_s8 + $0x1168] sm:$0xff]  ;;  %v2290_v20 = vld [vmem:[%s7655_s8 + $0x1198] sm:$0xff] }
 0x2a3   : > { %5207 = vst [vmem:[%s7664_s5 + $0x1e0] sm:$0xff] %v5063_v3  ;;  %6113 = vmatpush1.bf16.msra.mxu0 %v6112_v63  ;;  %5859 = vmatprep.subr.bf16.mxu1 %v5858_v56  ;;  %v6122_v56 = vpack.c.bf16 %v2278_v17, %v2272_v32  ;;  %v6124_v16 = vpack.c.bf16 %v2277_v57, %v2271_v38  ;;  %v2296_v30 = vld [vmem:[%s7655_s8 + $0x11c8] sm:$0xff]  ;;  %v2302_v31 = vld [vmem:[%s7655_s8 + $0x11f8] sm:$0xff]  ;;  %v1661_v35 = vld [vmem:[%s7664_s5 + $0x270] sm:$0xff] }
 0x2a4   : > { %5208 = vst [vmem:[%s7664_s5 + $0x1e8] sm:$0xff] %v5064_v55  ;;  %v2836_v13 = vpop.f32.mrb[22].mxu1  ;;  %3671 = vmatmul.mubr.f32.gmra.mrb[70].mxu1 %v11880_v19  ;;  %6115 = vmatprep.subr.bf16.mxu0 %v6114_v27  ;;  %v1656_v27 = vld [vmem:[%s7664_s5 + $0x248] sm:$0xff]  ;;  %v5868_v55 = vpack.c.bf16 %v2275_v43, %v2269_v29  ;;  %v6126_v25 = vpack.c.bf16 %v2290_v20, %v2284_v5  ;;  %v2301_v43 = vld [vmem:[%s7655_s8 + $0x11f0] sm:$0xff]  ;;  %v2306_v38 = vld [vmem:[%s7655_s8 + $0x1218] sm:$0xff] }
 0x2a5   : > { %v3254_v61 = vpop.f32.mrb[22].mxu0  ;;  %v2838_v50 = vpop.f32.mrb[23].mxu1  ;;  %4507 = vmatmul.mubr.f32.gmra.mrb[70].mxu0 %v11880_v19  ;;  %3676 = vmatprep.mubr.f32.mxu1 %v11881_v26  ;;  %v2294_v19 = vld [vmem:[%s7655_s8 + $0x11b8] sm:$0xff]  ;;  %v6130_v29 = vpack.c.bf16 %v2302_v31, %v2296_v30 }
 0x2a6   : > { %v6220_v51 = vadd.f32 %v3254_v61, %v2836_v13  ;;  %v3256_v39 = vpop.f32.mrb[23].mxu0  ;;  %4512 = vmatprep.mubr.f32.mxu0 %v11881_v26  ;;  %5861 = vmatpush1.bf16.msra.mxu1 %v5860_v52  ;;  %v2281_v52 = vld [vmem:[%s7655_s8 + $0x1150] sm:$0xff]  ;;  %v2287_v13 = vld [vmem:[%s7655_s8 + $0x1180] sm:$0xff]  ;;  %v2300_v61 = vld [vmem:[%s7655_s8 + $0x11e8] sm:$0xff] }
 0x2a7   : > { %v6221_v45 = vadd.f32 %v3256_v39, %v2838_v50  ;;  %6117 = vmatpush1.bf16.msra.mxu0 %v6116_v33  ;;  %5863 = vmatprep.subr.bf16.mxu1 %v5862_v36  ;;  %v2283_v33 = vld [vmem:[%s7655_s8 + $0x1160] sm:$0xff]  ;;  %v11884_v36 = vld [vmem:[#allocation139_spill] sm:$0xff]  ;;  %v11885_v50 = vld [vmem:[#allocation141_spill] sm:$0xff]  ;;  %v5872_v39 = vpack.c.bf16 %v2287_v13, %v2281_v52 }
 0x2a8   : > { %v5069_v0 = vadd.f32 %v6220_v51, %v1649_v10  ;;  %v2842_v46 = vpop.f32.mrb[24].mxu1  ;;  %3677 = vmatmul.mubr.f32.gmra.mrb[72].mxu1 %v11882_v60  ;;  %6119 = vmatprep.subr.bf16.mxu0 %v6118_v2  ;;  %v5870_v10 = vpack.c.bf16 %v2288_v28, %v2282_v4 }
 0x2a9   : > { %v5070_v21 = vadd.f32 %v6221_v45, %v1650_v53  ;;  %v3260_v9 = vpop.f32.mrb[24].mxu0  ;;  %v2844_v63 = vpop.f32.mrb[25].mxu1  ;;  %4513 = vmatmul.mubr.f32.gmra.mrb[72].mxu0 %v11882_v60  ;;  %3682 = vmatprep.mubr.f32.mxu1 %v11883_v44  ;;  %v1662_v53 = vld [vmem:[%s7664_s5 + $0x278] sm:$0xff]  ;;  %v6128_v45 = vpack.c.bf16 %v2289_v18, %v2283_v33  ;;  %v2312_v60 = vld [vmem:[%s7655_s8 + $0x1248] sm:$0xff] }
 0x2aa   : > { %5213 = vst [vmem:[%s7664_s5 + $0x210] sm:$0xff] %v5069_v0  ;;  %v6222_v3 = vadd.f32 %v3260_v9, %v2842_v46  ;;  %v3262_v59 = vpop.f32.mrb[25].mxu0  ;;  %4518 = vmatprep.mubr.f32.mxu0 %v11883_v44  ;;  %5865 = vmatpush1.bf16.msra.mxu1 %v5864_v22  ;;  %v2293_v22 = vld [vmem:[%s7655_s8 + $0x11b0] sm:$0xff]  ;;  %v2299_v0 = vld [vmem:[%s7655_s8 + $0x11e0] sm:$0xff] }
 0x2ab   : > { %5214 = vst [vmem:[%s7664_s5 + $0x218] sm:$0xff] %v5070_v21  ;;  %v6223_v42 = vadd.f32 %v3262_v59, %v2844_v63  ;;  %6121 = vmatpush1.bf16.msra.mxu0 %v6120_v11  ;;  %5867 = vmatprep.subr.bf16.mxu1 %v5866_v6  ;;  %v2295_v46 = vld [vmem:[%s7655_s8 + $0x11c0] sm:$0xff]  ;;  %v11886_v11 = vld [vmem:[#allocation143_spill] sm:$0xff]  ;;  %v11887_v21 = vld [vmem:[#allocation145_spill] sm:$0xff]  ;;  %v5876_v4 = vpack.c.bf16 %v2299_v0, %v2293_v22 }
 0x2ac   : > { %v5075_v37 = vadd.f32 %v6222_v3, %v1655_v40  ;;  %3683 = vmatmul.mubr.f32.gmra.mrb[74].mxu1 %v11884_v36  ;;  %6123 = vmatprep.subr.bf16.mxu0 %v6122_v56  ;;  %v5874_v40 = vpack.c.bf16 %v2300_v61, %v2294_v19  ;;  %v2308_v63 = vld [vmem:[%s7655_s8 + $0x1228] sm:$0xff]  ;;  %v2314_v56 = vld [vmem:[%s7655_s8 + $0x1258] sm:$0xff]  ;;  %v6132_v44 = vpack.c.bf16 %v2301_v43, %v2295_v46  ;;  %v1667_v59 = vld [vmem:[%s7664_s5 + $0x2a0] sm:$0xff] }
 0x2ad   : > { %v5076_v34 = vadd.f32 %v6223_v42, %v1656_v27  ;;  %4519 = vmatmul.mubr.f32.gmra.mrb[74].mxu0 %v11884_v36  ;;  %3688 = vmatprep.mubr.f32.mxu1 %v11885_v50  ;;  %v5878_v3 = vpack.c.bf16 %v2312_v60, %v2306_v38  ;;  %v11888_v27 = vld [vmem:[#allocation147_spill] sm:$0xff]  ;;  %v6134_v42 = vpack.c.bf16 %v2314_v56, %v2308_v63  ;;  %v11891_v61 = vld [vmem:[#allocation153_spill] sm:$0xff]  ;;  %v11895_v43 = vld [vmem:[#allocation162_spill] sm:$0xff] }
 0x2ae   : > { %5219 = vst [vmem:[%s7664_s5 + $0x240] sm:$0xff] %v5075_v37  ;;  %v2848_v2 = vpop.f32.mrb[26].mxu1  ;;  %4524 = vmatprep.mubr.f32.mxu0 %v11885_v50  ;;  %5869 = vmatpush1.bf16.msra.mxu1 %v5868_v55  ;;  %v11889_v55 = vld [vmem:[#allocation149_spill] sm:$0xff]  ;;  %v11890_v36 = vld [vmem:[#allocation151_spill] sm:$0xff]  ;;  %v11896_v38 = vld [vmem:[#allocation164_spill] sm:$0xff] }
 0x2af   : > { %5220 = vst [vmem:[%s7664_s5 + $0x248] sm:$0xff] %v5076_v34  ;;  %v3266_v26 = vpop.f32.mrb[26].mxu0  ;;  %v2850_v51 = vpop.f32.mrb[27].mxu1  ;;  %6125 = vmatpush1.bf16.msra.mxu0 %v6124_v16  ;;  %5871 = vmatprep.subr.bf16.mxu1 %v5870_v10  ;;  %v1668_v16 = vld [vmem:[%s7664_s5 + $0x2a8] sm:$0xff] }
 0x2b0   : > { %v6224_v32 = vadd.f32 %v3266_v26, %v2848_v2  ;;  %v3268_v17 = vpop.f32.mrb[27].mxu0  ;;  %3689 = vmatmul.mubr.f32.gmra.mrb[76].mxu1 %v11886_v11  ;;  %6127 = vmatprep.subr.bf16.mxu0 %v6126_v25  ;;  %v1673_v25 = vld [vmem:[%s7664_s5 + $0x2d0] sm:$0xff]  ;;  %v1674_v2 = vld [vmem:[%s7664_s5 + $0x2d8] sm:$0xff]  ;;  %v1680_v0 = vld [vmem:[%s7664_s5 + $0x308] sm:$0xff] }
 0x2b1   : > { %v6225_v6 = vadd.f32 %v3268_v17, %v2850_v51  ;;  %4525 = vmatmul.mubr.f32.gmra.mrb[76].mxu0 %v11886_v11  ;;  %3694 = vmatprep.mubr.f32.mxu1 %v11887_v21  ;;  %v11892_v26 = vld [vmem:[#allocation155_spill] sm:$0xff] }
 0x2b2   : > { %v5081_v9 = vadd.f32 %v6224_v32, %v1661_v35  ;;  %4530 = vmatprep.mubr.f32.mxu0 %v11887_v21  ;;  %5873 = vmatpush1.bf16.msra.mxu1 %v5872_v39  ;;  %v1679_v32 = vld [vmem:[%s7664_s5 + $0x300] sm:$0xff]  ;;  %v1685_v21 = vld [vmem:[%s7664_s5 + $0x330] sm:$0xff] }
 0x2b3   : > { %v5082_v57 = vadd.f32 %v6225_v6, %v1662_v53  ;;  %6129 = vmatpush1.bf16.msra.mxu0 %v6128_v45  ;;  %5875 = vmatprep.subr.bf16.mxu1 %v5874_v40  ;;  %v11893_v53 = vld [vmem:[#allocation157_spill] sm:$0xff]  ;;  %v11894_v40 = vld [vmem:[#allocation159_spill] sm:$0xff] }
 0x2b4   : > { %5225 = vst [vmem:[%s7664_s5 + $0x270] sm:$0xff] %v5081_v9  ;;  %v2854_v28 = vpop.f32.mrb[28].mxu1  ;;  %3695 = vmatmul.mubr.f32.gmra.mrb[78].mxu1 %v11888_v27  ;;  %6131 = vmatprep.subr.bf16.mxu0 %v6130_v29 }
 0x2b5   : > { %5226 = vst [vmem:[%s7664_s5 + $0x278] sm:$0xff] %v5082_v57  ;;  %v3272_v5 = vpop.f32.mrb[28].mxu0  ;;  %v2856_v20 = vpop.f32.mrb[29].mxu1  ;;  %4531 = vmatmul.mubr.f32.gmra.mrb[78].mxu0 %v11888_v27  ;;  %3700 = vmatprep.mubr.f32.mxu1 %v11889_v55  ;;  %v1691_v27 = vld [vmem:[%s7664_s5 + $0x360] sm:$0xff] }
 0x2b6   : > { %v6226_v37 = vadd.f32 %v3272_v5, %v2854_v28  ;;  %v3274_v10 = vpop.f32.mrb[29].mxu0  ;;  %4536 = vmatprep.mubr.f32.mxu0 %v11889_v55  ;;  %5877 = vmatpush1.bf16.msra.mxu1 %v5876_v4 }
 0x2b7   : > { %v6227_v52 = vadd.f32 %v3274_v10, %v2856_v20  ;;  %6133 = vmatpush1.bf16.msra.mxu0 %v6132_v44  ;;  %5879 = vmatprep.subr.bf16.mxu1 %v5878_v3  ;;  %v1697_v10 = vld [vmem:[%s7664_s5 + $0x390] sm:$0xff] }
 0x2b8   : > { %v5087_v13 = vadd.f32 %v6226_v37, %v1667_v59  ;;  %v2860_v33 = vpop.f32.mrb[30].mxu1  ;;  %3701 = vmatmul.mubr.f32.gmra.mrb[80].mxu1 %v11890_v36  ;;  %6135 = vmatprep.subr.bf16.mxu0 %v6134_v42  ;;  %v1692_v42 = vld [vmem:[%s7664_s5 + $0x368] sm:$0xff] }
 0x2b9   : > { %v5088_v34 = vadd.f32 %v6227_v52, %v1668_v16  ;;  %v3278_v18 = vpop.f32.mrb[30].mxu0  ;;  %v2862_v19 = vpop.f32.mrb[31].mxu1  ;;  %4537 = vmatmul.mubr.f32.gmra.mrb[80].mxu0 %v11890_v36  ;;  %3706 = vmatprep.mubr.f32.mxu1 %v11891_v61 }
 0x2ba   : > { %5231 = vst [vmem:[%s7664_s5 + $0x2a0] sm:$0xff] %v5087_v13  ;;  %v6228_v50 = vadd.f32 %v3278_v18, %v2860_v33  ;;  %v3280_v30 = vpop.f32.mrb[31].mxu0  ;;  %4542 = vmatprep.mubr.f32.mxu0 %v11891_v61  ;;  %v2313_v61 = vld [vmem:[%s7655_s8 + $0x1250] sm:$0xff] }
 0x2bb   : > { %5232 = vst [vmem:[%s7664_s5 + $0x2a8] sm:$0xff] %v5088_v34  ;;  %v6229_v31 = vadd.f32 %v3280_v30, %v2862_v19  ;;  %v2305_v34 = vld [vmem:[%s7655_s8 + $0x1210] sm:$0xff]  ;;  %v2307_v19 = vld [vmem:[%s7655_s8 + $0x1220] sm:$0xff] }
 0x2bc   : > { %v5093_v35 = vadd.f32 %v6228_v50, %v1673_v25  ;;  %3707 = vmatmul.mubr.f32.gmra.mrb[82].mxu1 %v11892_v26  ;;  %v2311_v25 = vld [vmem:[%s7655_s8 + $0x1240] sm:$0xff]  ;;  %v2318_v50 = vld [vmem:[%s7655_s8 + $0x1278] sm:$0xff] }
 0x2bd   : > { %v5094_v51 = vadd.f32 %v6229_v31, %v1674_v2  ;;  %4543 = vmatmul.mubr.f32.gmra.mrb[82].mxu0 %v11892_v26  ;;  %3712 = vmatprep.mubr.f32.mxu1 %v11893_v53  ;;  %v2324_v2 = vld [vmem:[%s7655_s8 + $0x12a8] sm:$0xff]  ;;  %v5880_v30 = vpack.c.bf16 %v2311_v25, %v2305_v34  ;;  %v2326_v26 = vld [vmem:[%s7655_s8 + $0x12b8] sm:$0xff] }
 0x2be   : > { %5237 = vst [vmem:[%s7664_s5 + $0x2d0] sm:$0xff] %v5093_v35  ;;  %4548 = vmatprep.mubr.f32.mxu0 %v11893_v53  ;;  %v2320_v35 = vld [vmem:[%s7655_s8 + $0x1288] sm:$0xff]  ;;  %v1703_v53 = vld [vmem:[%s7664_s5 + $0x3c0] sm:$0xff]  ;;  %v2350_v34 = vld [vmem:[%s7655_s8 + $0x1378] sm:$0xff] }
 0x2bf   : > { %5238 = vst [vmem:[%s7664_s5 + $0x2d8] sm:$0xff] %v5094_v51  ;;  %v2866_v39 = vpop.f32.mrb[32].mxu1  ;;  %v6136_v51 = vpack.c.bf16 %v2313_v61, %v2307_v19 }
 0x2c0   : > { %v3284_v17 = vpop.f32.mrb[32].mxu0  ;;  %v2868_v45 = vpop.f32.mrb[33].mxu1  ;;  %3713 = vmatmul.mubr.f32.gmra.mrb[84].mxu1 %v11894_v40 }
 0x2c1   : > { %v6230_v22 = vadd.f32 %v3284_v17, %v2866_v39  ;;  %v3286_v46 = vpop.f32.mrb[33].mxu0  ;;  %4549 = vmatmul.mubr.f32.gmra.mrb[84].mxu0 %v11894_v40  ;;  %3718 = vmatprep.mubr.f32.mxu1 %v10083_v49  ;;  %v5882_v40 = vpack.c.bf16 %v2324_v2, %v2318_v50  ;;  %v2347_v50 = vld [vmem:[%s7655_s8 + $0x1360] sm:$0xff] }
 0x2c2   : > { %v6231_v11 = vadd.f32 %v3286_v46, %v2868_v45  ;;  %4554 = vmatprep.mubr.f32.mxu0 %v10083_v49  ;;  %v1686_v49 = vld [vmem:[%s7664_s5 + $0x338] sm:$0xff]  ;;  %v2319_v46 = vld [vmem:[%s7655_s8 + $0x1280] sm:$0xff] }
 0x2c3   : > { %v5099_v6 = vadd.f32 %v6230_v22, %v1679_v32  ;;  %v1704_v32 = vld [vmem:[%s7664_s5 + $0x3c8] sm:$0xff]  ;;  %v2317_v22 = vld [vmem:[%s7655_s8 + $0x1270] sm:$0xff]  ;;  %v2343_v2 = vld [vmem:[%s7655_s8 + $0x1340] sm:$0xff] }
 0x2c4   : > { %v5100_v29 = vadd.f32 %v6231_v11, %v1680_v0  ;;  %3719 = vmatmul.mubr.f32.gmra.mrb[86].mxu1 %v11895_v43  ;;  %v2323_v0 = vld [vmem:[%s7655_s8 + $0x12a0] sm:$0xff]  ;;  %v11898_v11 = vld [vmem:[#allocation17_spill] sm:$0xff] }
 0x2c5   : > { %5243 = vst [vmem:[%s7664_s5 + $0x300] sm:$0xff] %v5099_v6  ;;  %4555 = vmatmul.mubr.f32.gmra.mrb[86].mxu0 %v11895_v43  ;;  %3724 = vmatprep.mubr.f32.mxu1 %v11896_v38  ;;  %v2325_v43 = vld [vmem:[%s7655_s8 + $0x12b0] sm:$0xff] }
 0x2c6   : > { %5244 = vst [vmem:[%s7664_s5 + $0x308] sm:$0xff] %v5100_v29  ;;  %v2872_v60 = vpop.f32.mrb[34].mxu1  ;;  %4560 = vmatprep.mubr.f32.mxu0 %v11896_v38  ;;  %v6138_v29 = vpack.c.bf16 %v2326_v26, %v2320_v35  ;;  %v2330_v38 = vld [vmem:[%s7655_s8 + $0x12d8] sm:$0xff]  ;;  %v2349_v35 = vld [vmem:[%s7655_s8 + $0x1370] sm:$0xff] }
 0x2c7   : > { %v3290_v9 = vpop.f32.mrb[34].mxu0  ;;  %v2874_v63 = vpop.f32.mrb[35].mxu1  ;;  %v2354_v26 = vld [vmem:[%s7655_s8 + $0x1398] sm:$0xff] }
 0x2c8   : > { %v6232_v56 = vadd.f32 %v3290_v9, %v2872_v60  ;;  %v3292_v57 = vpop.f32.mrb[35].mxu0  ;;  %3725 = vmatmul.mubr.f32.gmra.mrb[88].mxu1 %v10135_v41  ;;  %v2336_v60 = vld [vmem:[%s7655_s8 + $0x1308] sm:$0xff] }
 0x2c9   : > { %v6233_v4 = vadd.f32 %v3292_v57, %v2874_v63  ;;  %4561 = vmatmul.mubr.f32.gmra.mrb[88].mxu0 %v10135_v41  ;;  %3730 = vmatprep.mubr.f32.mxu1 %v10149_v24  ;;  %v2332_v63 = vld [vmem:[%s7655_s8 + $0x12e8] sm:$0xff] }
 0x2ca   : > { %v5105_v28 = vadd.f32 %v6232_v56, %v1685_v21  ;;  %v2878_v44 = vpop.f32.mrb[36].mxu1  ;;  %4566 = vmatprep.mubr.f32.mxu0 %v10149_v24  ;;  %v2338_v56 = vld [vmem:[%s7655_s8 + $0x1318] sm:$0xff] }
 0x2cb   : > { %v5106_v3 = vadd.f32 %v6233_v4, %v1686_v49  ;;  %v3296_v59 = vpop.f32.mrb[36].mxu0  ;;  %v2880_v5 = vpop.f32.mrb[37].mxu1  ;;  %v11899_v49 = vld [vmem:[#allocation18_spill] sm:$0xff] }
 0x2cc   : > { %5249 = vst [vmem:[%s7664_s5 + $0x330] sm:$0xff] %v5105_v28  ;;  %v6234_v20 = vadd.f32 %v3296_v59, %v2878_v44  ;;  %v3298_v55 = vpop.f32.mrb[37].mxu0  ;;  %3731 = vmatmul.mubr.f32.gmra.mrb[90].mxu1 %v10155_v12  ;;  %v1709_v4 = vld [vmem:[%s7664_s5 + $0x3f0] sm:$0xff]  ;;  %v5884_v44 = vpack.c.bf16 %v2323_v0, %v2317_v22  ;;  %v1716_v22 = vld [vmem:[%s7664_s5 + $0x428] sm:$0xff] }
 0x2cd   : > { %5250 = vst [vmem:[%s7664_s5 + $0x338] sm:$0xff] %v5106_v3  ;;  %v6235_v41 = vadd.f32 %v3298_v55, %v2880_v5  ;;  %4567 = vmatmul.mubr.f32.gmra.mrb[90].mxu0 %v10155_v12  ;;  %3736 = vmatprep.mubr.f32.mxu1 %v10167_v62  ;;  %v6140_v5 = vpack.c.bf16 %v2325_v43, %v2319_v46  ;;  %v2329_v55 = vld [vmem:[%s7655_s8 + $0x12d0] sm:$0xff] }
 0x2ce   : > { %v5111_v24 = vadd.f32 %v6234_v20, %v1691_v27  ;;  %4572 = vmatprep.mubr.f32.mxu0 %v10167_v62  ;;  %v1698_v62 = vld [vmem:[%s7664_s5 + $0x398] sm:$0xff]  ;;  %v2353_v43 = vld [vmem:[%s7655_s8 + $0x1390] sm:$0xff] }
 0x2cf   : > { %v5112_v37 = vadd.f32 %v6235_v41, %v1692_v42  ;;  %v1710_v27 = vld [vmem:[%s7664_s5 + $0x3f8] sm:$0xff]  ;;  %v5886_v42 = vpack.c.bf16 %v2336_v60, %v2330_v38  ;;  %v2335_v41 = vld [vmem:[%s7655_s8 + $0x1300] sm:$0xff] }
 0x2d0   : > { %5255 = vst [vmem:[%s7664_s5 + $0x360] sm:$0xff] %v5111_v24  ;;  %v2884_v16 = vpop.f32.mrb[38].mxu1  ;;  %3737 = vmatmul.mubr.f32.gmra.mrb[92].mxu1 %v10173_v47  ;;  %v2331_v24 = vld [vmem:[%s7655_s8 + $0x12e0] sm:$0xff] }
 0x2d1   : > { %5256 = vst [vmem:[%s7664_s5 + $0x368] sm:$0xff] %v5112_v37  ;;  %v3302_v52 = vpop.f32.mrb[38].mxu0  ;;  %v2886_v13 = vpop.f32.mrb[39].mxu1  ;;  %4573 = vmatmul.mubr.f32.gmra.mrb[92].mxu0 %v10173_v47  ;;  %3742 = vmatprep.mubr.f32.mxu1 %v10181_v58  ;;  %v11900_v37 = vld [vmem:[#allocation19_spill] sm:$0xff]  ;;  %v2359_v38 = vld [vmem:[%s7655_s8 + $0x13c0] sm:$0xff] }
 0x2d2   : > { %v6236_v12 = vadd.f32 %v3302_v52, %v2884_v16  ;;  %v3304_v33 = vpop.f32.mrb[39].mxu0  ;;  %4578 = vmatprep.mubr.f32.mxu0 %v10181_v58  ;;  %v11897_v58 = vld [vmem:[#allocation16_spill] sm:$0xff]  ;;  %v2337_v52 = vld [vmem:[%s7655_s8 + $0x1310] sm:$0xff] }
 0x2d3   : > { %v6237_v36 = vadd.f32 %v3304_v33, %v2886_v13  ;;  %v2342_v13 = vld [vmem:[%s7655_s8 + $0x1338] sm:$0xff]  ;;  %v11901_v33 = vld [vmem:[#allocation20_spill] sm:$0xff]  ;;  %v6144_v19 = vpack.c.bf16 %v2337_v52, %v2331_v24 }
 0x2d4   : > { %v5117_v18 = vadd.f32 %v6236_v12, %v1697_v10  ;;  %3743 = vmatmul.mubr.f32.gmra.mrb[94].mxu1 %v10188_v14  ;;  %v6142_v10 = vpack.c.bf16 %v2338_v56, %v2332_v63  ;;  %v2348_v12 = vld [vmem:[%s7655_s8 + $0x1368] sm:$0xff]  ;;  %v2355_v60 = vld [vmem:[%s7655_s8 + $0x13a0] sm:$0xff]  ;;  %v2361_v56 = vld [vmem:[%s7655_s8 + $0x13d0] sm:$0xff] }
 0x2d5   : > { %v5118_v47 = vadd.f32 %v6237_v36, %v1698_v62  ;;  %4579 = vmatmul.mubr.f32.gmra.mrb[94].mxu0 %v10188_v14  ;;  %3813 = vmatprep.mubr.f32.mxu1 %v11897_v58  ;;  %v2344_v36 = vld [vmem:[%s7655_s8 + $0x1348] sm:$0xff]  ;;  %v5890_v61 = vpack.c.bf16 %v2348_v12, %v2342_v13  ;;  %v2367_v24 = vld [vmem:[%s7655_s8 + $0x1400] sm:$0xff]  ;;  %v2373_v13 = vld [vmem:[%s7655_s8 + $0x1430] sm:$0xff] }
 0x2d6   : > { %5261 = vst [vmem:[%s7664_s5 + $0x390] sm:$0xff] %v5117_v18  ;;  %v2890_v31 = vpop.f32.mrb[40].mxu1  ;;  %4649 = vmatprep.mubr.f32.mxu0 %v11897_v58  ;;  %v5888_v18 = vpack.c.bf16 %v2335_v41, %v2329_v55  ;;  %v11902_v58 = vld [vmem:[#allocation21_spill] sm:$0xff]  ;;  %v2365_v55 = vld [vmem:[%s7655_s8 + $0x13f0] sm:$0xff]  ;;  %v2371_v41 = vld [vmem:[%s7655_s8 + $0x1420] sm:$0xff] }
 0x2d7   : > { %5262 = vst [vmem:[%s7664_s5 + $0x398] sm:$0xff] %v5118_v47  ;;  %v3308_v39 = vpop.f32.mrb[40].mxu0  ;;  %v2892_v14 = vpop.f32.mrb[41].mxu1  ;;  %v2341_v47 = vld [vmem:[%s7655_s8 + $0x1330] sm:$0xff]  ;;  %v2378_v12 = vld [vmem:[%s7655_s8 + $0x1458] sm:$0xff] }
 0x2d8   : > { %v6238_v17 = vadd.f32 %v3308_v39, %v2890_v31  ;;  %v3310_v45 = vpop.f32.mrb[41].mxu0  ;;  %3814 = vmatmul.mubr.f32.vlgmr.msra.gmra.mrb[48].mxu1 %v11898_v11  ;;  %v6146_v31 = vpack.c.bf16 %v2350_v34, %v2344_v36  ;;  %v5892_v46 = vpack.c.bf16 %v2347_v50, %v2341_v47  ;;  %v1722_v36 = vld [vmem:[%s7664_s5 + $0x458] sm:$0xff]  ;;  %v5900_v47 = vpack.c.bf16 %v2371_v41, %v2365_v55  ;;  %v2420_v55 = vld [vmem:[%s7655_s8 + $0x15a8] sm:$0xff]  ;;  %v11913_v41 = vld [vmem:[#allocation32_spill] sm:$0xff] }
 0x2d9   : > { %v6239_v6 = vadd.f32 %v3310_v45, %v2892_v14  ;;  %4650 = vmatmul.mubr.f32.vlgmr.msra.gmra.mrb[48].mxu0 %v11898_v11  ;;  %5881 = vmatpush1.bf16.msra.mxu1 %v5880_v30  ;;  %v11903_v14 = vld [vmem:[#allocation22_spill] sm:$0xff]  ;;  %v2362_v45 = vld [vmem:[%s7655_s8 + $0x13d8] sm:$0xff] }
 0x2da   : > { %v5123_v21 = vadd.f32 %v6238_v17, %v1703_v53  ;;  %v2896_v9 = vpop.f32.mrb[42].mxu1  ;;  %6137 = vmatpush1.bf16.msra.mxu0 %v6136_v51  ;;  %3819 = vmatprep.mubr.f32.mxu1 %v11899_v49  ;;  %v2360_v51 = vld [vmem:[%s7655_s8 + $0x13c8] sm:$0xff]  ;;  %v1715_v53 = vld [vmem:[%s7664_s5 + $0x420] sm:$0xff] }
 0x2db   : > { %v5124_v57 = vadd.f32 %v6239_v6, %v1704_v32  ;;  %v3314_v28 = vpop.f32.mrb[42].mxu0  ;;  %v2898_v3 = vpop.f32.mrb[43].mxu1  ;;  %4655 = vmatprep.mubr.f32.mxu0 %v11899_v49  ;;  %5883 = vmatprep.subr.bf16.mxu1 %v5882_v40  ;;  %v2356_v17 = vld [vmem:[%s7655_s8 + $0x13a8] sm:$0xff]  ;;  %v6148_v6 = vpack.c.bf16 %v2349_v35, %v2343_v2  ;;  %v2366_v49 = vld [vmem:[%s7655_s8 + $0x13f8] sm:$0xff]  ;;  %v6156_v2 = vpack.c.bf16 %v2373_v13, %v2367_v24  ;;  %v2379_v35 = vld [vmem:[%s7655_s8 + $0x1460] sm:$0xff] }
 0x2dc   : > { %5267 = vst [vmem:[%s7664_s5 + $0x3c0] sm:$0xff] %v5123_v21  ;;  %v6240_v59 = vadd.f32 %v3314_v28, %v2896_v9  ;;  %v3316_v20 = vpop.f32.mrb[43].mxu0  ;;  %3820 = vmatmul.mubr.f32.gmra.mrb[50].mxu1 %v11900_v37  ;;  %6139 = vmatprep.subr.bf16.mxu0 %v6138_v29  ;;  %v5894_v29 = vpack.c.bf16 %v2360_v51, %v2354_v26  ;;  %v11904_v9 = vld [vmem:[#allocation23_spill] sm:$0xff]  ;;  %v11905_v28 = vld [vmem:[#allocation24_spill] sm:$0xff]  ;;  %v2416_v24 = vld [vmem:[%s7655_s8 + $0x1588] sm:$0xff] }
 0x2dd   : > { %5268 = vst [vmem:[%s7664_s5 + $0x3c8] sm:$0xff] %v5124_v57  ;;  %v6241_v16 = vadd.f32 %v3316_v20, %v2898_v3  ;;  %4656 = vmatmul.mubr.f32.gmra.mrb[50].mxu0 %v11900_v37  ;;  %3825 = vmatprep.mubr.f32.mxu1 %v11901_v33  ;;  %v6150_v63 = vpack.c.bf16 %v2362_v45, %v2356_v17  ;;  %v2372_v57 = vld [vmem:[%s7655_s8 + $0x1428] sm:$0xff]  ;;  %v2374_v3 = vld [vmem:[%s7655_s8 + $0x1438] sm:$0xff]  ;;  %v11909_v17 = vld [vmem:[#allocation28_spill] sm:$0xff] }
 0x2de   : > { %v5129_v62 = vadd.f32 %v6240_v59, %v1709_v4  ;;  %5885 = vmatpush1.bf16.msra.mxu1 %v5884_v44  ;;  %4661 = vmatprep.mubr.f32.mxu0 %v11901_v33  ;;  %v2368_v44 = vld [vmem:[%s7655_s8 + $0x1408] sm:$0xff]  ;;  %v5896_v59 = vpack.c.bf16 %v2359_v38, %v2353_v43  ;;  %v6152_v20 = vpack.c.bf16 %v2361_v56, %v2355_v60  ;;  %v11908_v51 = vld [vmem:[#allocation27_spill] sm:$0xff]  ;;  %v2397_v60 = vld [vmem:[%s7655_s8 + $0x14f0] sm:$0xff] }
 0x2df   : > { %v5130_v25 = vadd.f32 %v6241_v16, %v1710_v27  ;;  %6141 = vmatpush1.bf16.msra.mxu0 %v6140_v5  ;;  %5887 = vmatprep.subr.bf16.mxu1 %v5886_v42  ;;  %v1721_v27 = vld [vmem:[%s7664_s5 + $0x450] sm:$0xff]  ;;  %v5898_v42 = vpack.c.bf16 %v2372_v57, %v2366_v49  ;;  %v6154_v52 = vpack.c.bf16 %v2374_v3, %v2368_v44  ;;  %v2392_v45 = vld [vmem:[%s7655_s8 + $0x14c8] sm:$0xff]  ;;  %v2410_v49 = vld [vmem:[%s7655_s8 + $0x1558] sm:$0xff] }
 0x2e0   : > { %5273 = vst [vmem:[%s7664_s5 + $0x3f0] sm:$0xff] %v5129_v62  ;;  %3826 = vmatmul.mubr.f32.gmra.mrb[52].mxu1 %v11902_v58  ;;  %6143 = vmatprep.subr.bf16.mxu0 %v6142_v10  ;;  %v11906_v10 = vld [vmem:[#allocation25_spill] sm:$0xff]  ;;  %v2401_v44 = vld [vmem:[%s7655_s8 + $0x1510] sm:$0xff]  ;;  %v2407_v3 = vld [vmem:[%s7655_s8 + $0x1540] sm:$0xff] }
 0x2e1   : > { %5274 = vst [vmem:[%s7664_s5 + $0x3f8] sm:$0xff] %v5130_v25  ;;  %v2902_v30 = vpop.f32.mrb[44].mxu1  ;;  %4662 = vmatmul.mubr.f32.gmra.mrb[52].mxu0 %v11902_v58  ;;  %3831 = vmatprep.mubr.f32.mxu1 %v11903_v14  ;;  %v2384_v62 = vld [vmem:[%s7655_s8 + $0x1488] sm:$0xff]  ;;  %v11907_v25 = vld [vmem:[#allocation26_spill] sm:$0xff] }
 0x2e2   : > { %v3320_v39 = vpop.f32.mrb[44].mxu0  ;;  %v2904_v32 = vpop.f32.mrb[45].mxu1  ;;  %4667 = vmatprep.mubr.f32.mxu0 %v11903_v14  ;;  %5889 = vmatpush1.bf16.msra.mxu1 %v5888_v18  ;;  %v2380_v18 = vld [vmem:[%s7655_s8 + $0x1468] sm:$0xff]  ;;  %v5902_v58 = vpack.c.bf16 %v2384_v62, %v2378_v12  ;;  %v2390_v14 = vld [vmem:[%s7655_s8 + $0x14b8] sm:$0xff]  ;;  %v2413_v13 = vld [vmem:[%s7655_s8 + $0x1570] sm:$0xff] }
 0x2e3   : > { %v6242_v40 = vadd.f32 %v3320_v39, %v2902_v30  ;;  %v3322_v0 = vpop.f32.mrb[45].mxu0  ;;  %6145 = vmatpush1.bf16.msra.mxu0 %v6144_v19  ;;  %5891 = vmatprep.subr.bf16.mxu1 %v5890_v61  ;;  %v2386_v19 = vld [vmem:[%s7655_s8 + $0x1498] sm:$0xff]  ;;  %v2377_v30 = vld [vmem:[%s7655_s8 + $0x1450] sm:$0xff]  ;;  %v11910_v43 = vld [vmem:[#allocation29_spill] sm:$0xff] }
 0x2e4   : > { %v6243_v11 = vadd.f32 %v3322_v0, %v2904_v32  ;;  %3832 = vmatmul.mubr.f32.gmra.mrb[54].mxu1 %v11904_v9  ;;  %6147 = vmatprep.subr.bf16.mxu0 %v6146_v31  ;;  %v2383_v31 = vld [vmem:[%s7655_s8 + $0x1480] sm:$0xff]  ;;  %v2385_v39 = vld [vmem:[%s7655_s8 + $0x1490] sm:$0xff]  ;;  %v2396_v32 = vld [vmem:[%s7655_s8 + $0x14e8] sm:$0xff] }
 0x2e5   : > { %v5135_v21 = vadd.f32 %v6242_v40, %v1715_v53  ;;  %4668 = vmatmul.mubr.f32.gmra.mrb[54].mxu0 %v11904_v9  ;;  %3837 = vmatprep.mubr.f32.mxu1 %v11905_v28  ;;  %v6158_v53 = vpack.c.bf16 %v2386_v19, %v2380_v18  ;;  %v2398_v40 = vld [vmem:[%s7655_s8 + $0x14f8] sm:$0xff]  ;;  %v6160_v0 = vpack.c.bf16 %v2385_v39, %v2379_v35  ;;  %v2408_v9 = vld [vmem:[%s7655_s8 + $0x1548] sm:$0xff]  ;;  %v2419_v12 = vld [vmem:[%s7655_s8 + $0x15a0] sm:$0xff] }
 0x2e6   : > { %v5136_v4 = vadd.f32 %v6243_v11, %v1716_v22  ;;  %4673 = vmatprep.mubr.f32.mxu0 %v11905_v28  ;;  %5893 = vmatpush1.bf16.msra.mxu1 %v5892_v46  ;;  %v5904_v22 = vpack.c.bf16 %v2383_v31, %v2377_v30  ;;  %v5906_v46 = vpack.c.bf16 %v2396_v32, %v2390_v14  ;;  %v2389_v11 = vld [vmem:[%s7655_s8 + $0x14b0] sm:$0xff]  ;;  %v2404_v56 = vld [vmem:[%s7655_s8 + $0x1528] sm:$0xff]  ;;  %v2415_v62 = vld [vmem:[%s7655_s8 + $0x1580] sm:$0xff] }
 0x2e7   : > { %5279 = vst [vmem:[%s7664_s5 + $0x420] sm:$0xff] %v5135_v21  ;;  %v2908_v5 = vpop.f32.mrb[46].mxu1  ;;  %6149 = vmatpush1.bf16.msra.mxu0 %v6148_v6  ;;  %5895 = vmatprep.subr.bf16.mxu1 %v5894_v29  ;;  %v2395_v6 = vld [vmem:[%s7655_s8 + $0x14e0] sm:$0xff]  ;;  %v6162_v38 = vpack.c.bf16 %v2398_v40, %v2392_v45  ;;  %v2402_v21 = vld [vmem:[%s7655_s8 + $0x1518] sm:$0xff]  ;;  %v2432_v18 = vld [vmem:[%s7655_s8 + $0x1608] sm:$0xff] }
 0x2e8   : > { %5280 = vst [vmem:[%s7664_s5 + $0x428] sm:$0xff] %v5136_v4  ;;  %v3326_v37 = vpop.f32.mrb[46].mxu0  ;;  %v2910_v16 = vpop.f32.mrb[47].mxu1  ;;  %3838 = vmatmul.mubr.f32.gmra.mrb[56].mxu1 %v11906_v10  ;;  %6151 = vmatprep.subr.bf16.mxu0 %v6150_v63  ;;  %v2391_v29 = vld [vmem:[%s7655_s8 + $0x14c0] sm:$0xff]  ;;  %v11911_v63 = vld [vmem:[#allocation30_spill] sm:$0xff]  ;;  %v5908_v57 = vpack.c.bf16 %v2395_v6, %v2389_v11  ;;  %v5910_v28 = vpack.c.bf16 %v2408_v9, %v2402_v21  ;;  %v2438_v39 = vld [vmem:[%s7655_s8 + $0x1638] sm:$0xff] }
 0x2e9   : > { %v6244_v33 = vadd.f32 %v3326_v37, %v2908_v5  ;;  %v3328_v34 = vpop.f32.mrb[47].mxu0  ;;  %4674 = vmatmul.mubr.f32.gmra.mrb[56].mxu0 %v11906_v10  ;;  %3843 = vmatprep.mubr.f32.mxu1 %v11907_v25  ;;  %v6164_v4 = vpack.c.bf16 %v2397_v60, %v2391_v29  ;;  %v6166_v5 = vpack.c.bf16 %v2410_v49, %v2404_v56  ;;  %v2422_v37 = vld [vmem:[%s7655_s8 + $0x15b8] sm:$0xff]  ;;  %v11915_v19 = vld [vmem:[#allocation34_spill] sm:$0xff]  ;;  %v2431_v31 = vld [vmem:[%s7655_s8 + $0x1600] sm:$0xff] }
 0x2ea   : > { %v6245_v61 = vadd.f32 %v3328_v34, %v2910_v16  ;;  %4679 = vmatprep.mubr.f32.mxu0 %v11907_v25  ;;  %5897 = vmatpush1.bf16.msra.mxu1 %v5896_v59  ;;  %v11912_v59 = vld [vmem:[#allocation31_spill] sm:$0xff]  ;;  %v5912_v16 = vpack.c.bf16 %v2407_v3, %v2401_v44  ;;  %v2421_v34 = vld [vmem:[%s7655_s8 + $0x15b0] sm:$0xff]  ;;  %v2427_v35 = vld [vmem:[%s7655_s8 + $0x15e0] sm:$0xff] }
 0x2eb   : > { %v5141_v50 = vadd.f32 %v6244_v33, %v1721_v27  ;;  %6153 = vmatpush1.bf16.msra.mxu0 %v6152_v20  ;;  %5899 = vmatprep.subr.bf16.mxu1 %v5898_v42  ;;  %v2403_v27 = vld [vmem:[%s7655_s8 + $0x1520] sm:$0xff]  ;;  %v2409_v20 = vld [vmem:[%s7655_s8 + $0x1550] sm:$0xff]  ;;  %v2414_v42 = vld [vmem:[%s7655_s8 + $0x1578] sm:$0xff] }
 0x2ec   : > { %v5142_v26 = vadd.f32 %v6245_v61, %v1722_v36  ;;  %3844 = vmatmul.mubr.f32.gmra.mrb[58].mxu1 %v11908_v51  ;;  %6155 = vmatprep.subr.bf16.mxu0 %v6154_v52  ;;  %v6168_v10 = vpack.c.bf16 %v2409_v20, %v2403_v27  ;;  %v5914_v52 = vpack.c.bf16 %v2420_v55, %v2414_v42  ;;  %v11914_v33 = vld [vmem:[#allocation33_spill] sm:$0xff]  ;;  %v2426_v25 = vld [vmem:[%s7655_s8 + $0x15d8] sm:$0xff]  ;;  %v2425_v30 = vld [vmem:[%s7655_s8 + $0x15d0] sm:$0xff] }
 0x2ed   : > { %5285 = vst [vmem:[%s7664_s5 + $0x450] sm:$0xff] %v5141_v50  ;;  %4680 = vmatmul.mubr.f32.gmra.mrb[58].mxu0 %v11908_v51  ;;  %3849 = vmatprep.mubr.f32.mxu1 %v11909_v17  ;;  %v6170_v36 = vpack.c.bf16 %v2422_v37, %v2416_v24  ;;  %v2428_v61 = vld [vmem:[%s7655_s8 + $0x15e8] sm:$0xff]  ;;  %v5916_v50 = vpack.c.bf16 %v2419_v12, %v2413_v13  ;;  %v11917_v32 = vld [vmem:[#allocation36_spill] sm:$0xff]  ;;  %v2446_v45 = vld [vmem:[%s7655_s8 + $0x1678] sm:$0xff] }
 0x2ee   : > { %5286 = vst [vmem:[%s7664_s5 + $0x458] sm:$0xff] %v5142_v26  ;;  %4685 = vmatprep.mubr.f32.mxu0 %v11909_v17  ;;  %5901 = vmatpush1.bf16.msra.mxu1 %v5900_v47  ;;  %v2434_v47 = vld [vmem:[%s7655_s8 + $0x1618] sm:$0xff]  ;;  %v2444_v14 = vld [vmem:[%s7655_s8 + $0x1668] sm:$0xff]  ;;  %v5920_v40 = vpack.c.bf16 %v2431_v31, %v2425_v30  ;;  %v2443_v11 = vld [vmem:[%s7655_s8 + $0x1660] sm:$0xff] }
 0x2ef   : > { %6157 = vmatpush1.bf16.msra.mxu0 %v6156_v2  ;;  %5903 = vmatprep.subr.bf16.mxu1 %v5902_v58  ;;  %v6172_v2 = vpack.c.bf16 %v2421_v34, %v2415_v62  ;;  %v5918_v58 = vpack.c.bf16 %v2432_v18, %v2426_v25  ;;  %v11916_v26 = vld [vmem:[#allocation35_spill] sm:$0xff]  ;;  %v6174_v51 = vpack.c.bf16 %v2434_v47, %v2428_v61  ;;  %v2440_v17 = vld [vmem:[%s7655_s8 + $0x1648] sm:$0xff]  ;;  %v2439_v6 = vld [vmem:[%s7655_s8 + $0x1640] sm:$0xff] }
 0x2f0   : > { %3850 = vmatmul.mubr.f32.gmra.mrb[60].mxu1 %v11910_v43  ;;  %6159 = vmatprep.subr.bf16.mxu0 %v6158_v53  ;;  %v2433_v53 = vld [vmem:[%s7655_s8 + $0x1610] sm:$0xff]  ;;  %v11918_v29 = vld [vmem:[#allocation37_spill] sm:$0xff]  ;;  %v2450_v60 = vld [vmem:[%s7655_s8 + $0x1698] sm:$0xff] }
 0x2f1   : > { %4686 = vmatmul.mubr.f32.gmra.mrb[60].mxu0 %v11910_v43  ;;  %3855 = vmatprep.mubr.f32.mxu1 %v11911_v63  ;;  %v6178_v43 = vpack.c.bf16 %v2446_v45, %v2440_v17  ;;  %v2456_v21 = vld [vmem:[%s7655_s8 + $0x16c8] sm:$0xff]  ;;  %v11919_v9 = vld [vmem:[#allocation38_spill] sm:$0xff]  ;;  %v2458_v56 = vld [vmem:[%s7655_s8 + $0x16d8] sm:$0xff] }
 0x2f2   : > { %4691 = vmatprep.mubr.f32.mxu0 %v11911_v63  ;;  %5905 = vmatpush1.bf16.msra.mxu1 %v5904_v22  ;;  %v6176_v22 = vpack.c.bf16 %v2433_v53, %v2427_v35  ;;  %v2452_v63 = vld [vmem:[%s7655_s8 + $0x16a8] sm:$0xff]  ;;  %v2455_v44 = vld [vmem:[%s7655_s8 + $0x16c0] sm:$0xff]  ;;  %v11920_v27 = vld [vmem:[#allocation39_spill] sm:$0xff] }
 0x2f3   : > { %6161 = vmatpush1.bf16.msra.mxu0 %v6160_v0  ;;  %5907 = vmatprep.subr.bf16.mxu1 %v5906_v46  ;;  %v5922_v0 = vpack.c.bf16 %v2444_v14, %v2438_v39  ;;  %v2437_v46 = vld [vmem:[%s7655_s8 + $0x1630] sm:$0xff]  ;;  %v2451_v3 = vld [vmem:[%s7655_s8 + $0x16a0] sm:$0xff]  ;;  %v2462_v20 = vld [vmem:[%s7655_s8 + $0x16f8] sm:$0xff] }
 0x2f4   : > { %3856 = vmatmul.mubr.f32.gmra.mrb[62].mxu1 %v11912_v59  ;;  %6163 = vmatprep.subr.bf16.mxu0 %v6162_v38  ;;  %v2445_v38 = vld [vmem:[%s7655_s8 + $0x1670] sm:$0xff]  ;;  %v5924_v49 = vpack.c.bf16 %v2443_v11, %v2437_v46  ;;  %v2468_v42 = vld [vmem:[%s7655_s8 + $0x1728] sm:$0xff]  ;;  %v11921_v55 = vld [vmem:[#allocation40_spill] sm:$0xff] }
 0x2f5   : > { %4692 = vmatmul.mubr.f32.gmra.mrb[62].mxu0 %v11912_v59  ;;  %3861 = vmatprep.mubr.f32.mxu1 %v11913_v41  ;;  %v6182_v59 = vpack.c.bf16 %v2458_v56, %v2452_v63  ;;  %v2470_v24 = vld [vmem:[%s7655_s8 + $0x1738] sm:$0xff]  ;;  %v2467_v13 = vld [vmem:[%s7655_s8 + $0x1720] sm:$0xff]  ;;  %v11922_v62 = vld [vmem:[#allocation41_spill] sm:$0xff] }
 0x2f6   : > { %4697 = vmatprep.mubr.f32.mxu0 %v11913_v41  ;;  %5909 = vmatpush1.bf16.msra.mxu1 %v5908_v57  ;;  %v6180_v57 = vpack.c.bf16 %v2445_v38, %v2439_v6  ;;  %v2464_v41 = vld [vmem:[%s7655_s8 + $0x1708] sm:$0xff]  ;;  %v2463_v12 = vld [vmem:[%s7655_s8 + $0x1700] sm:$0xff]  ;;  %v2474_v34 = vld [vmem:[%s7655_s8 + $0x1758] sm:$0xff] }
 0x2f7   : > { %6165 = vmatpush1.bf16.msra.mxu0 %v6164_v4  ;;  %5911 = vmatprep.subr.bf16.mxu1 %v5910_v28  ;;  %v5926_v4 = vpack.c.bf16 %v2456_v21, %v2450_v60  ;;  %v2449_v28 = vld [vmem:[%s7655_s8 + $0x1690] sm:$0xff]  ;;  %v2480_v25 = vld [vmem:[%s7655_s8 + $0x1788] sm:$0xff]  ;;  %v2482_v61 = vld [vmem:[%s7655_s8 + $0x1798] sm:$0xff] }
 0x2f8   : > { %3862 = vmatmul.mubr.f32.gmra.mrb[64].mxu1 %v11914_v33  ;;  %6167 = vmatprep.subr.bf16.mxu0 %v6166_v5  ;;  %v2457_v5 = vld [vmem:[%s7655_s8 + $0x16d0] sm:$0xff]  ;;  %v5928_v37 = vpack.c.bf16 %v2455_v44, %v2449_v28  ;;  %v2479_v30 = vld [vmem:[%s7655_s8 + $0x1780] sm:$0xff]  ;;  %v2486_v53 = vld [vmem:[%s7655_s8 + $0x17b8] sm:$0xff] }
 0x2f9   : > { %4698 = vmatmul.mubr.f32.gmra.mrb[64].mxu0 %v11914_v33  ;;  %3867 = vmatprep.mubr.f32.mxu1 %v11915_v19  ;;  %v6186_v33 = vpack.c.bf16 %v2470_v24, %v2464_v41  ;;  %v11923_v18 = vld [vmem:[#allocation42_spill] sm:$0xff]  ;;  %v2475_v31 = vld [vmem:[%s7655_s8 + $0x1760] sm:$0xff]  ;;  %v2492_v39 = vld [vmem:[%s7655_s8 + $0x17e8] sm:$0xff] }
 0x2fa   : > { %4703 = vmatprep.mubr.f32.mxu0 %v11915_v19  ;;  %5913 = vmatpush1.bf16.msra.mxu1 %v5912_v16  ;;  %v6184_v16 = vpack.c.bf16 %v2457_v5, %v2451_v3  ;;  %v2476_v19 = vld [vmem:[%s7655_s8 + $0x1768] sm:$0xff]  ;;  %v11924_v35 = vld [vmem:[#allocation44_spill] sm:$0xff]  ;;  %v11925_v14 = vld [vmem:[#allocation46_spill] sm:$0xff] }
 0x2fb   : > { %6169 = vmatpush1.bf16.msra.mxu0 %v6168_v10  ;;  %5915 = vmatprep.subr.bf16.mxu1 %v5914_v52  ;;  %v5930_v10 = vpack.c.bf16 %v2468_v42, %v2462_v20  ;;  %v2461_v52 = vld [vmem:[%s7655_s8 + $0x16f0] sm:$0xff]  ;;  %v2494_v17 = vld [vmem:[%s7655_s8 + $0x17f8] sm:$0xff]  ;;  %v2491_v46 = vld [vmem:[%s7655_s8 + $0x17e0] sm:$0xff] }
 0x2fc   : > { %3868 = vmatmul.mubr.f32.gmra.mrb[66].mxu1 %v11916_v26  ;;  %6171 = vmatprep.subr.bf16.mxu0 %v6170_v36  ;;  %v2469_v36 = vld [vmem:[%s7655_s8 + $0x1730] sm:$0xff]  ;;  %v5932_v47 = vpack.c.bf16 %v2467_v13, %v2461_v52  ;;  %v11926_v11 = vld [vmem:[#allocation48_spill] sm:$0xff] }
 0x2fd   : > { %4704 = vmatmul.mubr.f32.gmra.mrb[66].mxu0 %v11916_v26  ;;  %3873 = vmatprep.mubr.f32.mxu1 %v11917_v32  ;;  %v6190_v26 = vpack.c.bf16 %v2482_v61, %v2476_v19  ;;  %v11927_v38 = vld [vmem:[#allocation50_spill] sm:$0xff]  ;;  %v11930_v56 = vld [vmem:[#allocation56_spill] sm:$0xff] }
 0x2fe   : > { %4709 = vmatprep.mubr.f32.mxu0 %v11917_v32  ;;  %5917 = vmatpush1.bf16.msra.mxu1 %v5916_v50  ;;  %v6188_v50 = vpack.c.bf16 %v2469_v36, %v2463_v12  ;;  %v2488_v32 = vld [vmem:[%s7655_s8 + $0x17c8] sm:$0xff]  ;;  %v11929_v63 = vld [vmem:[#allocation54_spill] sm:$0xff]  ;;  %v11934_v28 = vld [vmem:[#allocation64_spill] sm:$0xff] }
 0x2ff   : > { %6173 = vmatpush1.bf16.msra.mxu0 %v6172_v2  ;;  %5919 = vmatprep.subr.bf16.mxu1 %v5918_v58  ;;  %v5934_v2 = vpack.c.bf16 %v2480_v25, %v2474_v34  ;;  %v2473_v58 = vld [vmem:[%s7655_s8 + $0x1750] sm:$0xff]  ;;  %v6194_v6 = vpack.c.bf16 %v2494_v17, %v2488_v32  ;;  %v11936_v3 = vld [vmem:[#allocation68_spill] sm:$0xff] }
 0x300   : > { %3874 = vmatmul.mubr.f32.gmra.mrb[68].mxu1 %v11918_v29  ;;  %6175 = vmatprep.subr.bf16.mxu0 %v6174_v51  ;;  %v2481_v51 = vld [vmem:[%s7655_s8 + $0x1790] sm:$0xff]  ;;  %v5936_v45 = vpack.c.bf16 %v2479_v30, %v2473_v58  ;;  %v11940_v20 = vld [vmem:[#allocation76_spill] sm:$0xff] }
 0x301   : > { %4710 = vmatmul.mubr.f32.gmra.mrb[68].mxu0 %v11918_v29  ;;  %3879 = vmatprep.mubr.f32.mxu1 %v11919_v9  ;;  %v2487_v29 = vld [vmem:[%s7655_s8 + $0x17c0] sm:$0xff]  ;;  %v11935_v44 = vld [vmem:[#allocation66_spill] sm:$0xff] }
 0x302   : > { %4715 = vmatprep.mubr.f32.mxu0 %v11919_v9  ;;  %5921 = vmatpush1.bf16.msra.mxu1 %v5920_v40  ;;  %v6192_v40 = vpack.c.bf16 %v2481_v51, %v2475_v31  ;;  %v11928_v9 = vld [vmem:[#allocation52_spill] sm:$0xff]  ;;  %v11939_v5 = vld [vmem:[#allocation74_spill] sm:$0xff] }
 0x303   : > { %6177 = vmatpush1.bf16.msra.mxu0 %v6176_v22  ;;  %5923 = vmatprep.subr.bf16.mxu1 %v5922_v0  ;;  %v5938_v22 = vpack.c.bf16 %v2492_v39, %v2486_v53  ;;  %v2485_v0 = vld [vmem:[%s7655_s8 + $0x17b0] sm:$0xff]  ;;  %v11944_v24 = vld [vmem:[#allocation84_spill] sm:$0xff] }
 0x304   : > { %3880 = vmatmul.mubr.f32.gmra.mrb[70].mxu1 %v11920_v27  ;;  %6179 = vmatprep.subr.bf16.mxu0 %v6178_v43  ;;  %v2493_v43 = vld [vmem:[%s7655_s8 + $0x17f0] sm:$0xff]  ;;  %v5940_v60 = vpack.c.bf16 %v2491_v46, %v2485_v0  ;;  %v11948_v52 = vld [vmem:[#allocation92_spill] sm:$0xff]  ;;  %s7226_s8 = sshll.u32 %s7381_s0, 4  ;;  %s7227_s8 = int_to_ptr.vmem [resolvable:$false] %s7226_s8 }
 0x305   : > { %4716 = vmatmul.mubr.f32.gmra.mrb[70].mxu0 %v11920_v27  ;;  %3885 = vmatprep.mubr.f32.mxu1 %v11921_v55  ;;  %v6196_v21 = vpack.c.bf16 %v2493_v43, %v2487_v29  ;;  %v11937_v27 = vld [vmem:[#allocation70_spill] sm:$0xff]  ;;  %v11950_v12 = vld [vmem:[#allocation96_spill] sm:$0xff]  ;;  %s7228_s4 = scalar_lea.vmem %s7227_s8, 36864  ;;  %p7229_p1 = scmp.lt.s32.totalorder %s11249_s3, %s7227_s8 }
 0x306   : > { %4721 = vmatprep.mubr.f32.mxu0 %v11921_v55  ;;  %5925 = vmatpush1.bf16.msra.mxu1 %v5924_v49  ;;  %v11931_v49 = vld [vmem:[#allocation58_spill] sm:$0xff]  ;;  %v11942_v55 = vld [vmem:[#allocation80_spill] sm:$0xff]  ;;  %p7230_p13 = scmp.lt.s32.totalorder %s7228_s4, %s7222_s6 }
 0x307   : > { %6181 = vmatpush1.bf16.msra.mxu0 %v6180_v57  ;;  %5927 = vmatprep.subr.bf16.mxu1 %v5926_v4  ;;  %v11932_v57 = vld [vmem:[#allocation60_spill] sm:$0xff]  ;;  %v11933_v4 = vld [vmem:[#allocation62_spill] sm:$0xff] }
 0x308   : > { %3886 = vmatmul.mubr.f32.gmra.mrb[72].mxu1 %v11922_v62  ;;  %6183 = vmatprep.subr.bf16.mxu0 %v6182_v59  ;;  %v11938_v59 = vld [vmem:[#allocation72_spill] sm:$0xff]  ;;  %v11941_v42 = vld [vmem:[#allocation78_spill] sm:$0xff]  ;;  %p7231_p8 = por %p7230_p13, %p7229_p1 }
 0x309   : > { %4722 = vmatmul.mubr.f32.gmra.mrb[72].mxu0 %v11922_v62  ;;  %3891 = vmatprep.mubr.f32.mxu1 %v11923_v18  ;;  %v11943_v41 = vld [vmem:[#allocation82_spill] sm:$0xff]  ;;  %v11954_v34 = vld [vmem:[#allocation104_spill] sm:$0xff] }
 0x30a   : > { %4727 = vmatprep.mubr.f32.mxu0 %v11923_v18  ;;  %5929 = vmatpush1.bf16.msra.mxu1 %v5928_v37  ;;  %v11945_v37 = vld [vmem:[#allocation86_spill] sm:$0xff]  ;;  %v11956_v18 = vld [vmem:[#allocation108_spill] sm:$0xff]  ;;  %p7232_p0 = pnand %p7231_p8, %p7225_p12 }
 0x30b   : > { %6185 = vmatpush1.bf16.msra.mxu0 %v6184_v16  ;;  %5931 = vmatprep.subr.bf16.mxu1 %v5930_v10  ;;  %v11946_v16 = vld [vmem:[#allocation88_spill] sm:$0xff]  ;;  %v11947_v10 = vld [vmem:[#allocation90_spill] sm:$0xff] }
 0x30c   : > { %3892 = vmatmul.mubr.f32.gmra.mrb[74].mxu1 %v11924_v35  ;;  %6187 = vmatprep.subr.bf16.mxu0 %v6186_v33  ;;  %v11949_v13 = vld [vmem:[#allocation94_spill] sm:$0xff]  ;;  %v11952_v33 = vld [vmem:[#allocation100_spill] sm:$0xff] }
 0x30d   : > { %4728 = vmatmul.mubr.f32.gmra.mrb[74].mxu0 %v11924_v35  ;;  %3897 = vmatprep.mubr.f32.mxu1 %v11925_v14  ;;  %v11951_v62 = vld [vmem:[#allocation98_spill] sm:$0xff]  ;;  %v11958_v61 = vld [vmem:[#allocation112_spill] sm:$0xff] }
 0x30e   : > { %4733 = vmatprep.mubr.f32.mxu0 %v11925_v14  ;;  %5933 = vmatpush1.bf16.msra.mxu1 %v5932_v47  ;;  %v11953_v36 = vld [vmem:[#allocation102_spill] sm:$0xff]  ;;  %v11962_v58 = vld [vmem:[#allocation120_spill] sm:$0xff] }
 0x30f   : > { %6189 = vmatpush1.bf16.msra.mxu0 %v6188_v50  ;;  %5935 = vmatprep.subr.bf16.mxu1 %v5934_v2  ;;  %v11955_v25 = vld [vmem:[#allocation106_spill] sm:$0xff]  ;;  %v11960_v50 = vld [vmem:[#allocation116_spill] sm:$0xff] }
 0x310   : > { %3898 = vmatmul.mubr.f32.gmra.mrb[76].mxu1 %v11926_v11  ;;  %6191 = vmatprep.subr.bf16.mxu0 %v6190_v26  ;;  %v11957_v19 = vld [vmem:[#allocation110_spill] sm:$0xff]  ;;  %v11964_v31 = vld [vmem:[#allocation124_spill] sm:$0xff] }
 0x311   : > { %4734 = vmatmul.mubr.f32.gmra.mrb[76].mxu0 %v11926_v11  ;;  %3903 = vmatprep.mubr.f32.mxu1 %v11927_v38  ;;  %v11959_v47 = vld [vmem:[#allocation114_spill] sm:$0xff]  ;;  %v11966_v26 = vld [vmem:[#allocation128_spill] sm:$0xff] }
 0x312   : > { %4739 = vmatprep.mubr.f32.mxu0 %v11927_v38  ;;  %5937 = vmatpush1.bf16.msra.mxu1 %v5936_v45  ;;  %v11961_v2 = vld [vmem:[#allocation118_spill] sm:$0xff]  ;;  %v11968_v53 = vld [vmem:[#allocation132_spill] sm:$0xff] }
 0x313   : > { %6193 = vmatpush1.bf16.msra.mxu0 %v6192_v40  ;;  %5939 = vmatprep.subr.bf16.mxu1 %v5938_v22  ;;  %v11963_v30 = vld [vmem:[#allocation122_spill] sm:$0xff]  ;;  %v11970_v14 = vld [vmem:[#allocation136_spill] sm:$0xff] }
 0x314   : > { %3904 = vmatmul.mubr.f32.gmra.mrb[78].mxu1 %v11928_v9  ;;  %6195 = vmatprep.subr.bf16.mxu0 %v6194_v6  ;;  %v11965_v35 = vld [vmem:[#allocation126_spill] sm:$0xff]  ;;  %v11972_v17 = vld [vmem:[#allocation140_spill] sm:$0xff] }
 0x315   : > { %4740 = vmatmul.mubr.f32.gmra.mrb[78].mxu0 %v11928_v9  ;;  %3909 = vmatprep.mubr.f32.mxu1 %v11929_v63  ;;  %v11967_v51 = vld [vmem:[#allocation130_spill] sm:$0xff]  ;;  %v11974_v40 = vld [vmem:[#allocation144_spill] sm:$0xff]  ;;  %v11985_v9 = vld [vmem:[#allocation165_spill] sm:$0xff] }
 0x316   : > { %4745 = vmatprep.mubr.f32.mxu0 %v11929_v63  ;;  %5941 = vmatpush1.bf16.msra.mxu1 %v5940_v60  ;;  %v11969_v39 = vld [vmem:[#allocation134_spill] sm:$0xff]  ;;  %v11976_v0 = vld [vmem:[#allocation148_spill] sm:$0xff]  ;;  %v11983_v60 = vld [vmem:[#allocation161_spill] sm:$0xff] }
 0x317   : > { %6197 = vmatpush1.bf16.msra.mxu0 %v6196_v21  ;;  %v11971_v32 = vld [vmem:[#allocation138_spill] sm:$0xff]  ;;  %v11978_v11 = vld [vmem:[#allocation152_spill] sm:$0xff]  ;;  %v11984_v21 = vld [vmem:[#allocation163_spill] sm:$0xff] }
 0x318   : > { %3910 = vmatmul.mubr.f32.gmra.mrb[80].mxu1 %v11930_v56  ;;  %v11973_v45 = vld [vmem:[#allocation142_spill] sm:$0xff]  ;;  %v11980_v29 = vld [vmem:[#allocation156_spill] sm:$0xff] }
 0x319   : > { %4746 = vmatmul.mubr.f32.gmra.mrb[80].mxu0 %v11930_v56  ;;  %3915 = vmatprep.mubr.f32.mxu1 %v11931_v49  ;;  %v11975_v22 = vld [vmem:[#allocation146_spill] sm:$0xff]  ;;  %v11982_v38 = vld [vmem:[#allocation160_spill] sm:$0xff] }
 0x31a   : > { %4751 = vmatprep.mubr.f32.mxu0 %v11931_v49  ;;  %v11977_v46 = vld [vmem:[#allocation150_spill] sm:$0xff] }
 0x31b   : > { %v11979_v6 = vld [vmem:[#allocation154_spill] sm:$0xff] }
 0x31c   : > { %3916 = vmatmul.mubr.f32.gmra.mrb[82].mxu1 %v11932_v57  ;;  %v11981_v43 = vld [vmem:[#allocation158_spill] sm:$0xff] }
 0x31d   : > { %4752 = vmatmul.mubr.f32.gmra.mrb[82].mxu0 %v11932_v57  ;;  %3921 = vmatprep.mubr.f32.mxu1 %v11933_v4 }
 0x31e   : > { %4757 = vmatprep.mubr.f32.mxu0 %v11933_v4 }
 0x320   : > { %3922 = vmatmul.mubr.f32.gmra.mrb[84].mxu1 %v11934_v28 }
 0x321   : > { %4758 = vmatmul.mubr.f32.gmra.mrb[84].mxu0 %v11934_v28  ;;  %3927 = vmatprep.mubr.f32.mxu1 %v11935_v44  ;;  %v1591_v28 = vld [vmem:[%s7664_s5 + $0x40] sm:$0xff] }
 0x322   : > { %4763 = vmatprep.mubr.f32.mxu0 %v11935_v44  ;;  %v1593_v44 = vld [vmem:[%s7664_s5 + $0x50] sm:$0xff] }
 0x324   : > { %3928 = vmatmul.mubr.f32.gmra.mrb[86].mxu1 %v11936_v3 }
 0x325   : > { %4764 = vmatmul.mubr.f32.gmra.mrb[86].mxu0 %v11936_v3  ;;  %3933 = vmatprep.mubr.f32.mxu1 %v11937_v27  ;;  %v1592_v3 = vld [vmem:[%s7664_s5 + $0x48] sm:$0xff] }
 0x326   : > { %4769 = vmatprep.mubr.f32.mxu0 %v11937_v27 }
 0x328   : > { %3934 = vmatmul.mubr.f32.gmra.mrb[88].mxu1 %v11938_v59 }
 0x329   : > { %4770 = vmatmul.mubr.f32.gmra.mrb[88].mxu0 %v11938_v59  ;;  %3939 = vmatprep.mubr.f32.mxu1 %v11939_v5  ;;  %v1594_v59 = vld [vmem:[%s7664_s5 + $0x58] sm:$0xff] }
 0x32a   : > { %4775 = vmatprep.mubr.f32.mxu0 %v11939_v5 }
 0x32c   : > { %3940 = vmatmul.mubr.f32.gmra.mrb[90].mxu1 %v11940_v20 }
 0x32d   : > { %4776 = vmatmul.mubr.f32.gmra.mrb[90].mxu0 %v11940_v20  ;;  %3945 = vmatprep.mubr.f32.mxu1 %v11941_v42 }
 0x32e   : > { %4781 = vmatprep.mubr.f32.mxu0 %v11941_v42 }
 0x330   : > { %3946 = vmatmul.mubr.f32.gmra.mrb[92].mxu1 %v11942_v55 }
 0x331   : > { %4782 = vmatmul.mubr.f32.gmra.mrb[92].mxu0 %v11942_v55  ;;  %3951 = vmatprep.mubr.f32.mxu1 %v11943_v41 }
 0x332   : > { %4787 = vmatprep.mubr.f32.mxu0 %v11943_v41 }
 0x334   : > { %3952 = vmatmul.mubr.f32.gmra.mrb[94].mxu1 %v11944_v24 }
 0x335   : > { %4788 = vmatmul.mubr.f32.gmra.mrb[94].mxu0 %v11944_v24  ;;  %4022 = vmatprep.mubr.f32.mxu1 %v11945_v37 }
 0x336   : > { %4858 = vmatprep.mubr.f32.mxu0 %v11945_v37  ;;  %v1597_v37 = vld [vmem:[%s7664_s5 + $0x70] sm:$0xff] }
 0x338   : > { %4023 = vmatmul.mubr.f32.vlgmr.msra.gmra.mrb[48].mxu1 %v11946_v16 }
 0x339   : > { %4859 = vmatmul.mubr.f32.vlgmr.msra.gmra.mrb[48].mxu0 %v11946_v16  ;;  %4028 = vmatprep.mubr.f32.mxu1 %v11947_v10 }
 0x33a   : > { %4864 = vmatprep.mubr.f32.mxu0 %v11947_v10  ;;  %v1599_v10 = vld [vmem:[%s7664_s5 + $0x80] sm:$0xff] }
 0x33c   : > { %4029 = vmatmul.mubr.f32.gmra.mrb[50].mxu1 %v11948_v52 }
 0x33d   : > { %4865 = vmatmul.mubr.f32.gmra.mrb[50].mxu0 %v11948_v52  ;;  %4034 = vmatprep.mubr.f32.mxu1 %v11949_v13  ;;  %v1598_v52 = vld [vmem:[%s7664_s5 + $0x78] sm:$0xff] }
 0x33e   : > { %4870 = vmatprep.mubr.f32.mxu0 %v11949_v13 }
 0x340   : > { %4035 = vmatmul.mubr.f32.gmra.mrb[52].mxu1 %v11950_v12 }
 0x341   : > { %4871 = vmatmul.mubr.f32.gmra.mrb[52].mxu0 %v11950_v12  ;;  %4040 = vmatprep.mubr.f32.mxu1 %v11951_v62  ;;  %v1600_v12 = vld [vmem:[%s7664_s5 + $0x88] sm:$0xff] }
 0x342   : > { %4876 = vmatprep.mubr.f32.mxu0 %v11951_v62 }
 0x344   : > { %4041 = vmatmul.mubr.f32.gmra.mrb[54].mxu1 %v11952_v33 }
 0x345   : > { %4877 = vmatmul.mubr.f32.gmra.mrb[54].mxu0 %v11952_v33  ;;  %4046 = vmatprep.mubr.f32.mxu1 %v11953_v36 }
 0x346   : > { %4882 = vmatprep.mubr.f32.mxu0 %v11953_v36 }
 0x348   : > { %4047 = vmatmul.mubr.f32.gmra.mrb[56].mxu1 %v11954_v34 }
 0x349   : > { %4883 = vmatmul.mubr.f32.gmra.mrb[56].mxu0 %v11954_v34  ;;  %4052 = vmatprep.mubr.f32.mxu1 %v11955_v25 }
 0x34a   : > { %4888 = vmatprep.mubr.f32.mxu0 %v11955_v25 }
 0x34c   : > { %4053 = vmatmul.mubr.f32.gmra.mrb[58].mxu1 %v11956_v18 }
 0x34d   : > { %4889 = vmatmul.mubr.f32.gmra.mrb[58].mxu0 %v11956_v18  ;;  %4058 = vmatprep.mubr.f32.mxu1 %v11957_v19 }
 0x34e   : > { %4894 = vmatprep.mubr.f32.mxu0 %v11957_v19  ;;  %v1603_v19 = vld [vmem:[%s7664_s5 + $0xa0] sm:$0xff] }
 0x350   : > { %4059 = vmatmul.mubr.f32.gmra.mrb[60].mxu1 %v11958_v61 }
 0x351   : > { %4895 = vmatmul.mubr.f32.gmra.mrb[60].mxu0 %v11958_v61  ;;  %4064 = vmatprep.mubr.f32.mxu1 %v11959_v47 }
 0x352   : > { %4900 = vmatprep.mubr.f32.mxu0 %v11959_v47  ;;  %v1605_v47 = vld [vmem:[%s7664_s5 + $0xb0] sm:$0xff] }
 0x354   : > { %4065 = vmatmul.mubr.f32.gmra.mrb[62].mxu1 %v11960_v50 }
 0x355   : > { %4901 = vmatmul.mubr.f32.gmra.mrb[62].mxu0 %v11960_v50  ;;  %4070 = vmatprep.mubr.f32.mxu1 %v11961_v2  ;;  %v1604_v50 = vld [vmem:[%s7664_s5 + $0xa8] sm:$0xff] }
 0x356   : > { %4906 = vmatprep.mubr.f32.mxu0 %v11961_v2 }
 0x358   : > { %4071 = vmatmul.mubr.f32.gmra.mrb[64].mxu1 %v11962_v58 }
 0x359   : > { %4907 = vmatmul.mubr.f32.gmra.mrb[64].mxu0 %v11962_v58  ;;  %4076 = vmatprep.mubr.f32.mxu1 %v11963_v30  ;;  %v1606_v58 = vld [vmem:[%s7664_s5 + $0xb8] sm:$0xff] }
 0x35a   : > { %4912 = vmatprep.mubr.f32.mxu0 %v11963_v30 }
 0x35c   : > { %4077 = vmatmul.mubr.f32.gmra.mrb[66].mxu1 %v11964_v31 }
 0x35d   : > { %4913 = vmatmul.mubr.f32.gmra.mrb[66].mxu0 %v11964_v31  ;;  %4082 = vmatprep.mubr.f32.mxu1 %v11965_v35 }
 0x35e   : > { %4918 = vmatprep.mubr.f32.mxu0 %v11965_v35 }
 0x360   : > { %4083 = vmatmul.mubr.f32.gmra.mrb[68].mxu1 %v11966_v26 }
 0x361   : > { %4919 = vmatmul.mubr.f32.gmra.mrb[68].mxu0 %v11966_v26  ;;  %4088 = vmatprep.mubr.f32.mxu1 %v11967_v51 }
 0x362   : > { %4924 = vmatprep.mubr.f32.mxu0 %v11967_v51 }
 0x364   : > { %4089 = vmatmul.mubr.f32.gmra.mrb[70].mxu1 %v11968_v53 }
 0x365   : > { %4925 = vmatmul.mubr.f32.gmra.mrb[70].mxu0 %v11968_v53  ;;  %4094 = vmatprep.mubr.f32.mxu1 %v11969_v39 }
 0x366   : > { %4930 = vmatprep.mubr.f32.mxu0 %v11969_v39  ;;  %v1609_v39 = vld [vmem:[%s7664_s5 + $0xd0] sm:$0xff] }
 0x368   : > { %4095 = vmatmul.mubr.f32.gmra.mrb[72].mxu1 %v11970_v14 }
 0x369   : > { %4931 = vmatmul.mubr.f32.gmra.mrb[72].mxu0 %v11970_v14  ;;  %4100 = vmatprep.mubr.f32.mxu1 %v11971_v32 }
 0x36a   : > { %4936 = vmatprep.mubr.f32.mxu0 %v11971_v32  ;;  %v1611_v32 = vld [vmem:[%s7664_s5 + $0xe0] sm:$0xff] }
 0x36c   : > { %4101 = vmatmul.mubr.f32.gmra.mrb[74].mxu1 %v11972_v17 }
 0x36d   : > { %4937 = vmatmul.mubr.f32.gmra.mrb[74].mxu0 %v11972_v17  ;;  %4106 = vmatprep.mubr.f32.mxu1 %v11973_v45  ;;  %v1610_v17 = vld [vmem:[%s7664_s5 + $0xd8] sm:$0xff] }
 0x36e   : > { %4942 = vmatprep.mubr.f32.mxu0 %v11973_v45 }
 0x370   : > { %4107 = vmatmul.mubr.f32.gmra.mrb[76].mxu1 %v11974_v40 }
 0x371   : > { %4943 = vmatmul.mubr.f32.gmra.mrb[76].mxu0 %v11974_v40  ;;  %4112 = vmatprep.mubr.f32.mxu1 %v11975_v22  ;;  %v1612_v40 = vld [vmem:[%s7664_s5 + $0xe8] sm:$0xff] }
 0x372   : > { %4948 = vmatprep.mubr.f32.mxu0 %v11975_v22 }
 0x374   : > { %4113 = vmatmul.mubr.f32.gmra.mrb[78].mxu1 %v11976_v0 }
 0x375   : > { %4949 = vmatmul.mubr.f32.gmra.mrb[78].mxu0 %v11976_v0  ;;  %4118 = vmatprep.mubr.f32.mxu1 %v11977_v46 }
 0x376   : > { %4954 = vmatprep.mubr.f32.mxu0 %v11977_v46 }
 0x378   : > { %4119 = vmatmul.mubr.f32.gmra.mrb[80].mxu1 %v11978_v11 }
 0x379   : > { %4955 = vmatmul.mubr.f32.gmra.mrb[80].mxu0 %v11978_v11  ;;  %4124 = vmatprep.mubr.f32.mxu1 %v11979_v6 }
 0x37a   : > { %4960 = vmatprep.mubr.f32.mxu0 %v11979_v6 }
 0x37c   : > { %4125 = vmatmul.mubr.f32.gmra.mrb[82].mxu1 %v11980_v29 }
 0x37d   : > { %4961 = vmatmul.mubr.f32.gmra.mrb[82].mxu0 %v11980_v29  ;;  %4130 = vmatprep.mubr.f32.mxu1 %v11981_v43 }
 0x37e   : > { %4966 = vmatprep.mubr.f32.mxu0 %v11981_v43  ;;  %v1615_v43 = vld [vmem:[%s7664_s5 + $0x100] sm:$0xff] }
 0x380   : > { %4131 = vmatmul.mubr.f32.gmra.mrb[84].mxu1 %v11982_v38 }
 0x381   : > { %4967 = vmatmul.mubr.f32.gmra.mrb[84].mxu0 %v11982_v38  ;;  %4136 = vmatprep.mubr.f32.mxu1 %v11983_v60 }
 0x382   : > { %4972 = vmatprep.mubr.f32.mxu0 %v11983_v60  ;;  %v1617_v60 = vld [vmem:[%s7664_s5 + $0x110] sm:$0xff] }
 0x384   : > { %4137 = vmatmul.mubr.f32.gmra.mrb[86].mxu1 %v11984_v21 }
 0x385   : > { %4973 = vmatmul.mubr.f32.gmra.mrb[86].mxu0 %v11984_v21  ;;  %4142 = vmatprep.mubr.f32.mxu1 %v11985_v9  ;;  %v1616_v21 = vld [vmem:[%s7664_s5 + $0x108] sm:$0xff] }
 0x386   : > { %4978 = vmatprep.mubr.f32.mxu0 %v11985_v9 }
 0x388   : > { %4143 = vmatmul.mubr.f32.gmra.mrb[88].mxu1 %v10143_v48 }
 0x389   : > { %4979 = vmatmul.mubr.f32.gmra.mrb[88].mxu0 %v10143_v48  ;;  %4148 = vmatprep.mubr.f32.mxu1 %v10152_v1  ;;  %v1585_v48 = vld [vmem:[%s7664_s5 + $0x10] sm:$0xff] }
 0x38a   : > { %4984 = vmatprep.mubr.f32.mxu0 %v10152_v1  ;;  %v1587_v1 = vld [vmem:[%s7664_s5 + $0x20] sm:$0xff] }
 0x38c   : > { %4149 = vmatmul.mubr.f32.gmra.mrb[90].mxu1 %v10159_v23 }
 0x38d   : > { %4985 = vmatmul.mubr.f32.gmra.mrb[90].mxu0 %v10159_v23  ;;  %4154 = vmatprep.mubr.f32.mxu1 %v10169_v54  ;;  %v1586_v23 = vld [vmem:[%s7664_s5 + $0x18] sm:$0xff] }
 0x38e   : > { %4990 = vmatprep.mubr.f32.mxu0 %v10169_v54 }
 0x390   : > { %4155 = vmatmul.mubr.f32.gmra.mrb[92].mxu1 %v10177_v15 }
 0x391   : > { %4991 = vmatmul.mubr.f32.gmra.mrb[92].mxu0 %v10177_v15  ;;  %4160 = vmatprep.mubr.f32.mxu1 %v10183_v8  ;;  %v1588_v15 = vld [vmem:[%s7664_s5 + $0x28] sm:$0xff] }
 0x392   : > { %4996 = vmatprep.mubr.f32.mxu0 %v10183_v8 }
 0x394   : > { %4161 = vmatmul.mubr.f32.gmra.mrb[94].mxu1 %v10192_v7 }
 0x395   : > { %4997 = vmatmul.mubr.f32.gmra.mrb[94].mxu0 %v10192_v7 }
 0x40b   : > { %v4024_v54 = vpop.f32.mrb[48].mxu1 }
 0x40c   : > { %v5005_v63 = vadd.f32 %v4024_v54, %v1585_v48  ;;  %v4860_v56 = vpop.f32.mrb[48].mxu0  ;;  %v4026_v49 = vpop.f32.mrb[49].mxu1  ;;  %v1618_v48 = vld [vmem:[%s7664_s5 + $0x118] sm:$0xff] }
 0x40d   : > { %v5007_v57 = vadd.f32 %v4860_v56, %v1587_v1  ;;  %v5006_v8 = vadd.f32 %v4026_v49, %v1586_v23  ;;  %v4862_v4 = vpop.f32.mrb[49].mxu0  ;;  %v1621_v49 = vld [vmem:[%s7664_s5 + $0x130] sm:$0xff] }
 0x40e   : > { %5149 = vst [vmem:[%s7664_s5 + $0x10] sm:$0xff] %v5005_v63  ;;  %v5008_v7 = vadd.f32 %v4862_v4, %v1588_v15  ;;  %v1622_v4 = vld [vmem:[%s7664_s5 + $0x138] sm:$0xff] }
 0x40f   : > { %5151 = vst [vmem:[%s7664_s5 + $0x20] sm:$0xff] %v5007_v57  ;;  %5150 = vst [vmem:[%s7664_s5 + $0x18] sm:$0xff] %v5006_v8  ;;  %v4030_v27 = vpop.f32.mrb[50].mxu1  ;;  %v1623_v8 = vld [vmem:[%s7664_s5 + $0x140] sm:$0xff] }
 0x410   : > { %5152 = vst [vmem:[%s7664_s5 + $0x28] sm:$0xff] %v5008_v7  ;;  %v5011_v5 = vadd.f32 %v4030_v27, %v1591_v28  ;;  %v4866_v20 = vpop.f32.mrb[50].mxu0  ;;  %v4032_v42 = vpop.f32.mrb[51].mxu1  ;;  %v1624_v7 = vld [vmem:[%s7664_s5 + $0x148] sm:$0xff] }
 0x411   : > { %v5013_v55 = vadd.f32 %v4866_v20, %v1593_v44  ;;  %v5012_v41 = vadd.f32 %v4032_v42, %v1592_v3  ;;  %v4868_v24 = vpop.f32.mrb[51].mxu0  ;;  %v1627_v42 = vld [vmem:[%s7664_s5 + $0x160] sm:$0xff] }
 0x412   : > { %5155 = vst [vmem:[%s7664_s5 + $0x40] sm:$0xff] %v5011_v5  ;;  %v5014_v16 = vadd.f32 %v4868_v24, %v1594_v59  ;;  %v1628_v24 = vld [vmem:[%s7664_s5 + $0x168] sm:$0xff] }
 0x413   : > { %5157 = vst [vmem:[%s7664_s5 + $0x50] sm:$0xff] %v5013_v55  ;;  %5156 = vst [vmem:[%s7664_s5 + $0x48] sm:$0xff] %v5012_v41  ;;  %v4036_v13 = vpop.f32.mrb[52].mxu1  ;;  %v1629_v41 = vld [vmem:[%s7664_s5 + $0x170] sm:$0xff] }
 0x414   : > { %5158 = vst [vmem:[%s7664_s5 + $0x58] sm:$0xff] %v5014_v16  ;;  %v5017_v62 = vadd.f32 %v4036_v13, %v1597_v37  ;;  %v4872_v33 = vpop.f32.mrb[52].mxu0  ;;  %v4038_v36 = vpop.f32.mrb[53].mxu1  ;;  %v1630_v16 = vld [vmem:[%s7664_s5 + $0x178] sm:$0xff] }
 0x415   : > { %v5019_v34 = vadd.f32 %v4872_v33, %v1599_v10  ;;  %v5018_v25 = vadd.f32 %v4038_v36, %v1598_v52  ;;  %v4874_v18 = vpop.f32.mrb[53].mxu0  ;;  %v1633_v36 = vld [vmem:[%s7664_s5 + $0x190] sm:$0xff] }
 0x416   : > { %5161 = vst [vmem:[%s7664_s5 + $0x70] sm:$0xff] %v5017_v62  ;;  %v5020_v61 = vadd.f32 %v4874_v18, %v1600_v12  ;;  %v1634_v18 = vld [vmem:[%s7664_s5 + $0x198] sm:$0xff] }
 0x417   : > { %5163 = vst [vmem:[%s7664_s5 + $0x80] sm:$0xff] %v5019_v34  ;;  %5162 = vst [vmem:[%s7664_s5 + $0x78] sm:$0xff] %v5018_v25  ;;  %v4042_v2 = vpop.f32.mrb[54].mxu1  ;;  %v1635_v25 = vld [vmem:[%s7664_s5 + $0x1a0] sm:$0xff] }
 0x418   : > { %5164 = vst [vmem:[%s7664_s5 + $0x88] sm:$0xff] %v5020_v61  ;;  %v5023_v30 = vadd.f32 %v4042_v2, %v1603_v19  ;;  %v4878_v31 = vpop.f32.mrb[54].mxu0  ;;  %v4044_v35 = vpop.f32.mrb[55].mxu1  ;;  %v1636_v61 = vld [vmem:[%s7664_s5 + $0x1a8] sm:$0xff] }
 0x419   : > { %v5025_v26 = vadd.f32 %v4878_v31, %v1605_v47  ;;  %v5024_v51 = vadd.f32 %v4044_v35, %v1604_v50  ;;  %v4880_v53 = vpop.f32.mrb[55].mxu0  ;;  %v1639_v35 = vld [vmem:[%s7664_s5 + $0x1c0] sm:$0xff] }
 0x41a   : > { %5167 = vst [vmem:[%s7664_s5 + $0xa0] sm:$0xff] %v5023_v30  ;;  %v5026_v14 = vadd.f32 %v4880_v53, %v1606_v58  ;;  %v1640_v53 = vld [vmem:[%s7664_s5 + $0x1c8] sm:$0xff] }
 0x41b   : > { %5169 = vst [vmem:[%s7664_s5 + $0xb0] sm:$0xff] %v5025_v26  ;;  %5168 = vst [vmem:[%s7664_s5 + $0xa8] sm:$0xff] %v5024_v51  ;;  %v4048_v45 = vpop.f32.mrb[56].mxu1  ;;  %v1641_v51 = vld [vmem:[%s7664_s5 + $0x1d0] sm:$0xff] }
 0x41c   : > { %5170 = vst [vmem:[%s7664_s5 + $0xb8] sm:$0xff] %v5026_v14  ;;  %v5029_v22 = vadd.f32 %v4048_v45, %v1609_v39  ;;  %v4884_v0 = vpop.f32.mrb[56].mxu0  ;;  %v4050_v46 = vpop.f32.mrb[57].mxu1  ;;  %v1642_v14 = vld [vmem:[%s7664_s5 + $0x1d8] sm:$0xff] }
 0x41d   : > { %v5031_v11 = vadd.f32 %v4884_v0, %v1611_v32  ;;  %v5030_v6 = vadd.f32 %v4050_v46, %v1610_v17  ;;  %v4886_v29 = vpop.f32.mrb[57].mxu0  ;;  %v1645_v46 = vld [vmem:[%s7664_s5 + $0x1f0] sm:$0xff] }
 0x41e   : > { %5173 = vst [vmem:[%s7664_s5 + $0xd0] sm:$0xff] %v5029_v22  ;;  %v5032_v38 = vadd.f32 %v4886_v29, %v1612_v40  ;;  %v1646_v29 = vld [vmem:[%s7664_s5 + $0x1f8] sm:$0xff] }
 0x41f   : > { %5175 = vst [vmem:[%s7664_s5 + $0xe0] sm:$0xff] %v5031_v11  ;;  %5174 = vst [vmem:[%s7664_s5 + $0xd8] sm:$0xff] %v5030_v6  ;;  %v4054_v9 = vpop.f32.mrb[58].mxu1  ;;  %v1647_v6 = vld [vmem:[%s7664_s5 + $0x200] sm:$0xff] }
 0x420   : > { %5176 = vst [vmem:[%s7664_s5 + $0xe8] sm:$0xff] %v5032_v38  ;;  %v5035_v1 = vadd.f32 %v4054_v9, %v1615_v43  ;;  %v4890_v23 = vpop.f32.mrb[58].mxu0  ;;  %v4056_v54 = vpop.f32.mrb[59].mxu1  ;;  %v1648_v38 = vld [vmem:[%s7664_s5 + $0x208] sm:$0xff] }
 0x421   : > { %v5037_v15 = vadd.f32 %v4890_v23, %v1617_v60  ;;  %v5036_v63 = vadd.f32 %v4056_v54, %v1616_v21  ;;  %v4892_v56 = vpop.f32.mrb[59].mxu0  ;;  %v1651_v54 = vld [vmem:[%s7664_s5 + $0x220] sm:$0xff] }
 0x422   : > { %5179 = vst [vmem:[%s7664_s5 + $0x100] sm:$0xff] %v5035_v1  ;;  %v5038_v57 = vadd.f32 %v4892_v56, %v1618_v48  ;;  %v1652_v56 = vld [vmem:[%s7664_s5 + $0x228] sm:$0xff] }
 0x423   : > { %5181 = vst [vmem:[%s7664_s5 + $0x110] sm:$0xff] %v5037_v15  ;;  %5180 = vst [vmem:[%s7664_s5 + $0x108] sm:$0xff] %v5036_v63  ;;  %v4060_v28 = vpop.f32.mrb[60].mxu1  ;;  %v1653_v63 = vld [vmem:[%s7664_s5 + $0x230] sm:$0xff] }
 0x424   : > { %5182 = vst [vmem:[%s7664_s5 + $0x118] sm:$0xff] %v5038_v57  ;;  %v5041_v44 = vadd.f32 %v4060_v28, %v1621_v49  ;;  %v4896_v3 = vpop.f32.mrb[60].mxu0  ;;  %v4062_v27 = vpop.f32.mrb[61].mxu1  ;;  %v1654_v57 = vld [vmem:[%s7664_s5 + $0x238] sm:$0xff] }
 0x425   : > { %v5043_v59 = vadd.f32 %v4896_v3, %v1623_v8  ;;  %v5042_v5 = vadd.f32 %v4062_v27, %v1622_v4  ;;  %v4898_v20 = vpop.f32.mrb[61].mxu0  ;;  %v1657_v27 = vld [vmem:[%s7664_s5 + $0x250] sm:$0xff] }
 0x426   : > { %5185 = vst [vmem:[%s7664_s5 + $0x130] sm:$0xff] %v5041_v44  ;;  %v5044_v55 = vadd.f32 %v4898_v20, %v1624_v7  ;;  %v1658_v20 = vld [vmem:[%s7664_s5 + $0x258] sm:$0xff] }
 0x427   : > { %5187 = vst [vmem:[%s7664_s5 + $0x140] sm:$0xff] %v5043_v59  ;;  %5186 = vst [vmem:[%s7664_s5 + $0x138] sm:$0xff] %v5042_v5  ;;  %v4066_v37 = vpop.f32.mrb[62].mxu1  ;;  %v1659_v5 = vld [vmem:[%s7664_s5 + $0x260] sm:$0xff] }
 0x428   : > { %5188 = vst [vmem:[%s7664_s5 + $0x148] sm:$0xff] %v5044_v55  ;;  %v5047_v10 = vadd.f32 %v4066_v37, %v1627_v42  ;;  %v4902_v52 = vpop.f32.mrb[62].mxu0  ;;  %v4068_v13 = vpop.f32.mrb[63].mxu1  ;;  %v1660_v55 = vld [vmem:[%s7664_s5 + $0x268] sm:$0xff] }
 0x429   : > { %v5049_v12 = vadd.f32 %v4902_v52, %v1629_v41  ;;  %v5048_v62 = vadd.f32 %v4068_v13, %v1628_v24  ;;  %v4904_v33 = vpop.f32.mrb[63].mxu0  ;;  %v1663_v13 = vld [vmem:[%s7664_s5 + $0x280] sm:$0xff] }
 0x42a   : > { %5191 = vst [vmem:[%s7664_s5 + $0x160] sm:$0xff] %v5047_v10  ;;  %v5050_v34 = vadd.f32 %v4904_v33, %v1630_v16  ;;  %v1664_v33 = vld [vmem:[%s7664_s5 + $0x288] sm:$0xff] }
 0x42b   : > { %5193 = vst [vmem:[%s7664_s5 + $0x170] sm:$0xff] %v5049_v12  ;;  %5192 = vst [vmem:[%s7664_s5 + $0x168] sm:$0xff] %v5048_v62  ;;  %v4072_v19 = vpop.f32.mrb[64].mxu1  ;;  %v1665_v62 = vld [vmem:[%s7664_s5 + $0x290] sm:$0xff] }
 0x42c   : > { %5194 = vst [vmem:[%s7664_s5 + $0x178] sm:$0xff] %v5050_v34  ;;  %v5053_v47 = vadd.f32 %v4072_v19, %v1633_v36  ;;  %v4908_v50 = vpop.f32.mrb[64].mxu0  ;;  %v4074_v2 = vpop.f32.mrb[65].mxu1  ;;  %v1666_v34 = vld [vmem:[%s7664_s5 + $0x298] sm:$0xff] }
 0x42d   : > { %v5055_v58 = vadd.f32 %v4908_v50, %v1635_v25  ;;  %v5054_v30 = vadd.f32 %v4074_v2, %v1634_v18  ;;  %v4910_v31 = vpop.f32.mrb[65].mxu0  ;;  %v1669_v2 = vld [vmem:[%s7664_s5 + $0x2b0] sm:$0xff] }
 0x42e   : > { %5197 = vst [vmem:[%s7664_s5 + $0x190] sm:$0xff] %v5053_v47  ;;  %v5056_v26 = vadd.f32 %v4910_v31, %v1636_v61  ;;  %v1670_v31 = vld [vmem:[%s7664_s5 + $0x2b8] sm:$0xff] }
 0x42f   : > { %5199 = vst [vmem:[%s7664_s5 + $0x1a0] sm:$0xff] %v5055_v58  ;;  %5198 = vst [vmem:[%s7664_s5 + $0x198] sm:$0xff] %v5054_v30  ;;  %v4078_v39 = vpop.f32.mrb[66].mxu1  ;;  %v1671_v30 = vld [vmem:[%s7664_s5 + $0x2c0] sm:$0xff] }
 0x430   : > { %5200 = vst [vmem:[%s7664_s5 + $0x1a8] sm:$0xff] %v5056_v26  ;;  %v5059_v32 = vadd.f32 %v4078_v39, %v1639_v35  ;;  %v4914_v17 = vpop.f32.mrb[66].mxu0  ;;  %v4080_v45 = vpop.f32.mrb[67].mxu1  ;;  %v1672_v26 = vld [vmem:[%s7664_s5 + $0x2c8] sm:$0xff] }
 0x431   : > { %v5061_v40 = vadd.f32 %v4914_v17, %v1641_v51  ;;  %v5060_v22 = vadd.f32 %v4080_v45, %v1640_v53  ;;  %v4916_v0 = vpop.f32.mrb[67].mxu0  ;;  %v1675_v45 = vld [vmem:[%s7664_s5 + $0x2e0] sm:$0xff] }
 0x432   : > { %5203 = vst [vmem:[%s7664_s5 + $0x1c0] sm:$0xff] %v5059_v32  ;;  %v5062_v11 = vadd.f32 %v4916_v0, %v1642_v14  ;;  %v1676_v0 = vld [vmem:[%s7664_s5 + $0x2e8] sm:$0xff] }
 0x433   : > { %5205 = vst [vmem:[%s7664_s5 + $0x1d0] sm:$0xff] %v5061_v40  ;;  %5204 = vst [vmem:[%s7664_s5 + $0x1c8] sm:$0xff] %v5060_v22  ;;  %v4084_v43 = vpop.f32.mrb[68].mxu1  ;;  %v1677_v22 = vld [vmem:[%s7664_s5 + $0x2f0] sm:$0xff] }
 0x434   : > { %5206 = vst [vmem:[%s7664_s5 + $0x1d8] sm:$0xff] %v5062_v11  ;;  %v5065_v60 = vadd.f32 %v4084_v43, %v1645_v46  ;;  %v4920_v21 = vpop.f32.mrb[68].mxu0  ;;  %v4086_v9 = vpop.f32.mrb[69].mxu1  ;;  %v1678_v11 = vld [vmem:[%s7664_s5 + $0x2f8] sm:$0xff] }
 0x435   : > { %v5067_v48 = vadd.f32 %v4920_v21, %v1647_v6  ;;  %v5066_v1 = vadd.f32 %v4086_v9, %v1646_v29  ;;  %v4922_v23 = vpop.f32.mrb[69].mxu0  ;;  %v1681_v9 = vld [vmem:[%s7664_s5 + $0x310] sm:$0xff] }
 0x436   : > { %5209 = vst [vmem:[%s7664_s5 + $0x1f0] sm:$0xff] %v5065_v60  ;;  %v5068_v15 = vadd.f32 %v4922_v23, %v1648_v38  ;;  %v1682_v23 = vld [vmem:[%s7664_s5 + $0x318] sm:$0xff] }
 0x437   : > { %5211 = vst [vmem:[%s7664_s5 + $0x200] sm:$0xff] %v5067_v48  ;;  %5210 = vst [vmem:[%s7664_s5 + $0x1f8] sm:$0xff] %v5066_v1  ;;  %v4090_v49 = vpop.f32.mrb[70].mxu1  ;;  %v1683_v1 = vld [vmem:[%s7664_s5 + $0x320] sm:$0xff] }
 0x438   : > { %5212 = vst [vmem:[%s7664_s5 + $0x208] sm:$0xff] %v5068_v15  ;;  %v5071_v8 = vadd.f32 %v4090_v49, %v1651_v54  ;;  %v4926_v4 = vpop.f32.mrb[70].mxu0  ;;  %v4092_v28 = vpop.f32.mrb[71].mxu1  ;;  %v1684_v15 = vld [vmem:[%s7664_s5 + $0x328] sm:$0xff] }
 0x439   : > { %v5073_v7 = vadd.f32 %v4926_v4, %v1653_v63  ;;  %v5072_v44 = vadd.f32 %v4092_v28, %v1652_v56  ;;  %v4928_v3 = vpop.f32.mrb[71].mxu0  ;;  %v1687_v28 = vld [vmem:[%s7664_s5 + $0x340] sm:$0xff] }
 0x43a   : > { %5215 = vst [vmem:[%s7664_s5 + $0x220] sm:$0xff] %v5071_v8  ;;  %v5074_v59 = vadd.f32 %v4928_v3, %v1654_v57  ;;  %v1688_v3 = vld [vmem:[%s7664_s5 + $0x348] sm:$0xff] }
 0x43b   : > { %5217 = vst [vmem:[%s7664_s5 + $0x230] sm:$0xff] %v5073_v7  ;;  %5216 = vst [vmem:[%s7664_s5 + $0x228] sm:$0xff] %v5072_v44  ;;  %v4096_v42 = vpop.f32.mrb[72].mxu1  ;;  %v1689_v44 = vld [vmem:[%s7664_s5 + $0x350] sm:$0xff] }
 0x43c   : > { %5218 = vst [vmem:[%s7664_s5 + $0x238] sm:$0xff] %v5074_v59  ;;  %v5077_v41 = vadd.f32 %v4096_v42, %v1657_v27  ;;  %v4932_v24 = vpop.f32.mrb[72].mxu0  ;;  %v4098_v37 = vpop.f32.mrb[73].mxu1  ;;  %v1690_v59 = vld [vmem:[%s7664_s5 + $0x358] sm:$0xff] }
 0x43d   : > { %v5079_v16 = vadd.f32 %v4932_v24, %v1659_v5  ;;  %v5078_v10 = vadd.f32 %v4098_v37, %v1658_v20  ;;  %v4934_v52 = vpop.f32.mrb[73].mxu0  ;;  %v1693_v37 = vld [vmem:[%s7664_s5 + $0x370] sm:$0xff] }
 0x43e   : > { %5221 = vst [vmem:[%s7664_s5 + $0x250] sm:$0xff] %v5077_v41  ;;  %v5080_v12 = vadd.f32 %v4934_v52, %v1660_v55  ;;  %v1694_v52 = vld [vmem:[%s7664_s5 + $0x378] sm:$0xff] }
 0x43f   : > { %5223 = vst [vmem:[%s7664_s5 + $0x260] sm:$0xff] %v5079_v16  ;;  %5222 = vst [vmem:[%s7664_s5 + $0x258] sm:$0xff] %v5078_v10  ;;  %v4102_v36 = vpop.f32.mrb[74].mxu1  ;;  %v1695_v10 = vld [vmem:[%s7664_s5 + $0x380] sm:$0xff] }
 0x440   : > { %5224 = vst [vmem:[%s7664_s5 + $0x268] sm:$0xff] %v5080_v12  ;;  %v5083_v25 = vadd.f32 %v4102_v36, %v1663_v13  ;;  %v4938_v18 = vpop.f32.mrb[74].mxu0  ;;  %v4104_v19 = vpop.f32.mrb[75].mxu1  ;;  %v1696_v12 = vld [vmem:[%s7664_s5 + $0x388] sm:$0xff] }
 0x441   : > { %v5085_v61 = vadd.f32 %v4938_v18, %v1665_v62  ;;  %v5084_v47 = vadd.f32 %v4104_v19, %v1664_v33  ;;  %v4940_v50 = vpop.f32.mrb[75].mxu0  ;;  %v1699_v19 = vld [vmem:[%s7664_s5 + $0x3a0] sm:$0xff] }
 0x442   : > { %5227 = vst [vmem:[%s7664_s5 + $0x280] sm:$0xff] %v5083_v25  ;;  %v5086_v58 = vadd.f32 %v4940_v50, %v1666_v34  ;;  %v1700_v50 = vld [vmem:[%s7664_s5 + $0x3a8] sm:$0xff] }
 0x443   : > { %5229 = vst [vmem:[%s7664_s5 + $0x290] sm:$0xff] %v5085_v61  ;;  %5228 = vst [vmem:[%s7664_s5 + $0x288] sm:$0xff] %v5084_v47  ;;  %v4108_v35 = vpop.f32.mrb[76].mxu1  ;;  %v1701_v47 = vld [vmem:[%s7664_s5 + $0x3b0] sm:$0xff] }
 0x444   : > { %5230 = vst [vmem:[%s7664_s5 + $0x298] sm:$0xff] %v5086_v58  ;;  %v5089_v51 = vadd.f32 %v4108_v35, %v1669_v2  ;;  %v4944_v53 = vpop.f32.mrb[76].mxu0  ;;  %v4110_v39 = vpop.f32.mrb[77].mxu1  ;;  %v1702_v58 = vld [vmem:[%s7664_s5 + $0x3b8] sm:$0xff] }
 0x445   : > { %v5091_v14 = vadd.f32 %v4944_v53, %v1671_v30  ;;  %v5090_v32 = vadd.f32 %v4110_v39, %v1670_v31  ;;  %v4946_v17 = vpop.f32.mrb[77].mxu0  ;;  %v1705_v39 = vld [vmem:[%s7664_s5 + $0x3d0] sm:$0xff] }
 0x446   : > { %5233 = vst [vmem:[%s7664_s5 + $0x2b0] sm:$0xff] %v5089_v51  ;;  %v5092_v40 = vadd.f32 %v4946_v17, %v1672_v26  ;;  %v1706_v17 = vld [vmem:[%s7664_s5 + $0x3d8] sm:$0xff] }
 0x447   : > { %5235 = vst [vmem:[%s7664_s5 + $0x2c0] sm:$0xff] %v5091_v14  ;;  %5234 = vst [vmem:[%s7664_s5 + $0x2b8] sm:$0xff] %v5090_v32  ;;  %v4114_v46 = vpop.f32.mrb[78].mxu1  ;;  %v1707_v32 = vld [vmem:[%s7664_s5 + $0x3e0] sm:$0xff] }
 0x448   : > { %5236 = vst [vmem:[%s7664_s5 + $0x2c8] sm:$0xff] %v5092_v40  ;;  %v5095_v6 = vadd.f32 %v4114_v46, %v1675_v45  ;;  %v4950_v29 = vpop.f32.mrb[78].mxu0  ;;  %v4116_v43 = vpop.f32.mrb[79].mxu1  ;;  %v1708_v40 = vld [vmem:[%s7664_s5 + $0x3e8] sm:$0xff] }
 0x449   : > { %v5097_v38 = vadd.f32 %v4950_v29, %v1677_v22  ;;  %v5096_v60 = vadd.f32 %v4116_v43, %v1676_v0  ;;  %v4952_v21 = vpop.f32.mrb[79].mxu0  ;;  %v1711_v43 = vld [vmem:[%s7664_s5 + $0x400] sm:$0xff] }
 0x44a   : > { %5239 = vst [vmem:[%s7664_s5 + $0x2e0] sm:$0xff] %v5095_v6  ;;  %v5098_v48 = vadd.f32 %v4952_v21, %v1678_v11  ;;  %v1712_v21 = vld [vmem:[%s7664_s5 + $0x408] sm:$0xff] }
 0x44b   : > { %5241 = vst [vmem:[%s7664_s5 + $0x2f0] sm:$0xff] %v5097_v38  ;;  %5240 = vst [vmem:[%s7664_s5 + $0x2e8] sm:$0xff] %v5096_v60  ;;  %v4120_v54 = vpop.f32.mrb[80].mxu1  ;;  %v1713_v60 = vld [vmem:[%s7664_s5 + $0x410] sm:$0xff] }
 0x44c   : > { %5242 = vst [vmem:[%s7664_s5 + $0x2f8] sm:$0xff] %v5098_v48  ;;  %v5101_v63 = vadd.f32 %v4120_v54, %v1681_v9  ;;  %v4956_v56 = vpop.f32.mrb[80].mxu0  ;;  %v4122_v49 = vpop.f32.mrb[81].mxu1  ;;  %v1714_v48 = vld [vmem:[%s7664_s5 + $0x418] sm:$0xff] }
 0x44d   : > { %v5103_v57 = vadd.f32 %v4956_v56, %v1683_v1  ;;  %v5102_v8 = vadd.f32 %v4122_v49, %v1682_v23  ;;  %v4958_v4 = vpop.f32.mrb[81].mxu0  ;;  %v1717_v49 = vld [vmem:[%s7664_s5 + $0x430] sm:$0xff] }
 0x44e   : > { %5245 = vst [vmem:[%s7664_s5 + $0x310] sm:$0xff] %v5101_v63  ;;  %v5104_v7 = vadd.f32 %v4958_v4, %v1684_v15  ;;  %v1718_v4 = vld [vmem:[%s7664_s5 + $0x438] sm:$0xff] }
 0x44f   : > { %5247 = vst [vmem:[%s7664_s5 + $0x320] sm:$0xff] %v5103_v57  ;;  %5246 = vst [vmem:[%s7664_s5 + $0x318] sm:$0xff] %v5102_v8  ;;  %v4126_v27 = vpop.f32.mrb[82].mxu1  ;;  %v1719_v8 = vld [vmem:[%s7664_s5 + $0x440] sm:$0xff] }
 0x450   : > { %5248 = vst [vmem:[%s7664_s5 + $0x328] sm:$0xff] %v5104_v7  ;;  %v5107_v5 = vadd.f32 %v4126_v27, %v1687_v28  ;;  %v4962_v20 = vpop.f32.mrb[82].mxu0  ;;  %v4128_v42 = vpop.f32.mrb[83].mxu1  ;;  %v1720_v7 = vld [vmem:[%s7664_s5 + $0x448] sm:$0xff] }
 0x451   : > { %v5109_v55 = vadd.f32 %v4962_v20, %v1689_v44  ;;  %v5108_v41 = vadd.f32 %v4128_v42, %v1688_v3  ;;  %v4964_v24 = vpop.f32.mrb[83].mxu0  ;;  %v1723_v42 = vld [vmem:[%s7664_s5 + $0x460] sm:$0xff] }
 0x452   : > { %5251 = vst [vmem:[%s7664_s5 + $0x340] sm:$0xff] %v5107_v5  ;;  %v5110_v16 = vadd.f32 %v4964_v24, %v1690_v59  ;;  %v1724_v24 = vld [vmem:[%s7664_s5 + $0x468] sm:$0xff] }
 0x453   : > { %5253 = vst [vmem:[%s7664_s5 + $0x350] sm:$0xff] %v5109_v55  ;;  %5252 = vst [vmem:[%s7664_s5 + $0x348] sm:$0xff] %v5108_v41  ;;  %v4132_v13 = vpop.f32.mrb[84].mxu1  ;;  %v1725_v41 = vld [vmem:[%s7664_s5 + $0x470] sm:$0xff] }
 0x454   : > { %5254 = vst [vmem:[%s7664_s5 + $0x358] sm:$0xff] %v5110_v16  ;;  %v5113_v62 = vadd.f32 %v4132_v13, %v1693_v37  ;;  %v4968_v33 = vpop.f32.mrb[84].mxu0  ;;  %v4134_v36 = vpop.f32.mrb[85].mxu1  ;;  %v1726_v16 = vld [vmem:[%s7664_s5 + $0x478] sm:$0xff] }
 0x455   : > { %v5115_v34 = vadd.f32 %v4968_v33, %v1695_v10  ;;  %v5114_v25 = vadd.f32 %v4134_v36, %v1694_v52  ;;  %v4970_v18 = vpop.f32.mrb[85].mxu0 }
 0x456   : > { %5257 = vst [vmem:[%s7664_s5 + $0x370] sm:$0xff] %v5113_v62  ;;  %v5116_v61 = vadd.f32 %v4970_v18, %v1696_v12 }
 0x457   : > { %5259 = vst [vmem:[%s7664_s5 + $0x380] sm:$0xff] %v5115_v34  ;;  %5258 = vst [vmem:[%s7664_s5 + $0x378] sm:$0xff] %v5114_v25  ;;  %v4138_v2 = vpop.f32.mrb[86].mxu1 }
 0x458   : > { %5260 = vst [vmem:[%s7664_s5 + $0x388] sm:$0xff] %v5116_v61  ;;  %v5119_v30 = vadd.f32 %v4138_v2, %v1699_v19  ;;  %v4974_v31 = vpop.f32.mrb[86].mxu0  ;;  %v4140_v35 = vpop.f32.mrb[87].mxu1 }
 0x459   : > { %v5121_v26 = vadd.f32 %v4974_v31, %v1701_v47  ;;  %v5120_v51 = vadd.f32 %v4140_v35, %v1700_v50  ;;  %v4976_v53 = vpop.f32.mrb[87].mxu0 }
 0x45a   : > { %5263 = vst [vmem:[%s7664_s5 + $0x3a0] sm:$0xff] %v5119_v30  ;;  %v5122_v14 = vadd.f32 %v4976_v53, %v1702_v58 }
 0x45b   : > { %5265 = vst [vmem:[%s7664_s5 + $0x3b0] sm:$0xff] %v5121_v26  ;;  %5264 = vst [vmem:[%s7664_s5 + $0x3a8] sm:$0xff] %v5120_v51  ;;  %v4144_v45 = vpop.f32.mrb[88].mxu1 }
 0x45c   : > { %5266 = vst [vmem:[%s7664_s5 + $0x3b8] sm:$0xff] %v5122_v14  ;;  %v5125_v22 = vadd.f32 %v4144_v45, %v1705_v39  ;;  %v4980_v0 = vpop.f32.mrb[88].mxu0  ;;  %v4146_v46 = vpop.f32.mrb[89].mxu1 }
 0x45d   : > { %v5127_v11 = vadd.f32 %v4980_v0, %v1707_v32  ;;  %v5126_v6 = vadd.f32 %v4146_v46, %v1706_v17  ;;  %v4982_v29 = vpop.f32.mrb[89].mxu0 }
 0x45e   : > { %5269 = vst [vmem:[%s7664_s5 + $0x3d0] sm:$0xff] %v5125_v22  ;;  %v5128_v38 = vadd.f32 %v4982_v29, %v1708_v40 }
 0x45f   : > { %5271 = vst [vmem:[%s7664_s5 + $0x3e0] sm:$0xff] %v5127_v11  ;;  %5270 = vst [vmem:[%s7664_s5 + $0x3d8] sm:$0xff] %v5126_v6  ;;  %v4150_v9 = vpop.f32.mrb[90].mxu1 }
 0x460   : > { %5272 = vst [vmem:[%s7664_s5 + $0x3e8] sm:$0xff] %v5128_v38  ;;  %v5131_v1 = vadd.f32 %v4150_v9, %v1711_v43  ;;  %v4986_v23 = vpop.f32.mrb[90].mxu0  ;;  %v4152_v54 = vpop.f32.mrb[91].mxu1 }
 0x461   : > { %v5133_v15 = vadd.f32 %v4986_v23, %v1713_v60  ;;  %v5132_v63 = vadd.f32 %v4152_v54, %v1712_v21  ;;  %v4988_v56 = vpop.f32.mrb[91].mxu0 }
 0x462   : > { %5275 = vst [vmem:[%s7664_s5 + $0x400] sm:$0xff] %v5131_v1  ;;  %v5134_v57 = vadd.f32 %v4988_v56, %v1714_v48 }
 0x463   : > { %5277 = vst [vmem:[%s7664_s5 + $0x410] sm:$0xff] %v5133_v15  ;;  %5276 = vst [vmem:[%s7664_s5 + $0x408] sm:$0xff] %v5132_v63  ;;  %v4156_v28 = vpop.f32.mrb[92].mxu1 }
 0x464   : > { %5278 = vst [vmem:[%s7664_s5 + $0x418] sm:$0xff] %v5134_v57  ;;  %v5137_v44 = vadd.f32 %v4156_v28, %v1717_v49  ;;  %v4992_v3 = vpop.f32.mrb[92].mxu0  ;;  %v4158_v27 = vpop.f32.mrb[93].mxu1 }
 0x465   : > { %v5139_v59 = vadd.f32 %v4992_v3, %v1719_v8  ;;  %v5138_v5 = vadd.f32 %v4158_v27, %v1718_v4  ;;  %v4994_v20 = vpop.f32.mrb[93].mxu0 }
 0x466   : > { %5281 = vst [vmem:[%s7664_s5 + $0x430] sm:$0xff] %v5137_v44  ;;  %v5140_v55 = vadd.f32 %v4994_v20, %v1720_v7 }
 0x467   : > { %5283 = vst [vmem:[%s7664_s5 + $0x440] sm:$0xff] %v5139_v59  ;;  %5282 = vst [vmem:[%s7664_s5 + $0x438] sm:$0xff] %v5138_v5  ;;  %v4162_v37 = vpop.f32.mrb[94].mxu1 }
 0x468   : > { %5284 = vst [vmem:[%s7664_s5 + $0x448] sm:$0xff] %v5140_v55  ;;  %v5143_v10 = vadd.f32 %v4162_v37, %v1723_v42  ;;  %v4998_v52 = vpop.f32.mrb[94].mxu0  ;;  %v4164_v13 = vpop.f32.mrb[95].mxu1 }
 0x469   : > { %v5145_v12 = vadd.f32 %v4998_v52, %v1725_v41  ;;  %v5144_v62 = vadd.f32 %v4164_v13, %v1724_v24  ;;  %v5000_v33 = vpop.f32.mrb[95].mxu0 }
 0x46a   : > { %5287 = vst [vmem:[%s7664_s5 + $0x460] sm:$0xff] %v5143_v10  ;;  %v5146_v36 = vadd.f32 %v5000_v33, %v1726_v16 }
 0x46b   : > { %5289 = vst [vmem:[%s7664_s5 + $0x470] sm:$0xff] %v5145_v12  ;;  %5288 = vst [vmem:[%s7664_s5 + $0x468] sm:$0xff] %v5144_v62 }
 0x46c   : > { %5290 = vst [vmem:[%s7664_s5 + $0x478] sm:$0xff] %v5146_v36 }
 0x46d   : > { %7235 = shalt.err (!%p7232_p0)
}
 0x46e   : > { %s7236_s11 = scalar_lea.hbm %s11247_s28, 18432  ;;  %s7240_s23 = scalar_lea.hbm %s11987_s27, 36864 }
 0x46f   : > { %p7237_p10 = scmp.ne.s32.totalorder %s11247_s28, %s7236_s11  ;;  %p7241_p7 = scmp.lt.u32.totalorder %s11247_s28, %s11987_s27 }
 0x470   : > { %p7242_p11 = scmp.lt.u32.totalorder %s7240_s23, %s7236_s11  ;;  %p7244_p2 = scmp.lt.u32.totalorder %s7236_s11, %s11247_s28 }
 0x471   : > { %p7238_p5 = pnand %p7237_p10, %p11988_p4 }
 0x472   : > { %p7243_p3 = por %p7242_p11, %p7241_p7 }
 0x473   : > { %p7239_p6 = pneg %p7238_p5 }
 0x474   : > { %p7245_p9 = por %p7244_p2, %p7243_p3 }
 0x476   : > { %p7246_p12 = pnand %p7245_p9, %p7239_p6 }
 0x478   : > { %7249 = shalt.err (!%p7246_p12)
}
 0x479   : > { %s7382_s29 = smov 768   ;;  %s7383_s22 = smov 48  }
 0x47a   : > { %6642 = dma.vmem_to_hbm [thread:$0]  (%p11988_p4), %s11249_s3, 18432, %s11247_s28, %s11257_s30, %s7382_s29, %s7382_s29, %s7383_s22  }
 0x47b PF: > { %p6658_p1 = scmp.ge.s32.totalorder %s7372_s25, 2  ;;  %s5321_s15 = sand.u32 1, %s7320_s12  }
 0x47c   : > { %p11989_p13 = scmp.ne.s32.totalorder %s11664_s26, 0  ;;  %s5322_s6 = scalar_lea.sflag [#allocation4], %s5321_s15 }
 0x47e   : > { %p6652_p8 = pnand %p6658_p1, %p11989_p13 }
 0x480   : > { %7315 = dma.done.wait (!%p6652_p8), %s5322_s6, 18432  }
 0x481   : > { %7317 = vsyncadd (!%p6652_p8), %s5322_s6, 4294948864  ;;  %s22_s25 = sadd.s32 1, %s7372_s25   ;;  %s11991_s21 = sld [smem:[#allocation12_spill]] }
 0x482   : > { %p11286_p0 = scmp.ge.s32.totalorder %s22_s25, 8   ;;  %s11992_s22 = sld [smem:[#allocation13_spill]] }
 0x483   : > { %s11993_s23 = sld [smem:[#allocation14_spill]]  ;;  %s11994_s24 = sld [smem:[#allocation15_spill]] }
 0x484   : > { %s11995_s12 = smov %s7324_s13  ;;  %s11996_s13 = smov %s7328_s14 }
 0x485   : > { %s11997_s14 = smov %s7504_s9  ;;  %s11998_s15 = smov %s7336_s16 }
 0x486   : > { %s11999_s16 = smov %s7340_s17  ;;  %s12000_s17 = smov %s7574_s2 }
 0x487   : > { %s12001_s18 = smov %s7348_s19  ;;  %s12002_s19 = smov %s7352_s20 }
 0x488   : > { %s12003_s20 = smov %s7507_s10  ;;  %21 = sbr.rel (!%p11286_p0) target bundleno = 16 (0x10), region = 94 }
 0x48f   :  { %5327 = vsyncpa [#allocation3], 1 }
 0x490   :  { %5329 = vsyncpa [#allocation3 + $0x1], 1 }
 0x491   :  { %5330 = vsyncpa [#allocation6], 1 }
 0x492   :  { %5332 = vsyncpa [#allocation6 + $0x1], 1 }
 0x493   :  { %5333 = vsyncpa [#allocation4], 1 }
 0x494   :  { %5335 = vsyncpa [#allocation4 + $0x1], 1 }

</bundles_post_ra>
